<compile_context>
chip_gen: v6e
topology: v6e:2x2x1
jax: 0.10.0
libtpu: 0.0.40
codegen_flags: <defaults>
</compile_context>

<pallas_src>
import functools

import jax
import jax.numpy as jnp
from jax import lax
from jax.experimental import pallas as pl
from jax.experimental.pallas import tpu as pltpu


def _round_up(x, m):
    return (x + m - 1) // m * m


def _pick_tk(kp):
    for t in (2048, 1024, 512, 256, 128):
        if kp % t == 0:
            return t
    return kp


def _pick_tm(m, max_tm):
    """Round M up to a 16-multiple (bf16-friendly sublane tiling) and pick tm."""
    mp = _round_up(m, 16)
    if mp >= max_tm:
        return _round_up(m, max_tm), max_tm
    return mp, mp


# ----------------------------------------------------------------- MXU matmul kernel
def _mm_bias_act_kernel(x_ref, w_ref, b_ref, o_ref, acc_ref, *, act, neg_slope):
    """o = act(x @ w + b); K is grid axis 2 (innermost, 'arbitrary')."""
    k = pl.program_id(2)

    @pl.when(k == 0)
    def _():
        acc_ref[...] = jnp.zeros_like(acc_ref)

    acc_ref[...] += jnp.dot(x_ref[...], w_ref[...],
                            preferred_element_type=jnp.float32)

    @pl.when(k == pl.num_programs(2) - 1)
    def _():
        y = acc_ref[...] + b_ref[...]
        if act == "leaky_relu":
            y = jnp.where(y >= 0, y, neg_slope * y)
        elif act == "sigmoid":
            y = jax.nn.sigmoid(y)
        o_ref[...] = y.astype(o_ref.dtype)


def matmul_bias_act(x, w_p, b_p, n_real, *, act=None, neg_slope=0.2,
                    out_dtype=jnp.bfloat16):
    """act(x @ w + b) with pre-padded weights.

    x:   [M, K]    any float dtype (cast to bf16 for the MXU)
    w_p: [Kp, Np]  bf16, zero-padded K/N (prepared once at init)
    b_p: [1, Np]   f32, zero-padded N
    returns [M, n_real] in out_dtype.
    """
    M, K = x.shape
    Kp, Np = w_p.shape
    assert K <= Kp and n_real <= Np

    Mp, tm = _pick_tm(M, 128)
    tk = _pick_tk(Kp)
    tn = 256 if Np % 256 == 0 else 128

    xp = jnp.pad(x.astype(jnp.bfloat16), ((0, Mp - M), (0, Kp - K)))

    grid = (Mp // tm, Np // tn, Kp // tk)
    kernel = functools.partial(_mm_bias_act_kernel, act=act, neg_slope=neg_slope)

    out = pl.pallas_call(
        kernel,
        out_shape=jax.ShapeDtypeStruct((Mp, Np), out_dtype),
        grid_spec=pltpu.PrefetchScalarGridSpec(
            num_scalar_prefetch=0,
            grid=grid,
            in_specs=[
                pl.BlockSpec((tm, tk), lambda i, j, k: (i, k)),
                pl.BlockSpec((tk, tn), lambda i, j, k: (k, j)),
                # block index does not depend on k -> only re-fetched when j changes
                pl.BlockSpec((1, tn), lambda i, j, k: (0, j)),
            ],
            out_specs=pl.BlockSpec((tm, tn), lambda i, j, k: (i, j)),
            scratch_shapes=[pltpu.VMEM((tm, tn), jnp.float32)],
        ),
        compiler_params=pltpu.CompilerParams(
            dimension_semantics=("parallel", "parallel", "arbitrary")),
    )(xp, w_p, b_p)
    return out[:M, :n_real]


# -------------------------------------------------- VPU kernel for Cout == 1 layers
def _n1_bias_act_kernel(x_ref, w_ref, b_ref, o_ref, acc_ref, *, act, neg_slope):
    """Single-output-channel conv: o[:, 0] = act(sum_k x * w + b).  VPU only."""
    k = pl.program_id(1)

    @pl.when(k == 0)
    def _():
        acc_ref[...] = jnp.zeros_like(acc_ref)

    acc_ref[...] += jnp.sum(x_ref[...].astype(jnp.float32) * w_ref[...],
                            axis=-1, keepdims=True)

    @pl.when(k == pl.num_programs(1) - 1)
    def _():
        y = acc_ref[...] + b_ref[0]
        if act == "leaky_relu":
            y = jnp.where(y >= 0, y, neg_slope * y)
        elif act == "sigmoid":
            y = jax.nn.sigmoid(y)
        o_ref[...] = y.astype(o_ref.dtype)


def n1_matvec_bias_act(x, w_p, b, *, act=None, neg_slope=0.2):
    """act(x @ w.T + b) for a single output channel (f32 VPU path).

    x: [M, K] (f32 or bf16), w_p: [1, Kp] f32 zero-padded, b: [1] f32.
    Returns [M, 1] f32.
    """
    M, K = x.shape
    _, Kp = w_p.shape
    assert K <= Kp

    Mp, tm = _pick_tm(M, 512)
    tk = _pick_tk(Kp)

    xp = jnp.pad(x, ((0, Mp - M), (0, Kp - K)))

    kernel = functools.partial(_n1_bias_act_kernel, act=act, neg_slope=neg_slope)
    out = pl.pallas_call(
        kernel,
        out_shape=jax.ShapeDtypeStruct((Mp, 1), jnp.float32),
        grid_spec=pltpu.PrefetchScalarGridSpec(
            num_scalar_prefetch=0,
            grid=(Mp // tm, Kp // tk),
            in_specs=[
                pl.BlockSpec((tm, tk), lambda i, k: (i, k)),
                pl.BlockSpec((1, tk), lambda i, k: (0, k)),
                pl.BlockSpec(memory_space=pltpu.MemorySpace.SMEM),   # scalar bias
            ],
            out_specs=pl.BlockSpec((tm, 1), lambda i, k: (i, 0)),
            scratch_shapes=[pltpu.VMEM((tm, 1), jnp.float32)],
        ),
        compiler_params=pltpu.CompilerParams(
            dimension_semantics=("parallel", "arbitrary")),
    )(xp, w_p, b)
    return out[:M]


# ---------------------------------------------------------------------- conv wrappers
def _im2col_nhwc(x, kh, kw, stride, pad):
    """x: [N, H, W, C] -> patches [N*OH*OW, kh*kw*C] (K-order = (kh, kw, C))."""
    N, H, W, C = x.shape
    xp = jnp.pad(x, ((0, 0), (pad, pad), (pad, pad), (0, 0)))
    OH = (H + 2 * pad - kh) // stride + 1
    OW = (W + 2 * pad - kw) // stride + 1
    cols = []
    for i in range(kh):
        for j in range(kw):
            cols.append(xp[:, i:i + stride * OH:stride, j:j + stride * OW:stride, :])
    col = jnp.stack(cols, axis=3)                      # [N, OH, OW, kh*kw, C]
    return col.reshape(N * OH * OW, kh * kw * C), OH, OW


def conv2d_mxu(x, w_p, b_p, cout, kh, kw, stride, pad, *, act, neg_slope=0.2):
    n = x.shape[0]
    cols, OH, OW = _im2col_nhwc(x, kh, kw, stride, pad)
    out = matmul_bias_act(cols, w_p, b_p, cout, act=act, neg_slope=neg_slope,
                          out_dtype=jnp.bfloat16)
    return out.reshape(n, OH, OW, cout)


def conv2d_n1(x, w_p, b, kh, kw, stride, pad, *, act):
    n = x.shape[0]
    cols, OH, OW = _im2col_nhwc(x, kh, kw, stride, pad)
    out = n1_matvec_bias_act(cols, w_p, b, act=act)
    return out.reshape(n, OH, OW, 1)


# ------------------------------------------------------------------- params + forward
def init_params(key, input_dim=1, num_filters=(64, 128, 256, 512), output_dim=1):
    """Torch-layout parameters (OIHW weights), matching the PyTorch initializers."""
    keys = jax.random.split(key, len(num_filters) + 2)
    params = {}
    # projection: Conv2d(input_dim, 1, k=8, s=2, p=3, bias=False), weight /= ||W||_F
    w_proj = jax.random.normal(keys[0], (1, input_dim, 8, 8), jnp.float32)
    w_proj = w_proj / jnp.linalg.norm(jnp.squeeze(w_proj))
    params["proj_w"] = w_proj
    # hidden: Conv2d(k=4, s=2, p=1), weight ~ N(0, 0.02), bias = 0, LeakyReLU(0.2)
    cin = 1
    hidden = []
    for i, cout in enumerate(num_filters):
        w = 0.02 * jax.random.normal(keys[i + 1], (cout, cin, 4, 4), jnp.float32)
        b = jnp.zeros((cout,), jnp.float32)
        hidden.append((w, b))
        cin = cout
    params["hidden"] = hidden
    # output: Conv2d(num_filters[-1], output_dim, k=4, s=1, p=1), Sigmoid
    params["out_w"] = 0.02 * jax.random.normal(keys[-1], (output_dim, cin, 4, 4),
                                               jnp.float32)
    params["out_b"] = jnp.zeros((output_dim,), jnp.float32)
    return params


def prepare_params(params):
    """One-time (outside jit) weight relayout + padding for the Pallas kernels."""
    def im2col_weight(w):                     # [Cout, Cin, kh, kw] -> [kh*kw*Cin, Cout]
        cout = w.shape[0]
        return jnp.transpose(w, (2, 3, 1, 0)).reshape(-1, cout)

    prep = {}

    # projection conv (Cout == 1, no bias): f32 row vector for the VPU kernel
    wm = im2col_weight(params["proj_w"])      # [K, 1]
    K = wm.shape[0]
    Kp = _round_up(K, 128)
    prep["proj_w"] = jnp.pad(wm.T, ((0, 0), (0, Kp - K)))
    prep["proj_b"] = jnp.zeros((1,), jnp.float32)

    # hidden convs: [Kp, Np] bf16 weight + [1, Np] f32 bias for the MXU kernel
    hidden = []
    for (w, b) in params["hidden"]:
        wm = im2col_weight(w)                 # [K, Cout]
        K, cout = wm.shape
        Kp, Np = _round_up(K, 128), _round_up(cout, 128)
        w_p = jnp.pad(wm, ((0, Kp - K), (0, Np - cout))).astype(jnp.bfloat16)
        b_p = jnp.pad(b[None, :], ((0, 0), (0, Np - cout)))
        hidden.append((w_p, b_p))
    prep["hidden"] = tuple(hidden)

    # output conv (Cout == 1): f32 row vector + scalar bias for the VPU kernel
    assert params["out_w"].shape[0] == 1, "output_dim != 1 not supported"
    wm = im2col_weight(params["out_w"])       # [K, 1]
    K = wm.shape[0]
    Kp = _round_up(K, 128)
    prep["out_w"] = jnp.pad(wm.T, ((0, 0), (0, Kp - K)))
    prep["out_b"] = params["out_b"].reshape(1).astype(jnp.float32)
    return prep


def discriminator_forward(prep, x_nchw, *, num_filters):
    """Pallas forward.  x_nchw: [N, Cin, H, W] f32 (torch layout)."""
    x = jnp.transpose(x_nchw, (0, 2, 3, 1))                            # NHWC
    h = conv2d_n1(x, prep["proj_w"], prep["proj_b"], 8, 8, 2, 3, act=None)
    for idx, cout in enumerate(num_filters):
        w_p, b_p = prep["hidden"][idx]
        h = conv2d_mxu(h, w_p, b_p, cout, 4, 4, 2, 1, act="leaky_relu")
    out = conv2d_n1(h, prep["out_w"], prep["out_b"], 4, 4, 1, 1, act="sigmoid")
    return jnp.squeeze(out)


# ------------------------------------------------------------------ pure-JAX reference
def _ref_conv(x, w, b, stride, pad):
    out = lax.conv_general_dilated(x, w, (stride, stride), [(pad, pad), (pad, pad)],
                                   dimension_numbers=("NCHW", "OIHW", "NCHW"))
    if b is not None:
        out = out + b[None, :, None, None]
    return out


def reference_forward(params, x, *, match_bf16=False):
    """Pure-JAX reference.  match_bf16=True emulates the kernel's bf16 MXU inputs and
    bf16 inter-layer activations exactly (modulo f32 accumulation order)."""
    def rnd(a):
        return a.astype(jnp.bfloat16).astype(jnp.float32) if match_bf16 else a

    h = _ref_conv(x, params["proj_w"], None, 2, 3)                     # f32 path
    for (w, b) in params["hidden"]:
        o = _ref_conv(rnd(h), rnd(w), b, 2, 1)
        h = rnd(jnp.where(o >= 0, o, 0.2 * o))
    out = _ref_conv(h, params["out_w"], params["out_b"], 1, 1)         # f32 path
    return jnp.squeeze(jax.nn.sigmoid(out))


if __name__ == "__main__":
    key = jax.random.PRNGKey(0)
    pkey, xkey = jax.random.split(key)

    num_filters = (64, 128, 256, 512)        # reduced from the (128,...,1024) default
    params = init_params(pkey, input_dim=1, num_filters=num_filters, output_dim=1)
    prep = prepare_params(params)            # one-time weight relayout, outside jit

    x = jax.random.normal(xkey, (2, 1, 64, 64), jnp.float32)           # NCHW, as torch

    fwd = jax.jit(functools.partial(discriminator_forward, num_filters=num_filters))
    out = jax.block_until_ready(fwd(prep, x))

    # 1) strong kernel check: reference with matching bf16 rounding -> tight tolerance
    ref_exact = reference_forward(params, x, match_bf16=True)
    # 2) semantic check vs the pure-f32 torch math -> tolerance covers bf16 rounding
    ref_f32 = reference_forward(params, x, match_bf16=False)

    assert out.shape == ref_f32.shape, (out.shape, ref_f32.shape)
    assert jnp.allclose(out, ref_exact, atol=2e-3, rtol=2e-3), \
        float(jnp.max(jnp.abs(out - ref_exact)))
    assert jnp.allclose(out, ref_f32, atol=3e-2, rtol=3e-2), \
        float(jnp.max(jnp.abs(out - ref_f32)))

    print("KERNEL_OK")
</pallas_src>

<mosaic_0001>
module attributes {stable_mosaic.version = 11 : i64} {
  func.func @_n1_bias_act_kernel(%arg0: i32, %arg1: i32, %arg2: memref<512x128xf32, #tpu.memory_space<vmem>>, %arg3: memref<1x128xf32, #tpu.memory_space<vmem>>, %arg4: memref<1xf32, #tpu.memory_space<smem>>, %arg5: memref<512x1xf32, #tpu.memory_space<vmem>>, %arg6: memref<512x1xf32, #tpu.memory_space<vmem>>) attributes {dimension_semantics = [#tpu.dimension_semantics<parallel>, #tpu.dimension_semantics<arbitrary>], iteration_bounds = array<i64: 4, 1>, scalar_prefetch = 0 : i64, scratch_operands = 1 : i64, tpu.core_type = #tpu.core_type<tc>, window_params = [{transform_indices = @transform_0, window_bounds = array<i64: 512, 128>}, {transform_indices = @transform_1, window_bounds = array<i64: 1, 128>}, {transform_indices = @transform_2, window_bounds = array<i64: 1>}, {transform_indices = @transform_3, window_bounds = array<i64: 512, 1>}]} {
    %c0_i32 = arith.constant 0 : i32
    %0 = arith.cmpi eq, %arg1, %c0_i32 : i32
    %1 = arith.extui %0 : i1 to i32
    %c0_i32_0 = arith.constant 0 : i32
    %2 = arith.cmpi ne, %1, %c0_i32_0 : i32
    scf.if %2 {
      %cst_10 = arith.constant 0.000000e+00 : f32
      %15 = vector.broadcast %cst_10 : f32 to vector<512x1xf32>
      %c0_11 = arith.constant 0 : index
      %c0_12 = arith.constant 0 : index
      %16 = vector.load %arg6[%c0_11, %c0_12] : memref<512x1xf32, #tpu.memory_space<vmem>>, vector<512x1xf32>
      tpu.vector_store %arg6[%c0_11, %c0_12], %15 {strides = array<i32>} : memref<512x1xf32, #tpu.memory_space<vmem>>, vector<512x1xf32>,
    } else {
    }
    %c0 = arith.constant 0 : index
    %c0_1 = arith.constant 0 : index
    %3 = vector.load %arg6[%c0, %c0_1] : memref<512x1xf32, #tpu.memory_space<vmem>>, vector<512x1xf32>
    %c0_2 = arith.constant 0 : index
    %c0_3 = arith.constant 0 : index
    %4 = vector.load %arg2[%c0_2, %c0_3] : memref<512x128xf32, #tpu.memory_space<vmem>>, vector<512x128xf32>
    %c0_4 = arith.constant 0 : index
    %c0_5 = arith.constant 0 : index
    %5 = vector.load %arg3[%c0_4, %c0_5] : memref<1x128xf32, #tpu.memory_space<vmem>>, vector<1x128xf32>
    %6 = vector.broadcast %5 : vector<1x128xf32> to vector<512x128xf32>
    %7 = arith.mulf %4, %6 : vector<512x128xf32>
    %cst = arith.constant dense<0.000000e+00> : vector<512xf32>
    %8 = vector.multi_reduction <add>, %7, %cst [1] : vector<512x128xf32> to vector<512xf32>
    %9 = vector.shape_cast %8 : vector<512xf32> to vector<512x1xf32>
    %10 = arith.addf %3, %9 : vector<512x1xf32>
    %c0_6 = arith.constant 0 : index
    %c0_7 = arith.constant 0 : index
    %11 = vector.load %arg6[%c0_6, %c0_7] : memref<512x1xf32, #tpu.memory_space<vmem>>, vector<512x1xf32>
    tpu.vector_store %arg6[%c0_6, %c0_7], %10 {strides = array<i32>} : memref<512x1xf32, #tpu.memory_space<vmem>>, vector<512x1xf32>,
    %c0_i32_8 = arith.constant 0 : i32
    %12 = arith.cmpi eq, %arg1, %c0_i32_8 : i32
    %13 = arith.extui %12 : i1 to i32
    %c0_i32_9 = arith.constant 0 : i32
    %14 = arith.cmpi ne, %13, %c0_i32_9 : i32
    scf.if %14 {
      %c0_10 = arith.constant 0 : index
      %c0_11 = arith.constant 0 : index
      %15 = vector.load %arg6[%c0_10, %c0_11] : memref<512x1xf32, #tpu.memory_space<vmem>>, vector<512x1xf32>
      %c0_12 = arith.constant 0 : index
      %16 = memref.load %arg4[%c0_12] : memref<1xf32, #tpu.memory_space<smem>>
      %17 = vector.broadcast %16 : f32 to vector<512x1xf32>
      %18 = arith.addf %15, %17 : vector<512x1xf32>
      %c0_13 = arith.constant 0 : index
      %c0_14 = arith.constant 0 : index
      %19 = vector.load %arg5[%c0_13, %c0_14] : memref<512x1xf32, #tpu.memory_space<vmem>>, vector<512x1xf32>
      tpu.vector_store %arg5[%c0_13, %c0_14], %18 {strides = array<i32>} : memref<512x1xf32, #tpu.memory_space<vmem>>, vector<512x1xf32>,
    } else {
    }
    return
  }
  func.func @transform_0(%arg0: i32, %arg1: i32) -> (i32, i32) {
    %c0_i32 = arith.constant 0 : i32
    return %arg0, %arg1 : i32, i32
  }
  func.func @transform_1(%arg0: i32, %arg1: i32) -> (i32, i32) {
    %c0_i32 = arith.constant 0 : i32
    %c0_i32_0 = arith.constant 0 : i32
    return %c0_i32, %arg1 : i32, i32
  }
  func.func @transform_2(%arg0: i32, %arg1: i32) -> i32 {
    %c0_i32 = arith.constant 0 : i32
    %c0_i32_0 = arith.constant 0 : i32
    return %c0_i32 : i32
  }
  func.func @transform_3(%arg0: i32, %arg1: i32) -> (i32, i32) {
    %c0_i32 = arith.constant 0 : i32
    %c0_i32_0 = arith.constant 0 : i32
    return %arg0, %c0_i32 : i32, i32
  }
}

module attributes {stable_mosaic.version = 11 : i64} {
  func.func @_mm_bias_act_kernel(%arg0: i32, %arg1: i32, %arg2: i32, %arg3: memref<128x128xbf16, #tpu.memory_space<vmem>>, %arg4: memref<128x128xbf16, #tpu.memory_space<vmem>>, %arg5: memref<1x128xf32, #tpu.memory_space<vmem>>, %arg6: memref<128x128xbf16, #tpu.memory_space<vmem>>, %arg7: memref<128x128xf32, #tpu.memory_space<vmem>>) attributes {dimension_semantics = [#tpu.dimension_semantics<parallel>, #tpu.dimension_semantics<parallel>, #tpu.dimension_semantics<arbitrary>], iteration_bounds = array<i64: 4, 1, 1>, scalar_prefetch = 0 : i64, scratch_operands = 1 : i64, tpu.core_type = #tpu.core_type<tc>, window_params = [{transform_indices = @transform_0, window_bounds = array<i64: 128, 128>}, {transform_indices = @transform_1, window_bounds = array<i64: 128, 128>}, {transform_indices = @transform_2, window_bounds = array<i64: 1, 128>}, {transform_indices = @transform_3, window_bounds = array<i64: 128, 128>}]} {
    %c0_i32 = arith.constant 0 : i32
    %0 = arith.cmpi eq, %arg2, %c0_i32 : i32
    %1 = arith.extui %0 : i1 to i32
    %c0_i32_0 = arith.constant 0 : i32
    %2 = arith.cmpi ne, %1, %c0_i32_0 : i32
    scf.if %2 {
      %cst_10 = arith.constant 0.000000e+00 : f32
      %12 = vector.broadcast %cst_10 : f32 to vector<128x128xf32>
      %c0_11 = arith.constant 0 : index
      %c0_12 = arith.constant 0 : index
      %13 = vector.load %arg7[%c0_11, %c0_12] : memref<128x128xf32, #tpu.memory_space<vmem>>, vector<128x128xf32>
      tpu.vector_store %arg7[%c0_11, %c0_12], %12 {strides = array<i32>} : memref<128x128xf32, #tpu.memory_space<vmem>>, vector<128x128xf32>,
    } else {
    }
    %c0 = arith.constant 0 : index
    %c0_1 = arith.constant 0 : index
    %3 = vector.load %arg7[%c0, %c0_1] : memref<128x128xf32, #tpu.memory_space<vmem>>, vector<128x128xf32>
    %c0_2 = arith.constant 0 : index
    %c0_3 = arith.constant 0 : index
    %4 = vector.load %arg3[%c0_2, %c0_3] : memref<128x128xbf16, #tpu.memory_space<vmem>>, vector<128x128xbf16>
    %c0_4 = arith.constant 0 : index
    %c0_5 = arith.constant 0 : index
    %5 = vector.load %arg4[%c0_4, %c0_5] : memref<128x128xbf16, #tpu.memory_space<vmem>>, vector<128x128xbf16>
    %cst = arith.constant dense<0.000000e+00> : vector<128x128xf32>
    %6 = tpu.matmul %4, %5, %cst {dimension_numbers = #tpu.dot_dimension_numbers<[1], [0], [0], [1], [0, 0, 1, 1], [], []>} : vector<128x128xbf16>, vector<128x128xbf16>, vector<128x128xf32> -> vector<128x128xf32>
    %7 = arith.addf %3, %6 : vector<128x128xf32>
    %c0_6 = arith.constant 0 : index
    %c0_7 = arith.constant 0 : index
    %8 = vector.load %arg7[%c0_6, %c0_7] : memref<128x128xf32, #tpu.memory_space<vmem>>, vector<128x128xf32>
    tpu.vector_store %arg7[%c0_6, %c0_7], %7 {strides = array<i32>} : memref<128x128xf32, #tpu.memory_space<vmem>>, vector<128x128xf32>,
    %c0_i32_8 = arith.constant 0 : i32
    %9 = arith.cmpi eq, %arg2, %c0_i32_8 : i32
    %10 = arith.extui %9 : i1 to i32
    %c0_i32_9 = arith.constant 0 : i32
    %11 = arith.cmpi ne, %10, %c0_i32_9 : i32
    scf.if %11 {
      %c0_10 = arith.constant 0 : index
      %c0_11 = arith.constant 0 : index
      %12 = vector.load %arg7[%c0_10, %c0_11] : memref<128x128xf32, #tpu.memory_space<vmem>>, vector<128x128xf32>
      %c0_12 = arith.constant 0 : index
      %c0_13 = arith.constant 0 : index
      %13 = vector.load %arg5[%c0_12, %c0_13] : memref<1x128xf32, #tpu.memory_space<vmem>>, vector<1x128xf32>
      %14 = vector.broadcast %13 : vector<1x128xf32> to vector<128x128xf32>
      %15 = arith.addf %12, %14 : vector<128x128xf32>
      %cst_14 = arith.constant 0.000000e+00 : f32
      %16 = vector.broadcast %cst_14 : f32 to vector<128x128xf32>
      %17 = arith.cmpf oge, %15, %16 : vector<128x128xf32>
      %cst_15 = arith.constant 2.000000e-01 : f32
      %18 = vector.broadcast %cst_15 : f32 to vector<128x128xf32>
      %19 = arith.mulf %18, %15 : vector<128x128xf32>
      %20 = arith.select %17, %15, %19 : vector<128x128xi1>, vector<128x128xf32>
      %21 = arith.truncf %20 : vector<128x128xf32> to vector<128x128xbf16>
      %c0_16 = arith.constant 0 : index
      %c0_17 = arith.constant 0 : index
      %22 = vector.load %arg6[%c0_16, %c0_17] : memref<128x128xbf16, #tpu.memory_space<vmem>>, vector<128x128xbf16>
      tpu.vector_store %arg6[%c0_16, %c0_17], %21 {strides = array<i32>} : memref<128x128xbf16, #tpu.memory_space<vmem>>, vector<128x128xbf16>,
    } else {
    }
    return
  }
  func.func @transform_0(%arg0: i32, %arg1: i32, %arg2: i32) -> (i32, i32) {
    %c0_i32 = arith.constant 0 : i32
    return %arg0, %arg2 : i32, i32
  }
  func.func @transform_1(%arg0: i32, %arg1: i32, %arg2: i32) -> (i32, i32) {
    %c0_i32 = arith.constant 0 : i32
    return %arg2, %arg1 : i32, i32
  }
  func.func @transform_2(%arg0: i32, %arg1: i32, %arg2: i32) -> (i32, i32) {
    %c0_i32 = arith.constant 0 : i32
    %c0_i32_0 = arith.constant 0 : i32
    return %c0_i32, %arg1 : i32, i32
  }
  func.func @transform_3(%arg0: i32, %arg1: i32, %arg2: i32) -> (i32, i32) {
    %c0_i32 = arith.constant 0 : i32
    return %arg0, %arg1 : i32, i32
  }
}

module attributes {stable_mosaic.version = 11 : i64} {
  func.func @_mm_bias_act_kernel(%arg0: i32, %arg1: i32, %arg2: i32, %arg3: memref<128x1024xbf16, #tpu.memory_space<vmem>>, %arg4: memref<1024x128xbf16, #tpu.memory_space<vmem>>, %arg5: memref<1x128xf32, #tpu.memory_space<vmem>>, %arg6: memref<128x128xbf16, #tpu.memory_space<vmem>>, %arg7: memref<128x128xf32, #tpu.memory_space<vmem>>) attributes {dimension_semantics = [#tpu.dimension_semantics<parallel>, #tpu.dimension_semantics<parallel>, #tpu.dimension_semantics<arbitrary>], iteration_bounds = array<i64: 1, 1, 1>, scalar_prefetch = 0 : i64, scratch_operands = 1 : i64, tpu.core_type = #tpu.core_type<tc>, window_params = [{transform_indices = @transform_0, window_bounds = array<i64: 128, 1024>}, {transform_indices = @transform_1, window_bounds = array<i64: 1024, 128>}, {transform_indices = @transform_2, window_bounds = array<i64: 1, 128>}, {transform_indices = @transform_3, window_bounds = array<i64: 128, 128>}]} {
    %c0_i32 = arith.constant 0 : i32
    %0 = arith.cmpi eq, %arg2, %c0_i32 : i32
    %1 = arith.extui %0 : i1 to i32
    %c0_i32_0 = arith.constant 0 : i32
    %2 = arith.cmpi ne, %1, %c0_i32_0 : i32
    scf.if %2 {
      %cst_10 = arith.constant 0.000000e+00 : f32
      %12 = vector.broadcast %cst_10 : f32 to vector<128x128xf32>
      %c0_11 = arith.constant 0 : index
      %c0_12 = arith.constant 0 : index
      %13 = vector.load %arg7[%c0_11, %c0_12] : memref<128x128xf32, #tpu.memory_space<vmem>>, vector<128x128xf32>
      tpu.vector_store %arg7[%c0_11, %c0_12], %12 {strides = array<i32>} : memref<128x128xf32, #tpu.memory_space<vmem>>, vector<128x128xf32>,
    } else {
    }
    %c0 = arith.constant 0 : index
    %c0_1 = arith.constant 0 : index
    %3 = vector.load %arg7[%c0, %c0_1] : memref<128x128xf32, #tpu.memory_space<vmem>>, vector<128x128xf32>
    %c0_2 = arith.constant 0 : index
    %c0_3 = arith.constant 0 : index
    %4 = vector.load %arg3[%c0_2, %c0_3] : memref<128x1024xbf16, #tpu.memory_space<vmem>>, vector<128x1024xbf16>
    %c0_4 = arith.constant 0 : index
    %c0_5 = arith.constant 0 : index
    %5 = vector.load %arg4[%c0_4, %c0_5] : memref<1024x128xbf16, #tpu.memory_space<vmem>>, vector<1024x128xbf16>
    %cst = arith.constant dense<0.000000e+00> : vector<128x128xf32>
    %6 = tpu.matmul %4, %5, %cst {dimension_numbers = #tpu.dot_dimension_numbers<[1], [0], [0], [1], [0, 0, 1, 1], [], []>} : vector<128x1024xbf16>, vector<1024x128xbf16>, vector<128x128xf32> -> vector<128x128xf32>
    %7 = arith.addf %3, %6 : vector<128x128xf32>
    %c0_6 = arith.constant 0 : index
    %c0_7 = arith.constant 0 : index
    %8 = vector.load %arg7[%c0_6, %c0_7] : memref<128x128xf32, #tpu.memory_space<vmem>>, vector<128x128xf32>
    tpu.vector_store %arg7[%c0_6, %c0_7], %7 {strides = array<i32>} : memref<128x128xf32, #tpu.memory_space<vmem>>, vector<128x128xf32>,
    %c0_i32_8 = arith.constant 0 : i32
    %9 = arith.cmpi eq, %arg2, %c0_i32_8 : i32
    %10 = arith.extui %9 : i1 to i32
    %c0_i32_9 = arith.constant 0 : i32
    %11 = arith.cmpi ne, %10, %c0_i32_9 : i32
    scf.if %11 {
      %c0_10 = arith.constant 0 : index
      %c0_11 = arith.constant 0 : index
      %12 = vector.load %arg7[%c0_10, %c0_11] : memref<128x128xf32, #tpu.memory_space<vmem>>, vector<128x128xf32>
      %c0_12 = arith.constant 0 : index
      %c0_13 = arith.constant 0 : index
      %13 = vector.load %arg5[%c0_12, %c0_13] : memref<1x128xf32, #tpu.memory_space<vmem>>, vector<1x128xf32>
      %14 = vector.broadcast %13 : vector<1x128xf32> to vector<128x128xf32>
      %15 = arith.addf %12, %14 : vector<128x128xf32>
      %cst_14 = arith.constant 0.000000e+00 : f32
      %16 = vector.broadcast %cst_14 : f32 to vector<128x128xf32>
      %17 = arith.cmpf oge, %15, %16 : vector<128x128xf32>
      %cst_15 = arith.constant 2.000000e-01 : f32
      %18 = vector.broadcast %cst_15 : f32 to vector<128x128xf32>
      %19 = arith.mulf %18, %15 : vector<128x128xf32>
      %20 = arith.select %17, %15, %19 : vector<128x128xi1>, vector<128x128xf32>
      %21 = arith.truncf %20 : vector<128x128xf32> to vector<128x128xbf16>
      %c0_16 = arith.constant 0 : index
      %c0_17 = arith.constant 0 : index
      %22 = vector.load %arg6[%c0_16, %c0_17] : memref<128x128xbf16, #tpu.memory_space<vmem>>, vector<128x128xbf16>
      tpu.vector_store %arg6[%c0_16, %c0_17], %21 {strides = array<i32>} : memref<128x128xbf16, #tpu.memory_space<vmem>>, vector<128x128xbf16>,
    } else {
    }
    return
  }
  func.func @transform_0(%arg0: i32, %arg1: i32, %arg2: i32) -> (i32, i32) {
    %c0_i32 = arith.constant 0 : i32
    return %arg0, %arg2 : i32, i32
  }
  func.func @transform_1(%arg0: i32, %arg1: i32, %arg2: i32) -> (i32, i32) {
    %c0_i32 = arith.constant 0 : i32
    return %arg2, %arg1 : i32, i32
  }
  func.func @transform_2(%arg0: i32, %arg1: i32, %arg2: i32) -> (i32, i32) {
    %c0_i32 = arith.constant 0 : i32
    %c0_i32_0 = arith.constant 0 : i32
    return %c0_i32, %arg1 : i32, i32
  }
  func.func @transform_3(%arg0: i32, %arg1: i32, %arg2: i32) -> (i32, i32) {
    %c0_i32 = arith.constant 0 : i32
    return %arg0, %arg1 : i32, i32
  }
}

module attributes {stable_mosaic.version = 11 : i64} {
  func.func @_mm_bias_act_kernel(%arg0: i32, %arg1: i32, %arg2: i32, %arg3: memref<32x2048xbf16, #tpu.memory_space<vmem>>, %arg4: memref<2048x256xbf16, #tpu.memory_space<vmem>>, %arg5: memref<1x256xf32, #tpu.memory_space<vmem>>, %arg6: memref<32x256xbf16, #tpu.memory_space<vmem>>, %arg7: memref<32x256xf32, #tpu.memory_space<vmem>>) attributes {dimension_semantics = [#tpu.dimension_semantics<parallel>, #tpu.dimension_semantics<parallel>, #tpu.dimension_semantics<arbitrary>], iteration_bounds = array<i64: 1, 1, 1>, scalar_prefetch = 0 : i64, scratch_operands = 1 : i64, tpu.core_type = #tpu.core_type<tc>, window_params = [{transform_indices = @transform_0, window_bounds = array<i64: 32, 2048>}, {transform_indices = @transform_1, window_bounds = array<i64: 2048, 256>}, {transform_indices = @transform_2, window_bounds = array<i64: 1, 256>}, {transform_indices = @transform_3, window_bounds = array<i64: 32, 256>}]} {
    %c0_i32 = arith.constant 0 : i32
    %0 = arith.cmpi eq, %arg2, %c0_i32 : i32
    %1 = arith.extui %0 : i1 to i32
    %c0_i32_0 = arith.constant 0 : i32
    %2 = arith.cmpi ne, %1, %c0_i32_0 : i32
    scf.if %2 {
      %cst_10 = arith.constant 0.000000e+00 : f32
      %12 = vector.broadcast %cst_10 : f32 to vector<32x256xf32>
      %c0_11 = arith.constant 0 : index
      %c0_12 = arith.constant 0 : index
      %13 = vector.load %arg7[%c0_11, %c0_12] : memref<32x256xf32, #tpu.memory_space<vmem>>, vector<32x256xf32>
      tpu.vector_store %arg7[%c0_11, %c0_12], %12 {strides = array<i32>} : memref<32x256xf32, #tpu.memory_space<vmem>>, vector<32x256xf32>,
    } else {
    }
    %c0 = arith.constant 0 : index
    %c0_1 = arith.constant 0 : index
    %3 = vector.load %arg7[%c0, %c0_1] : memref<32x256xf32, #tpu.memory_space<vmem>>, vector<32x256xf32>
    %c0_2 = arith.constant 0 : index
    %c0_3 = arith.constant 0 : index
    %4 = vector.load %arg3[%c0_2, %c0_3] : memref<32x2048xbf16, #tpu.memory_space<vmem>>, vector<32x2048xbf16>
    %c0_4 = arith.constant 0 : index
    %c0_5 = arith.constant 0 : index
    %5 = vector.load %arg4[%c0_4, %c0_5] : memref<2048x256xbf16, #tpu.memory_space<vmem>>, vector<2048x256xbf16>
    %cst = arith.constant dense<0.000000e+00> : vector<32x256xf32>
    %6 = tpu.matmul %4, %5, %cst {dimension_numbers = #tpu.dot_dimension_numbers<[1], [0], [0], [1], [0, 0, 1, 1], [], []>} : vector<32x2048xbf16>, vector<2048x256xbf16>, vector<32x256xf32> -> vector<32x256xf32>
    %7 = arith.addf %3, %6 : vector<32x256xf32>
    %c0_6 = arith.constant 0 : index
    %c0_7 = arith.constant 0 : index
    %8 = vector.load %arg7[%c0_6, %c0_7] : memref<32x256xf32, #tpu.memory_space<vmem>>, vector<32x256xf32>
    tpu.vector_store %arg7[%c0_6, %c0_7], %7 {strides = array<i32>} : memref<32x256xf32, #tpu.memory_space<vmem>>, vector<32x256xf32>,
    %c0_i32_8 = arith.constant 0 : i32
    %9 = arith.cmpi eq, %arg2, %c0_i32_8 : i32
    %10 = arith.extui %9 : i1 to i32
    %c0_i32_9 = arith.constant 0 : i32
    %11 = arith.cmpi ne, %10, %c0_i32_9 : i32
    scf.if %11 {
      %c0_10 = arith.constant 0 : index
      %c0_11 = arith.constant 0 : index
      %12 = vector.load %arg7[%c0_10, %c0_11] : memref<32x256xf32, #tpu.memory_space<vmem>>, vector<32x256xf32>
      %c0_12 = arith.constant 0 : index
      %c0_13 = arith.constant 0 : index
      %13 = vector.load %arg5[%c0_12, %c0_13] : memref<1x256xf32, #tpu.memory_space<vmem>>, vector<1x256xf32>
      %14 = vector.broadcast %13 : vector<1x256xf32> to vector<32x256xf32>
      %15 = arith.addf %12, %14 : vector<32x256xf32>
      %cst_14 = arith.constant 0.000000e+00 : f32
      %16 = vector.broadcast %cst_14 : f32 to vector<32x256xf32>
      %17 = arith.cmpf oge, %15, %16 : vector<32x256xf32>
      %cst_15 = arith.constant 2.000000e-01 : f32
      %18 = vector.broadcast %cst_15 : f32 to vector<32x256xf32>
      %19 = arith.mulf %18, %15 : vector<32x256xf32>
      %20 = arith.select %17, %15, %19 : vector<32x256xi1>, vector<32x256xf32>
      %21 = arith.truncf %20 : vector<32x256xf32> to vector<32x256xbf16>
      %c0_16 = arith.constant 0 : index
      %c0_17 = arith.constant 0 : index
      %22 = vector.load %arg6[%c0_16, %c0_17] : memref<32x256xbf16, #tpu.memory_space<vmem>>, vector<32x256xbf16>
      tpu.vector_store %arg6[%c0_16, %c0_17], %21 {strides = array<i32>} : memref<32x256xbf16, #tpu.memory_space<vmem>>, vector<32x256xbf16>,
    } else {
    }
    return
  }
  func.func @transform_0(%arg0: i32, %arg1: i32, %arg2: i32) -> (i32, i32) {
    %c0_i32 = arith.constant 0 : i32
    return %arg0, %arg2 : i32, i32
  }
  func.func @transform_1(%arg0: i32, %arg1: i32, %arg2: i32) -> (i32, i32) {
    %c0_i32 = arith.constant 0 : i32
    return %arg2, %arg1 : i32, i32
  }
  func.func @transform_2(%arg0: i32, %arg1: i32, %arg2: i32) -> (i32, i32) {
    %c0_i32 = arith.constant 0 : i32
    %c0_i32_0 = arith.constant 0 : i32
    return %c0_i32, %arg1 : i32, i32
  }
  func.func @transform_3(%arg0: i32, %arg1: i32, %arg2: i32) -> (i32, i32) {
    %c0_i32 = arith.constant 0 : i32
    return %arg0, %arg1 : i32, i32
  }
}

module attributes {stable_mosaic.version = 11 : i64} {
  func.func @_mm_bias_act_kernel(%arg0: i32, %arg1: i32, %arg2: i32, %arg3: memref<16x2048xbf16, #tpu.memory_space<vmem>>, %arg4: memref<2048x256xbf16, #tpu.memory_space<vmem>>, %arg5: memref<1x256xf32, #tpu.memory_space<vmem>>, %arg6: memref<16x256xbf16, #tpu.memory_space<vmem>>, %arg7: memref<16x256xf32, #tpu.memory_space<vmem>>) attributes {dimension_semantics = [#tpu.dimension_semantics<parallel>, #tpu.dimension_semantics<parallel>, #tpu.dimension_semantics<arbitrary>], iteration_bounds = array<i64: 1, 2, 2>, scalar_prefetch = 0 : i64, scratch_operands = 1 : i64, tpu.core_type = #tpu.core_type<tc>, window_params = [{transform_indices = @transform_0, window_bounds = array<i64: 16, 2048>}, {transform_indices = @transform_1, window_bounds = array<i64: 2048, 256>}, {transform_indices = @transform_2, window_bounds = array<i64: 1, 256>}, {transform_indices = @transform_3, window_bounds = array<i64: 16, 256>}]} {
    %c0_i32 = arith.constant 0 : i32
    %0 = arith.cmpi eq, %arg2, %c0_i32 : i32
    %1 = arith.extui %0 : i1 to i32
    %c0_i32_0 = arith.constant 0 : i32
    %2 = arith.cmpi ne, %1, %c0_i32_0 : i32
    scf.if %2 {
      %cst_9 = arith.constant 0.000000e+00 : f32
      %12 = vector.broadcast %cst_9 : f32 to vector<16x256xf32>
      %c0_10 = arith.constant 0 : index
      %c0_11 = arith.constant 0 : index
      %13 = vector.load %arg7[%c0_10, %c0_11] : memref<16x256xf32, #tpu.memory_space<vmem>>, vector<16x256xf32>
      tpu.vector_store %arg7[%c0_10, %c0_11], %12 {strides = array<i32>} : memref<16x256xf32, #tpu.memory_space<vmem>>, vector<16x256xf32>,
    } else {
    }
    %c0 = arith.constant 0 : index
    %c0_1 = arith.constant 0 : index
    %3 = vector.load %arg7[%c0, %c0_1] : memref<16x256xf32, #tpu.memory_space<vmem>>, vector<16x256xf32>
    %c0_2 = arith.constant 0 : index
    %c0_3 = arith.constant 0 : index
    %4 = vector.load %arg3[%c0_2, %c0_3] : memref<16x2048xbf16, #tpu.memory_space<vmem>>, vector<16x2048xbf16>
    %c0_4 = arith.constant 0 : index
    %c0_5 = arith.constant 0 : index
    %5 = vector.load %arg4[%c0_4, %c0_5] : memref<2048x256xbf16, #tpu.memory_space<vmem>>, vector<2048x256xbf16>
    %cst = arith.constant dense<0.000000e+00> : vector<16x256xf32>
    %6 = tpu.matmul %4, %5, %cst {dimension_numbers = #tpu.dot_dimension_numbers<[1], [0], [0], [1], [0, 0, 1, 1], [], []>} : vector<16x2048xbf16>, vector<2048x256xbf16>, vector<16x256xf32> -> vector<16x256xf32>
    %7 = arith.addf %3, %6 : vector<16x256xf32>
    %c0_6 = arith.constant 0 : index
    %c0_7 = arith.constant 0 : index
    %8 = vector.load %arg7[%c0_6, %c0_7] : memref<16x256xf32, #tpu.memory_space<vmem>>, vector<16x256xf32>
    tpu.vector_store %arg7[%c0_6, %c0_7], %7 {strides = array<i32>} : memref<16x256xf32, #tpu.memory_space<vmem>>, vector<16x256xf32>,
    %c1_i32 = arith.constant 1 : i32
    %9 = arith.cmpi eq, %arg2, %c1_i32 : i32
    %10 = arith.extui %9 : i1 to i32
    %c0_i32_8 = arith.constant 0 : i32
    %11 = arith.cmpi ne, %10, %c0_i32_8 : i32
    scf.if %11 {
      %c0_9 = arith.constant 0 : index
      %c0_10 = arith.constant 0 : index
      %12 = vector.load %arg7[%c0_9, %c0_10] : memref<16x256xf32, #tpu.memory_space<vmem>>, vector<16x256xf32>
      %c0_11 = arith.constant 0 : index
      %c0_12 = arith.constant 0 : index
      %13 = vector.load %arg5[%c0_11, %c0_12] : memref<1x256xf32, #tpu.memory_space<vmem>>, vector<1x256xf32>
      %14 = vector.broadcast %13 : vector<1x256xf32> to vector<16x256xf32>
      %15 = arith.addf %12, %14 : vector<16x256xf32>
      %cst_13 = arith.constant 0.000000e+00 : f32
      %16 = vector.broadcast %cst_13 : f32 to vector<16x256xf32>
      %17 = arith.cmpf oge, %15, %16 : vector<16x256xf32>
      %cst_14 = arith.constant 2.000000e-01 : f32
      %18 = vector.broadcast %cst_14 : f32 to vector<16x256xf32>
      %19 = arith.mulf %18, %15 : vector<16x256xf32>
      %20 = arith.select %17, %15, %19 : vector<16x256xi1>, vector<16x256xf32>
      %21 = arith.truncf %20 : vector<16x256xf32> to vector<16x256xbf16>
      %c0_15 = arith.constant 0 : index
      %c0_16 = arith.constant 0 : index
      %22 = vector.load %arg6[%c0_15, %c0_16] : memref<16x256xbf16, #tpu.memory_space<vmem>>, vector<16x256xbf16>
      tpu.vector_store %arg6[%c0_15, %c0_16], %21 {strides = array<i32>} : memref<16x256xbf16, #tpu.memory_space<vmem>>, vector<16x256xbf16>,
    } else {
    }
    return
  }
  func.func @transform_0(%arg0: i32, %arg1: i32, %arg2: i32) -> (i32, i32) {
    %c0_i32 = arith.constant 0 : i32
    return %arg0, %arg2 : i32, i32
  }
  func.func @transform_1(%arg0: i32, %arg1: i32, %arg2: i32) -> (i32, i32) {
    %c0_i32 = arith.constant 0 : i32
    return %arg2, %arg1 : i32, i32
  }
  func.func @transform_2(%arg0: i32, %arg1: i32, %arg2: i32) -> (i32, i32) {
    %c0_i32 = arith.constant 0 : i32
    %c0_i32_0 = arith.constant 0 : i32
    return %c0_i32, %arg1 : i32, i32
  }
  func.func @transform_3(%arg0: i32, %arg1: i32, %arg2: i32) -> (i32, i32) {
    %c0_i32 = arith.constant 0 : i32
    return %arg0, %arg1 : i32, i32
  }
}

module attributes {stable_mosaic.version = 11 : i64} {
  func.func @_n1_bias_act_kernel(%arg0: i32, %arg1: i32, %arg2: memref<16x2048xbf16, #tpu.memory_space<vmem>>, %arg3: memref<1x2048xf32, #tpu.memory_space<vmem>>, %arg4: memref<1xf32, #tpu.memory_space<smem>>, %arg5: memref<16x1xf32, #tpu.memory_space<vmem>>, %arg6: memref<16x1xf32, #tpu.memory_space<vmem>>) attributes {dimension_semantics = [#tpu.dimension_semantics<parallel>, #tpu.dimension_semantics<arbitrary>], iteration_bounds = array<i64: 1, 4>, scalar_prefetch = 0 : i64, scratch_operands = 1 : i64, tpu.core_type = #tpu.core_type<tc>, window_params = [{transform_indices = @transform_0, window_bounds = array<i64: 16, 2048>}, {transform_indices = @transform_1, window_bounds = array<i64: 1, 2048>}, {transform_indices = @transform_2, window_bounds = array<i64: 1>}, {transform_indices = @transform_3, window_bounds = array<i64: 16, 1>}]} {
    %c0_i32 = arith.constant 0 : i32
    %0 = arith.cmpi eq, %arg1, %c0_i32 : i32
    %1 = arith.extui %0 : i1 to i32
    %c0_i32_0 = arith.constant 0 : i32
    %2 = arith.cmpi ne, %1, %c0_i32_0 : i32
    scf.if %2 {
      %cst_9 = arith.constant 0.000000e+00 : f32
      %16 = vector.broadcast %cst_9 : f32 to vector<16x1xf32>
      %c0_10 = arith.constant 0 : index
      %c0_11 = arith.constant 0 : index
      %17 = vector.load %arg6[%c0_10, %c0_11] : memref<16x1xf32, #tpu.memory_space<vmem>>, vector<16x1xf32>
      tpu.vector_store %arg6[%c0_10, %c0_11], %16 {strides = array<i32>} : memref<16x1xf32, #tpu.memory_space<vmem>>, vector<16x1xf32>,
    } else {
    }
    %c0 = arith.constant 0 : index
    %c0_1 = arith.constant 0 : index
    %3 = vector.load %arg6[%c0, %c0_1] : memref<16x1xf32, #tpu.memory_space<vmem>>, vector<16x1xf32>
    %c0_2 = arith.constant 0 : index
    %c0_3 = arith.constant 0 : index
    %4 = vector.load %arg2[%c0_2, %c0_3] : memref<16x2048xbf16, #tpu.memory_space<vmem>>, vector<16x2048xbf16>
    %5 = arith.extf %4 : vector<16x2048xbf16> to vector<16x2048xf32>
    %c0_4 = arith.constant 0 : index
    %c0_5 = arith.constant 0 : index
    %6 = vector.load %arg3[%c0_4, %c0_5] : memref<1x2048xf32, #tpu.memory_space<vmem>>, vector<1x2048xf32>
    %7 = vector.broadcast %6 : vector<1x2048xf32> to vector<16x2048xf32>
    %8 = arith.mulf %5, %7 : vector<16x2048xf32>
    %cst = arith.constant dense<0.000000e+00> : vector<16xf32>
    %9 = vector.multi_reduction <add>, %8, %cst [1] : vector<16x2048xf32> to vector<16xf32>
    %10 = vector.shape_cast %9 : vector<16xf32> to vector<16x1xf32>
    %11 = arith.addf %3, %10 : vector<16x1xf32>
    %c0_6 = arith.constant 0 : index
    %c0_7 = arith.constant 0 : index
    %12 = vector.load %arg6[%c0_6, %c0_7] : memref<16x1xf32, #tpu.memory_space<vmem>>, vector<16x1xf32>
    tpu.vector_store %arg6[%c0_6, %c0_7], %11 {strides = array<i32>} : memref<16x1xf32, #tpu.memory_space<vmem>>, vector<16x1xf32>,
    %c3_i32 = arith.constant 3 : i32
    %13 = arith.cmpi eq, %arg1, %c3_i32 : i32
    %14 = arith.extui %13 : i1 to i32
    %c0_i32_8 = arith.constant 0 : i32
    %15 = arith.cmpi ne, %14, %c0_i32_8 : i32
    scf.if %15 {
      %c0_9 = arith.constant 0 : index
      %c0_10 = arith.constant 0 : index
      %16 = vector.load %arg6[%c0_9, %c0_10] : memref<16x1xf32, #tpu.memory_space<vmem>>, vector<16x1xf32>
      %c0_11 = arith.constant 0 : index
      %17 = memref.load %arg4[%c0_11] : memref<1xf32, #tpu.memory_space<smem>>
      %18 = vector.broadcast %17 : f32 to vector<16x1xf32>
      %19 = arith.addf %16, %18 : vector<16x1xf32>
      %20 = arith.negf %19 : vector<16x1xf32>
      %21 = math.exp %20 : vector<16x1xf32>
      %cst_12 = arith.constant 1.000000e+00 : f32
      %22 = vector.broadcast %cst_12 : f32 to vector<16x1xf32>
      %23 = arith.addf %22, %21 : vector<16x1xf32>
      %24 = arith.divf %22, %23 : vector<16x1xf32>
      %c0_13 = arith.constant 0 : index
      %c0_14 = arith.constant 0 : index
      %25 = vector.load %arg5[%c0_13, %c0_14] : memref<16x1xf32, #tpu.memory_space<vmem>>, vector<16x1xf32>
      tpu.vector_store %arg5[%c0_13, %c0_14], %24 {strides = array<i32>} : memref<16x1xf32, #tpu.memory_space<vmem>>, vector<16x1xf32>,
    } else {
    }
    return
  }
  func.func @transform_0(%arg0: i32, %arg1: i32) -> (i32, i32) {
    %c0_i32 = arith.constant 0 : i32
    return %arg0, %arg1 : i32, i32
  }
  func.func @transform_1(%arg0: i32, %arg1: i32) -> (i32, i32) {
    %c0_i32 = arith.constant 0 : i32
    %c0_i32_0 = arith.constant 0 : i32
    return %c0_i32, %arg1 : i32, i32
  }
  func.func @transform_2(%arg0: i32, %arg1: i32) -> i32 {
    %c0_i32 = arith.constant 0 : i32
    %c0_i32_0 = arith.constant 0 : i32
    return %c0_i32 : i32
  }
  func.func @transform_3(%arg0: i32, %arg1: i32) -> (i32, i32) {
    %c0_i32 = arith.constant 0 : i32
    %c0_i32_0 = arith.constant 0 : i32
    return %arg0, %c0_i32 : i32, i32
  }
}

</mosaic_0001>

<bundles_post_ra>
// kernel: discriminator_forward.6
= control target key start
LH: loop header
LB: loop body
LE: loop exit
PB: predicated region body
PF: predicated region fallthrough
CT: control target
= control target key end

     0   :  { %s1100_s14 = smov 0   ;;  %s1102_s15 = smov 0   ;;  %s1768_s0 = inlined_call_operand.vmem [shape: f32[2048,128], index: 0, kind: input, shape index: {}]   ;;  %s1769_s1 = inlined_call_operand.vmem [shape: f32[1,128], index: 1, kind: input, shape index: {}]   ;;  %s1770_s2 = inlined_call_operand.<no memory space> [shape: f32[1], index: 2, kind: input, shape index: {}]   ;;  %s1771_s3 = inlined_call_operand.vmem [shape: f32[2048,1], index: 3, kind: output, shape index: {}]  }
   0x1   :  { %8 = sst [smem:[#allocation3]] %s1770_s2  ;;  %s1104_s16 = smov 0  }
   0x2 LB: > { %s26_s2 = sadd.s32 1, %s1070_s15  ;;  %p1019_p0 = scmp.ge.s32.totalorder %s1074_s16, 1  ;;  %s1074_s16 = sphi %s1104_s16, %s14_s16   ;;  %s1070_s15 = sphi %s1102_s15, %s1773_s15   ;;  %s1066_s14 = sphi %s1100_s14, %s1772_s14  }
   0x3   : > { %p28_p1 = scmp.ge.s32.totalorder %s26_s2, 4  ;;  %p164_p2 = scmp.lt.s32.totalorder %s1074_s16, 5 }
   0x5   : > { %s1775_s2 = smov (%p28_p1, %s26_s2), 0  ;;  %p165_p3 = pnand %p1019_p0, %p164_p2 }
   0x6   : > { %s1020_s17 = sshll.u32 (!%p165_p3), %s1066_s14, 6  ;;  %s804_s24 = sld [smem:[#allocation3]] (!%p165_p3) }
   0x7   : > { %168 = sbr.rel (%p165_p3) target bundleno = 299 (0x12b), region = 32  ;;  %p195_p4 = scmp.lt.s32.totalorder (!%p165_p3), %s1020_s17, 255 }
   0xc   : > { %s1777_s17 = smov (!%p195_p4, %s1020_s17), 255  ;;  %v1124_v0 = vld [vmem:[%s1769_s1] ss:$0 sm:$0xff]  ;;  %vm216_vm0 = vcmask 7168   ;;  %v1076_v4 = vmov 0.0  }
   0xd   : > { %s1021_s18 = sshll.u32 %s1777_s17, 3  ;;  %219 = vst.msk [vmem:[#allocation2 + $0x10] sm:$0xff] %vm216_vm0, %v1076_v4  ;;  %217 = vst.msk [vmem:[#allocation2] sm:$0xff] %vm216_vm0, %v1076_v4 }
   0xe   : > { %s1131_s23 = scalar_lea.vmem %s1768_s0, %s1021_s18  ;;  %218 = vst.msk [vmem:[#allocation2 + $0x8] sm:$0xff] %vm216_vm0, %v1076_v4  ;;  %220 = vst.msk [vmem:[#allocation2 + $0x18] sm:$0xff] %vm216_vm0, %v1076_v4  ;;  %s1505_s27 = scalar_lea.vmem %s1771_s3, %s1021_s18 }
   0xf   : > { %v1134_v1 = vld [vmem:[%s1131_s23 + $0x10] sm:$0xff]  ;;  %v1137_v2 = vld [vmem:[%s1131_s23] sm:$0xff]  ;;  %v1140_v3 = vld [vmem:[%s1131_s23 + $0x18] sm:$0xff]  ;;  %221 = vst.msk [vmem:[#allocation2 + $0x20] sm:$0xff] %vm216_vm0, %v1076_v4 }
  0x10   : > { %222 = vst.msk [vmem:[#allocation2 + $0x28] sm:$0xff] %vm216_vm0, %v1076_v4  ;;  %223 = vst.msk [vmem:[#allocation2 + $0x30] sm:$0xff] %vm216_vm0, %v1076_v4  ;;  %v418_v5 = vmul.f32 %v1124_v0, %v1134_v1  ;;  %v416_v6 = vmul.f32 %v1124_v0, %v1137_v2  ;;  %v346_v7 = vld [vmem:[%s1131_s23 + $0x8] sm:$0xff]  ;;  %v419_v8 = vmul.f32 %v1124_v0, %v1140_v3  ;;  %v349_v11 = vld [vmem:[%s1131_s23 + $0x20] sm:$0xff] }
  0x11   : > { %224 = vst.msk [vmem:[#allocation2 + $0x38] sm:$0xff] %vm216_vm0, %v1076_v4  ;;  %225 = vst.msk [vmem:[#allocation2 + $0x40] sm:$0xff] %vm216_vm0, %v1076_v4  ;;  %v417_v9 = vmul.f32 %v1124_v0, %v346_v7  ;;  %v350_v10 = vld [vmem:[%s1131_s23 + $0x28] sm:$0xff]  ;;  %v420_v13 = vmul.f32 %v1124_v0, %v349_v11  ;;  %v352_v14 = vld [vmem:[%s1131_s23 + $0x38] sm:$0xff] }
  0x12   : > { %226 = vst.msk [vmem:[#allocation2 + $0x48] sm:$0xff] %vm216_vm0, %v1076_v4  ;;  %227 = vst.msk [vmem:[#allocation2 + $0x50] sm:$0xff] %vm216_vm0, %v1076_v4  ;;  %484 = vadd.xlane.f32.xlu1 %v418_v5  ;;  %480 = vadd.xlane.f32.xlu0 %v416_v6  ;;  %v421_v12 = vmul.f32 %v1124_v0, %v350_v10  ;;  %v351_v15 = vld [vmem:[%s1131_s23 + $0x30] sm:$0xff]  ;;  %v354_v16 = vld [vmem:[%s1131_s23 + $0x48] sm:$0xff]  ;;  %v423_v19 = vmul.f32 %v1124_v0, %v352_v14 }
  0x13   : > { %228 = vst.msk [vmem:[#allocation2 + $0x58] sm:$0xff] %vm216_vm0, %v1076_v4  ;;  %229 = vst.msk [vmem:[#allocation2 + $0x60] sm:$0xff] %vm216_vm0, %v1076_v4  ;;  %v353_v17 = vld [vmem:[%s1131_s23 + $0x40] sm:$0xff]  ;;  %v378_v18 = vld [vmem:[%s1131_s23 + $0x108] sm:$0xff]  ;;  %v422_v20 = vmul.f32 %v1124_v0, %v351_v15  ;;  %v425_v32 = vmul.f32 %v1124_v0, %v354_v16 }
  0x14   : > { %230 = vst.msk [vmem:[#allocation2 + $0x68] sm:$0xff] %vm216_vm0, %v1076_v4  ;;  %231 = vst.msk [vmem:[#allocation2 + $0x70] sm:$0xff] %vm216_vm0, %v1076_v4  ;;  %v1290_v21 = vmul.f32 %v1124_v0, %v378_v18  ;;  %v377_v22 = vld [vmem:[%s1131_s23 + $0x100] sm:$0xff]  ;;  %v380_v23 = vld [vmem:[%s1131_s23 + $0x118] sm:$0xff]  ;;  %v424_v40 = vmul.f32 %v1124_v0, %v353_v17 }
  0x15   : > { %232 = vst.msk [vmem:[#allocation2 + $0x78] sm:$0xff] %vm216_vm0, %v1076_v4  ;;  %233 = vst.msk [vmem:[#allocation2 + $0x80] sm:$0xff] %vm216_vm0, %v1076_v4  ;;  %v379_v24 = vld [vmem:[%s1131_s23 + $0x110] sm:$0xff]  ;;  %v356_v25 = vld [vmem:[%s1131_s23 + $0x58] sm:$0xff]  ;;  %v1297_v26 = vmul.f32 %v1124_v0, %v377_v22  ;;  %v1300_v27 = vmul.f32 %v1124_v0, %v380_v23 }
  0x16   : > { %234 = vst.msk [vmem:[#allocation2 + $0x88] sm:$0xff] %vm216_vm0, %v1076_v4  ;;  %235 = vst.msk [vmem:[#allocation2 + $0x90] sm:$0xff] %vm216_vm0, %v1076_v4  ;;  %486 = vadd.xlane.f32.xlu1 %v419_v8  ;;  %482 = vadd.xlane.f32.xlu0 %v417_v9  ;;  %v1303_v28 = vmul.f32 %v1124_v0, %v379_v24  ;;  %v382_v29 = vld [vmem:[%s1131_s23 + $0x128] sm:$0xff]  ;;  %v381_v30 = vld [vmem:[%s1131_s23 + $0x120] sm:$0xff]  ;;  %v427_v59 = vmul.f32 %v1124_v0, %v356_v25 }
  0x17   : > { %236 = vst.msk [vmem:[#allocation2 + $0x98] sm:$0xff] %vm216_vm0, %v1076_v4  ;;  %237 = vst.msk [vmem:[#allocation2 + $0xa0] sm:$0xff] %vm216_vm0, %v1076_v4  ;;  %v384_v31 = vld [vmem:[%s1131_s23 + $0x138] sm:$0xff]  ;;  %v355_v33 = vld [vmem:[%s1131_s23 + $0x50] sm:$0xff]  ;;  %v1311_v34 = vmul.f32 %v1124_v0, %v382_v29  ;;  %v1314_v35 = vmul.f32 %v1124_v0, %v381_v30 }
  0x18   : > { %238 = vst.msk [vmem:[#allocation2 + $0xa8] sm:$0xff] %vm216_vm0, %v1076_v4  ;;  %239 = vst.msk [vmem:[#allocation2 + $0xb0] sm:$0xff] %vm216_vm0, %v1076_v4  ;;  %v1317_v36 = vmul.f32 %v1124_v0, %v384_v31  ;;  %v383_v37 = vld [vmem:[%s1131_s23 + $0x130] sm:$0xff]  ;;  %v386_v38 = vld [vmem:[%s1131_s23 + $0x148] sm:$0xff]  ;;  %v426_v3 = vmul.f32 %v1124_v0, %v355_v33 }
  0x19   : > { %240 = vst.msk [vmem:[#allocation2 + $0xb8] sm:$0xff] %vm216_vm0, %v1076_v4  ;;  %241 = vst.msk [vmem:[#allocation2 + $0xc0] sm:$0xff] %vm216_vm0, %v1076_v4  ;;  %v385_v39 = vld [vmem:[%s1131_s23 + $0x140] sm:$0xff]  ;;  %v1324_v41 = vmul.f32 %v1124_v0, %v383_v37  ;;  %v1327_v42 = vmul.f32 %v1124_v0, %v386_v38  ;;  %v388_v44 = vld [vmem:[%s1131_s23 + $0x158] sm:$0xff] }
  0x1a   : > { %242 = vst.msk [vmem:[#allocation2 + $0xc8] sm:$0xff] %vm216_vm0, %v1076_v4  ;;  %243 = vst.msk [vmem:[#allocation2 + $0xd0] sm:$0xff] %vm216_vm0, %v1076_v4  ;;  %490 = vadd.xlane.f32.xlu1 %v421_v12  ;;  %488 = vadd.xlane.f32.xlu0 %v420_v13  ;;  %v1330_v43 = vmul.f32 %v1124_v0, %v385_v39  ;;  %v387_v45 = vld [vmem:[%s1131_s23 + $0x150] sm:$0xff]  ;;  %v390_v46 = vld [vmem:[%s1131_s23 + $0x168] sm:$0xff]  ;;  %v1336_v47 = vmul.f32 %v1124_v0, %v388_v44 }
  0x1b   : > { %244 = vst.msk [vmem:[#allocation2 + $0xd8] sm:$0xff] %vm216_vm0, %v1076_v4  ;;  %245 = vst.msk [vmem:[#allocation2 + $0xe0] sm:$0xff] %vm216_vm0, %v1076_v4  ;;  %v1339_v48 = vmul.f32 %v1124_v0, %v387_v45  ;;  %v1342_v49 = vmul.f32 %v1124_v0, %v390_v46  ;;  %v389_v50 = vld [vmem:[%s1131_s23 + $0x160] sm:$0xff]  ;;  %v392_v51 = vld [vmem:[%s1131_s23 + $0x178] sm:$0xff] }
  0x1c   : > { %246 = vst.msk [vmem:[#allocation2 + $0xe8] sm:$0xff] %vm216_vm0, %v1076_v4  ;;  %247 = vst.msk [vmem:[#allocation2 + $0xf0] sm:$0xff] %vm216_vm0, %v1076_v4  ;;  %v391_v52 = vld [vmem:[%s1131_s23 + $0x170] sm:$0xff]  ;;  %v1348_v53 = vmul.f32 %v1124_v0, %v389_v50  ;;  %v1351_v54 = vmul.f32 %v1124_v0, %v392_v51  ;;  %v394_v56 = vld [vmem:[%s1131_s23 + $0x188] sm:$0xff] }
  0x1d   : > { %248 = vst.msk [vmem:[#allocation2 + $0xf8] sm:$0xff] %vm216_vm0, %v1076_v4  ;;  %249 = vst.msk [vmem:[#allocation2 + $0x100] sm:$0xff] %vm216_vm0, %v1076_v4  ;;  %v1354_v55 = vmul.f32 %v1124_v0, %v391_v52  ;;  %v393_v57 = vld [vmem:[%s1131_s23 + $0x180] sm:$0xff]  ;;  %v396_v58 = vld [vmem:[%s1131_s23 + $0x198] sm:$0xff]  ;;  %v1361_v60 = vmul.f32 %v1124_v0, %v394_v56 }
  0x1e   : > { %250 = vst.msk [vmem:[#allocation2 + $0x108] sm:$0xff] %vm216_vm0, %v1076_v4  ;;  %251 = vst.msk [vmem:[#allocation2 + $0x110] sm:$0xff] %vm216_vm0, %v1076_v4  ;;  %494 = vadd.xlane.f32.xlu1 %v423_v19  ;;  %492 = vadd.xlane.f32.xlu0 %v422_v20  ;;  %v1364_v61 = vmul.f32 %v1124_v0, %v393_v57  ;;  %v1367_v62 = vmul.f32 %v1124_v0, %v396_v58  ;;  %v395_v63 = vld [vmem:[%s1131_s23 + $0x190] sm:$0xff]  ;;  %v398_v1 = vld [vmem:[%s1131_s23 + $0x1a8] sm:$0xff] }
  0x1f   : > { %252 = vst.msk [vmem:[#allocation2 + $0x118] sm:$0xff] %vm216_vm0, %v1076_v4  ;;  %253 = vst.msk [vmem:[#allocation2 + $0x120] sm:$0xff] %vm216_vm0, %v1076_v4  ;;  %v397_v2 = vld [vmem:[%s1131_s23 + $0x1a0] sm:$0xff]  ;;  %v1376_v6 = vmul.f32 %v1124_v0, %v395_v63  ;;  %v1379_v7 = vmul.f32 %v1124_v0, %v398_v1  ;;  %v400_v9 = vld [vmem:[%s1131_s23 + $0x1b8] sm:$0xff] }
  0x20   : > { %254 = vst.msk [vmem:[#allocation2 + $0x128] sm:$0xff] %vm216_vm0, %v1076_v4  ;;  %255 = vst.msk [vmem:[#allocation2 + $0x130] sm:$0xff] %vm216_vm0, %v1076_v4  ;;  %v357_v5 = vld [vmem:[%s1131_s23 + $0x60] sm:$0xff]  ;;  %v1382_v8 = vmul.f32 %v1124_v0, %v397_v2  ;;  %v399_v10 = vld [vmem:[%s1131_s23 + $0x1b0] sm:$0xff]  ;;  %v1388_v12 = vmul.f32 %v1124_v0, %v400_v9 }
  0x21   : > { %256 = vst.msk [vmem:[#allocation2 + $0x138] sm:$0xff] %vm216_vm0, %v1076_v4  ;;  %257 = vst.msk [vmem:[#allocation2 + $0x140] sm:$0xff] %vm216_vm0, %v1076_v4  ;;  %v402_v11 = vld [vmem:[%s1131_s23 + $0x1c8] sm:$0xff]  ;;  %v1391_v13 = vmul.f32 %v1124_v0, %v399_v10  ;;  %v401_v15 = vld [vmem:[%s1131_s23 + $0x1c0] sm:$0xff]  ;;  %v428_v37 = vmul.f32 %v1124_v0, %v357_v5 }
  0x22   : > { %258 = vst.msk [vmem:[#allocation2 + $0x148] sm:$0xff] %vm216_vm0, %v1076_v4  ;;  %259 = vst.msk [vmem:[#allocation2 + $0x150] sm:$0xff] %vm216_vm0, %v1076_v4  ;;  %498 = vadd.xlane.f32.xlu1 %v425_v32  ;;  %496 = vadd.xlane.f32.xlu0 %v424_v40  ;;  %v1394_v14 = vmul.f32 %v1124_v0, %v402_v11  ;;  %v404_v16 = vld [vmem:[%s1131_s23 + $0x1d8] sm:$0xff]  ;;  %v403_v17 = vld [vmem:[%s1131_s23 + $0x1d0] sm:$0xff]  ;;  %v1400_v18 = vmul.f32 %v1124_v0, %v401_v15 }
  0x23   : > { %260 = vst.msk [vmem:[#allocation2 + $0x158] sm:$0xff] %vm216_vm0, %v1076_v4  ;;  %261 = vst.msk [vmem:[#allocation2 + $0x160] sm:$0xff] %vm216_vm0, %v1076_v4  ;;  %v1403_v19 = vmul.f32 %v1124_v0, %v404_v16  ;;  %v1406_v20 = vmul.f32 %v1124_v0, %v403_v17  ;;  %v406_v22 = vld [vmem:[%s1131_s23 + $0x1e8] sm:$0xff]  ;;  %v405_v23 = vld [vmem:[%s1131_s23 + $0x1e0] sm:$0xff] }
  0x24   : > { %262 = vst.msk [vmem:[#allocation2 + $0x168] sm:$0xff] %vm216_vm0, %v1076_v4  ;;  %263 = vst.msk [vmem:[#allocation2 + $0x170] sm:$0xff] %vm216_vm0, %v1076_v4  ;;  %v408_v24 = vld [vmem:[%s1131_s23 + $0x1f8] sm:$0xff]  ;;  %v1412_v25 = vmul.f32 %v1124_v0, %v406_v22  ;;  %v1415_v29 = vmul.f32 %v1124_v0, %v405_v23  ;;  %v407_v31 = vld [vmem:[%s1131_s23 + $0x1f0] sm:$0xff] }
  0x25   : > { %264 = vst.msk [vmem:[#allocation2 + $0x178] sm:$0xff] %vm216_vm0, %v1076_v4  ;;  %265 = vst.msk [vmem:[#allocation2 + $0x180] sm:$0xff] %vm216_vm0, %v1076_v4  ;;  %v1418_v30 = vmul.f32 %v1124_v0, %v408_v24  ;;  %v1422_v32 = vmul.f32 %v1124_v0, %v407_v31  ;;  %v360_v38 = vld [vmem:[%s1131_s23 + $0x78] sm:$0xff]  ;;  %v359_v39 = vld [vmem:[%s1131_s23 + $0x70] sm:$0xff] }
  0x26   : > { %266 = vst.msk [vmem:[#allocation2 + $0x188] sm:$0xff] %vm216_vm0, %v1076_v4  ;;  %267 = vst.msk [vmem:[#allocation2 + $0x190] sm:$0xff] %vm216_vm0, %v1076_v4  ;;  %502 = vadd.xlane.f32.xlu1 %v427_v59  ;;  %500 = vadd.xlane.f32.xlu0 %v426_v3  ;;  %v431_v40 = vmul.f32 %v1124_v0, %v360_v38  ;;  %v430_v44 = vmul.f32 %v1124_v0, %v359_v39  ;;  %v362_v45 = vld [vmem:[%s1131_s23 + $0x88] sm:$0xff]  ;;  %v361_v46 = vld [vmem:[%s1131_s23 + $0x80] sm:$0xff] }
  0x27   : > { %268 = vst.msk [vmem:[#allocation2 + $0x198] sm:$0xff] %vm216_vm0, %v1076_v4  ;;  %269 = vst.msk [vmem:[#allocation2 + $0x1a0] sm:$0xff] %vm216_vm0, %v1076_v4  ;;  %v433_v50 = vmul.f32 %v1124_v0, %v362_v45  ;;  %v432_v51 = vmul.f32 %v1124_v0, %v361_v46  ;;  %v364_v52 = vld [vmem:[%s1131_s23 + $0x98] sm:$0xff]  ;;  %v363_v56 = vld [vmem:[%s1131_s23 + $0x90] sm:$0xff] }
  0x28   : > { %270 = vst.msk [vmem:[#allocation2 + $0x1a8] sm:$0xff] %vm216_vm0, %v1076_v4  ;;  %271 = vst.msk [vmem:[#allocation2 + $0x1b0] sm:$0xff] %vm216_vm0, %v1076_v4  ;;  %v435_v57 = vmul.f32 %v1124_v0, %v364_v52  ;;  %v434_v58 = vmul.f32 %v1124_v0, %v363_v56  ;;  %v366_v59 = vld [vmem:[%s1131_s23 + $0xa8] sm:$0xff]  ;;  %v365_v63 = vld [vmem:[%s1131_s23 + $0xa0] sm:$0xff] }
  0x29   : > { %272 = vst.msk [vmem:[#allocation2 + $0x1b8] sm:$0xff] %vm216_vm0, %v1076_v4  ;;  %273 = vst.msk [vmem:[#allocation2 + $0x1c0] sm:$0xff] %vm216_vm0, %v1076_v4  ;;  %v437_v1 = vmul.f32 %v1124_v0, %v366_v59  ;;  %v436_v2 = vmul.f32 %v1124_v0, %v365_v63  ;;  %v368_v3 = vld [vmem:[%s1131_s23 + $0xb8] sm:$0xff]  ;;  %v370_v10 = vld [vmem:[%s1131_s23 + $0xc8] sm:$0xff] }
  0x2a   : > { %274 = vst.msk [vmem:[#allocation2 + $0x1c8] sm:$0xff] %vm216_vm0, %v1076_v4  ;;  %275 = vst.msk [vmem:[#allocation2 + $0x1d0] sm:$0xff] %vm216_vm0, %v1076_v4  ;;  %504 = vadd.xlane.f32.xlu0 %v428_v37  ;;  %v439_v5 = vmul.f32 %v1124_v0, %v368_v3  ;;  %v369_v11 = vld [vmem:[%s1131_s23 + $0xc0] sm:$0xff]  ;;  %v441_v15 = vmul.f32 %v1124_v0, %v370_v10  ;;  %v372_v17 = vld [vmem:[%s1131_s23 + $0xd8] sm:$0xff] }
  0x2b   : > { %276 = vst.msk [vmem:[#allocation2 + $0x1d8] sm:$0xff] %vm216_vm0, %v1076_v4  ;;  %277 = vst.msk [vmem:[#allocation2 + $0x1e0] sm:$0xff] %vm216_vm0, %v1076_v4  ;;  %v440_v16 = vmul.f32 %v1124_v0, %v369_v11  ;;  %v371_v22 = vld [vmem:[%s1131_s23 + $0xd0] sm:$0xff]  ;;  %v443_v23 = vmul.f32 %v1124_v0, %v372_v17  ;;  %v374_v31 = vld [vmem:[%s1131_s23 + $0xe8] sm:$0xff] }
  0x2c   : > { %278 = vst.msk [vmem:[#allocation2 + $0x1e8] sm:$0xff] %vm216_vm0, %v1076_v4  ;;  %279 = vst.msk [vmem:[#allocation2 + $0x1f0] sm:$0xff] %vm216_vm0, %v1076_v4  ;;  %v442_v24 = vmul.f32 %v1124_v0, %v371_v22  ;;  %v445_v37 = vmul.f32 %v1124_v0, %v374_v31  ;;  %v376_v39 = vld [vmem:[%s1131_s23 + $0xf8] sm:$0xff]  ;;  %v294_v11 = vld [vmem:[#allocation2 + $0x68] sm:$0xff] }
  0x2d   : > { %280 = vst.msk [vmem:[#allocation2 + $0x1f8] sm:$0xff] %vm216_vm0, %v1076_v4  ;;  %v358_v4 = vld [vmem:[%s1131_s23 + $0x68] sm:$0xff]  ;;  %v293_v17 = vld [vmem:[#allocation2 + $0x60] sm:$0xff] }
  0x2e   : > { %v429_v33 = vmul.f32 %v1124_v0, %v358_v4  ;;  %508 = vadd.xlane.f32.xlu0 %v430_v44  ;;  %v367_v4 = vld [vmem:[%s1131_s23 + $0xb0] sm:$0xff]  ;;  %v447_v44 = vmul.f32 %v1124_v0, %v376_v39 }
  0x2f   : > { %v438_v9 = vmul.f32 %v1124_v0, %v367_v4 }
  0x30   : > { %506 = vadd.xlane.f32.xlu1 %v429_v33  ;;  %v373_v33 = vld [vmem:[%s1131_s23 + $0xe0] sm:$0xff] }
  0x31   : > { %v444_v38 = vmul.f32 %v1124_v0, %v373_v33 }
  0x32   : > { %512 = vadd.xlane.f32.xlu0 %v432_v51 }
  0x34   : > { %510 = vadd.xlane.f32.xlu1 %v431_v40  ;;  %v375_v40 = vld [vmem:[%s1131_s23 + $0xf0] sm:$0xff] }
  0x35   : > { %v446_v45 = vmul.f32 %v1124_v0, %v375_v40  ;;  %v283_v0 = vld [vmem:[#allocation2 + $0x10] sm:$0xff] }
  0x36   : > { %516 = vadd.xlane.f32.xlu0 %v434_v58  ;;  %v292_v58 = vld [vmem:[#allocation2 + $0x58] sm:$0xff] }
  0x38   : > { %514 = vadd.xlane.f32.xlu1 %v433_v50 }
  0x3a   : > { %520 = vadd.xlane.f32.xlu0 %v436_v2 }
  0x3c   : > { %518 = vadd.xlane.f32.xlu1 %v435_v57 }
  0x3e   : > { %524 = vadd.xlane.f32.xlu0 %v438_v9 }
  0x40   : > { %522 = vadd.xlane.f32.xlu1 %v437_v1  ;;  %v291_v1 = vld [vmem:[#allocation2 + $0x50] sm:$0xff] }
  0x42   : > { %528 = vadd.xlane.f32.xlu0 %v440_v16 }
  0x44   : > { %526 = vadd.xlane.f32.xlu1 %v439_v5 }
  0x46   : > { %532 = vadd.xlane.f32.xlu0 %v442_v24 }
  0x48   : > { %530 = vadd.xlane.f32.xlu1 %v441_v15 }
  0x4a   : > { %536 = vadd.xlane.f32.xlu0 %v444_v38  ;;  %v296_v38 = vld [vmem:[#allocation2 + $0x78] sm:$0xff] }
  0x4c   : > { %534 = vadd.xlane.f32.xlu1 %v443_v23 }
  0x4e   : > { %540 = vadd.xlane.f32.xlu0 %v446_v45 }
  0x50   : > { %538 = vadd.xlane.f32.xlu1 %v445_v37 }
  0x52   : > { %544 = vadd.xlane.f32.xlu0 %v1297_v26 }
  0x54   : > { %542 = vadd.xlane.f32.xlu1 %v447_v44  ;;  %v295_v44 = vld [vmem:[#allocation2 + $0x70] sm:$0xff] }
  0x56   : > { %548 = vadd.xlane.f32.xlu0 %v1303_v28 }
  0x58   : > { %546 = vadd.xlane.f32.xlu1 %v1290_v21  ;;  %v281_v21 = vld [vmem:[#allocation2] sm:$0xff] }
  0x5a   : > { %552 = vadd.xlane.f32.xlu0 %v1314_v35  ;;  %v284_v35 = vld [vmem:[#allocation2 + $0x18] sm:$0xff] }
  0x5c   : > { %550 = vadd.xlane.f32.xlu1 %v1300_v27 }
  0x5e   : > { %556 = vadd.xlane.f32.xlu0 %v1324_v41 }
  0x60   : > { %554 = vadd.xlane.f32.xlu1 %v1311_v34 }
  0x62   : > { %560 = vadd.xlane.f32.xlu0 %v1330_v43 }
  0x64   : > { %558 = vadd.xlane.f32.xlu1 %v1317_v36  ;;  %v282_v36 = vld [vmem:[#allocation2 + $0x8] sm:$0xff] }
  0x66   : > { %564 = vadd.xlane.f32.xlu0 %v1339_v48  ;;  %v286_v48 = vld [vmem:[#allocation2 + $0x28] sm:$0xff] }
  0x68   : > { %562 = vadd.xlane.f32.xlu1 %v1327_v42 }
  0x6a   : > { %568 = vadd.xlane.f32.xlu0 %v1348_v53  ;;  %v1498_v53 = vstv %s804_s24 }
  0x6c   : > { %566 = vadd.xlane.f32.xlu1 %v1336_v47 }
  0x6e   : > { %572 = vadd.xlane.f32.xlu0 %v1354_v55 }
  0x70   : > { %570 = vadd.xlane.f32.xlu1 %v1342_v49  ;;  %v285_v49 = vld [vmem:[#allocation2 + $0x20] sm:$0xff] }
  0x72   : > { %576 = vadd.xlane.f32.xlu0 %v1364_v61 }
  0x74   : > { %574 = vadd.xlane.f32.xlu1 %v1351_v54 }
  0x76   : > { %580 = vadd.xlane.f32.xlu0 %v1376_v6 }
  0x78   : > { %578 = vadd.xlane.f32.xlu1 %v1361_v60 }
  0x7a   : > { %584 = vadd.xlane.f32.xlu0 %v1382_v8  ;;  %v287_v8 = vld [vmem:[#allocation2 + $0x30] sm:$0xff] }
  0x7c   : > { %582 = vadd.xlane.f32.xlu1 %v1367_v62  ;;  %v288_v62 = vld [vmem:[#allocation2 + $0x38] sm:$0xff] }
  0x7e   : > { %588 = vadd.xlane.f32.xlu0 %v1391_v13 }
  0x80   : > { %586 = vadd.xlane.f32.xlu1 %v1379_v7 }
  0x82   : > { %592 = vadd.xlane.f32.xlu0 %v1400_v18 }
  0x84   : > { %590 = vadd.xlane.f32.xlu1 %v1388_v12 }
  0x86   : > { %596 = vadd.xlane.f32.xlu0 %v1406_v20 }
  0x88   : > { %594 = vadd.xlane.f32.xlu1 %v1394_v14 }
  0x8a   : > { %600 = vadd.xlane.f32.xlu0 %v1415_v29 }
  0x8c   : > { %598 = vadd.xlane.f32.xlu1 %v1403_v19 }
  0x8e   : > { %604 = vadd.xlane.f32.xlu0 %v1422_v32  ;;  %v289_v32 = vld [vmem:[#allocation2 + $0x40] sm:$0xff] }
  0x90   : > { %602 = vadd.xlane.f32.xlu1 %v1412_v25  ;;  %v290_v25 = vld [vmem:[#allocation2 + $0x48] sm:$0xff] }
  0x94   : > { %606 = vadd.xlane.f32.xlu1 %v1418_v30 }
  0x9b   : > { %v485_v26 = vpop.xlane.xlu1 %484  ;;  %v481_v27 = vpop.xlane.xlu0 %480 }
  0x9c   : > { %v610_v28 = vadd.f32 %v485_v26, %v283_v0  ;;  %v608_v34 = vadd.f32 %v481_v27, %v281_v21 }
  0x9e   : > { %675 = vst.msk [vmem:[#allocation2 + $0x10] sm:$0xff] %vm216_vm0, %v610_v28  ;;  %673 = vst.msk [vmem:[#allocation2] sm:$0xff] %vm216_vm0, %v608_v34  ;;  %v298_v34 = vld [vmem:[#allocation2 + $0x88] sm:$0xff] }
  0x9f   : > { %v487_v41 = vpop.xlane.xlu1 %486  ;;  %v483_v42 = vpop.xlane.xlu0 %482 }
  0xa0   : > { %v611_v43 = vadd.f32 %v487_v41, %v284_v35  ;;  %v609_v47 = vadd.f32 %v483_v42, %v282_v36  ;;  %v297_v41 = vld [vmem:[#allocation2 + $0x80] sm:$0xff] }
  0xa2   : > { %676 = vst.msk [vmem:[#allocation2 + $0x18] sm:$0xff] %vm216_vm0, %v611_v43  ;;  %674 = vst.msk [vmem:[#allocation2 + $0x8] sm:$0xff] %vm216_vm0, %v609_v47 }
  0xa3   : > { %v491_v54 = vpop.xlane.xlu1 %490  ;;  %v489_v55 = vpop.xlane.xlu0 %488 }
  0xa4   : > { %v613_v60 = vadd.f32 %v491_v54, %v286_v48  ;;  %v612_v61 = vadd.f32 %v489_v55, %v285_v49  ;;  %v300_v55 = vld [vmem:[#allocation2 + $0x98] sm:$0xff] }
  0xa5   : > { %v742_v6 = vld [vmem:[#allocation2 + $0x10] sm:$0xff]  ;;  %v740_v7 = vld [vmem:[#allocation2] sm:$0xff] }
  0xa6   : > { %v808_v12 = vadd.f32 %v1498_v53, %v742_v6  ;;  %v806_v13 = vadd.f32 %v1498_v53, %v740_v7  ;;  %678 = vst.msk [vmem:[#allocation2 + $0x28] sm:$0xff] %vm216_vm0, %v613_v60  ;;  %677 = vst.msk [vmem:[#allocation2 + $0x20] sm:$0xff] %vm216_vm0, %v612_v61 }
  0xa7   : > { %v495_v14 = vpop.xlane.xlu1 %494  ;;  %v493_v18 = vpop.xlane.xlu0 %492 }
  0xa8   : > { %872 = vst.msk [vmem:[%s1505_s27 + $0x10] sm:$0xff] %vm216_vm0, %v808_v12  ;;  %870 = vst.msk [vmem:[%s1505_s27] sm:$0xff] %vm216_vm0, %v806_v13  ;;  %v615_v19 = vadd.f32 %v495_v14, %v288_v62  ;;  %v614_v20 = vadd.f32 %v493_v18, %v287_v8  ;;  %v299_v62 = vld [vmem:[#allocation2 + $0x90] sm:$0xff]  ;;  %v302_v18 = vld [vmem:[#allocation2 + $0xa8] sm:$0xff] }
  0xa9   : > { %v743_v29 = vld [vmem:[#allocation2 + $0x18] sm:$0xff]  ;;  %v741_v30 = vld [vmem:[#allocation2 + $0x8] sm:$0xff] }
  0xaa   : > { %v809_v46 = vadd.f32 %v1498_v53, %v743_v29  ;;  %v807_v50 = vadd.f32 %v1498_v53, %v741_v30  ;;  %680 = vst.msk [vmem:[#allocation2 + $0x38] sm:$0xff] %vm216_vm0, %v615_v19  ;;  %679 = vst.msk [vmem:[#allocation2 + $0x30] sm:$0xff] %vm216_vm0, %v614_v20 }
  0xab   : > { %v499_v51 = vpop.xlane.xlu1 %498  ;;  %v497_v52 = vpop.xlane.xlu0 %496 }
  0xac   : > { %873 = vst.msk [vmem:[%s1505_s27 + $0x18] sm:$0xff] %vm216_vm0, %v809_v46  ;;  %871 = vst.msk [vmem:[%s1505_s27 + $0x8] sm:$0xff] %vm216_vm0, %v807_v50  ;;  %v617_v56 = vadd.f32 %v499_v51, %v290_v25  ;;  %v616_v57 = vadd.f32 %v497_v52, %v289_v32  ;;  %v301_v25 = vld [vmem:[#allocation2 + $0xa0] sm:$0xff]  ;;  %v304_v52 = vld [vmem:[#allocation2 + $0xb8] sm:$0xff] }
  0xad   : > { %v745_v59 = vld [vmem:[#allocation2 + $0x28] sm:$0xff]  ;;  %v744_v63 = vld [vmem:[#allocation2 + $0x20] sm:$0xff] }
  0xae   : > { %v811_v2 = vadd.f32 %v1498_v53, %v745_v59  ;;  %v810_v3 = vadd.f32 %v1498_v53, %v744_v63  ;;  %682 = vst.msk [vmem:[#allocation2 + $0x48] sm:$0xff] %vm216_vm0, %v617_v56  ;;  %681 = vst.msk [vmem:[#allocation2 + $0x40] sm:$0xff] %vm216_vm0, %v616_v57 }
  0xaf   : > { %v503_v4 = vpop.xlane.xlu1 %502  ;;  %v501_v5 = vpop.xlane.xlu0 %500 }
  0xb0   : > { %875 = vst.msk [vmem:[%s1505_s27 + $0x28] sm:$0xff] %vm216_vm0, %v811_v2  ;;  %874 = vst.msk [vmem:[%s1505_s27 + $0x20] sm:$0xff] %vm216_vm0, %v810_v3  ;;  %v619_v9 = vadd.f32 %v503_v4, %v292_v58  ;;  %v618_v10 = vadd.f32 %v501_v5, %v291_v1  ;;  %v303_v58 = vld [vmem:[#allocation2 + $0xb0] sm:$0xff]  ;;  %v306_v5 = vld [vmem:[#allocation2 + $0xc8] sm:$0xff] }
  0xb1   : > { %v747_v15 = vld [vmem:[#allocation2 + $0x38] sm:$0xff]  ;;  %v746_v16 = vld [vmem:[#allocation2 + $0x30] sm:$0xff] }
  0xb2   : > { %v813_v22 = vadd.f32 %v1498_v53, %v747_v15  ;;  %v812_v23 = vadd.f32 %v1498_v53, %v746_v16  ;;  %684 = vst.msk [vmem:[#allocation2 + $0x58] sm:$0xff] %vm216_vm0, %v619_v9  ;;  %683 = vst.msk [vmem:[#allocation2 + $0x50] sm:$0xff] %vm216_vm0, %v618_v10 }
  0xb3   : > { %v505_v31 = vpop.xlane.xlu0 %504 }
  0xb4   : > { %877 = vst.msk [vmem:[%s1505_s27 + $0x38] sm:$0xff] %vm216_vm0, %v813_v22  ;;  %876 = vst.msk [vmem:[%s1505_s27 + $0x30] sm:$0xff] %vm216_vm0, %v812_v23  ;;  %v620_v37 = vadd.f32 %v505_v31, %v293_v17  ;;  %v308_v31 = vld [vmem:[#allocation2 + $0xd8] sm:$0xff] }
  0xb5   : > { %v749_v39 = vld [vmem:[#allocation2 + $0x48] sm:$0xff]  ;;  %v748_v40 = vld [vmem:[#allocation2 + $0x40] sm:$0xff] }
  0xb6   : > { %v815_v45 = vadd.f32 %v1498_v53, %v749_v39  ;;  %v814_v0 = vadd.f32 %v1498_v53, %v748_v40  ;;  %685 = vst.msk [vmem:[#allocation2 + $0x60] sm:$0xff] %vm216_vm0, %v620_v37 }
  0xb7   : > { %v509_v26 = vpop.xlane.xlu0 %508 }
  0xb8   : > { %879 = vst.msk [vmem:[%s1505_s27 + $0x48] sm:$0xff] %vm216_vm0, %v815_v45  ;;  %878 = vst.msk [vmem:[%s1505_s27 + $0x40] sm:$0xff] %vm216_vm0, %v814_v0  ;;  %v622_v28 = vadd.f32 %v509_v26, %v295_v44  ;;  %v310_v26 = vld [vmem:[#allocation2 + $0xe8] sm:$0xff] }
  0xb9   : > { %v507_v24 = vpop.xlane.xlu1 %506  ;;  %v751_v35 = vld [vmem:[#allocation2 + $0x58] sm:$0xff]  ;;  %v750_v36 = vld [vmem:[#allocation2 + $0x50] sm:$0xff] }
  0xba   : > { %v621_v33 = vadd.f32 %v507_v24, %v294_v11  ;;  %v817_v42 = vadd.f32 %v1498_v53, %v751_v35  ;;  %v816_v43 = vadd.f32 %v1498_v53, %v750_v36  ;;  %687 = vst.msk [vmem:[#allocation2 + $0x70] sm:$0xff] %vm216_vm0, %v622_v28  ;;  %v305_v11 = vld [vmem:[#allocation2 + $0xc0] sm:$0xff] }
  0xbb   : > { %v513_v48 = vpop.xlane.xlu0 %512 }
  0xbc   : > { %686 = vst.msk [vmem:[#allocation2 + $0x68] sm:$0xff] %vm216_vm0, %v621_v33  ;;  %881 = vst.msk [vmem:[%s1505_s27 + $0x58] sm:$0xff] %vm216_vm0, %v817_v42  ;;  %v624_v54 = vadd.f32 %v513_v48, %v297_v41  ;;  %v312_v48 = vld [vmem:[#allocation2 + $0xf8] sm:$0xff] }
  0xbd   : > { %v511_v21 = vpop.xlane.xlu1 %510  ;;  %880 = vst.msk [vmem:[%s1505_s27 + $0x50] sm:$0xff] %vm216_vm0, %v816_v43  ;;  %v752_v61 = vld [vmem:[#allocation2 + $0x60] sm:$0xff] }
  0xbe   : > { %v623_v27 = vadd.f32 %v511_v21, %v296_v38  ;;  %v818_v7 = vadd.f32 %v1498_v53, %v752_v61  ;;  %689 = vst.msk [vmem:[#allocation2 + $0x80] sm:$0xff] %vm216_vm0, %v624_v54  ;;  %v307_v38 = vld [vmem:[#allocation2 + $0xd0] sm:$0xff] }
  0xbf   : > { %v517_v12 = vpop.xlane.xlu0 %516 }
  0xc0   : > { %688 = vst.msk [vmem:[#allocation2 + $0x78] sm:$0xff] %vm216_vm0, %v623_v27  ;;  %882 = vst.msk [vmem:[%s1505_s27 + $0x60] sm:$0xff] %vm216_vm0, %v818_v7  ;;  %v626_v14 = vadd.f32 %v517_v12, %v299_v62  ;;  %v314_v12 = vld [vmem:[#allocation2 + $0x108] sm:$0xff] }
  0xc1   : > { %v515_v47 = vpop.xlane.xlu1 %514  ;;  %v754_v20 = vld [vmem:[#allocation2 + $0x70] sm:$0xff] }
  0xc2   : > { %v625_v49 = vadd.f32 %v515_v47, %v298_v34  ;;  %v820_v30 = vadd.f32 %v1498_v53, %v754_v20  ;;  %691 = vst.msk [vmem:[#allocation2 + $0x90] sm:$0xff] %vm216_vm0, %v626_v14  ;;  %v309_v34 = vld [vmem:[#allocation2 + $0xe0] sm:$0xff] }
  0xc3   : > { %v753_v60 = vld [vmem:[#allocation2 + $0x68] sm:$0xff]  ;;  %v521_v46 = vpop.xlane.xlu0 %520 }
  0xc4   : > { %v819_v6 = vadd.f32 %v1498_v53, %v753_v60  ;;  %690 = vst.msk [vmem:[#allocation2 + $0x88] sm:$0xff] %vm216_vm0, %v625_v49  ;;  %884 = vst.msk [vmem:[%s1505_s27 + $0x70] sm:$0xff] %vm216_vm0, %v820_v30  ;;  %v628_v51 = vadd.f32 %v521_v46, %v301_v25  ;;  %v316_v46 = vld [vmem:[#allocation2 + $0x118] sm:$0xff] }
  0xc5   : > { %v519_v8 = vpop.xlane.xlu1 %518  ;;  %v756_v57 = vld [vmem:[#allocation2 + $0x80] sm:$0xff] }
  0xc6   : > { %883 = vst.msk [vmem:[%s1505_s27 + $0x68] sm:$0xff] %vm216_vm0, %v819_v6  ;;  %v627_v13 = vadd.f32 %v519_v8, %v300_v55  ;;  %v822_v63 = vadd.f32 %v1498_v53, %v756_v57  ;;  %693 = vst.msk [vmem:[#allocation2 + $0xa0] sm:$0xff] %vm216_vm0, %v628_v51  ;;  %v311_v55 = vld [vmem:[#allocation2 + $0xf0] sm:$0xff] }
  0xc7   : > { %v755_v19 = vld [vmem:[#allocation2 + $0x78] sm:$0xff]  ;;  %v525_v2 = vpop.xlane.xlu0 %524 }
  0xc8   : > { %v821_v29 = vadd.f32 %v1498_v53, %v755_v19  ;;  %692 = vst.msk [vmem:[#allocation2 + $0x98] sm:$0xff] %vm216_vm0, %v627_v13  ;;  %886 = vst.msk [vmem:[%s1505_s27 + $0x80] sm:$0xff] %vm216_vm0, %v822_v63  ;;  %v630_v4 = vadd.f32 %v525_v2, %v303_v58  ;;  %v318_v2 = vld [vmem:[#allocation2 + $0x128] sm:$0xff] }
  0xc9   : > { %v523_v32 = vpop.xlane.xlu1 %522  ;;  %v758_v10 = vld [vmem:[#allocation2 + $0x90] sm:$0xff] }
  0xca   : > { %885 = vst.msk [vmem:[%s1505_s27 + $0x78] sm:$0xff] %vm216_vm0, %v821_v29  ;;  %v629_v50 = vadd.f32 %v523_v32, %v302_v18  ;;  %v824_v16 = vadd.f32 %v1498_v53, %v758_v10  ;;  %695 = vst.msk [vmem:[#allocation2 + $0xb0] sm:$0xff] %vm216_vm0, %v630_v4  ;;  %v313_v18 = vld [vmem:[#allocation2 + $0x100] sm:$0xff] }
  0xcb   : > { %v757_v56 = vld [vmem:[#allocation2 + $0x88] sm:$0xff]  ;;  %v529_v22 = vpop.xlane.xlu0 %528 }
  0xcc   : > { %v823_v59 = vadd.f32 %v1498_v53, %v757_v56  ;;  %694 = vst.msk [vmem:[#allocation2 + $0xa8] sm:$0xff] %vm216_vm0, %v629_v50  ;;  %888 = vst.msk [vmem:[%s1505_s27 + $0x90] sm:$0xff] %vm216_vm0, %v824_v16  ;;  %v632_v24 = vadd.f32 %v529_v22, %v305_v11  ;;  %v320_v22 = vld [vmem:[#allocation2 + $0x138] sm:$0xff] }
  0xcd   : > { %v527_v1 = vpop.xlane.xlu1 %526  ;;  %v760_v37 = vld [vmem:[#allocation2 + $0xa0] sm:$0xff] }
  0xce   : > { %887 = vst.msk [vmem:[%s1505_s27 + $0x88] sm:$0xff] %vm216_vm0, %v823_v59  ;;  %v631_v3 = vadd.f32 %v527_v1, %v304_v52  ;;  %v826_v40 = vadd.f32 %v1498_v53, %v760_v37  ;;  %697 = vst.msk [vmem:[#allocation2 + $0xc0] sm:$0xff] %vm216_vm0, %v632_v24  ;;  %v315_v52 = vld [vmem:[#allocation2 + $0x110] sm:$0xff] }
  0xcf   : > { %v759_v9 = vld [vmem:[#allocation2 + $0x98] sm:$0xff]  ;;  %v533_v45 = vpop.xlane.xlu0 %532 }
  0xd0   : > { %v825_v15 = vadd.f32 %v1498_v53, %v759_v9  ;;  %696 = vst.msk [vmem:[#allocation2 + $0xb8] sm:$0xff] %vm216_vm0, %v631_v3  ;;  %890 = vst.msk [vmem:[%s1505_s27 + $0xa0] sm:$0xff] %vm216_vm0, %v826_v40  ;;  %v634_v21 = vadd.f32 %v533_v45, %v307_v38  ;;  %v322_v45 = vld [vmem:[#allocation2 + $0x148] sm:$0xff] }
  0xd1   : > { %v531_v17 = vpop.xlane.xlu1 %530  ;;  %v762_v28 = vld [vmem:[#allocation2 + $0xb0] sm:$0xff] }
  0xd2   : > { %889 = vst.msk [vmem:[%s1505_s27 + $0x98] sm:$0xff] %vm216_vm0, %v825_v15  ;;  %v633_v23 = vadd.f32 %v531_v17, %v306_v5  ;;  %v828_v36 = vadd.f32 %v1498_v53, %v762_v28  ;;  %699 = vst.msk [vmem:[#allocation2 + $0xd0] sm:$0xff] %vm216_vm0, %v634_v21  ;;  %v317_v5 = vld [vmem:[#allocation2 + $0x120] sm:$0xff] }
  0xd3   : > { %v761_v33 = vld [vmem:[#allocation2 + $0xa8] sm:$0xff]  ;;  %v537_v42 = vpop.xlane.xlu0 %536 }
  0xd4   : > { %v827_v39 = vadd.f32 %v1498_v53, %v761_v33  ;;  %698 = vst.msk [vmem:[#allocation2 + $0xc8] sm:$0xff] %vm216_vm0, %v633_v23  ;;  %892 = vst.msk [vmem:[%s1505_s27 + $0xb0] sm:$0xff] %vm216_vm0, %v828_v36  ;;  %v636_v47 = vadd.f32 %v537_v42, %v309_v34  ;;  %v324_v42 = vld [vmem:[#allocation2 + $0x158] sm:$0xff] }
  0xd5   : > { %v535_v44 = vpop.xlane.xlu1 %534  ;;  %v764_v54 = vld [vmem:[#allocation2 + $0xc0] sm:$0xff] }
  0xd6   : > { %891 = vst.msk [vmem:[%s1505_s27 + $0xa8] sm:$0xff] %vm216_vm0, %v827_v39  ;;  %v635_v0 = vadd.f32 %v535_v44, %v308_v31  ;;  %v830_v61 = vadd.f32 %v1498_v53, %v764_v54  ;;  %701 = vst.msk [vmem:[#allocation2 + $0xe0] sm:$0xff] %vm216_vm0, %v636_v47  ;;  %v319_v31 = vld [vmem:[#allocation2 + $0x130] sm:$0xff] }
  0xd7   : > { %v763_v27 = vld [vmem:[#allocation2 + $0xb8] sm:$0xff]  ;;  %v541_v6 = vpop.xlane.xlu0 %540 }
  0xd8   : > { %v829_v35 = vadd.f32 %v1498_v53, %v763_v27  ;;  %700 = vst.msk [vmem:[#allocation2 + $0xd8] sm:$0xff] %vm216_vm0, %v635_v0  ;;  %894 = vst.msk [vmem:[%s1505_s27 + $0xc0] sm:$0xff] %vm216_vm0, %v830_v61  ;;  %v638_v8 = vadd.f32 %v541_v6, %v311_v55  ;;  %v326_v6 = vld [vmem:[#allocation2 + $0x168] sm:$0xff] }
  0xd9   : > { %v539_v41 = vpop.xlane.xlu1 %538  ;;  %v766_v14 = vld [vmem:[#allocation2 + $0xd0] sm:$0xff] }
  0xda   : > { %893 = vst.msk [vmem:[%s1505_s27 + $0xb8] sm:$0xff] %vm216_vm0, %v829_v35  ;;  %v637_v43 = vadd.f32 %v539_v41, %v310_v26  ;;  %v832_v20 = vadd.f32 %v1498_v53, %v766_v14  ;;  %703 = vst.msk [vmem:[#allocation2 + $0xf0] sm:$0xff] %vm216_vm0, %v638_v8  ;;  %v321_v26 = vld [vmem:[#allocation2 + $0x140] sm:$0xff] }
  0xdb   : > { %v765_v49 = vld [vmem:[#allocation2 + $0xc8] sm:$0xff]  ;;  %v545_v29 = vpop.xlane.xlu0 %544 }
  0xdc   : > { %v831_v60 = vadd.f32 %v1498_v53, %v765_v49  ;;  %702 = vst.msk [vmem:[#allocation2 + $0xe8] sm:$0xff] %vm216_vm0, %v637_v43  ;;  %896 = vst.msk [vmem:[%s1505_s27 + $0xd0] sm:$0xff] %vm216_vm0, %v832_v20  ;;  %v640_v32 = vadd.f32 %v545_v29, %v313_v18  ;;  %v328_v29 = vld [vmem:[#allocation2 + $0x178] sm:$0xff] }
  0xdd   : > { %v543_v62 = vpop.xlane.xlu1 %542  ;;  %v768_v51 = vld [vmem:[#allocation2 + $0xe0] sm:$0xff] }
  0xde   : > { %895 = vst.msk [vmem:[%s1505_s27 + $0xc8] sm:$0xff] %vm216_vm0, %v831_v60  ;;  %v639_v7 = vadd.f32 %v543_v62, %v312_v48  ;;  %v834_v57 = vadd.f32 %v1498_v53, %v768_v51  ;;  %705 = vst.msk [vmem:[#allocation2 + $0x100] sm:$0xff] %vm216_vm0, %v640_v32  ;;  %v323_v48 = vld [vmem:[#allocation2 + $0x150] sm:$0xff] }
  0xdf   : > { %v767_v13 = vld [vmem:[#allocation2 + $0xd8] sm:$0xff]  ;;  %v549_v59 = vpop.xlane.xlu0 %548 }
  0xe0   : > { %v833_v19 = vadd.f32 %v1498_v53, %v767_v13  ;;  %704 = vst.msk [vmem:[#allocation2 + $0xf8] sm:$0xff] %vm216_vm0, %v639_v7  ;;  %898 = vst.msk [vmem:[%s1505_s27 + $0xe0] sm:$0xff] %vm216_vm0, %v834_v57  ;;  %v642_v1 = vadd.f32 %v549_v59, %v315_v52  ;;  %v330_v59 = vld [vmem:[#allocation2 + $0x188] sm:$0xff] }
  0xe1   : > { %v547_v25 = vpop.xlane.xlu1 %546  ;;  %v770_v4 = vld [vmem:[#allocation2 + $0xf0] sm:$0xff] }
  0xe2   : > { %897 = vst.msk [vmem:[%s1505_s27 + $0xd8] sm:$0xff] %vm216_vm0, %v833_v19  ;;  %v641_v30 = vadd.f32 %v547_v25, %v314_v12  ;;  %v836_v10 = vadd.f32 %v1498_v53, %v770_v4  ;;  %707 = vst.msk [vmem:[#allocation2 + $0x110] sm:$0xff] %vm216_vm0, %v642_v1  ;;  %v325_v12 = vld [vmem:[#allocation2 + $0x160] sm:$0xff] }
  0xe3   : > { %v769_v50 = vld [vmem:[#allocation2 + $0xe8] sm:$0xff]  ;;  %v553_v15 = vpop.xlane.xlu0 %552 }
  0xe4   : > { %v835_v56 = vadd.f32 %v1498_v53, %v769_v50  ;;  %706 = vst.msk [vmem:[#allocation2 + $0x108] sm:$0xff] %vm216_vm0, %v641_v30  ;;  %900 = vst.msk [vmem:[%s1505_s27 + $0xf0] sm:$0xff] %vm216_vm0, %v836_v10  ;;  %v644_v17 = vadd.f32 %v553_v15, %v317_v5  ;;  %v332_v15 = vld [vmem:[#allocation2 + $0x198] sm:$0xff] }
  0xe5   : > { %v551_v58 = vpop.xlane.xlu1 %550  ;;  %v772_v24 = vld [vmem:[#allocation2 + $0x100] sm:$0xff] }
  0xe6   : > { %899 = vst.msk [vmem:[%s1505_s27 + $0xe8] sm:$0xff] %vm216_vm0, %v835_v56  ;;  %v643_v63 = vadd.f32 %v551_v58, %v316_v46  ;;  %v838_v37 = vadd.f32 %v1498_v53, %v772_v24  ;;  %709 = vst.msk [vmem:[#allocation2 + $0x120] sm:$0xff] %vm216_vm0, %v644_v17  ;;  %v327_v46 = vld [vmem:[#allocation2 + $0x170] sm:$0xff] }
  0xe7   : > { %v771_v3 = vld [vmem:[#allocation2 + $0xf8] sm:$0xff]  ;;  %v557_v39 = vpop.xlane.xlu0 %556 }
  0xe8   : > { %v837_v9 = vadd.f32 %v1498_v53, %v771_v3  ;;  %708 = vst.msk [vmem:[#allocation2 + $0x118] sm:$0xff] %vm216_vm0, %v643_v63  ;;  %902 = vst.msk [vmem:[%s1505_s27 + $0x100] sm:$0xff] %vm216_vm0, %v838_v37  ;;  %v646_v44 = vadd.f32 %v557_v39, %v319_v31  ;;  %v334_v39 = vld [vmem:[#allocation2 + $0x1a8] sm:$0xff] }
  0xe9   : > { %v555_v11 = vpop.xlane.xlu1 %554  ;;  %v774_v21 = vld [vmem:[#allocation2 + $0x110] sm:$0xff] }
  0xea   : > { %901 = vst.msk [vmem:[%s1505_s27 + $0xf8] sm:$0xff] %vm216_vm0, %v837_v9  ;;  %v645_v16 = vadd.f32 %v555_v11, %v318_v2  ;;  %v840_v28 = vadd.f32 %v1498_v53, %v774_v21  ;;  %711 = vst.msk [vmem:[#allocation2 + $0x130] sm:$0xff] %vm216_vm0, %v646_v44  ;;  %v329_v2 = vld [vmem:[#allocation2 + $0x180] sm:$0xff] }
  0xeb   : > { %v773_v23 = vld [vmem:[#allocation2 + $0x108] sm:$0xff]  ;;  %v561_v35 = vpop.xlane.xlu0 %560 }
  0xec   : > { %v839_v33 = vadd.f32 %v1498_v53, %v773_v23  ;;  %710 = vst.msk [vmem:[#allocation2 + $0x128] sm:$0xff] %vm216_vm0, %v645_v16  ;;  %904 = vst.msk [vmem:[%s1505_s27 + $0x110] sm:$0xff] %vm216_vm0, %v840_v28  ;;  %v648_v41 = vadd.f32 %v561_v35, %v321_v26  ;;  %v336_v35 = vld [vmem:[#allocation2 + $0x1b8] sm:$0xff] }
  0xed   : > { %v559_v38 = vpop.xlane.xlu1 %558  ;;  %v776_v47 = vld [vmem:[#allocation2 + $0x120] sm:$0xff] }
  0xee   : > { %903 = vst.msk [vmem:[%s1505_s27 + $0x108] sm:$0xff] %vm216_vm0, %v839_v33  ;;  %v647_v40 = vadd.f32 %v559_v38, %v320_v22  ;;  %v842_v54 = vadd.f32 %v1498_v53, %v776_v47  ;;  %713 = vst.msk [vmem:[#allocation2 + $0x140] sm:$0xff] %vm216_vm0, %v648_v41  ;;  %v331_v22 = vld [vmem:[#allocation2 + $0x190] sm:$0xff] }
  0xef   : > { %v775_v0 = vld [vmem:[#allocation2 + $0x118] sm:$0xff]  ;;  %v565_v60 = vpop.xlane.xlu0 %564 }
  0xf0   : > { %v841_v27 = vadd.f32 %v1498_v53, %v775_v0  ;;  %712 = vst.msk [vmem:[#allocation2 + $0x138] sm:$0xff] %vm216_vm0, %v647_v40  ;;  %906 = vst.msk [vmem:[%s1505_s27 + $0x120] sm:$0xff] %vm216_vm0, %v842_v54  ;;  %v650_v62 = vadd.f32 %v565_v60, %v323_v48  ;;  %v338_v60 = vld [vmem:[#allocation2 + $0x1c8] sm:$0xff] }
  0xf1   : > { %v563_v34 = vpop.xlane.xlu1 %562  ;;  %v778_v8 = vld [vmem:[#allocation2 + $0x130] sm:$0xff] }
  0xf2   : > { %905 = vst.msk [vmem:[%s1505_s27 + $0x118] sm:$0xff] %vm216_vm0, %v841_v27  ;;  %v649_v36 = vadd.f32 %v563_v34, %v322_v45  ;;  %v844_v14 = vadd.f32 %v1498_v53, %v778_v8  ;;  %715 = vst.msk [vmem:[#allocation2 + $0x150] sm:$0xff] %vm216_vm0, %v650_v62  ;;  %v333_v45 = vld [vmem:[#allocation2 + $0x1a0] sm:$0xff] }
  0xf3   : > { %v777_v43 = vld [vmem:[#allocation2 + $0x128] sm:$0xff]  ;;  %v569_v19 = vpop.xlane.xlu0 %568 }
  0xf4   : > { %v843_v49 = vadd.f32 %v1498_v53, %v777_v43  ;;  %714 = vst.msk [vmem:[#allocation2 + $0x148] sm:$0xff] %vm216_vm0, %v649_v36  ;;  %908 = vst.msk [vmem:[%s1505_s27 + $0x130] sm:$0xff] %vm216_vm0, %v844_v14  ;;  %v652_v25 = vadd.f32 %v569_v19, %v325_v12  ;;  %v340_v19 = vld [vmem:[#allocation2 + $0x1d8] sm:$0xff] }
  0xf5   : > { %v567_v55 = vpop.xlane.xlu1 %566  ;;  %v780_v32 = vld [vmem:[#allocation2 + $0x140] sm:$0xff] }
  0xf6   : > { %907 = vst.msk [vmem:[%s1505_s27 + $0x128] sm:$0xff] %vm216_vm0, %v843_v49  ;;  %v651_v61 = vadd.f32 %v567_v55, %v324_v42  ;;  %v846_v51 = vadd.f32 %v1498_v53, %v780_v32  ;;  %717 = vst.msk [vmem:[#allocation2 + $0x160] sm:$0xff] %vm216_vm0, %v652_v25  ;;  %v335_v42 = vld [vmem:[#allocation2 + $0x1b0] sm:$0xff] }
  0xf7   : > { %v779_v7 = vld [vmem:[#allocation2 + $0x138] sm:$0xff]  ;;  %v573_v56 = vpop.xlane.xlu0 %572 }
  0xf8   : > { %v845_v13 = vadd.f32 %v1498_v53, %v779_v7  ;;  %716 = vst.msk [vmem:[#allocation2 + $0x158] sm:$0xff] %vm216_vm0, %v651_v61  ;;  %910 = vst.msk [vmem:[%s1505_s27 + $0x140] sm:$0xff] %vm216_vm0, %v846_v51  ;;  %v654_v58 = vadd.f32 %v573_v56, %v327_v46  ;;  %v342_v56 = vld [vmem:[#allocation2 + $0x1e8] sm:$0xff] }
  0xf9   : > { %v571_v18 = vpop.xlane.xlu1 %570  ;;  %v782_v1 = vld [vmem:[#allocation2 + $0x150] sm:$0xff] }
  0xfa   : > { %909 = vst.msk [vmem:[%s1505_s27 + $0x138] sm:$0xff] %vm216_vm0, %v845_v13  ;;  %v653_v20 = vadd.f32 %v571_v18, %v326_v6  ;;  %v848_v4 = vadd.f32 %v1498_v53, %v782_v1  ;;  %719 = vst.msk [vmem:[#allocation2 + $0x170] sm:$0xff] %vm216_vm0, %v654_v58  ;;  %v337_v6 = vld [vmem:[#allocation2 + $0x1c0] sm:$0xff] }
  0xfb   : > { %v781_v30 = vld [vmem:[#allocation2 + $0x148] sm:$0xff]  ;;  %v577_v9 = vpop.xlane.xlu0 %576 }
  0xfc   : > { %v847_v50 = vadd.f32 %v1498_v53, %v781_v30  ;;  %718 = vst.msk [vmem:[#allocation2 + $0x168] sm:$0xff] %vm216_vm0, %v653_v20  ;;  %912 = vst.msk [vmem:[%s1505_s27 + $0x150] sm:$0xff] %vm216_vm0, %v848_v4  ;;  %v656_v11 = vadd.f32 %v577_v9, %v329_v2  ;;  %v344_v9 = vld [vmem:[#allocation2 + $0x1f8] sm:$0xff] }
  0xfd   : > { %v575_v52 = vpop.xlane.xlu1 %574  ;;  %v784_v17 = vld [vmem:[#allocation2 + $0x160] sm:$0xff] }
  0xfe   : > { %911 = vst.msk [vmem:[%s1505_s27 + $0x148] sm:$0xff] %vm216_vm0, %v847_v50  ;;  %v655_v57 = vadd.f32 %v575_v52, %v328_v29  ;;  %v850_v24 = vadd.f32 %v1498_v53, %v784_v17  ;;  %721 = vst.msk [vmem:[#allocation2 + $0x180] sm:$0xff] %vm216_vm0, %v656_v11  ;;  %v339_v29 = vld [vmem:[#allocation2 + $0x1d0] sm:$0xff] }
  0xff   : > { %v783_v63 = vld [vmem:[#allocation2 + $0x158] sm:$0xff]  ;;  %v581_v33 = vpop.xlane.xlu0 %580 }
 0x100   : > { %v849_v3 = vadd.f32 %v1498_v53, %v783_v63  ;;  %720 = vst.msk [vmem:[#allocation2 + $0x178] sm:$0xff] %vm216_vm0, %v655_v57  ;;  %914 = vst.msk [vmem:[%s1505_s27 + $0x160] sm:$0xff] %vm216_vm0, %v850_v24  ;;  %v658_v38 = vadd.f32 %v581_v33, %v331_v22 }
 0x101   : > { %v579_v5 = vpop.xlane.xlu1 %578  ;;  %v786_v44 = vld [vmem:[#allocation2 + $0x170] sm:$0xff] }
 0x102   : > { %913 = vst.msk [vmem:[%s1505_s27 + $0x158] sm:$0xff] %vm216_vm0, %v849_v3  ;;  %v657_v10 = vadd.f32 %v579_v5, %v330_v59  ;;  %v852_v21 = vadd.f32 %v1498_v53, %v786_v44  ;;  %723 = vst.msk [vmem:[#allocation2 + $0x190] sm:$0xff] %vm216_vm0, %v658_v38  ;;  %v341_v59 = vld [vmem:[#allocation2 + $0x1e0] sm:$0xff] }
 0x103   : > { %v785_v16 = vld [vmem:[#allocation2 + $0x168] sm:$0xff]  ;;  %v585_v27 = vpop.xlane.xlu0 %584 }
 0x104   : > { %v851_v23 = vadd.f32 %v1498_v53, %v785_v16  ;;  %722 = vst.msk [vmem:[#allocation2 + $0x188] sm:$0xff] %vm216_vm0, %v657_v10  ;;  %916 = vst.msk [vmem:[%s1505_s27 + $0x170] sm:$0xff] %vm216_vm0, %v852_v21  ;;  %v660_v34 = vadd.f32 %v585_v27, %v333_v45 }
 0x105   : > { %v583_v31 = vpop.xlane.xlu1 %582  ;;  %v788_v41 = vld [vmem:[#allocation2 + $0x180] sm:$0xff] }
 0x106   : > { %915 = vst.msk [vmem:[%s1505_s27 + $0x168] sm:$0xff] %vm216_vm0, %v851_v23  ;;  %v659_v37 = vadd.f32 %v583_v31, %v332_v15  ;;  %v854_v47 = vadd.f32 %v1498_v53, %v788_v41  ;;  %725 = vst.msk [vmem:[#allocation2 + $0x1a0] sm:$0xff] %vm216_vm0, %v660_v34  ;;  %v343_v15 = vld [vmem:[#allocation2 + $0x1f0] sm:$0xff] }
 0x107   : > { %v787_v40 = vld [vmem:[#allocation2 + $0x178] sm:$0xff]  ;;  %v589_v49 = vpop.xlane.xlu0 %588 }
 0x108   : > { %v853_v0 = vadd.f32 %v1498_v53, %v787_v40  ;;  %724 = vst.msk [vmem:[#allocation2 + $0x198] sm:$0xff] %vm216_vm0, %v659_v37  ;;  %918 = vst.msk [vmem:[%s1505_s27 + $0x180] sm:$0xff] %vm216_vm0, %v854_v47  ;;  %v662_v55 = vadd.f32 %v589_v49, %v335_v42 }
 0x109   : > { %v587_v26 = vpop.xlane.xlu1 %586  ;;  %v790_v62 = vld [vmem:[#allocation2 + $0x190] sm:$0xff] }
 0x10a   : > { %917 = vst.msk [vmem:[%s1505_s27 + $0x178] sm:$0xff] %vm216_vm0, %v853_v0  ;;  %v661_v28 = vadd.f32 %v587_v26, %v334_v39  ;;  %v856_v8 = vadd.f32 %v1498_v53, %v790_v62  ;;  %727 = vst.msk [vmem:[#allocation2 + $0x1b0] sm:$0xff] %vm216_vm0, %v662_v55 }
 0x10b   : > { %v789_v36 = vld [vmem:[#allocation2 + $0x188] sm:$0xff]  ;;  %v593_v13 = vpop.xlane.xlu0 %592 }
 0x10c   : > { %v855_v43 = vadd.f32 %v1498_v53, %v789_v36  ;;  %726 = vst.msk [vmem:[#allocation2 + $0x1a8] sm:$0xff] %vm216_vm0, %v661_v28  ;;  %920 = vst.msk [vmem:[%s1505_s27 + $0x190] sm:$0xff] %vm216_vm0, %v856_v8  ;;  %v664_v18 = vadd.f32 %v593_v13, %v337_v6 }
 0x10d   : > { %v591_v48 = vpop.xlane.xlu1 %590  ;;  %v792_v25 = vld [vmem:[#allocation2 + $0x1a0] sm:$0xff] }
 0x10e   : > { %919 = vst.msk [vmem:[%s1505_s27 + $0x188] sm:$0xff] %vm216_vm0, %v855_v43  ;;  %v663_v54 = vadd.f32 %v591_v48, %v336_v35  ;;  %v858_v32 = vadd.f32 %v1498_v53, %v792_v25  ;;  %729 = vst.msk [vmem:[#allocation2 + $0x1c0] sm:$0xff] %vm216_vm0, %v664_v18 }
 0x10f   : > { %v791_v61 = vld [vmem:[#allocation2 + $0x198] sm:$0xff]  ;;  %v597_v50 = vpop.xlane.xlu0 %596 }
 0x110   : > { %v857_v7 = vadd.f32 %v1498_v53, %v791_v61  ;;  %728 = vst.msk [vmem:[#allocation2 + $0x1b8] sm:$0xff] %vm216_vm0, %v663_v54  ;;  %922 = vst.msk [vmem:[%s1505_s27 + $0x1a0] sm:$0xff] %vm216_vm0, %v858_v32  ;;  %v666_v52 = vadd.f32 %v597_v50, %v339_v29 }
 0x111   : > { %v595_v12 = vpop.xlane.xlu1 %594  ;;  %v794_v58 = vld [vmem:[#allocation2 + $0x1b0] sm:$0xff] }
 0x112   : > { %921 = vst.msk [vmem:[%s1505_s27 + $0x198] sm:$0xff] %vm216_vm0, %v857_v7  ;;  %v665_v14 = vadd.f32 %v595_v12, %v338_v60  ;;  %v860_v1 = vadd.f32 %v1498_v53, %v794_v58  ;;  %731 = vst.msk [vmem:[#allocation2 + $0x1d0] sm:$0xff] %vm216_vm0, %v666_v52 }
 0x113   : > { %v793_v20 = vld [vmem:[#allocation2 + $0x1a8] sm:$0xff]  ;;  %v601_v3 = vpop.xlane.xlu0 %600 }
 0x114   : > { %v859_v30 = vadd.f32 %v1498_v53, %v793_v20  ;;  %730 = vst.msk [vmem:[#allocation2 + $0x1c8] sm:$0xff] %vm216_vm0, %v665_v14  ;;  %924 = vst.msk [vmem:[%s1505_s27 + $0x1b0] sm:$0xff] %vm216_vm0, %v860_v1  ;;  %v668_v5 = vadd.f32 %v601_v3, %v341_v59 }
 0x115   : > { %v599_v46 = vpop.xlane.xlu1 %598  ;;  %v796_v11 = vld [vmem:[#allocation2 + $0x1c0] sm:$0xff] }
 0x116   : > { %923 = vst.msk [vmem:[%s1505_s27 + $0x1a8] sm:$0xff] %vm216_vm0, %v859_v30  ;;  %v667_v51 = vadd.f32 %v599_v46, %v340_v19  ;;  %v862_v17 = vadd.f32 %v1498_v53, %v796_v11  ;;  %733 = vst.msk [vmem:[#allocation2 + $0x1e0] sm:$0xff] %vm216_vm0, %v668_v5 }
 0x117   : > { %v795_v57 = vld [vmem:[#allocation2 + $0x1b8] sm:$0xff]  ;;  %v605_v23 = vpop.xlane.xlu0 %604 }
 0x118   : > { %v861_v63 = vadd.f32 %v1498_v53, %v795_v57  ;;  %732 = vst.msk [vmem:[#allocation2 + $0x1d8] sm:$0xff] %vm216_vm0, %v667_v51  ;;  %926 = vst.msk [vmem:[%s1505_s27 + $0x1c0] sm:$0xff] %vm216_vm0, %v862_v17  ;;  %v670_v31 = vadd.f32 %v605_v23, %v343_v15 }
 0x119   : > { %v603_v2 = vpop.xlane.xlu1 %602  ;;  %v798_v37 = vld [vmem:[#allocation2 + $0x1d0] sm:$0xff] }
 0x11a   : > { %925 = vst.msk [vmem:[%s1505_s27 + $0x1b8] sm:$0xff] %vm216_vm0, %v861_v63  ;;  %v669_v4 = vadd.f32 %v603_v2, %v342_v56  ;;  %v864_v39 = vadd.f32 %v1498_v53, %v798_v37  ;;  %735 = vst.msk [vmem:[#allocation2 + $0x1f0] sm:$0xff] %vm216_vm0, %v670_v31 }
 0x11b   : > { %v797_v10 = vld [vmem:[#allocation2 + $0x1c8] sm:$0xff] }
 0x11c   : > { %v863_v16 = vadd.f32 %v1498_v53, %v797_v10  ;;  %734 = vst.msk [vmem:[#allocation2 + $0x1e8] sm:$0xff] %vm216_vm0, %v669_v4  ;;  %928 = vst.msk [vmem:[%s1505_s27 + $0x1d0] sm:$0xff] %vm216_vm0, %v864_v39 }
 0x11d   : > { %v607_v22 = vpop.xlane.xlu1 %606  ;;  %v800_v44 = vld [vmem:[#allocation2 + $0x1e0] sm:$0xff] }
 0x11e   : > { %927 = vst.msk [vmem:[%s1505_s27 + $0x1c8] sm:$0xff] %vm216_vm0, %v863_v16  ;;  %v671_v24 = vadd.f32 %v607_v22, %v344_v9  ;;  %v866_v0 = vadd.f32 %v1498_v53, %v800_v44 }
 0x11f   : > { %v799_v33 = vld [vmem:[#allocation2 + $0x1d8] sm:$0xff] }
 0x120   : > { %v865_v38 = vadd.f32 %v1498_v53, %v799_v33  ;;  %736 = vst.msk [vmem:[#allocation2 + $0x1f8] sm:$0xff] %vm216_vm0, %v671_v24  ;;  %930 = vst.msk [vmem:[%s1505_s27 + $0x1e0] sm:$0xff] %vm216_vm0, %v866_v0 }
 0x121   : > { %v802_v26 = vld [vmem:[#allocation2 + $0x1f0] sm:$0xff] }
 0x122   : > { %929 = vst.msk [vmem:[%s1505_s27 + $0x1d8] sm:$0xff] %vm216_vm0, %v865_v38  ;;  %v868_v28 = vadd.f32 %v1498_v53, %v802_v26 }
 0x123   : > { %v801_v40 = vld [vmem:[#allocation2 + $0x1e8] sm:$0xff] }
 0x124   : > { %v867_v45 = vadd.f32 %v1498_v53, %v801_v40  ;;  %932 = vst.msk [vmem:[%s1505_s27 + $0x1f0] sm:$0xff] %vm216_vm0, %v868_v28 }
 0x126   : > { %931 = vst.msk [vmem:[%s1505_s27 + $0x1e8] sm:$0xff] %vm216_vm0, %v867_v45 }
 0x127   : > { %v803_v21 = vld [vmem:[#allocation2 + $0x1f8] sm:$0xff] }
 0x128   : > { %v869_v27 = vadd.f32 %v1498_v53, %v803_v21 }
 0x12a   : > { %933 = vst.msk [vmem:[%s1505_s27 + $0x1f8] sm:$0xff] %vm216_vm0, %v869_v27 }
 0x12b PF: > { %s14_s16 = sadd.s32 1, %s1074_s16   ;;  %s1772_s14 = smov %s1070_s15 }
 0x12c   : > { %p11_p5 = scmp.ge.s32.totalorder %s14_s16, 6   ;;  %s1773_s15 = smov %s1775_s2 }
 0x12e   :  { %13 = sbr.rel (!%p11_p5) target bundleno = 2 (0x2), region = 73 }

// kernel: discriminator_forward.7
= control target key start
LH: loop header
LB: loop body
LE: loop exit
PB: predicated region body
PF: predicated region fallthrough
CT: control target
= control target key end

     0   :  { %s1091_s12 = smov 0   ;;  %s1093_s13 = smov 0   ;;  %s1202_s0 = inlined_call_operand.vmem [shape: bf16[512,128], index: 0, kind: input, shape index: {}]   ;;  %s1203_s1 = inlined_call_operand.vmem [shape: bf16[128,128], index: 1, kind: input, shape index: {}]   ;;  %s1204_s2 = inlined_call_operand.vmem [shape: f32[1,128], index: 2, kind: input, shape index: {}]   ;;  %s1205_s3 = inlined_call_operand.vmem [shape: bf16[512,128], index: 3, kind: output, shape index: {}]  }
   0x1   :  { %s1095_s14 = smov 0  }
   0x2 LB: > { %s32_s15 = sadd.s32 1, %s1065_s13  ;;  %p840_p0 = scmp.ge.s32.totalorder %s1069_s14, 1  ;;  %s1069_s14 = sphi %s1095_s14, %s13_s14   ;;  %s1065_s13 = sphi %s1093_s13, %s1207_s13   ;;  %s1061_s12 = sphi %s1091_s12, %s1206_s12  }
   0x3   : > { %p34_p1 = scmp.ge.s32.totalorder %s32_s15, 4  ;;  %p188_p2 = scmp.lt.s32.totalorder %s1069_s14, 5 }
   0x5   : > { %s1209_s15 = smov (%p34_p1, %s32_s15), 0  ;;  %p189_p3 = pnand %p840_p0, %p188_p2 }
   0x6   : > { %s841_s18 = sshll.u32 (!%p189_p3), %s1061_s12, 4 }
   0x7   : > { %192 = sbr.rel (%p189_p3) target bundleno = 261 (0x105), region = 32  ;;  %p230_p4 = scmp.lt.s32.totalorder (!%p189_p3), %s841_s18, 63 }
   0xc   : > { %v1031_v0 = vld [vmem:[%s1203_s1 + $0x38] sm:$0xff]   ;;  %v1032_v1 = vld [vmem:[%s1203_s1 + $0x30] sm:$0xff]   ;;  %s1211_s18 = smov (!%p230_p4, %s841_s18), 63  ;;  %v1033_v2 = vld [vmem:[%s1203_s1 + $0x28] sm:$0xff]  }
   0xd   : > { %959 = vmatprep.subr.bf16.mxu0 %v1031_v0  ;;  %991 = vmatprep.subr.bf16.mxu1 %v1031_v0  ;;  %s842_s23 = sshll.u32 %s1211_s18, 2  ;;  %v1034_v3 = vld [vmem:[%s1203_s1 + $0x20] sm:$0xff]   ;;  %v1035_v6 = vld [vmem:[%s1203_s1 + $0x18] sm:$0xff]   ;;  %v1036_v7 = vld [vmem:[%s1203_s1 + $0x10] sm:$0xff]  }
   0xe   : > { %960 = vmatpush3.bf16.msra.mxu0 %v1031_v0  ;;  %999 = vmatpush3.bf16.msra.mxu1 %v1031_v0  ;;  %s1126_s26 = scalar_lea.vmem %s1202_s0, %s842_s23  ;;  %v1037_v8 = vld [vmem:[%s1203_s1 + $0x8] sm:$0xff]   ;;  %v1038_v9 = vld [vmem:[%s1203_s1] sm:$0xff]   ;;  %s1169_s17 = scalar_lea.vmem %s1205_s3, %s842_s23 }
   0xf   : > { %961 = vmatprep.subr.bf16.mxu0 %v1032_v1  ;;  %992 = vmatprep.subr.bf16.mxu1 %v1032_v1  ;;  %v1039_v4 = vld [vmem:[%s1126_s26] sm:$0xff]   ;;  %v1041_v10 = vld [vmem:[%s1126_s26 + $0x8] sm:$0xff]   ;;  %v1043_v12 = vld [vmem:[%s1126_s26 + $0x10] sm:$0xff]  }
  0x10   : > { %v1040_v5 = vld [vmem:[%s1126_s26 + $0x20] sm:$0xff]   ;;  %975 = vmatprep.mubr.bf16.mxu0 %v1039_v4  ;;  %v1042_v11 = vld [vmem:[%s1126_s26 + $0x28] sm:$0xff]   ;;  %v1044_v13 = vld [vmem:[%s1126_s26 + $0x30] sm:$0xff]  }
  0x11   : > { %983 = vmatprep.mubr.bf16.mxu1 %v1040_v5  ;;  %v1045_v14 = vld [vmem:[%s1126_s26 + $0x18] sm:$0xff]   ;;  %v1154_v16 = vld [vmem:[%s1204_s2] ss:$0 sm:$0xff] }
  0x12   : > { %962 = vmatpush3.bf16.msra.mxu0 %v1032_v1  ;;  %1000 = vmatpush3.bf16.msra.mxu1 %v1032_v1  ;;  %v1046_v15 = vld [vmem:[%s1126_s26 + $0x38] sm:$0xff]  }
  0x13   : > { %963 = vmatprep.subr.bf16.mxu0 %v1033_v2  ;;  %993 = vmatprep.subr.bf16.mxu1 %v1033_v2 }
  0x16   : > { %964 = vmatpush3.bf16.msra.mxu0 %v1033_v2  ;;  %1001 = vmatpush3.bf16.msra.mxu1 %v1033_v2 }
  0x17   : > { %965 = vmatprep.subr.bf16.mxu0 %v1034_v3  ;;  %994 = vmatprep.subr.bf16.mxu1 %v1034_v3 }
  0x1a   : > { %966 = vmatpush3.bf16.msra.mxu0 %v1034_v3  ;;  %1002 = vmatpush3.bf16.msra.mxu1 %v1034_v3 }
  0x1b   : > { %967 = vmatprep.subr.bf16.mxu0 %v1035_v6  ;;  %995 = vmatprep.subr.bf16.mxu1 %v1035_v6 }
  0x1e   : > { %968 = vmatpush3.bf16.msra.mxu0 %v1035_v6  ;;  %1003 = vmatpush3.bf16.msra.mxu1 %v1035_v6 }
  0x1f   : > { %969 = vmatprep.subr.bf16.mxu0 %v1036_v7  ;;  %996 = vmatprep.subr.bf16.mxu1 %v1036_v7 }
  0x22   : > { %970 = vmatpush3.bf16.msra.mxu0 %v1036_v7  ;;  %1004 = vmatpush3.bf16.msra.mxu1 %v1036_v7 }
  0x23   : > { %971 = vmatprep.subr.bf16.mxu0 %v1037_v8  ;;  %997 = vmatprep.subr.bf16.mxu1 %v1037_v8 }
  0x26   : > { %972 = vmatpush3.bf16.msra.mxu0 %v1037_v8  ;;  %1005 = vmatpush3.bf16.msra.mxu1 %v1037_v8 }
  0x27   : > { %973 = vmatprep.subr.bf16.mxu0 %v1038_v9  ;;  %998 = vmatprep.subr.bf16.mxu1 %v1038_v9 }
  0x2a   : > { %974 = vmatpush3.bf16.msra.mxu0 %v1038_v9  ;;  %1006 = vmatpush3.bf16.msra.mxu1 %v1038_v9 }
  0x2d   : > { %976 = vmatmul.mubr.bf16.vlgmr.msra.gmra.mxu0 %v1041_v10  ;;  %984 = vmatmul.mubr.bf16.vlgmr.msra.gmra.mxu1 %v1042_v11 }
  0x2e   : > { %979 = vmatprep.mubr.bf16.mxu0 %v1043_v12  ;;  %987 = vmatprep.mubr.bf16.mxu1 %v1044_v13 }
  0x35   : > { %980 = vmatmul.mubr.bf16.gmra.mxu0 %v1045_v14  ;;  %988 = vmatmul.mubr.bf16.gmra.mxu1 %v1046_v15 }
  0xed   : > { %v977_v17 = vpop.f32.mrf.mxu0  ;;  %v985_v18 = vpop.f32.mrf.mxu1 }
  0xee   : > { %v581_v19 = vadd.f32 %v977_v17, %v1154_v16  ;;  %v589_v20 = vadd.f32 %v985_v18, %v1154_v16 }
  0xef   : > { %v458_v21 = vpop.f32.mrf.mxu0  ;;  %v490_v22 = vpop.f32.mrf.mxu1 }
  0xf0   : > { %vm597_vm0 = vcmp.ge.f32.partialorder %v581_v19, 0.0  ;;  %v613_v23 = vmul.f32 0.2, %v581_v19  ;;  %vm605_vm1 = vcmp.ge.f32.partialorder %v589_v20, 0.0  ;;  %v621_v24 = vmul.f32 0.2, %v589_v20 }
  0xf1   : > { %v579_v25 = vadd.f32 %v1154_v16, %v458_v21  ;;  %v587_v26 = vadd.f32 %v1154_v16, %v490_v22  ;;  %v978_v27 = vpop.f32.mrf.mxu0  ;;  %v986_v28 = vpop.f32.mrf.mxu1 }
  0xf2   : > { %v582_v29 = vadd.f32 %v978_v27, %v1154_v16  ;;  %v590_v30 = vadd.f32 %v986_v28, %v1154_v16  ;;  %v629_v31 = vsel %vm597_vm0, %v581_v19, %v613_v23  ;;  %v637_v32 = vsel %vm605_vm1, %v589_v20, %v621_v24 }
  0xf3   : > { %vm595_vm2 = vcmp.ge.f32.partialorder %v579_v25, 0.0  ;;  %v611_v33 = vmul.f32 0.2, %v579_v25  ;;  %v461_v34 = vpop.f32.mrf.mxu0  ;;  %v493_v35 = vpop.f32.mrf.mxu1  ;;  %vm603_vm5 = vcmp.ge.f32.partialorder %v587_v26, 0.0  ;;  %v619_v38 = vmul.f32 0.2, %v587_v26 }
  0xf4   : > { %vm598_vm3 = vcmp.ge.f32.partialorder %v582_v29, 0.0  ;;  %v614_v36 = vmul.f32 0.2, %v582_v29  ;;  %vm606_vm4 = vcmp.ge.f32.partialorder %v590_v30, 0.0  ;;  %v622_v37 = vmul.f32 0.2, %v590_v30 }
  0xf5   : > { %v580_v39 = vadd.f32 %v1154_v16, %v461_v34  ;;  %v588_v40 = vadd.f32 %v1154_v16, %v493_v35  ;;  %v981_v41 = vpop.f32.mrf.mxu0  ;;  %v989_v42 = vpop.f32.mrf.mxu1  ;;  %v627_v53 = vsel %vm595_vm2, %v579_v25, %v611_v33  ;;  %v635_v58 = vsel %vm603_vm5, %v587_v26, %v619_v38 }
  0xf6   : > { %v630_v43 = vsel %vm598_vm3, %v582_v29, %v614_v36  ;;  %v638_v44 = vsel %vm606_vm4, %v590_v30, %v622_v37  ;;  %v585_v45 = vadd.f32 %v981_v41, %v1154_v16  ;;  %v593_v46 = vadd.f32 %v989_v42, %v1154_v16 }
  0xf7   : > { %v904_v47 = vpack.c.bf16 %v630_v43, %v629_v31  ;;  %v924_v48 = vpack.c.bf16 %v638_v44, %v637_v32  ;;  %vm596_vm6 = vcmp.ge.f32.partialorder %v580_v39, 0.0  ;;  %v612_v49 = vmul.f32 0.2, %v580_v39  ;;  %v474_v50 = vpop.f32.mrf.mxu0  ;;  %v506_v51 = vpop.f32.mrf.mxu1 }
  0xf8   : > { %vm604_vm7 = vcmp.ge.f32.partialorder %v588_v40, 0.0  ;;  %v620_v52 = vmul.f32 0.2, %v588_v40  ;;  %v583_v55 = vadd.f32 %v1154_v16, %v474_v50  ;;  %v591_v61 = vadd.f32 %v1154_v16, %v506_v51 }
  0xf9   : > { %936 = vst [vmem:[%s1169_s17 + $0x8] sm:$0xff] %v904_v47   ;;  %940 = vst [vmem:[%s1169_s17 + $0x28] sm:$0xff] %v924_v48   ;;  %v628_v54 = vsel %vm596_vm6, %v580_v39, %v612_v49  ;;  %v982_v56 = vpop.f32.mrf.mxu0  ;;  %v990_v57 = vpop.f32.mrf.mxu1  ;;  %vm601_vm8 = vcmp.ge.f32.partialorder %v585_v45, 0.0  ;;  %v617_v63 = vmul.f32 0.2, %v585_v45  ;;  %vm609_vm9 = vcmp.ge.f32.partialorder %v593_v46, 0.0 }
  0xfa   : > { %v899_v59 = vpack.c.bf16 %v628_v54, %v627_v53  ;;  %v636_v60 = vsel %vm604_vm7, %v588_v40, %v620_v52  ;;  %v625_v2 = vmul.f32 0.2, %v593_v46  ;;  %vm599_vm10 = vcmp.ge.f32.partialorder %v583_v55, 0.0 }
  0xfb   : > { %v919_v62 = vpack.c.bf16 %v636_v60, %v635_v58  ;;  %v477_v0 = vpop.f32.mrf.mxu0  ;;  %v509_v1 = vpop.f32.mrf.mxu1  ;;  %v586_v3 = vadd.f32 %v982_v56, %v1154_v16  ;;  %v594_v4 = vadd.f32 %v990_v57, %v1154_v16  ;;  %v615_v5 = vmul.f32 0.2, %v583_v55 }
  0xfc   : > { %900 = vst [vmem:[%s1169_s17] sm:$0xff] %v899_v59   ;;  %vm607_vm11 = vcmp.ge.f32.partialorder %v591_v61, 0.0  ;;  %v584_v6 = vadd.f32 %v1154_v16, %v477_v0  ;;  %v592_v7 = vadd.f32 %v1154_v16, %v509_v1  ;;  %v623_v8 = vmul.f32 0.2, %v591_v61 }
  0xfd   : > { %939 = vst [vmem:[%s1169_s17 + $0x20] sm:$0xff] %v919_v62   ;;  %vm602_vm12 = vcmp.ge.f32.partialorder %v586_v3, 0.0  ;;  %v618_v9 = vmul.f32 0.2, %v586_v3  ;;  %vm610_vm13 = vcmp.ge.f32.partialorder %v594_v4, 0.0  ;;  %v633_v12 = vsel %vm601_vm8, %v585_v45, %v617_v63 }
  0xfe   : > { %v626_v10 = vmul.f32 0.2, %v594_v4  ;;  %vm600_vm14 = vcmp.ge.f32.partialorder %v584_v6, 0.0  ;;  %v616_v11 = vmul.f32 0.2, %v584_v6  ;;  %vm608_vm15 = vcmp.ge.f32.partialorder %v592_v7, 0.0 }
  0xff   : > { %v641_v13 = vsel %vm609_vm9, %v593_v46, %v625_v2  ;;  %v634_v14 = vsel %vm602_vm12, %v586_v3, %v618_v9  ;;  %v624_v15 = vmul.f32 0.2, %v592_v7  ;;  %v631_v16 = vsel %vm599_vm10, %v583_v55, %v615_v5 }
 0x100   : > { %v914_v17 = vpack.c.bf16 %v634_v14, %v633_v12  ;;  %v642_v18 = vsel %vm610_vm13, %v594_v4, %v626_v10  ;;  %v632_v19 = vsel %vm600_vm14, %v584_v6, %v616_v11  ;;  %v639_v20 = vsel %vm607_vm11, %v591_v61, %v623_v8 }
 0x101   : > { %v934_v21 = vpack.c.bf16 %v642_v18, %v641_v13  ;;  %v909_v22 = vpack.c.bf16 %v632_v19, %v631_v16  ;;  %v640_v23 = vsel %vm608_vm15, %v592_v7, %v624_v15 }
 0x102   : > { %938 = vst [vmem:[%s1169_s17 + $0x18] sm:$0xff] %v914_v17   ;;  %v929_v24 = vpack.c.bf16 %v640_v23, %v639_v20 }
 0x103   : > { %942 = vst [vmem:[%s1169_s17 + $0x38] sm:$0xff] %v934_v21   ;;  %937 = vst [vmem:[%s1169_s17 + $0x10] sm:$0xff] %v909_v22  }
 0x104   : > { %941 = vst [vmem:[%s1169_s17 + $0x30] sm:$0xff] %v929_v24  }
 0x105 PF: > { %s13_s14 = sadd.s32 1, %s1069_s14   ;;  %s1206_s12 = smov %s1065_s13 }
 0x106   : > { %p10_p5 = scmp.ge.s32.totalorder %s13_s14, 6   ;;  %s1207_s13 = smov %s1209_s15 }
 0x108   :  { %12 = sbr.rel (!%p10_p5) target bundleno = 2 (0x2), region = 76 }

// kernel: discriminator_forward.8
= control target key start
LH: loop header
LB: loop body
LE: loop exit
PB: predicated region body
PF: predicated region fallthrough
CT: control target
= control target key end

     0   :  { %s2638_s1 = inlined_call_operand.vmem [shape: bf16[1024,128], index: 1, kind: input, shape index: {}]   ;;  %s2639_s0 = inlined_call_operand.vmem [shape: bf16[128,1024], index: 0, kind: input, shape index: {}]   ;;  %s2640_s2 = inlined_call_operand.vmem [shape: f32[1,128], index: 2, kind: input, shape index: {}]   ;;  %s2641_s3 = inlined_call_operand.vmem [shape: bf16[128,128], index: 3, kind: output, shape index: {}]  }
   0x1   :  { %v2005_v0 = vld [vmem:[%s2638_s1 + $0x78] sm:$0xff]   ;;  %v2009_v4 = vld [vmem:[%s2638_s1 + $0x70] sm:$0xff]   ;;  %v2013_v8 = vld [vmem:[%s2638_s1 + $0x68] sm:$0xff]  }
   0x2   :  { %v2006_v1 = vld [vmem:[%s2638_s1 + $0xf8] sm:$0xff]   ;;  %1749 = vmatprep.subr.bf16.mxu0 %v2005_v0  ;;  %v2010_v5 = vld [vmem:[%s2638_s1 + $0xf0] sm:$0xff]   ;;  %v2014_v9 = vld [vmem:[%s2638_s1 + $0xe8] sm:$0xff]  }
   0x3   :  { %v2007_v2 = vld [vmem:[%s2638_s1 + $0x38] sm:$0xff]   ;;  %1813 = vmatprep.subr.bf16.mxu1 %v2006_v1  ;;  %v2011_v6 = vld [vmem:[%s2638_s1 + $0x30] sm:$0xff]   ;;  %v2015_v10 = vld [vmem:[%s2638_s1 + $0x28] sm:$0xff]  }
   0x4   :  { %v2008_v3 = vld [vmem:[%s2638_s1 + $0xb8] sm:$0xff]   ;;  %1750 = vmatpush3.bf16.msra.mxu0 %v2007_v2  ;;  %v2012_v7 = vld [vmem:[%s2638_s1 + $0xb0] sm:$0xff]   ;;  %v2016_v11 = vld [vmem:[%s2638_s1 + $0xa8] sm:$0xff]  }
   0x5   :  { %1814 = vmatpush3.bf16.msra.mxu1 %v2008_v3  ;;  %1751 = vmatprep.subr.bf16.mxu0 %v2009_v4  ;;  %v2017_v12 = vld [vmem:[%s2638_s1 + $0x60] sm:$0xff]   ;;  %v2021_v16 = vld [vmem:[%s2638_s1 + $0x58] sm:$0xff]   ;;  %v2025_v20 = vld [vmem:[%s2638_s1 + $0x50] sm:$0xff]  }
   0x6   :  { %1815 = vmatprep.subr.bf16.mxu1 %v2010_v5  ;;  %v2018_v13 = vld [vmem:[%s2638_s1 + $0xe0] sm:$0xff]   ;;  %v2022_v17 = vld [vmem:[%s2638_s1 + $0xd8] sm:$0xff]   ;;  %v2026_v21 = vld [vmem:[%s2638_s1 + $0xd0] sm:$0xff]  }
   0x7   :  { %v2019_v14 = vld [vmem:[%s2638_s1 + $0x20] sm:$0xff]   ;;  %v2023_v18 = vld [vmem:[%s2638_s1 + $0x18] sm:$0xff]   ;;  %v2027_v22 = vld [vmem:[%s2638_s1 + $0x10] sm:$0xff]  }
   0x8   :  { %1752 = vmatpush3.bf16.msra.mxu0 %v2011_v6  ;;  %v2020_v15 = vld [vmem:[%s2638_s1 + $0xa0] sm:$0xff]   ;;  %v2024_v19 = vld [vmem:[%s2638_s1 + $0x98] sm:$0xff]   ;;  %v2028_v23 = vld [vmem:[%s2638_s1 + $0x90] sm:$0xff]  }
   0x9   :  { %1816 = vmatpush3.bf16.msra.mxu1 %v2012_v7  ;;  %1753 = vmatprep.subr.bf16.mxu0 %v2013_v8  ;;  %v2029_v24 = vld [vmem:[%s2638_s1 + $0x48] sm:$0xff]   ;;  %v2033_v28 = vld [vmem:[%s2638_s1 + $0x40] sm:$0xff]   ;;  %v2037_v40 = vld [vmem:[%s2638_s1 + $0x178] sm:$0xff]  }
   0xa   :  { %1817 = vmatprep.subr.bf16.mxu1 %v2014_v9  ;;  %v2030_v25 = vld [vmem:[%s2638_s1 + $0xc8] sm:$0xff]   ;;  %v2034_v29 = vld [vmem:[%s2638_s1 + $0xc0] sm:$0xff]   ;;  %v2038_v41 = vld [vmem:[%s2638_s1 + $0x138] sm:$0xff]  }
   0xb   :  { %v2031_v26 = vld [vmem:[%s2638_s1 + $0x8] sm:$0xff]   ;;  %v2035_v30 = vld [vmem:[%s2638_s1] sm:$0xff]   ;;  %v2039_v42 = vld [vmem:[%s2638_s1 + $0x1f8] sm:$0xff]  }
   0xc   :  { %1754 = vmatpush3.bf16.msra.mxu0 %v2015_v10  ;;  %v2032_v27 = vld [vmem:[%s2638_s1 + $0x88] sm:$0xff]   ;;  %v2036_v31 = vld [vmem:[%s2638_s1 + $0x80] sm:$0xff]   ;;  %v2040_v43 = vld [vmem:[%s2638_s1 + $0x1b8] sm:$0xff]  }
   0xd   :  { %1818 = vmatpush3.bf16.msra.mxu1 %v2016_v11  ;;  %1755 = vmatprep.subr.bf16.mxu0 %v2017_v12  ;;  %v51_v32 = vld [vmem:[%s2639_s0] sm:$0xff]  ;;  %v52_v34 = vld [vmem:[%s2639_s0 + $0x8] sm:$0xff]  ;;  %v2041_v50 = vld [vmem:[%s2638_s1 + $0x170] sm:$0xff]  }
   0xe   :  { %1819 = vmatprep.subr.bf16.mxu1 %v2018_v13  ;;  %v55_v33 = vld [vmem:[%s2639_s0 + $0x20] sm:$0xff]  ;;  %v56_v37 = vld [vmem:[%s2639_s0 + $0x28] sm:$0xff]  ;;  %v2042_v52 = vld [vmem:[%s2638_s1 + $0x130] sm:$0xff]  }
   0xf   :  { %v1541_v35 = vcombine.low %v51_v32, %v55_v33  ;;  %v1542_v36 = vcombine.high %v51_v32, %v55_v33  ;;  %v1543_v38 = vcombine.low %v52_v34, %v56_v37  ;;  %v1544_v39 = vcombine.high %v52_v34, %v56_v37  ;;  %v59_v44 = vld [vmem:[%s2639_s0 + $0x40] sm:$0xff]  ;;  %v60_v47 = vld [vmem:[%s2639_s0 + $0x48] sm:$0xff]  ;;  %v2043_v54 = vld [vmem:[%s2638_s1 + $0x1f0] sm:$0xff]  }
  0x10   :  { %1756 = vmatpush3.bf16.msra.mxu0 %v2019_v14  ;;  %v63_v45 = vld [vmem:[%s2639_s0 + $0x60] sm:$0xff]  ;;  %v64_v48 = vld [vmem:[%s2639_s0 + $0x68] sm:$0xff]  ;;  %v2044_v55 = vld [vmem:[%s2638_s1 + $0x1b0] sm:$0xff]  }
  0x11   :  { %1820 = vmatpush3.bf16.msra.mxu1 %v2020_v15  ;;  %1757 = vmatprep.subr.bf16.mxu0 %v2021_v16  ;;  %v1550_v46 = vcombine.high %v59_v44, %v63_v45  ;;  %v1552_v49 = vcombine.high %v60_v47, %v64_v48  ;;  %v1549_v51 = vcombine.low %v59_v44, %v63_v45  ;;  %v67_v56 = vld [vmem:[%s2639_s0 + $0x80] sm:$0xff]  ;;  %v68_v58 = vld [vmem:[%s2639_s0 + $0x88] sm:$0xff]  ;;  %v2059_v32 = vld [vmem:[%s2638_s1 + $0x1d0] sm:$0xff]  }
  0x12   :  { %1821 = vmatprep.subr.bf16.mxu1 %v2022_v17  ;;  %979 = vmatprep.mubr.bf16.mxu0 %v1542_v36  ;;  %v1551_v53 = vcombine.low %v60_v47, %v64_v48  ;;  %v71_v57 = vld [vmem:[%s2639_s0 + $0xa0] sm:$0xff]  ;;  %v72_v59 = vld [vmem:[%s2639_s0 + $0xa8] sm:$0xff]  ;;  %v2060_v33 = vld [vmem:[%s2638_s1 + $0x190] sm:$0xff]  }
  0x13   :  { %1076 = vmatprep.mubr.bf16.mxu1 %v1544_v39  ;;  %v1558_v60 = vcombine.high %v67_v56, %v71_v57  ;;  %v1560_v61 = vcombine.high %v68_v58, %v72_v59  ;;  %v2045_v62 = vld [vmem:[%s2638_s1 + $0x168] sm:$0xff]   ;;  %v1557_v2 = vcombine.low %v67_v56, %v71_v57  ;;  %v75_v3 = vld [vmem:[%s2639_s0 + $0xc0] sm:$0xff]  ;;  %v1559_v6 = vcombine.low %v68_v58, %v72_v59 }
  0x14   :  { %1758 = vmatpush3.bf16.msra.mxu0 %v2023_v18  ;;  %v2046_v63 = vld [vmem:[%s2638_s1 + $0x128] sm:$0xff]   ;;  %v79_v4 = vld [vmem:[%s2639_s0 + $0xe0] sm:$0xff]  ;;  %v2053_v18 = vld [vmem:[%s2638_s1 + $0x158] sm:$0xff]  }
  0x15   :  { %1822 = vmatpush3.bf16.msra.mxu1 %v2024_v19  ;;  %1759 = vmatprep.subr.bf16.mxu0 %v2025_v20  ;;  %v2047_v0 = vld [vmem:[%s2638_s1 + $0x1e8] sm:$0xff]   ;;  %v1566_v7 = vcombine.high %v75_v3, %v79_v4  ;;  %v2049_v10 = vld [vmem:[%s2638_s1 + $0x160] sm:$0xff]   ;;  %v1565_v19 = vcombine.low %v75_v3, %v79_v4  ;;  %v2054_v20 = vld [vmem:[%s2638_s1 + $0x118] sm:$0xff]  }
  0x16   :  { %1823 = vmatprep.subr.bf16.mxu1 %v2026_v21  ;;  %v2048_v1 = vld [vmem:[%s2638_s1 + $0x1a8] sm:$0xff]   ;;  %v2050_v11 = vld [vmem:[%s2638_s1 + $0x120] sm:$0xff]  }
  0x17   :  { %v76_v5 = vld [vmem:[%s2639_s0 + $0xc8] sm:$0xff]  ;;  %v2051_v12 = vld [vmem:[%s2638_s1 + $0x1e0] sm:$0xff]  }
  0x18   :  { %1760 = vmatpush3.bf16.msra.mxu0 %v2027_v22  ;;  %v80_v8 = vld [vmem:[%s2639_s0 + $0xe8] sm:$0xff]  ;;  %v2052_v13 = vld [vmem:[%s2638_s1 + $0x1a0] sm:$0xff]  }
  0x19   :  { %1824 = vmatpush3.bf16.msra.mxu1 %v2028_v23  ;;  %1761 = vmatprep.subr.bf16.mxu0 %v2029_v24  ;;  %v1568_v9 = vcombine.high %v76_v5, %v80_v8  ;;  %v83_v14 = vld [vmem:[%s2639_s0 + $0x100] sm:$0xff]  ;;  %v84_v16 = vld [vmem:[%s2639_s0 + $0x108] sm:$0xff]  ;;  %v1567_v21 = vcombine.low %v76_v5, %v80_v8  ;;  %v2055_v23 = vld [vmem:[%s2638_s1 + $0x1d8] sm:$0xff]  }
  0x1a   :  { %1825 = vmatprep.subr.bf16.mxu1 %v2030_v25  ;;  %v87_v15 = vld [vmem:[%s2639_s0 + $0x120] sm:$0xff]  ;;  %v88_v17 = vld [vmem:[%s2639_s0 + $0x128] sm:$0xff]  ;;  %v2056_v25 = vld [vmem:[%s2638_s1 + $0x198] sm:$0xff]  }
  0x1b   :  { %v1574_v22 = vcombine.high %v83_v14, %v87_v15  ;;  %v1576_v24 = vcombine.high %v84_v16, %v88_v17  ;;  %v1573_v34 = vcombine.low %v83_v14, %v87_v15  ;;  %v2062_v39 = vld [vmem:[%s2638_s1 + $0x108] sm:$0xff]   ;;  %v2066_v48 = vld [vmem:[%s2638_s1 + $0x100] sm:$0xff]   ;;  %v62_v8 = vld [vmem:[%s2639_s0 + $0x58] sm:$0xff] }
  0x1c   :  { %1762 = vmatpush3.bf16.msra.mxu0 %v2031_v26  ;;  %v91_v26 = vld [vmem:[%s2639_s0 + $0x140] sm:$0xff]  ;;  %v100_v44 = vld [vmem:[%s2639_s0 + $0x188] sm:$0xff]  ;;  %v69_v14 = vld [vmem:[%s2639_s0 + $0x90] sm:$0xff] }
  0x1d   :  { %1826 = vmatpush3.bf16.msra.mxu1 %v2032_v27  ;;  %1763 = vmatprep.subr.bf16.mxu0 %v2033_v28  ;;  %v95_v27 = vld [vmem:[%s2639_s0 + $0x160] sm:$0xff]  ;;  %v2057_v28 = vld [vmem:[%s2638_s1 + $0x150] sm:$0xff]   ;;  %v104_v45 = vld [vmem:[%s2639_s0 + $0x1a8] sm:$0xff] }
  0x1e   :  { %1827 = vmatprep.subr.bf16.mxu1 %v2034_v29  ;;  %v92_v29 = vld [vmem:[%s2639_s0 + $0x148] sm:$0xff]  ;;  %v1582_v36 = vcombine.high %v91_v26, %v95_v27  ;;  %v1581_v47 = vcombine.low %v91_v26, %v95_v27  ;;  %v1591_v59 = vcombine.low %v100_v44, %v104_v45  ;;  %v73_v15 = vld [vmem:[%s2639_s0 + $0xb0] sm:$0xff] }
  0x1f   :  { %v108_v56 = vld [vmem:[%s2639_s0 + $0x1c8] sm:$0xff]  ;;  %v1561_v26 = vcombine.low %v69_v14, %v73_v15 }
  0x20   :  { %1764 = vmatpush3.bf16.msra.mxu0 %v2035_v30  ;;  %v96_v30 = vld [vmem:[%s2639_s0 + $0x168] sm:$0xff] }
  0x21   :  { %1828 = vmatpush3.bf16.msra.mxu1 %v2036_v31  ;;  %1877 = vmatprep.subr.bf16.mxu0 %v2037_v40  ;;  %v2058_v31 = vld [vmem:[%s2638_s1 + $0x110] sm:$0xff]   ;;  %v1584_v37 = vcombine.high %v92_v29, %v96_v30  ;;  %v2063_v40 = vld [vmem:[%s2638_s1 + $0x1c8] sm:$0xff]  }
  0x22   :  { %1941 = vmatprep.subr.bf16.mxu1 %v2039_v42  ;;  %v103_v42 = vld [vmem:[%s2639_s0 + $0x1a0] sm:$0xff]  ;;  %v112_v57 = vld [vmem:[%s2639_s0 + $0x1e8] sm:$0xff] }
  0x23   :  { %980 = vmatmul.mubr.bf16.vlgmr.msra.gmra.mxu0 %v1541_v35  ;;  %v1575_v35 = vcombine.low %v84_v16, %v88_v17  ;;  %v1599_v3 = vcombine.low %v108_v56, %v112_v57  ;;  %v70_v16 = vld [vmem:[%s2639_s0 + $0x98] sm:$0xff] }
  0x24   :  { %1077 = vmatmul.mubr.bf16.vlgmr.msra.gmra.mxu1 %v1543_v38  ;;  %1878 = vmatpush3.bf16.msra.mxu0 %v2038_v41  ;;  %v2061_v38 = vld [vmem:[%s2638_s1 + $0x148] sm:$0xff]   ;;  %v99_v41 = vld [vmem:[%s2639_s0 + $0x180] sm:$0xff]  ;;  %v74_v17 = vld [vmem:[%s2639_s0 + $0xb8] sm:$0xff] }
  0x25   :  { %1942 = vmatpush3.bf16.msra.mxu1 %v2040_v43  ;;  %987 = vmatprep.mubr.bf16.mxu0 %v1550_v46  ;;  %v2064_v43 = vld [vmem:[%s2638_s1 + $0x188] sm:$0xff]   ;;  %v2065_v46 = vld [vmem:[%s2638_s1 + $0x140] sm:$0xff]   ;;  %v1589_v58 = vcombine.low %v99_v41, %v103_v42  ;;  %v1563_v27 = vcombine.low %v70_v16, %v74_v17 }
  0x26   :  { %1084 = vmatprep.mubr.bf16.mxu1 %v1552_v49  ;;  %1879 = vmatprep.subr.bf16.mxu0 %v2041_v50  ;;  %v1583_v49 = vcombine.low %v92_v29, %v96_v30  ;;  %v1590_v50 = vcombine.high %v99_v41, %v103_v42  ;;  %v85_v30 = vld [vmem:[%s2639_s0 + $0x110] sm:$0xff]  ;;  %v98_v41 = vld [vmem:[%s2639_s0 + $0x178] sm:$0xff] }
  0x27   :  { %1943 = vmatprep.subr.bf16.mxu1 %v2043_v54  ;;  %v107_v54 = vld [vmem:[%s2639_s0 + $0x1c0] sm:$0xff] }
  0x28   :  { %1880 = vmatpush3.bf16.msra.mxu0 %v2042_v52  ;;  %v1592_v52 = vcombine.high %v100_v44, %v104_v45 }
  0x29   :  { %1944 = vmatpush3.bf16.msra.mxu1 %v2044_v55  ;;  %1881 = vmatprep.subr.bf16.mxu0 %v2045_v62  ;;  %v111_v55 = vld [vmem:[%s2639_s0 + $0x1e0] sm:$0xff]  ;;  %v53_v62 = vld [vmem:[%s2639_s0 + $0x10] sm:$0xff] }
  0x2a   :  { %1945 = vmatprep.subr.bf16.mxu1 %v2047_v0  ;;  %v54_v0 = vld [vmem:[%s2639_s0 + $0x18] sm:$0xff] }
  0x2b   :  { %988 = vmatmul.mubr.bf16.gmra.mxu0 %v1549_v51  ;;  %v2067_v51 = vld [vmem:[%s2638_s1 + $0x1c0] sm:$0xff]  }
  0x2c   :  { %1085 = vmatmul.mubr.bf16.gmra.mxu1 %v1551_v53  ;;  %995 = vmatprep.mubr.bf16.mxu0 %v1558_v60  ;;  %v2068_v53 = vld [vmem:[%s2638_s1 + $0x180] sm:$0xff]   ;;  %v1598_v60 = vcombine.high %v107_v54, %v111_v55 }
  0x2d   :  { %1092 = vmatprep.mubr.bf16.mxu1 %v1560_v61  ;;  %1882 = vmatpush3.bf16.msra.mxu0 %v2046_v63  ;;  %v1600_v61 = vcombine.high %v108_v56, %v112_v57  ;;  %v57_v63 = vld [vmem:[%s2639_s0 + $0x30] sm:$0xff]  ;;  %v110_v56 = vld [vmem:[%s2639_s0 + $0x1d8] sm:$0xff] }
  0x2e   :  { %1946 = vmatpush3.bf16.msra.mxu1 %v2048_v1  ;;  %1883 = vmatprep.subr.bf16.mxu0 %v2049_v10  ;;  %v58_v1 = vld [vmem:[%s2639_s0 + $0x38] sm:$0xff]  ;;  %v1546_v4 = vcombine.high %v53_v62, %v57_v63  ;;  %v1545_v10 = vcombine.low %v53_v62, %v57_v63 }
  0x2f   :  { %1947 = vmatprep.subr.bf16.mxu1 %v2051_v12  ;;  %v1548_v5 = vcombine.high %v54_v0, %v58_v1  ;;  %v114_v57 = vld [vmem:[%s2639_s0 + $0x1f8] sm:$0xff] }
  0x30   :  { %v1603_v63 = vcombine.low %v110_v56, %v114_v57 }
  0x31   :  { %1884 = vmatpush3.bf16.msra.mxu0 %v2050_v11  ;;  %v1547_v11 = vcombine.low %v54_v0, %v58_v1 }
  0x32   :  { %1948 = vmatpush3.bf16.msra.mxu1 %v2052_v13  ;;  %1885 = vmatprep.subr.bf16.mxu0 %v2053_v18 }
  0x33   :  { %996 = vmatmul.mubr.bf16.gmra.mxu0 %v1557_v2  ;;  %1949 = vmatprep.subr.bf16.mxu1 %v2055_v23  ;;  %v1597_v2 = vcombine.low %v107_v54, %v111_v55  ;;  %v81_v23 = vld [vmem:[%s2639_s0 + $0xf0] sm:$0xff] }
  0x34   :  { %1093 = vmatmul.mubr.bf16.gmra.mxu1 %v1559_v6  ;;  %1003 = vmatprep.mubr.bf16.mxu0 %v1566_v7  ;;  %v61_v6 = vld [vmem:[%s2639_s0 + $0x50] sm:$0xff] }
  0x35   :  { %1100 = vmatprep.mubr.bf16.mxu1 %v1568_v9  ;;  %1886 = vmatpush3.bf16.msra.mxu0 %v2054_v20  ;;  %v65_v7 = vld [vmem:[%s2639_s0 + $0x70] sm:$0xff]  ;;  %v66_v9 = vld [vmem:[%s2639_s0 + $0x78] sm:$0xff]  ;;  %v1562_v20 = vcombine.high %v69_v14, %v73_v15 }
  0x36   :  { %1950 = vmatpush3.bf16.msra.mxu1 %v2056_v25  ;;  %1887 = vmatprep.subr.bf16.mxu0 %v2057_v28  ;;  %v1554_v12 = vcombine.high %v61_v6, %v65_v7  ;;  %v1556_v13 = vcombine.high %v62_v8, %v66_v9  ;;  %v1553_v18 = vcombine.low %v61_v6, %v65_v7  ;;  %v82_v25 = vld [vmem:[%s2639_s0 + $0xf8] sm:$0xff]  ;;  %v109_v54 = vld [vmem:[%s2639_s0 + $0x1d0] sm:$0xff] }
  0x37   :  { %1951 = vmatprep.subr.bf16.mxu1 %v2059_v32  ;;  %v86_v32 = vld [vmem:[%s2639_s0 + $0x118] sm:$0xff]  ;;  %v113_v55 = vld [vmem:[%s2639_s0 + $0x1f0] sm:$0xff] }
  0x38   :  { %v1601_v62 = vcombine.low %v109_v54, %v113_v55 }
  0x39   :  { %1888 = vmatpush3.bf16.msra.mxu0 %v2058_v31  ;;  %v89_v31 = vld [vmem:[%s2639_s0 + $0x130] sm:$0xff] }
  0x3a   :  { %1952 = vmatpush3.bf16.msra.mxu1 %v2060_v33  ;;  %1889 = vmatprep.subr.bf16.mxu0 %v2061_v38  ;;  %v90_v33 = vld [vmem:[%s2639_s0 + $0x138] sm:$0xff]  ;;  %v93_v38 = vld [vmem:[%s2639_s0 + $0x150] sm:$0xff]  ;;  %v1577_v42 = vcombine.low %v85_v30, %v89_v31 }
  0x3b   :  { %1004 = vmatmul.mubr.bf16.gmra.mxu0 %v1565_v19  ;;  %1953 = vmatprep.subr.bf16.mxu1 %v2063_v40  ;;  %v1555_v19 = vcombine.low %v62_v8, %v66_v9  ;;  %v94_v40 = vld [vmem:[%s2639_s0 + $0x158] sm:$0xff] }
  0x3c   :  { %1101 = vmatmul.mubr.bf16.gmra.mxu1 %v1567_v21  ;;  %1011 = vmatprep.mubr.bf16.mxu0 %v1574_v22  ;;  %v1564_v21 = vcombine.high %v70_v16, %v74_v17  ;;  %v77_v22 = vld [vmem:[%s2639_s0 + $0xd0] sm:$0xff]  ;;  %v1588_v45 = vcombine.high %v94_v40, %v98_v41 }
  0x3d   :  { %1108 = vmatprep.mubr.bf16.mxu1 %v1576_v24  ;;  %1890 = vmatpush3.bf16.msra.mxu0 %v2062_v39  ;;  %v78_v24 = vld [vmem:[%s2639_s0 + $0xd8] sm:$0xff]  ;;  %v1570_v28 = vcombine.high %v77_v22, %v81_v23  ;;  %v97_v39 = vld [vmem:[%s2639_s0 + $0x170] sm:$0xff] }
  0x3e   :  { %1954 = vmatpush3.bf16.msra.mxu1 %v2064_v43  ;;  %1891 = vmatprep.subr.bf16.mxu0 %v2065_v46  ;;  %v1572_v29 = vcombine.high %v78_v24, %v82_v25  ;;  %v1579_v43 = vcombine.low %v86_v32, %v90_v33  ;;  %v1586_v44 = vcombine.high %v93_v38, %v97_v39  ;;  %v101_v46 = vld [vmem:[%s2639_s0 + $0x190] sm:$0xff] }
  0x3f   :  { %1955 = vmatprep.subr.bf16.mxu1 %v2067_v51  ;;  %v1587_v51 = vcombine.low %v94_v40, %v98_v41 }
  0x41   :  { %1892 = vmatpush3.bf16.msra.mxu0 %v2066_v48  ;;  %v102_v48 = vld [vmem:[%s2639_s0 + $0x198] sm:$0xff] }
  0x42   :  { %1956 = vmatpush3.bf16.msra.mxu1 %v2068_v53 }
  0x43   :  { %1012 = vmatmul.mubr.bf16.gmra.mxu0 %v1573_v34  ;;  %v1569_v34 = vcombine.low %v77_v22, %v81_v23 }
  0x44   :  { %1109 = vmatmul.mubr.bf16.gmra.mxu1 %v1575_v35  ;;  %1019 = vmatprep.mubr.bf16.mxu0 %v1582_v36  ;;  %v1571_v35 = vcombine.low %v78_v24, %v82_v25  ;;  %v1578_v36 = vcombine.high %v85_v30, %v89_v31 }
  0x45   :  { %1116 = vmatprep.mubr.bf16.mxu1 %v1584_v37  ;;  %v1580_v37 = vcombine.high %v86_v32, %v90_v33 }
  0x4b   :  { %1020 = vmatmul.mubr.bf16.gmra.mxu0 %v1581_v47  ;;  %v105_v47 = vld [vmem:[%s2639_s0 + $0x1b0] sm:$0xff] }
  0x4c   :  { %1117 = vmatmul.mubr.bf16.gmra.mxu1 %v1583_v49  ;;  %1027 = vmatprep.mubr.bf16.mxu0 %v1590_v50  ;;  %v106_v49 = vld [vmem:[%s2639_s0 + $0x1b8] sm:$0xff]  ;;  %v1585_v50 = vcombine.low %v93_v38, %v97_v39 }
  0x4d   :  { %1124 = vmatprep.mubr.bf16.mxu1 %v1592_v52  ;;  %v1594_v52 = vcombine.high %v101_v46, %v105_v47  ;;  %v1596_v53 = vcombine.high %v102_v48, %v106_v49 }
  0x53   :  { %1028 = vmatmul.mubr.bf16.gmra.mxu0 %v1589_v58  ;;  %v1593_v58 = vcombine.low %v101_v46, %v105_v47 }
  0x54   :  { %1125 = vmatmul.mubr.bf16.gmra.mxu1 %v1591_v59  ;;  %1035 = vmatprep.mubr.bf16.mxu0 %v1598_v60  ;;  %v1595_v59 = vcombine.low %v102_v48, %v106_v49  ;;  %v1602_v60 = vcombine.high %v109_v54, %v113_v55 }
  0x55   :  { %1132 = vmatprep.mubr.bf16.mxu1 %v1600_v61  ;;  %v1604_v61 = vcombine.high %v110_v56, %v114_v57 }
  0x5b   :  { %1036 = vmatmul.mubr.bf16.gmra.mxu0 %v1597_v2 }
  0x5c   :  { %1133 = vmatmul.mubr.bf16.gmra.mxu1 %v1599_v3  ;;  %1173 = vmatprep.mubr.bf16.mxu0 %v1546_v4 }
  0x5d   :  { %1270 = vmatprep.mubr.bf16.mxu1 %v1548_v5 }
  0x63   :  { %1174 = vmatmul.mubr.bf16.vlgmr.msra.gmra.mxu0 %v1545_v10 }
  0x64   :  { %1271 = vmatmul.mubr.bf16.vlgmr.msra.gmra.mxu1 %v1547_v11  ;;  %1181 = vmatprep.mubr.bf16.mxu0 %v1554_v12 }
  0x65   :  { %1278 = vmatprep.mubr.bf16.mxu1 %v1556_v13 }
  0x6b   :  { %1182 = vmatmul.mubr.bf16.gmra.mxu0 %v1553_v18 }
  0x6c   :  { %1279 = vmatmul.mubr.bf16.gmra.mxu1 %v1555_v19  ;;  %1189 = vmatprep.mubr.bf16.mxu0 %v1562_v20 }
  0x6d   :  { %1286 = vmatprep.mubr.bf16.mxu1 %v1564_v21 }
  0x73   :  { %1190 = vmatmul.mubr.bf16.gmra.mxu0 %v1561_v26 }
  0x74   :  { %1287 = vmatmul.mubr.bf16.gmra.mxu1 %v1563_v27  ;;  %1197 = vmatprep.mubr.bf16.mxu0 %v1570_v28 }
  0x75   :  { %1294 = vmatprep.mubr.bf16.mxu1 %v1572_v29 }
  0x7b   :  { %1198 = vmatmul.mubr.bf16.gmra.mxu0 %v1569_v34 }
  0x7c   :  { %1295 = vmatmul.mubr.bf16.gmra.mxu1 %v1571_v35  ;;  %1205 = vmatprep.mubr.bf16.mxu0 %v1578_v36 }
  0x7d   :  { %1302 = vmatprep.mubr.bf16.mxu1 %v1580_v37 }
  0x83   :  { %1206 = vmatmul.mubr.bf16.gmra.mxu0 %v1577_v42 }
  0x84   :  { %1303 = vmatmul.mubr.bf16.gmra.mxu1 %v1579_v43  ;;  %1213 = vmatprep.mubr.bf16.mxu0 %v1586_v44 }
  0x85   :  { %1310 = vmatprep.mubr.bf16.mxu1 %v1588_v45 }
  0x8b   :  { %1214 = vmatmul.mubr.bf16.gmra.mxu0 %v1585_v50 }
  0x8c   :  { %1311 = vmatmul.mubr.bf16.gmra.mxu1 %v1587_v51  ;;  %1221 = vmatprep.mubr.bf16.mxu0 %v1594_v52 }
  0x8d   :  { %1318 = vmatprep.mubr.bf16.mxu1 %v1596_v53 }
  0x93   :  { %1222 = vmatmul.mubr.bf16.gmra.mxu0 %v1593_v58 }
  0x94   :  { %1319 = vmatmul.mubr.bf16.gmra.mxu1 %v1595_v59  ;;  %1229 = vmatprep.mubr.bf16.mxu0 %v1602_v60 }
  0x95   :  { %1326 = vmatprep.mubr.bf16.mxu1 %v1604_v61 }
  0x9b   :  { %1230 = vmatmul.mubr.bf16.gmra.mxu0 %v1601_v62 }
  0x9c   :  { %1327 = vmatmul.mubr.bf16.gmra.mxu1 %v1603_v63 }
  0xe3   :  { %v1765_v0 = vpop.f32.mrf.mxu0 }
  0xe4   :  { %v1829_v1 = vpop.f32.mrf.mxu1 }
  0xe5   :  { %v1766_v2 = vpop.f32.mrf.mxu0 }
  0xe6   :  { %v1767_v3 = vadd.f32 %v1766_v2, %v1765_v0  ;;  %v1830_v4 = vpop.f32.mrf.mxu1 }
  0xe7   :  { %v1831_v5 = vadd.f32 %v1830_v4, %v1829_v1  ;;  %v2473_v6 = vpop.f32.mrf.mxu0 }
  0xe8   :  { %v2475_v7 = vpop.f32.mrf.mxu1 }
  0xe9   :  { %v2477_v8 = vadd.f32 %v1831_v5, %v1767_v3  ;;  %v2479_v9 = vpop.f32.mrf.mxu0 }
  0xea   :  { %v2481_v10 = vpop.f32.mrf.mxu1 }
  0xeb   :  { %v1771_v11 = vpop.f32.mrf.mxu0 }
  0xec   :  { %v1835_v12 = vpop.f32.mrf.mxu1 }
  0xed   :  { %v1772_v13 = vpop.f32.mrf.mxu0 }
  0xee   :  { %v1773_v14 = vadd.f32 %v1772_v13, %v1771_v11  ;;  %v1836_v15 = vpop.f32.mrf.mxu1 }
  0xef   :  { %v1837_v16 = vadd.f32 %v1836_v15, %v1835_v12  ;;  %v2483_v17 = vpop.f32.mrf.mxu0 }
  0xf0   :  { %v2485_v18 = vpop.f32.mrf.mxu1 }
  0xf1   :  { %v2487_v19 = vadd.f32 %v1837_v16, %v1773_v14  ;;  %v2489_v20 = vpop.f32.mrf.mxu0 }
  0xf2   :  { %v2491_v21 = vpop.f32.mrf.mxu1 }
  0xf3   :  { %v1777_v22 = vpop.f32.mrf.mxu0 }
  0xf4   :  { %v1841_v23 = vpop.f32.mrf.mxu1 }
  0xf5   :  { %v1778_v24 = vpop.f32.mrf.mxu0 }
  0xf6   :  { %v1779_v25 = vadd.f32 %v1778_v24, %v1777_v22  ;;  %v1842_v26 = vpop.f32.mrf.mxu1 }
  0xf7   :  { %v1843_v27 = vadd.f32 %v1842_v26, %v1841_v23  ;;  %v2493_v28 = vpop.f32.mrf.mxu0 }
  0xf8   :  { %v2495_v29 = vpop.f32.mrf.mxu1 }
  0xf9   :  { %v2497_v30 = vadd.f32 %v1843_v27, %v1779_v25  ;;  %v2499_v31 = vpop.f32.mrf.mxu0 }
  0xfa   :  { %v2501_v32 = vpop.f32.mrf.mxu1 }
  0xfb   :  { %v1783_v33 = vpop.f32.mrf.mxu0 }
  0xfc   :  { %v1847_v34 = vpop.f32.mrf.mxu1 }
  0xfd   :  { %v1784_v35 = vpop.f32.mrf.mxu0 }
  0xfe   :  { %v1785_v36 = vadd.f32 %v1784_v35, %v1783_v33  ;;  %v1848_v37 = vpop.f32.mrf.mxu1 }
  0xff   :  { %v1849_v38 = vadd.f32 %v1848_v37, %v1847_v34  ;;  %v2503_v39 = vpop.f32.mrf.mxu0 }
 0x100   :  { %v2505_v40 = vpop.f32.mrf.mxu1 }
 0x101   :  { %v2507_v41 = vadd.f32 %v1849_v38, %v1785_v36  ;;  %v2509_v42 = vpop.f32.mrf.mxu0 }
 0x102   :  { %v2511_v43 = vpop.f32.mrf.mxu1 }
 0x103   :  { %v1789_v44 = vpop.f32.mrf.mxu0 }
 0x104   :  { %v1853_v45 = vpop.f32.mrf.mxu1 }
 0x105   :  { %v1790_v46 = vpop.f32.mrf.mxu0 }
 0x106   :  { %v1791_v47 = vadd.f32 %v1790_v46, %v1789_v44  ;;  %v1854_v48 = vpop.f32.mrf.mxu1 }
 0x107   :  { %v1855_v49 = vadd.f32 %v1854_v48, %v1853_v45  ;;  %v2513_v50 = vpop.f32.mrf.mxu0  ;;  %v1834_v48 = vadd.f32 %v2481_v10, %v2475_v7 }
 0x108   :  { %v2515_v51 = vpop.f32.mrf.mxu1 }
 0x109   :  { %v2517_v52 = vadd.f32 %v1855_v49, %v1791_v47  ;;  %v2519_v53 = vpop.f32.mrf.mxu0  ;;  %v1770_v47 = vadd.f32 %v2479_v9, %v2473_v6 }
 0x10a   :  { %v2521_v54 = vpop.f32.mrf.mxu1 }
 0x10b   :  { %v1795_v55 = vpop.f32.mrf.mxu0 }
 0x10c   :  { %v1859_v56 = vpop.f32.mrf.mxu1 }
 0x10d   :  { %v1796_v57 = vpop.f32.mrf.mxu0 }
 0x10e   :  { %v1797_v58 = vadd.f32 %v1796_v57, %v1795_v55  ;;  %v1860_v59 = vpop.f32.mrf.mxu1 }
 0x10f   :  { %v1861_v60 = vadd.f32 %v1860_v59, %v1859_v56  ;;  %v2523_v61 = vpop.f32.mrf.mxu0 }
 0x110   :  { %v2525_v62 = vpop.f32.mrf.mxu1 }
 0x111   :  { %v2527_v63 = vadd.f32 %v1861_v60, %v1797_v58  ;;  %v2529_v0 = vpop.f32.mrf.mxu0  ;;  %v2561_v60 = vld [vmem:[%s2640_s2] ss:$0 sm:$0xff] }
 0x112   :  { %v2531_v1 = vpop.f32.mrf.mxu1 }
 0x113   :  { %v1801_v2 = vpop.f32.mrf.mxu0 }
 0x114   :  { %v1865_v3 = vpop.f32.mrf.mxu1 }
 0x115   :  { %v1802_v4 = vpop.f32.mrf.mxu0 }
 0x116   :  { %v1803_v5 = vadd.f32 %v1802_v4, %v1801_v2  ;;  %v1866_v11 = vpop.f32.mrf.mxu1 }
 0x117   :  { %v1867_v12 = vadd.f32 %v1866_v11, %v1865_v3  ;;  %v2533_v13 = vpop.f32.mrf.mxu0  ;;  %v1082_v3 = vadd.f32 %v1834_v48, %v1770_v47 }
 0x118   :  { %v2535_v14 = vpop.f32.mrf.mxu1 }
 0x119   :  { %v2537_v15 = vadd.f32 %v1867_v12, %v1803_v5  ;;  %v2539_v16 = vpop.f32.mrf.mxu0 }
 0x11a   :  { %v2541_v22 = vpop.f32.mrf.mxu1 }
 0x11b   :  { %v1807_v23 = vpop.f32.mrf.mxu0 }
 0x11c   :  { %v1871_v24 = vpop.f32.mrf.mxu1 }
 0x11d   :  { %v1808_v25 = vpop.f32.mrf.mxu0 }
 0x11e   :  { %v1809_v26 = vadd.f32 %v1808_v25, %v1807_v23  ;;  %v1872_v27 = vpop.f32.mrf.mxu1  ;;  %v1840_v23 = vadd.f32 %v2491_v21, %v2485_v18 }
 0x11f   :  { %v1873_v33 = vadd.f32 %v1872_v27, %v1871_v24  ;;  %v2543_v34 = vpop.f32.mrf.mxu0 }
 0x120   :  { %v2545_v35 = vpop.f32.mrf.mxu1 }
 0x121   :  { %v2547_v36 = vadd.f32 %v1873_v33, %v1809_v26  ;;  %v2549_v37 = vpop.f32.mrf.mxu0 }
 0x122   :  { %v2551_v38 = vpop.f32.mrf.mxu1 }
 0x123   :  { %v1893_v44 = vpop.f32.mrf.mxu0 }
 0x124   :  { %v1957_v45 = vpop.f32.mrf.mxu1 }
 0x125   :  { %v1894_v46 = vpop.f32.mrf.mxu0 }
 0x126   :  { %v1895_v49 = vadd.f32 %v1894_v46, %v1893_v44  ;;  %v1958_v55 = vpop.f32.mrf.mxu1 }
 0x127   :  { %v1896_v56 = vpop.f32.mrf.mxu0  ;;  %v1959_v58 = vadd.f32 %v1958_v55, %v1957_v45 }
 0x128   :  { %v1176_v57 = vadd.f32 %v1895_v49, %v2477_v8  ;;  %v1960_v59 = vpop.f32.mrf.mxu1  ;;  %v1776_v8 = vadd.f32 %v2489_v20, %v2483_v17 }
 0x129   :  { %v1897_v2 = vpop.f32.mrf.mxu0 }
 0x12a   :  { %v1273_v4 = vadd.f32 %v1959_v58, %v1176_v57  ;;  %v1898_v5 = vadd.f32 %v1897_v2, %v1896_v56  ;;  %v1961_v6 = vpop.f32.mrf.mxu1  ;;  %v1090_v49 = vadd.f32 %v1840_v23, %v1776_v8 }
 0x12b   :  { %v1899_v9 = vpop.f32.mrf.mxu0  ;;  %v1962_v11 = vadd.f32 %v1961_v6, %v1960_v59 }
 0x12c   :  { %v1393_v7 = vadd.f32 %v2561_v60, %v1273_v4  ;;  %v1179_v10 = vadd.f32 %v1898_v5, %v1082_v3  ;;  %v1963_v12 = vpop.f32.mrf.mxu1  ;;  %v1846_v5 = vadd.f32 %v2501_v32, %v2495_v29 }
 0x12d   :  { %v1900_v24 = vpop.f32.mrf.mxu0 }
 0x12e   :  { %v1276_v25 = vadd.f32 %v1962_v11, %v1179_v10  ;;  %v1901_v26 = vadd.f32 %v1900_v24, %v1899_v9  ;;  %v1964_v27 = vpop.f32.mrf.mxu1  ;;  %v1425_v33 = vmul.f32 0.2, %v1393_v7  ;;  %vm1409_vm0 = vcmp.ge.f32.partialorder %v1393_v7, 0.0 }
 0x12f   :  { %v1902_v44 = vpop.f32.mrf.mxu0  ;;  %v1965_v47 = vadd.f32 %v1964_v27, %v1963_v12 }
 0x130   :  { %v1394_v45 = vadd.f32 %v2561_v60, %v1276_v25  ;;  %v1184_v46 = vadd.f32 %v1901_v26, %v2487_v19  ;;  %v1966_v48 = vpop.f32.mrf.mxu1  ;;  %v1441_v21 = vsel %vm1409_vm0, %v1393_v7, %v1425_v33  ;;  %v1782_v19 = vadd.f32 %v2499_v31, %v2493_v28 }
 0x131   :  { %v1903_v55 = vpop.f32.mrf.mxu0 }
 0x132   :  { %vm1410_vm1 = vcmp.ge.f32.partialorder %v1394_v45, 0.0  ;;  %v1426_v17 = vmul.f32 0.2, %v1394_v45  ;;  %v1281_v20 = vadd.f32 %v1965_v47, %v1184_v46  ;;  %v1904_v56 = vadd.f32 %v1903_v55, %v1902_v44  ;;  %v1967_v18 = vpop.f32.mrf.mxu1 }
 0x133   :  { %v1905_v57 = vpop.f32.mrf.mxu0  ;;  %v1968_v3 = vadd.f32 %v1967_v18, %v1966_v48  ;;  %v1098_v25 = vadd.f32 %v1846_v5, %v1782_v19 }
 0x134   :  { %v1442_v58 = vsel %vm1410_vm1, %v1394_v45, %v1426_v17  ;;  %v1395_v59 = vadd.f32 %v2561_v60, %v1281_v20  ;;  %v1187_v2 = vadd.f32 %v1904_v56, %v1090_v49  ;;  %v1969_v4 = vpop.f32.mrf.mxu1  ;;  %v1852_v17 = vadd.f32 %v2511_v43, %v2505_v40 }
 0x135   :  { %v1705_v6 = vpack.c.bf16 %v1442_v58, %v1441_v21  ;;  %v1906_v9 = vpop.f32.mrf.mxu0 }
 0x136   :  { %v1284_v10 = vadd.f32 %v1968_v3, %v1187_v2  ;;  %v1907_v11 = vadd.f32 %v1906_v9, %v1905_v57  ;;  %v1970_v12 = vpop.f32.mrf.mxu1  ;;  %v1427_v7 = vmul.f32 0.2, %v1395_v59  ;;  %vm1411_vm2 = vcmp.ge.f32.partialorder %v1395_v59, 0.0 }
 0x137   :  { %1706 = vst [vmem:[%s2641_s3] sm:$0xff] %v1705_v6   ;;  %v1908_v8 = vpop.f32.mrf.mxu0  ;;  %v1971_v28 = vadd.f32 %v1970_v12, %v1969_v4 }
 0x138   :  { %v1396_v23 = vadd.f32 %v2561_v60, %v1284_v10  ;;  %v1192_v24 = vadd.f32 %v1907_v11, %v2497_v30  ;;  %v1972_v31 = vpop.f32.mrf.mxu1  ;;  %v1443_v44 = vsel %vm1411_vm2, %v1395_v59, %v1427_v7  ;;  %v1788_v30 = vadd.f32 %v2509_v42, %v2503_v39 }
 0x139   :  { %v1909_v29 = vpop.f32.mrf.mxu0 }
 0x13a   :  { %vm1412_vm3 = vcmp.ge.f32.partialorder %v1396_v23, 0.0  ;;  %v1428_v32 = vmul.f32 0.2, %v1396_v23  ;;  %v1289_v26 = vadd.f32 %v1971_v28, %v1192_v24  ;;  %v1910_v27 = vadd.f32 %v1909_v29, %v1908_v8  ;;  %v1973_v33 = vpop.f32.mrf.mxu1 }
 0x13b   :  { %v1911_v45 = vpop.f32.mrf.mxu0  ;;  %v1974_v49 = vadd.f32 %v1973_v33, %v1972_v31  ;;  %v1106_v4 = vadd.f32 %v1852_v17, %v1788_v30  ;;  %v1858_v24 = vadd.f32 %v2521_v54, %v2515_v51 }
 0x13c   :  { %v1444_v46 = vsel %vm1412_vm3, %v1396_v23, %v1428_v32  ;;  %v1397_v47 = vadd.f32 %v2561_v60, %v1289_v26  ;;  %v1195_v48 = vadd.f32 %v1910_v27, %v1098_v25  ;;  %v1975_v55 = vpop.f32.mrf.mxu1 }
 0x13d   :  { %v1710_v20 = vpack.c.bf16 %v1444_v46, %v1443_v44  ;;  %v1912_v56 = vpop.f32.mrf.mxu0 }
 0x13e   :  { %v1292_v18 = vadd.f32 %v1974_v49, %v1195_v48  ;;  %v1913_v21 = vadd.f32 %v1912_v56, %v1911_v45  ;;  %v1976_v57 = vpop.f32.mrf.mxu1  ;;  %v1429_v58 = vmul.f32 0.2, %v1397_v47  ;;  %vm1413_vm4 = vcmp.ge.f32.partialorder %v1397_v47, 0.0 }
 0x13f   :  { %1742 = vst [vmem:[%s2641_s3 + $0x8] sm:$0xff] %v1710_v20   ;;  %v1914_v59 = vpop.f32.mrf.mxu0  ;;  %v1977_v39 = vadd.f32 %v1976_v57, %v1975_v55 }
 0x140   :  { %v1398_v2 = vadd.f32 %v2561_v60, %v1292_v18  ;;  %v1200_v3 = vadd.f32 %v1913_v21, %v2507_v41  ;;  %v1978_v42 = vpop.f32.mrf.mxu1  ;;  %v1445_v9 = vsel %vm1413_vm4, %v1397_v47, %v1429_v58  ;;  %v1794_v41 = vadd.f32 %v2519_v53, %v2513_v50 }
 0x141   :  { %v1915_v40 = vpop.f32.mrf.mxu0  ;;  %v1864_v21 = vadd.f32 %v2531_v1, %v2525_v62 }
 0x142   :  { %vm1414_vm5 = vcmp.ge.f32.partialorder %v1398_v2, 0.0  ;;  %v1430_v43 = vmul.f32 0.2, %v1398_v2  ;;  %v1297_v19 = vadd.f32 %v1977_v39, %v1200_v3  ;;  %v1916_v5 = vadd.f32 %v1915_v40, %v1914_v59  ;;  %v1979_v6 = vpop.f32.mrf.mxu1 }
 0x143   :  { %v1917_v10 = vpop.f32.mrf.mxu0  ;;  %v1980_v8 = vadd.f32 %v1979_v6, %v1978_v42  ;;  %v1114_v45 = vadd.f32 %v1858_v24, %v1794_v41  ;;  %v1870_v41 = vadd.f32 %v2541_v22, %v2535_v14 }
 0x144   :  { %v1446_v11 = vsel %vm1414_vm5, %v1398_v2, %v1430_v43  ;;  %v1399_v12 = vadd.f32 %v2561_v60, %v1297_v19  ;;  %v1203_v7 = vadd.f32 %v1916_v5, %v1106_v4  ;;  %v1981_v23 = vpop.f32.mrf.mxu1 }
 0x145   :  { %v1715_v28 = vpack.c.bf16 %v1446_v11, %v1445_v9  ;;  %v1918_v31 = vpop.f32.mrf.mxu0 }
 0x146   :  { %v1300_v25 = vadd.f32 %v1980_v8, %v1203_v7  ;;  %v1919_v29 = vadd.f32 %v1918_v31, %v1917_v10  ;;  %v1982_v32 = vpop.f32.mrf.mxu1  ;;  %v1431_v26 = vmul.f32 0.2, %v1399_v12  ;;  %vm1415_vm6 = vcmp.ge.f32.partialorder %v1399_v12, 0.0 }
 0x147   :  { %1743 = vst [vmem:[%s2641_s3 + $0x10] sm:$0xff] %v1715_v28   ;;  %v1920_v27 = vpop.f32.mrf.mxu0  ;;  %v1983_v50 = vadd.f32 %v1982_v32, %v1981_v23 }
 0x148   :  { %v1400_v33 = vadd.f32 %v2561_v60, %v1300_v25  ;;  %v1208_v44 = vadd.f32 %v1919_v29, %v2517_v52  ;;  %v1984_v53 = vpop.f32.mrf.mxu1  ;;  %v1447_v49 = vsel %vm1415_vm6, %v1399_v12, %v1431_v26  ;;  %v1800_v52 = vadd.f32 %v2529_v0, %v2523_v61 }
 0x149   :  { %v1921_v51 = vpop.f32.mrf.mxu0 }
 0x14a   :  { %vm1416_vm7 = vcmp.ge.f32.partialorder %v1400_v33, 0.0  ;;  %v1432_v54 = vmul.f32 0.2, %v1400_v33  ;;  %v1305_v46 = vadd.f32 %v1983_v50, %v1208_v44  ;;  %v1922_v47 = vadd.f32 %v1921_v51, %v1920_v27  ;;  %v1985_v48 = vpop.f32.mrf.mxu1 }
 0x14b   :  { %v1923_v55 = vpop.f32.mrf.mxu0  ;;  %v1986_v56 = vadd.f32 %v1985_v48, %v1984_v53  ;;  %v1122_v43 = vadd.f32 %v1864_v21, %v1800_v52 }
 0x14c   :  { %v1448_v30 = vsel %vm1416_vm7, %v1400_v33, %v1432_v54  ;;  %v1401_v17 = vadd.f32 %v2561_v60, %v1305_v46  ;;  %v1211_v20 = vadd.f32 %v1922_v47, %v1114_v45  ;;  %v1987_v18 = vpop.f32.mrf.mxu1 }
 0x14d   :  { %v1720_v57 = vpack.c.bf16 %v1448_v30, %v1447_v49  ;;  %v1924_v58 = vpop.f32.mrf.mxu0  ;;  %v1876_v30 = vadd.f32 %v2551_v38, %v2545_v35 }
 0x14e   :  { %v1308_v59 = vadd.f32 %v1986_v56, %v1211_v20  ;;  %v1925_v2 = vadd.f32 %v1924_v58, %v1923_v55  ;;  %v1988_v3 = vpop.f32.mrf.mxu1  ;;  %v1433_v39 = vmul.f32 0.2, %v1401_v17  ;;  %vm1417_vm8 = vcmp.ge.f32.partialorder %v1401_v17, 0.0 }
 0x14f   :  { %1744 = vst [vmem:[%s2641_s3 + $0x18] sm:$0xff] %v1720_v57   ;;  %v1926_v42 = vpop.f32.mrf.mxu0  ;;  %v1989_v61 = vadd.f32 %v1988_v3, %v1987_v18 }
 0x150   :  { %v1402_v4 = vadd.f32 %v2561_v60, %v1308_v59  ;;  %v1216_v40 = vadd.f32 %v1925_v2, %v2527_v63  ;;  %v1990_v0 = vpop.f32.mrf.mxu1  ;;  %v1449_v9 = vsel %vm1417_vm8, %v1401_v17, %v1433_v39  ;;  %v1806_v63 = vadd.f32 %v2539_v16, %v2533_v13 }
 0x151   :  { %v1927_v62 = vpop.f32.mrf.mxu0 }
 0x152   :  { %vm1418_vm9 = vcmp.ge.f32.partialorder %v1402_v4, 0.0  ;;  %v1434_v1 = vmul.f32 0.2, %v1402_v4  ;;  %v1313_v19 = vadd.f32 %v1989_v61, %v1216_v40  ;;  %v1928_v5 = vadd.f32 %v1927_v62, %v1926_v42  ;;  %v1991_v6 = vpop.f32.mrf.mxu1 }
 0x153   :  { %v1929_v10 = vpop.f32.mrf.mxu0  ;;  %v1992_v8 = vadd.f32 %v1991_v6, %v1990_v0  ;;  %v1130_v44 = vadd.f32 %v1870_v41, %v1806_v63 }
 0x154   :  { %v1450_v11 = vsel %vm1418_vm9, %v1402_v4, %v1434_v1  ;;  %v1403_v12 = vadd.f32 %v2561_v60, %v1313_v19  ;;  %v1219_v7 = vadd.f32 %v1928_v5, %v1122_v43  ;;  %v1993_v23 = vpop.f32.mrf.mxu1 }
 0x155   :  { %v1725_v24 = vpack.c.bf16 %v1450_v11, %v1449_v9  ;;  %v1930_v28 = vpop.f32.mrf.mxu0 }
 0x156   :  { %v1316_v31 = vadd.f32 %v1992_v8, %v1219_v7  ;;  %v1931_v25 = vadd.f32 %v1930_v28, %v1929_v10  ;;  %v1994_v29 = vpop.f32.mrf.mxu1  ;;  %v1435_v32 = vmul.f32 0.2, %v1403_v12  ;;  %vm1419_vm10 = vcmp.ge.f32.partialorder %v1403_v12, 0.0 }
 0x157   :  { %1745 = vst [vmem:[%s2641_s3 + $0x20] sm:$0xff] %v1725_v24   ;;  %v1932_v26 = vpop.f32.mrf.mxu0  ;;  %v1995_v13 = vadd.f32 %v1994_v29, %v1993_v23 }
 0x158   :  { %v1404_v27 = vadd.f32 %v2561_v60, %v1316_v31  ;;  %v1224_v33 = vadd.f32 %v1931_v25, %v2537_v15  ;;  %v1996_v16 = vpop.f32.mrf.mxu1  ;;  %v1451_v51 = vsel %vm1419_vm10, %v1403_v12, %v1435_v32  ;;  %v1812_v15 = vadd.f32 %v2549_v37, %v2543_v34 }
 0x159   :  { %v1933_v14 = vpop.f32.mrf.mxu0 }
 0x15a   :  { %vm1420_vm11 = vcmp.ge.f32.partialorder %v1404_v27, 0.0  ;;  %v1436_v22 = vmul.f32 0.2, %v1404_v27  ;;  %v1321_v50 = vadd.f32 %v1995_v13, %v1224_v33  ;;  %v1934_v53 = vadd.f32 %v1933_v14, %v1932_v26  ;;  %v1997_v45 = vpop.f32.mrf.mxu1 }
 0x15b   :  { %v1935_v54 = vpop.f32.mrf.mxu0  ;;  %v1998_v49 = vadd.f32 %v1997_v45, %v1996_v16  ;;  %v1138_v2 = vadd.f32 %v1876_v30, %v1812_v15 }
 0x15c   :  { %v1452_v46 = vsel %vm1420_vm11, %v1404_v27, %v1436_v22  ;;  %v1405_v47 = vadd.f32 %v2561_v60, %v1321_v50  ;;  %v1227_v48 = vadd.f32 %v1934_v53, %v1130_v44  ;;  %v1999_v55 = vpop.f32.mrf.mxu1 }
 0x15d   :  { %v1730_v17 = vpack.c.bf16 %v1452_v46, %v1451_v51  ;;  %v1936_v20 = vpop.f32.mrf.mxu0 }
 0x15e   :  { %v1324_v56 = vadd.f32 %v1998_v49, %v1227_v48  ;;  %v1937_v18 = vadd.f32 %v1936_v20, %v1935_v54  ;;  %v2000_v52 = vpop.f32.mrf.mxu1  ;;  %v1437_v21 = vmul.f32 0.2, %v1405_v47  ;;  %vm1421_vm12 = vcmp.ge.f32.partialorder %v1405_v47, 0.0 }
 0x15f   :  { %1746 = vst [vmem:[%s2641_s3 + $0x28] sm:$0xff] %v1730_v17   ;;  %v1938_v57 = vpop.f32.mrf.mxu0  ;;  %v2001_v34 = vadd.f32 %v2000_v52, %v1999_v55 }
 0x160   :  { %v1406_v58 = vadd.f32 %v2561_v60, %v1324_v56  ;;  %v1232_v59 = vadd.f32 %v1937_v18, %v2547_v36  ;;  %v2002_v37 = vpop.f32.mrf.mxu1  ;;  %v1453_v4 = vsel %vm1421_vm12, %v1405_v47, %v1437_v21 }
 0x161   :  { %v1939_v35 = vpop.f32.mrf.mxu0 }
 0x162   :  { %vm1422_vm13 = vcmp.ge.f32.partialorder %v1406_v58, 0.0  ;;  %v1438_v38 = vmul.f32 0.2, %v1406_v58  ;;  %v1329_v3 = vadd.f32 %v2001_v34, %v1232_v59  ;;  %v1940_v39 = vadd.f32 %v1939_v35, %v1938_v57  ;;  %v2003_v42 = vpop.f32.mrf.mxu1 }
 0x163   :  { %v2004_v43 = vadd.f32 %v2003_v42, %v2002_v37 }
 0x164   :  { %v1454_v40 = vsel %vm1422_vm13, %v1406_v58, %v1438_v38  ;;  %v1407_v61 = vadd.f32 %v2561_v60, %v1329_v3  ;;  %v1235_v0 = vadd.f32 %v1940_v39, %v1138_v2 }
 0x165   :  { %v1735_v62 = vpack.c.bf16 %v1454_v40, %v1453_v4 }
 0x166   :  { %v1332_v1 = vadd.f32 %v2004_v43, %v1235_v0  ;;  %v1439_v36 = vmul.f32 0.2, %v1407_v61  ;;  %vm1423_vm14 = vcmp.ge.f32.partialorder %v1407_v61, 0.0 }
 0x167   :  { %1747 = vst [vmem:[%s2641_s3 + $0x30] sm:$0xff] %v1735_v62  }
 0x168   :  { %v1408_v19 = vadd.f32 %v2561_v60, %v1332_v1  ;;  %v1455_v6 = vsel %vm1423_vm14, %v1407_v61, %v1439_v36 }
 0x16a   :  { %vm1424_vm15 = vcmp.ge.f32.partialorder %v1408_v19, 0.0  ;;  %v1440_v5 = vmul.f32 0.2, %v1408_v19 }
 0x16c   :  { %v1456_v9 = vsel %vm1424_vm15, %v1408_v19, %v1440_v5 }
 0x16d   :  { %v1740_v10 = vpack.c.bf16 %v1456_v9, %v1455_v6 }
 0x16f   :  { %1748 = vst [vmem:[%s2641_s3 + $0x38] sm:$0xff] %v1740_v10  }

// kernel: discriminator_forward.9
= control target key start
LH: loop header
LB: loop body
LE: loop exit
PB: predicated region body
PF: predicated region fallthrough
CT: control target
= control target key end

     0   :  { %s3943_s1 = inlined_call_operand.vmem [shape: bf16[2048,256], index: 1, kind: input, shape index: {}]   ;;  %s3944_s0 = inlined_call_operand.vmem [shape: bf16[32,2048], index: 0, kind: input, shape index: {}]   ;;  %s3945_s2 = inlined_call_operand.vmem [shape: f32[1,256], index: 2, kind: input, shape index: {}]   ;;  %s3946_s3 = inlined_call_operand.vmem [shape: bf16[32,256], index: 3, kind: output, shape index: {}]  }
   0x1   :  { %v2585_v0 = vld [vmem:[%s3943_s1 + $0x74] ss:$8 sps:$4 sm:$0xff]   ;;  %v2589_v2 = vld [vmem:[%s3943_s1 + $0x70] ss:$8 sps:$4 sm:$0xff]   ;;  %v2591_v4 = vld [vmem:[%s3943_s1 + $0x64] ss:$8 sps:$4 sm:$0xff]  }
   0x2   :  { %v2587_v1 = vld [vmem:[%s3943_s1 + $0x174] ss:$8 sps:$4 sm:$0xff]   ;;  %1762 = vmatprep.subr.bf16.mxu0 %v2585_v0  ;;  %v2590_v3 = vld [vmem:[%s3943_s1 + $0x170] ss:$8 sps:$4 sm:$0xff]   ;;  %v2593_v5 = vld [vmem:[%s3943_s1 + $0x164] ss:$8 sps:$4 sm:$0xff]  }
   0x3   :  { %1815 = vmatprep.subr.bf16.mxu1 %v2587_v1  ;;  %1763 = vmatpush1.bf16.msra.mxu0 %v2589_v2  ;;  %v2595_v6 = vld [vmem:[%s3943_s1 + $0x60] ss:$8 sps:$4 sm:$0xff]   ;;  %v2597_v8 = vld [vmem:[%s3943_s1 + $0x54] ss:$8 sps:$4 sm:$0xff]   ;;  %v2601_v10 = vld [vmem:[%s3943_s1 + $0x50] ss:$8 sps:$4 sm:$0xff]  }
   0x4   :  { %1816 = vmatpush1.bf16.msra.mxu1 %v2590_v3  ;;  %1764 = vmatprep.subr.bf16.mxu0 %v2591_v4  ;;  %v2596_v7 = vld [vmem:[%s3943_s1 + $0x160] ss:$8 sps:$4 sm:$0xff]   ;;  %v2599_v9 = vld [vmem:[%s3943_s1 + $0x154] ss:$8 sps:$4 sm:$0xff]   ;;  %v2602_v11 = vld [vmem:[%s3943_s1 + $0x150] ss:$8 sps:$4 sm:$0xff]  }
   0x5   :  { %1817 = vmatprep.subr.bf16.mxu1 %v2593_v5  ;;  %v2603_v12 = vld [vmem:[%s3943_s1 + $0x44] ss:$8 sps:$4 sm:$0xff]   ;;  %v2607_v14 = vld [vmem:[%s3943_s1 + $0x40] ss:$8 sps:$4 sm:$0xff]   ;;  %v2609_v16 = vld [vmem:[%s3943_s1 + $0x34] ss:$8 sps:$4 sm:$0xff]  }
   0x6   :  { %v2605_v13 = vld [vmem:[%s3943_s1 + $0x144] ss:$8 sps:$4 sm:$0xff]   ;;  %v2608_v15 = vld [vmem:[%s3943_s1 + $0x140] ss:$8 sps:$4 sm:$0xff]   ;;  %v2611_v17 = vld [vmem:[%s3943_s1 + $0x134] ss:$8 sps:$4 sm:$0xff]  }
   0x7   :  { %1765 = vmatpush1.bf16.msra.mxu0 %v2595_v6  ;;  %v2613_v18 = vld [vmem:[%s3943_s1 + $0x30] ss:$8 sps:$4 sm:$0xff]   ;;  %v2615_v20 = vld [vmem:[%s3943_s1 + $0x24] ss:$8 sps:$4 sm:$0xff]   ;;  %v2619_v22 = vld [vmem:[%s3943_s1 + $0x20] ss:$8 sps:$4 sm:$0xff]  }
   0x8   :  { %1818 = vmatpush1.bf16.msra.mxu1 %v2596_v7  ;;  %1766 = vmatprep.subr.bf16.mxu0 %v2597_v8  ;;  %v2614_v19 = vld [vmem:[%s3943_s1 + $0x130] ss:$8 sps:$4 sm:$0xff]   ;;  %v2617_v21 = vld [vmem:[%s3943_s1 + $0x124] ss:$8 sps:$4 sm:$0xff]   ;;  %v2620_v23 = vld [vmem:[%s3943_s1 + $0x120] ss:$8 sps:$4 sm:$0xff]  }
   0x9   :  { %1819 = vmatprep.subr.bf16.mxu1 %v2599_v9  ;;  %v2621_v24 = vld [vmem:[%s3943_s1 + $0x14] ss:$8 sps:$4 sm:$0xff]   ;;  %v2625_v26 = vld [vmem:[%s3943_s1 + $0x10] ss:$8 sps:$4 sm:$0xff]   ;;  %v2627_v28 = vld [vmem:[%s3943_s1 + $0x4] ss:$8 sps:$4 sm:$0xff]  }
   0xa   :  { %v2623_v25 = vld [vmem:[%s3943_s1 + $0x114] ss:$8 sps:$4 sm:$0xff]   ;;  %v2626_v27 = vld [vmem:[%s3943_s1 + $0x110] ss:$8 sps:$4 sm:$0xff]   ;;  %v2629_v29 = vld [vmem:[%s3943_s1 + $0x104] ss:$8 sps:$4 sm:$0xff]  }
   0xb   :  { %1767 = vmatpush1.bf16.msra.mxu0 %v2601_v10  ;;  %v2631_v30 = vld [vmem:[%s3943_s1] ss:$8 sps:$4 sm:$0xff]   ;;  %v2633_v32 = vld [vmem:[%s3943_s1 + $0xf4] ss:$8 sps:$4 sm:$0xff]   ;;  %v2637_v34 = vld [vmem:[%s3943_s1 + $0xf0] ss:$8 sps:$4 sm:$0xff]  }
   0xc   :  { %1820 = vmatpush1.bf16.msra.mxu1 %v2602_v11  ;;  %1768 = vmatprep.subr.bf16.mxu0 %v2603_v12  ;;  %v2632_v31 = vld [vmem:[%s3943_s1 + $0x100] ss:$8 sps:$4 sm:$0xff]   ;;  %v2635_v33 = vld [vmem:[%s3943_s1 + $0x1f4] ss:$8 sps:$4 sm:$0xff]   ;;  %v2638_v35 = vld [vmem:[%s3943_s1 + $0x1f0] ss:$8 sps:$4 sm:$0xff]  }
   0xd   :  { %1821 = vmatprep.subr.bf16.mxu1 %v2605_v13  ;;  %v2639_v36 = vld [vmem:[%s3943_s1 + $0xe4] ss:$8 sps:$4 sm:$0xff]   ;;  %v2643_v38 = vld [vmem:[%s3943_s1 + $0xe0] ss:$8 sps:$4 sm:$0xff]   ;;  %v2645_v40 = vld [vmem:[%s3943_s1 + $0xd4] ss:$8 sps:$4 sm:$0xff]  }
   0xe   :  { %v2641_v37 = vld [vmem:[%s3943_s1 + $0x1e4] ss:$8 sps:$4 sm:$0xff]   ;;  %v2644_v39 = vld [vmem:[%s3943_s1 + $0x1e0] ss:$8 sps:$4 sm:$0xff]   ;;  %v2647_v41 = vld [vmem:[%s3943_s1 + $0x1d4] ss:$8 sps:$4 sm:$0xff]  }
   0xf   :  { %1769 = vmatpush1.bf16.msra.mxu0 %v2607_v14  ;;  %v2649_v42 = vld [vmem:[%s3943_s1 + $0xd0] ss:$8 sps:$4 sm:$0xff]   ;;  %v2651_v44 = vld [vmem:[%s3943_s1 + $0xc4] ss:$8 sps:$4 sm:$0xff]   ;;  %v2655_v46 = vld [vmem:[%s3943_s1 + $0xc0] ss:$8 sps:$4 sm:$0xff]  }
  0x10   :  { %1822 = vmatpush1.bf16.msra.mxu1 %v2608_v15  ;;  %1770 = vmatprep.subr.bf16.mxu0 %v2609_v16  ;;  %v2650_v43 = vld [vmem:[%s3943_s1 + $0x1d0] ss:$8 sps:$4 sm:$0xff]   ;;  %v2653_v45 = vld [vmem:[%s3943_s1 + $0x1c4] ss:$8 sps:$4 sm:$0xff]   ;;  %v2656_v47 = vld [vmem:[%s3943_s1 + $0x1c0] ss:$8 sps:$4 sm:$0xff]  }
  0x11   :  { %1823 = vmatprep.subr.bf16.mxu1 %v2611_v17  ;;  %v34_v48 = vld [vmem:[%s3944_s0] sm:$0xff]  ;;  %v35_v50 = vld [vmem:[%s3944_s0 + $0x8] sm:$0xff]  ;;  %v2657_v52 = vld [vmem:[%s3943_s1 + $0xb4] ss:$8 sps:$4 sm:$0xff]  }
  0x12   :  { %v42_v49 = vld [vmem:[%s3944_s0 + $0x40] sm:$0xff]  ;;  %v43_v51 = vld [vmem:[%s3944_s0 + $0x48] sm:$0xff]  ;;  %v2659_v54 = vld [vmem:[%s3943_s1 + $0x1b4] ss:$8 sps:$4 sm:$0xff]  }
  0x13   :  { %1771 = vmatpush1.bf16.msra.mxu0 %v2613_v18  ;;  %v2290_v53 = vcombine.high %v34_v48, %v42_v49  ;;  %v2292_v55 = vcombine.high %v35_v50, %v43_v51  ;;  %v2661_v56 = vld [vmem:[%s3943_s1 + $0xb0] ss:$8 sps:$4 sm:$0xff]   ;;  %v2663_v58 = vld [vmem:[%s3943_s1 + $0xa4] ss:$8 sps:$4 sm:$0xff]   ;;  %v2667_v60 = vld [vmem:[%s3943_s1 + $0xa0] ss:$8 sps:$4 sm:$0xff]   ;;  %v2289_v8 = vcombine.low %v34_v48, %v42_v49  ;;  %v2291_v9 = vcombine.low %v35_v50, %v43_v51 }
  0x14   :  { %1824 = vmatpush1.bf16.msra.mxu1 %v2614_v19  ;;  %1772 = vmatprep.subr.bf16.mxu0 %v2615_v20  ;;  %v2662_v57 = vld [vmem:[%s3943_s1 + $0x1b0] ss:$8 sps:$4 sm:$0xff]   ;;  %v2665_v59 = vld [vmem:[%s3943_s1 + $0x1a4] ss:$8 sps:$4 sm:$0xff]   ;;  %v2668_v61 = vld [vmem:[%s3943_s1 + $0x1a0] ss:$8 sps:$4 sm:$0xff]  }
  0x15   :  { %1825 = vmatprep.subr.bf16.mxu1 %v2617_v21  ;;  %1794 = vmatprep.mubr.bf16.mxu0 %v2290_v53  ;;  %v2669_v62 = vld [vmem:[%s3943_s1 + $0x94] ss:$8 sps:$4 sm:$0xff]   ;;  %v2673_v0 = vld [vmem:[%s3943_s1 + $0x90] ss:$8 sps:$4 sm:$0xff]   ;;  %v2675_v2 = vld [vmem:[%s3943_s1 + $0x84] ss:$8 sps:$4 sm:$0xff]  }
  0x16   :  { %1847 = vmatprep.mubr.bf16.mxu1 %v2292_v55  ;;  %v2671_v63 = vld [vmem:[%s3943_s1 + $0x194] ss:$8 sps:$4 sm:$0xff]   ;;  %v2674_v1 = vld [vmem:[%s3943_s1 + $0x190] ss:$8 sps:$4 sm:$0xff]   ;;  %v2677_v3 = vld [vmem:[%s3943_s1 + $0x184] ss:$8 sps:$4 sm:$0xff]  }
  0x17   :  { %1773 = vmatpush1.bf16.msra.mxu0 %v2619_v22  ;;  %v2679_v4 = vld [vmem:[%s3943_s1 + $0x80] ss:$8 sps:$4 sm:$0xff]   ;;  %v2683_v6 = vld [vmem:[%s3943_s1 + $0x274] ss:$8 sps:$4 sm:$0xff]   ;;  %v2681_v10 = vld [vmem:[%s3943_s1 + $0x270] ss:$8 sps:$4 sm:$0xff]  }
  0x18   :  { %1826 = vmatpush1.bf16.msra.mxu1 %v2620_v23  ;;  %1774 = vmatprep.subr.bf16.mxu0 %v2621_v24  ;;  %v2680_v5 = vld [vmem:[%s3943_s1 + $0x180] ss:$8 sps:$4 sm:$0xff]   ;;  %v2686_v7 = vld [vmem:[%s3943_s1 + $0x374] ss:$8 sps:$4 sm:$0xff]   ;;  %v2684_v11 = vld [vmem:[%s3943_s1 + $0x370] ss:$8 sps:$4 sm:$0xff]  }
  0x19   :  { %1827 = vmatprep.subr.bf16.mxu1 %v2623_v25  ;;  %v2689_v12 = vld [vmem:[%s3943_s1 + $0x264] ss:$8 sps:$4 sm:$0xff]   ;;  %v2687_v14 = vld [vmem:[%s3943_s1 + $0x260] ss:$8 sps:$4 sm:$0xff]   ;;  %v2695_v16 = vld [vmem:[%s3943_s1 + $0x254] ss:$8 sps:$4 sm:$0xff]  }
  0x1a   :  { %v2692_v13 = vld [vmem:[%s3943_s1 + $0x364] ss:$8 sps:$4 sm:$0xff]   ;;  %v2690_v15 = vld [vmem:[%s3943_s1 + $0x360] ss:$8 sps:$4 sm:$0xff]   ;;  %v2698_v17 = vld [vmem:[%s3943_s1 + $0x354] ss:$8 sps:$4 sm:$0xff]  }
  0x1b   :  { %1775 = vmatpush1.bf16.msra.mxu0 %v2625_v26  ;;  %v2693_v18 = vld [vmem:[%s3943_s1 + $0x250] ss:$8 sps:$4 sm:$0xff]   ;;  %v2701_v20 = vld [vmem:[%s3943_s1 + $0x244] ss:$8 sps:$4 sm:$0xff]   ;;  %v2699_v22 = vld [vmem:[%s3943_s1 + $0x240] ss:$8 sps:$4 sm:$0xff]  }
  0x1c   :  { %1828 = vmatpush1.bf16.msra.mxu1 %v2626_v27  ;;  %1776 = vmatprep.subr.bf16.mxu0 %v2627_v28  ;;  %v2696_v19 = vld [vmem:[%s3943_s1 + $0x350] ss:$8 sps:$4 sm:$0xff]   ;;  %v2704_v21 = vld [vmem:[%s3943_s1 + $0x344] ss:$8 sps:$4 sm:$0xff]   ;;  %v2702_v23 = vld [vmem:[%s3943_s1 + $0x340] ss:$8 sps:$4 sm:$0xff]  }
  0x1d   :  { %1829 = vmatprep.subr.bf16.mxu1 %v2629_v29  ;;  %v2707_v24 = vld [vmem:[%s3943_s1 + $0x234] ss:$8 sps:$4 sm:$0xff]   ;;  %v2705_v26 = vld [vmem:[%s3943_s1 + $0x230] ss:$8 sps:$4 sm:$0xff]   ;;  %v50_v28 = vld [vmem:[%s3944_s0 + $0x80] sm:$0xff] }
  0x1e   :  { %v2710_v25 = vld [vmem:[%s3943_s1 + $0x334] ss:$8 sps:$4 sm:$0xff]   ;;  %v2708_v27 = vld [vmem:[%s3943_s1 + $0x330] ss:$8 sps:$4 sm:$0xff]   ;;  %v58_v29 = vld [vmem:[%s3944_s0 + $0xc0] sm:$0xff] }
  0x1f   :  { %1777 = vmatpush1.bf16.msra.mxu0 %v2631_v30  ;;  %v51_v30 = vld [vmem:[%s3944_s0 + $0x88] sm:$0xff]  ;;  %v3308_v48 = vld [vmem:[%s3944_s0 + $0x18] sm:$0xff] }
  0x20   :  { %1830 = vmatpush1.bf16.msra.mxu1 %v2632_v31  ;;  %1778 = vmatprep.subr.bf16.mxu0 %v2633_v32  ;;  %v59_v31 = vld [vmem:[%s3944_s0 + $0xc8] sm:$0xff]  ;;  %v3315_v50 = vld [vmem:[%s3944_s0 + $0x58] sm:$0xff] }
  0x21   :  { %1831 = vmatprep.subr.bf16.mxu1 %v2635_v33  ;;  %v2713_v32 = vld [vmem:[%s3943_s1 + $0x224] ss:$8 sps:$4 sm:$0xff]   ;;  %v2306_v33 = vcombine.high %v50_v28, %v58_v29  ;;  %v2296_v51 = vcombine.high %v3308_v48, %v3315_v50  ;;  %v2726_v53 = vld [vmem:[%s3943_s1 + $0x300] ss:$8 sps:$4 sm:$0xff]   ;;  %v2734_v55 = vld [vmem:[%s3943_s1 + $0x3f4] ss:$8 sps:$4 sm:$0xff]  }
  0x23   :  { %1779 = vmatpush2.bf16.msra.mxu0 %v2637_v34  ;;  %v2308_v34 = vcombine.high %v51_v30, %v59_v31 }
  0x24   :  { %1832 = vmatpush2.bf16.msra.mxu1 %v2638_v35  ;;  %1780 = vmatprep.subr.bf16.mxu0 %v2639_v36  ;;  %v2305_v35 = vcombine.low %v50_v28, %v58_v29  ;;  %v2716_v36 = vld [vmem:[%s3943_s1 + $0x324] ss:$8 sps:$4 sm:$0xff]   ;;  %v2295_v29 = vcombine.low %v3308_v48, %v3315_v50 }
  0x25   :  { %1833 = vmatprep.subr.bf16.mxu1 %v2641_v37  ;;  %v2307_v37 = vcombine.low %v51_v30, %v59_v31  ;;  %v53_v30 = vld [vmem:[%s3944_s0 + $0x98] sm:$0xff]  ;;  %v2797_v48 = vld [vmem:[%s3943_s1 + $0x444] ss:$8 sps:$4 sm:$0xff]  }
  0x26   :  { %v61_v31 = vld [vmem:[%s3944_s0 + $0xd8] sm:$0xff] }
  0x27   :  { %1781 = vmatpush2.bf16.msra.mxu0 %v2643_v38  ;;  %v2711_v38 = vld [vmem:[%s3943_s1 + $0x220] ss:$8 sps:$4 sm:$0xff]  }
  0x28   :  { %1834 = vmatpush2.bf16.msra.mxu1 %v2644_v39  ;;  %1782 = vmatprep.subr.bf16.mxu0 %v2645_v40  ;;  %v2714_v39 = vld [vmem:[%s3943_s1 + $0x320] ss:$8 sps:$4 sm:$0xff]   ;;  %v2719_v40 = vld [vmem:[%s3943_s1 + $0x214] ss:$8 sps:$4 sm:$0xff]  }
  0x29   :  { %1835 = vmatprep.subr.bf16.mxu1 %v2647_v41  ;;  %v2722_v41 = vld [vmem:[%s3943_s1 + $0x314] ss:$8 sps:$4 sm:$0xff]  }
  0x2b   :  { %1783 = vmatpush2.bf16.msra.mxu0 %v2649_v42  ;;  %v2717_v42 = vld [vmem:[%s3943_s1 + $0x210] ss:$8 sps:$4 sm:$0xff]  }
  0x2c   :  { %1836 = vmatpush2.bf16.msra.mxu1 %v2650_v43  ;;  %1784 = vmatprep.subr.bf16.mxu0 %v2651_v44  ;;  %v2720_v43 = vld [vmem:[%s3943_s1 + $0x310] ss:$8 sps:$4 sm:$0xff]   ;;  %v2725_v44 = vld [vmem:[%s3943_s1 + $0x204] ss:$8 sps:$4 sm:$0xff]  }
  0x2d   :  { %1837 = vmatprep.subr.bf16.mxu1 %v2653_v45  ;;  %v2728_v45 = vld [vmem:[%s3943_s1 + $0x304] ss:$8 sps:$4 sm:$0xff]  }
  0x2f   :  { %1785 = vmatpush2.bf16.msra.mxu0 %v2655_v46  ;;  %v3298_v46 = vld [vmem:[%s3944_s0 + $0x10] sm:$0xff] }
  0x30   :  { %1838 = vmatpush2.bf16.msra.mxu1 %v2656_v47  ;;  %1786 = vmatprep.subr.bf16.mxu0 %v2657_v52  ;;  %v3303_v47 = vld [vmem:[%s3944_s0 + $0x50] sm:$0xff]  ;;  %v2723_v52 = vld [vmem:[%s3943_s1 + $0x200] ss:$8 sps:$4 sm:$0xff]  }
  0x31   :  { %1839 = vmatprep.subr.bf16.mxu1 %v2659_v54  ;;  %v2294_v49 = vcombine.high %v3298_v46, %v3303_v47  ;;  %v2731_v54 = vld [vmem:[%s3943_s1 + $0x2f4] ss:$8 sps:$4 sm:$0xff]   ;;  %v2293_v28 = vcombine.low %v3298_v46, %v3303_v47  ;;  %v3486_v46 = vld [vmem:[%s3944_s0 + $0x28] sm:$0xff] }
  0x32   :  { %v3491_v47 = vld [vmem:[%s3944_s0 + $0x68] sm:$0xff] }
  0x33   :  { %1787 = vmatpush2.bf16.msra.mxu0 %v2661_v56  ;;  %v2729_v56 = vld [vmem:[%s3943_s1 + $0x2f0] ss:$8 sps:$4 sm:$0xff]  }
  0x34   :  { %1840 = vmatpush2.bf16.msra.mxu1 %v2662_v57  ;;  %1788 = vmatprep.subr.bf16.mxu0 %v2663_v58  ;;  %v2732_v57 = vld [vmem:[%s3943_s1 + $0x3f0] ss:$8 sps:$4 sm:$0xff]   ;;  %v2737_v58 = vld [vmem:[%s3943_s1 + $0x2e4] ss:$8 sps:$4 sm:$0xff]  }
  0x35   :  { %1841 = vmatprep.subr.bf16.mxu1 %v2665_v59  ;;  %v2740_v59 = vld [vmem:[%s3943_s1 + $0x3e4] ss:$8 sps:$4 sm:$0xff]  }
  0x37   :  { %1789 = vmatpush2.bf16.msra.mxu0 %v2667_v60  ;;  %v2735_v60 = vld [vmem:[%s3943_s1 + $0x2e0] ss:$8 sps:$4 sm:$0xff]  }
  0x38   :  { %1842 = vmatpush2.bf16.msra.mxu1 %v2668_v61  ;;  %1790 = vmatprep.subr.bf16.mxu0 %v2669_v62  ;;  %v2738_v61 = vld [vmem:[%s3943_s1 + $0x3e0] ss:$8 sps:$4 sm:$0xff]   ;;  %v2743_v62 = vld [vmem:[%s3943_s1 + $0x2d4] ss:$8 sps:$4 sm:$0xff]  }
  0x39   :  { %1843 = vmatprep.subr.bf16.mxu1 %v2671_v63  ;;  %v2746_v63 = vld [vmem:[%s3943_s1 + $0x3d4] ss:$8 sps:$4 sm:$0xff]  }
  0x3b   :  { %1791 = vmatpush2.bf16.msra.mxu0 %v2673_v0  ;;  %v2741_v0 = vld [vmem:[%s3943_s1 + $0x2d0] ss:$8 sps:$4 sm:$0xff]  }
  0x3c   :  { %1844 = vmatpush2.bf16.msra.mxu1 %v2674_v1  ;;  %1792 = vmatprep.subr.bf16.mxu0 %v2675_v2  ;;  %v2744_v1 = vld [vmem:[%s3943_s1 + $0x3d0] ss:$8 sps:$4 sm:$0xff]   ;;  %v2749_v2 = vld [vmem:[%s3943_s1 + $0x2c4] ss:$8 sps:$4 sm:$0xff]  }
  0x3d   :  { %1845 = vmatprep.subr.bf16.mxu1 %v2677_v3  ;;  %v2752_v3 = vld [vmem:[%s3943_s1 + $0x3c4] ss:$8 sps:$4 sm:$0xff]  }
  0x3f   :  { %1793 = vmatpush2.bf16.msra.mxu0 %v2679_v4  ;;  %v2747_v4 = vld [vmem:[%s3943_s1 + $0x2c0] ss:$8 sps:$4 sm:$0xff]  }
  0x40   :  { %1846 = vmatpush2.bf16.msra.mxu1 %v2680_v5  ;;  %1868 = vmatprep.subr.bf16.mxu0 %v2683_v6  ;;  %v2750_v5 = vld [vmem:[%s3943_s1 + $0x3c0] ss:$8 sps:$4 sm:$0xff]   ;;  %v2755_v6 = vld [vmem:[%s3943_s1 + $0x2b4] ss:$8 sps:$4 sm:$0xff]  }
  0x41   :  { %1921 = vmatprep.subr.bf16.mxu1 %v2686_v7  ;;  %v2758_v7 = vld [vmem:[%s3943_s1 + $0x3b4] ss:$8 sps:$4 sm:$0xff]  }
  0x42   :  { %1795 = vmatmul.mubr.bf16.vlgmr.msra.gmra.mxu0 %v2289_v8  ;;  %v2753_v8 = vld [vmem:[%s3943_s1 + $0x2b0] ss:$8 sps:$4 sm:$0xff]  }
  0x43   :  { %1848 = vmatmul.mubr.bf16.vlgmr.msra.gmra.mxu1 %v2291_v9  ;;  %1869 = vmatpush1.bf16.msra.mxu0 %v2681_v10  ;;  %v2756_v9 = vld [vmem:[%s3943_s1 + $0x3b0] ss:$8 sps:$4 sm:$0xff]   ;;  %v2761_v10 = vld [vmem:[%s3943_s1 + $0x2a4] ss:$8 sps:$4 sm:$0xff]  }
  0x44   :  { %1922 = vmatpush1.bf16.msra.mxu1 %v2684_v11  ;;  %1870 = vmatprep.subr.bf16.mxu0 %v2689_v12  ;;  %v2764_v11 = vld [vmem:[%s3943_s1 + $0x3a4] ss:$8 sps:$4 sm:$0xff]   ;;  %v2759_v12 = vld [vmem:[%s3943_s1 + $0x2a0] ss:$8 sps:$4 sm:$0xff]  }
  0x45   :  { %1923 = vmatprep.subr.bf16.mxu1 %v2692_v13  ;;  %1804 = vmatprep.mubr.bf16.mxu0 %v2306_v33  ;;  %v2762_v13 = vld [vmem:[%s3943_s1 + $0x3a0] ss:$8 sps:$4 sm:$0xff]   ;;  %v2788_v33 = vld [vmem:[%s3943_s1 + $0x564] ss:$8 sps:$4 sm:$0xff]  }
  0x46   :  { %1857 = vmatprep.mubr.bf16.mxu1 %v2308_v34 }
  0x47   :  { %1871 = vmatpush1.bf16.msra.mxu0 %v2687_v14  ;;  %v2767_v14 = vld [vmem:[%s3943_s1 + $0x294] ss:$8 sps:$4 sm:$0xff]  }
  0x48   :  { %1924 = vmatpush1.bf16.msra.mxu1 %v2690_v15  ;;  %1872 = vmatprep.subr.bf16.mxu0 %v2695_v16  ;;  %v2770_v15 = vld [vmem:[%s3943_s1 + $0x394] ss:$8 sps:$4 sm:$0xff]   ;;  %v2765_v16 = vld [vmem:[%s3943_s1 + $0x290] ss:$8 sps:$4 sm:$0xff]  }
  0x49   :  { %1925 = vmatprep.subr.bf16.mxu1 %v2698_v17  ;;  %v2768_v17 = vld [vmem:[%s3943_s1 + $0x390] ss:$8 sps:$4 sm:$0xff]  }
  0x4a   :  { %1805 = vmatmul.mubr.bf16.gmra.mxu0 %v2305_v35  ;;  %v2312_v35 = vcombine.high %v53_v30, %v61_v31 }
  0x4b   :  { %1873 = vmatpush1.bf16.msra.mxu0 %v2693_v18  ;;  %1858 = vmatmul.mubr.bf16.gmra.mxu1 %v2307_v37  ;;  %v2773_v18 = vld [vmem:[%s3943_s1 + $0x284] ss:$8 sps:$4 sm:$0xff]   ;;  %v2786_v37 = vld [vmem:[%s3943_s1 + $0x560] ss:$8 sps:$4 sm:$0xff]  }
  0x4c   :  { %1926 = vmatpush1.bf16.msra.mxu1 %v2696_v19  ;;  %1874 = vmatprep.subr.bf16.mxu0 %v2701_v20  ;;  %v2776_v19 = vld [vmem:[%s3943_s1 + $0x384] ss:$8 sps:$4 sm:$0xff]   ;;  %v2771_v20 = vld [vmem:[%s3943_s1 + $0x280] ss:$8 sps:$4 sm:$0xff]  }
  0x4d   :  { %1927 = vmatprep.subr.bf16.mxu1 %v2704_v21  ;;  %1900 = vmatprep.mubr.bf16.mxu0 %v2294_v49  ;;  %v2774_v21 = vld [vmem:[%s3943_s1 + $0x380] ss:$8 sps:$4 sm:$0xff]   ;;  %v2800_v49 = vld [vmem:[%s3943_s1 + $0x544] ss:$8 sps:$4 sm:$0xff]  }
  0x4e   :  { %1953 = vmatprep.mubr.bf16.mxu1 %v2296_v51  ;;  %v2300_v51 = vcombine.high %v3486_v46, %v3491_v47 }
  0x4f   :  { %1875 = vmatpush1.bf16.msra.mxu0 %v2699_v22  ;;  %v2779_v22 = vld [vmem:[%s3943_s1 + $0x474] ss:$8 sps:$4 sm:$0xff]  }
  0x50   :  { %1928 = vmatpush1.bf16.msra.mxu1 %v2702_v23  ;;  %1876 = vmatprep.subr.bf16.mxu0 %v2707_v24  ;;  %v2782_v23 = vld [vmem:[%s3943_s1 + $0x574] ss:$8 sps:$4 sm:$0xff]   ;;  %v2777_v24 = vld [vmem:[%s3943_s1 + $0x470] ss:$8 sps:$4 sm:$0xff]  }
  0x51   :  { %1929 = vmatprep.subr.bf16.mxu1 %v2710_v25  ;;  %v2780_v25 = vld [vmem:[%s3943_s1 + $0x570] ss:$8 sps:$4 sm:$0xff]  }
  0x53   :  { %1877 = vmatpush1.bf16.msra.mxu0 %v2705_v26  ;;  %v52_v26 = vld [vmem:[%s3944_s0 + $0x90] sm:$0xff] }
  0x54   :  { %1930 = vmatpush1.bf16.msra.mxu1 %v2708_v27  ;;  %1878 = vmatprep.subr.bf16.mxu0 %v2713_v32  ;;  %v60_v27 = vld [vmem:[%s3944_s0 + $0xd0] sm:$0xff]  ;;  %v2785_v32 = vld [vmem:[%s3943_s1 + $0x464] ss:$8 sps:$4 sm:$0xff]  }
  0x55   :  { %1931 = vmatprep.subr.bf16.mxu1 %v2716_v36  ;;  %v2310_v34 = vcombine.high %v52_v26, %v60_v27  ;;  %v2783_v36 = vld [vmem:[%s3943_s1 + $0x460] ss:$8 sps:$4 sm:$0xff]  }
  0x57   :  { %1879 = vmatpush1.bf16.msra.mxu0 %v2711_v38  ;;  %v2791_v38 = vld [vmem:[%s3943_s1 + $0x454] ss:$8 sps:$4 sm:$0xff]  }
  0x58   :  { %1932 = vmatpush1.bf16.msra.mxu1 %v2714_v39  ;;  %1880 = vmatprep.subr.bf16.mxu0 %v2719_v40  ;;  %v2794_v39 = vld [vmem:[%s3943_s1 + $0x554] ss:$8 sps:$4 sm:$0xff]   ;;  %v2789_v40 = vld [vmem:[%s3943_s1 + $0x450] ss:$8 sps:$4 sm:$0xff]  }
  0x59   :  { %1933 = vmatprep.subr.bf16.mxu1 %v2722_v41  ;;  %v2792_v41 = vld [vmem:[%s3943_s1 + $0x550] ss:$8 sps:$4 sm:$0xff]  }
  0x5b   :  { %1881 = vmatpush1.bf16.msra.mxu0 %v2717_v42  ;;  %v3476_v42 = vld [vmem:[%s3944_s0 + $0x20] sm:$0xff] }
  0x5c   :  { %1934 = vmatpush1.bf16.msra.mxu1 %v2720_v43  ;;  %1882 = vmatprep.subr.bf16.mxu0 %v2725_v44  ;;  %v3481_v43 = vld [vmem:[%s3944_s0 + $0x60] sm:$0xff]  ;;  %v2309_v44 = vcombine.low %v52_v26, %v60_v27 }
  0x5d   :  { %1935 = vmatprep.subr.bf16.mxu1 %v2728_v45  ;;  %v2311_v45 = vcombine.low %v53_v30, %v61_v31  ;;  %v2298_v50 = vcombine.high %v3476_v42, %v3481_v43  ;;  %v2857_v26 = vld [vmem:[%s3943_s1 + $0x4a4] ss:$8 sps:$4 sm:$0xff]   ;;  %v2863_v30 = vld [vmem:[%s3943_s1 + $0x494] ss:$8 sps:$4 sm:$0xff]  }
  0x5e   :  { %v2860_v27 = vld [vmem:[%s3943_s1 + $0x5a4] ss:$8 sps:$4 sm:$0xff]   ;;  %v2866_v31 = vld [vmem:[%s3943_s1 + $0x594] ss:$8 sps:$4 sm:$0xff]  }
  0x5f   :  { %1883 = vmatpush1.bf16.msra.mxu0 %v2723_v52  ;;  %v2795_v52 = vld [vmem:[%s3943_s1 + $0x440] ss:$8 sps:$4 sm:$0xff]  }
  0x60   :  { %1936 = vmatpush1.bf16.msra.mxu1 %v2726_v53  ;;  %1884 = vmatprep.subr.bf16.mxu0 %v2731_v54  ;;  %v2798_v53 = vld [vmem:[%s3943_s1 + $0x540] ss:$8 sps:$4 sm:$0xff]   ;;  %v2803_v54 = vld [vmem:[%s3943_s1 + $0x434] ss:$8 sps:$4 sm:$0xff]  }
  0x61   :  { %1937 = vmatprep.subr.bf16.mxu1 %v2734_v55  ;;  %v2806_v55 = vld [vmem:[%s3943_s1 + $0x534] ss:$8 sps:$4 sm:$0xff]  }
  0x63   :  { %1885 = vmatpush2.bf16.msra.mxu0 %v2729_v56  ;;  %v2801_v56 = vld [vmem:[%s3943_s1 + $0x430] ss:$8 sps:$4 sm:$0xff]  }
  0x64   :  { %1938 = vmatpush2.bf16.msra.mxu1 %v2732_v57  ;;  %1886 = vmatprep.subr.bf16.mxu0 %v2737_v58  ;;  %v2804_v57 = vld [vmem:[%s3943_s1 + $0x530] ss:$8 sps:$4 sm:$0xff]   ;;  %v2809_v58 = vld [vmem:[%s3943_s1 + $0x424] ss:$8 sps:$4 sm:$0xff]  }
  0x65   :  { %1939 = vmatprep.subr.bf16.mxu1 %v2740_v59  ;;  %v2812_v59 = vld [vmem:[%s3943_s1 + $0x524] ss:$8 sps:$4 sm:$0xff]  }
  0x67   :  { %1887 = vmatpush2.bf16.msra.mxu0 %v2735_v60  ;;  %v2807_v60 = vld [vmem:[%s3943_s1 + $0x420] ss:$8 sps:$4 sm:$0xff]  }
  0x68   :  { %1940 = vmatpush2.bf16.msra.mxu1 %v2738_v61  ;;  %1888 = vmatprep.subr.bf16.mxu0 %v2743_v62  ;;  %v2810_v61 = vld [vmem:[%s3943_s1 + $0x520] ss:$8 sps:$4 sm:$0xff]   ;;  %v2815_v62 = vld [vmem:[%s3943_s1 + $0x414] ss:$8 sps:$4 sm:$0xff]  }
  0x69   :  { %1941 = vmatprep.subr.bf16.mxu1 %v2746_v63  ;;  %v2818_v63 = vld [vmem:[%s3943_s1 + $0x514] ss:$8 sps:$4 sm:$0xff]  }
  0x6b   :  { %1889 = vmatpush2.bf16.msra.mxu0 %v2741_v0  ;;  %v2813_v0 = vld [vmem:[%s3943_s1 + $0x410] ss:$8 sps:$4 sm:$0xff]  }
  0x6c   :  { %1942 = vmatpush2.bf16.msra.mxu1 %v2744_v1  ;;  %1890 = vmatprep.subr.bf16.mxu0 %v2749_v2  ;;  %v2816_v1 = vld [vmem:[%s3943_s1 + $0x510] ss:$8 sps:$4 sm:$0xff]   ;;  %v2821_v2 = vld [vmem:[%s3943_s1 + $0x404] ss:$8 sps:$4 sm:$0xff]  }
  0x6d   :  { %1943 = vmatprep.subr.bf16.mxu1 %v2752_v3  ;;  %v2824_v3 = vld [vmem:[%s3943_s1 + $0x504] ss:$8 sps:$4 sm:$0xff]  }
  0x6f   :  { %1891 = vmatpush2.bf16.msra.mxu0 %v2747_v4  ;;  %v2819_v4 = vld [vmem:[%s3943_s1 + $0x400] ss:$8 sps:$4 sm:$0xff]  }
  0x70   :  { %1944 = vmatpush2.bf16.msra.mxu1 %v2750_v5  ;;  %1892 = vmatprep.subr.bf16.mxu0 %v2755_v6  ;;  %v2822_v5 = vld [vmem:[%s3943_s1 + $0x500] ss:$8 sps:$4 sm:$0xff]   ;;  %v2827_v6 = vld [vmem:[%s3943_s1 + $0x4f4] ss:$8 sps:$4 sm:$0xff]  }
  0x71   :  { %1945 = vmatprep.subr.bf16.mxu1 %v2758_v7  ;;  %v2830_v7 = vld [vmem:[%s3943_s1 + $0x5f4] ss:$8 sps:$4 sm:$0xff]  }
  0x73   :  { %1893 = vmatpush2.bf16.msra.mxu0 %v2753_v8  ;;  %v2825_v8 = vld [vmem:[%s3943_s1 + $0x4f0] ss:$8 sps:$4 sm:$0xff]  }
  0x74   :  { %1946 = vmatpush2.bf16.msra.mxu1 %v2756_v9  ;;  %1894 = vmatprep.subr.bf16.mxu0 %v2761_v10  ;;  %v2828_v9 = vld [vmem:[%s3943_s1 + $0x5f0] ss:$8 sps:$4 sm:$0xff]   ;;  %v2833_v10 = vld [vmem:[%s3943_s1 + $0x4e4] ss:$8 sps:$4 sm:$0xff]  }
  0x75   :  { %1947 = vmatprep.subr.bf16.mxu1 %v2764_v11  ;;  %v2836_v11 = vld [vmem:[%s3943_s1 + $0x5e4] ss:$8 sps:$4 sm:$0xff]  }
  0x77   :  { %1895 = vmatpush2.bf16.msra.mxu0 %v2759_v12  ;;  %v2831_v12 = vld [vmem:[%s3943_s1 + $0x4e0] ss:$8 sps:$4 sm:$0xff]  }
  0x78   :  { %1948 = vmatpush2.bf16.msra.mxu1 %v2762_v13  ;;  %1896 = vmatprep.subr.bf16.mxu0 %v2767_v14  ;;  %v2834_v13 = vld [vmem:[%s3943_s1 + $0x5e0] ss:$8 sps:$4 sm:$0xff]   ;;  %v2839_v14 = vld [vmem:[%s3943_s1 + $0x4d4] ss:$8 sps:$4 sm:$0xff]  }
  0x79   :  { %1949 = vmatprep.subr.bf16.mxu1 %v2770_v15  ;;  %v2842_v15 = vld [vmem:[%s3943_s1 + $0x5d4] ss:$8 sps:$4 sm:$0xff]  }
  0x7b   :  { %1897 = vmatpush2.bf16.msra.mxu0 %v2765_v16  ;;  %v2837_v16 = vld [vmem:[%s3943_s1 + $0x4d0] ss:$8 sps:$4 sm:$0xff]  }
  0x7c   :  { %1950 = vmatpush2.bf16.msra.mxu1 %v2768_v17  ;;  %1898 = vmatprep.subr.bf16.mxu0 %v2773_v18  ;;  %v2840_v17 = vld [vmem:[%s3943_s1 + $0x5d0] ss:$8 sps:$4 sm:$0xff]   ;;  %v2845_v18 = vld [vmem:[%s3943_s1 + $0x4c4] ss:$8 sps:$4 sm:$0xff]  }
  0x7d   :  { %1951 = vmatprep.subr.bf16.mxu1 %v2776_v19  ;;  %v2848_v19 = vld [vmem:[%s3943_s1 + $0x5c4] ss:$8 sps:$4 sm:$0xff]  }
  0x7f   :  { %1899 = vmatpush2.bf16.msra.mxu0 %v2771_v20  ;;  %v2843_v20 = vld [vmem:[%s3943_s1 + $0x4c0] ss:$8 sps:$4 sm:$0xff]  }
  0x80   :  { %1952 = vmatpush2.bf16.msra.mxu1 %v2774_v21  ;;  %1974 = vmatprep.subr.bf16.mxu0 %v2779_v22  ;;  %v2846_v21 = vld [vmem:[%s3943_s1 + $0x5c0] ss:$8 sps:$4 sm:$0xff]   ;;  %v2851_v22 = vld [vmem:[%s3943_s1 + $0x4b4] ss:$8 sps:$4 sm:$0xff]  }
  0x81   :  { %2027 = vmatprep.subr.bf16.mxu1 %v2782_v23  ;;  %v2854_v23 = vld [vmem:[%s3943_s1 + $0x5b4] ss:$8 sps:$4 sm:$0xff]  }
  0x82   :  { %1901 = vmatmul.mubr.bf16.vlgmr.msra.gmra.mxu0 %v2293_v28  ;;  %v2855_v28 = vld [vmem:[%s3943_s1 + $0x4a0] ss:$8 sps:$4 sm:$0xff]  }
  0x83   :  { %1954 = vmatmul.mubr.bf16.vlgmr.msra.gmra.mxu1 %v2295_v29  ;;  %1975 = vmatpush1.bf16.msra.mxu0 %v2777_v24  ;;  %v2849_v24 = vld [vmem:[%s3943_s1 + $0x4b0] ss:$8 sps:$4 sm:$0xff]   ;;  %v2858_v29 = vld [vmem:[%s3943_s1 + $0x5a0] ss:$8 sps:$4 sm:$0xff]  }
  0x84   :  { %2028 = vmatpush1.bf16.msra.mxu1 %v2780_v25  ;;  %1976 = vmatprep.subr.bf16.mxu0 %v2785_v32  ;;  %v2852_v25 = vld [vmem:[%s3943_s1 + $0x5b0] ss:$8 sps:$4 sm:$0xff]  }
  0x85   :  { %2029 = vmatprep.subr.bf16.mxu1 %v2788_v33  ;;  %1910 = vmatprep.mubr.bf16.mxu0 %v2310_v34  ;;  %v2861_v32 = vld [vmem:[%s3943_s1 + $0x490] ss:$8 sps:$4 sm:$0xff]   ;;  %v2869_v34 = vld [vmem:[%s3943_s1 + $0x484] ss:$8 sps:$4 sm:$0xff]  }
  0x86   :  { %1963 = vmatprep.mubr.bf16.mxu1 %v2312_v35  ;;  %v2864_v33 = vld [vmem:[%s3943_s1 + $0x590] ss:$8 sps:$4 sm:$0xff]   ;;  %v2872_v35 = vld [vmem:[%s3943_s1 + $0x584] ss:$8 sps:$4 sm:$0xff]  }
  0x87   :  { %1977 = vmatpush1.bf16.msra.mxu0 %v2783_v36  ;;  %v2867_v36 = vld [vmem:[%s3943_s1 + $0x480] ss:$8 sps:$4 sm:$0xff]  }
  0x88   :  { %2030 = vmatpush1.bf16.msra.mxu1 %v2786_v37  ;;  %1978 = vmatprep.subr.bf16.mxu0 %v2791_v38  ;;  %v2870_v37 = vld [vmem:[%s3943_s1 + $0x580] ss:$8 sps:$4 sm:$0xff]   ;;  %v2875_v38 = vld [vmem:[%s3943_s1 + $0x674] ss:$8 sps:$4 sm:$0xff]  }
  0x89   :  { %2031 = vmatprep.subr.bf16.mxu1 %v2794_v39  ;;  %v2878_v39 = vld [vmem:[%s3943_s1 + $0x774] ss:$8 sps:$4 sm:$0xff]  }
  0x8a   :  { %1911 = vmatmul.mubr.bf16.gmra.mxu0 %v2309_v44  ;;  %v2299_v44 = vcombine.low %v3486_v46, %v3491_v47  ;;  %v2881_v46 = vld [vmem:[%s3943_s1 + $0x664] ss:$8 sps:$4 sm:$0xff]  }
  0x8b   :  { %1964 = vmatmul.mubr.bf16.gmra.mxu1 %v2311_v45  ;;  %1979 = vmatpush1.bf16.msra.mxu0 %v2789_v40  ;;  %v54_v40 = vld [vmem:[%s3944_s0 + $0xa0] sm:$0xff] }
  0x8c   :  { %2032 = vmatpush1.bf16.msra.mxu1 %v2792_v41  ;;  %1980 = vmatprep.subr.bf16.mxu0 %v2797_v48  ;;  %v2297_v41 = vcombine.low %v3476_v42, %v3481_v43  ;;  %v62_v45 = vld [vmem:[%s3944_s0 + $0xe0] sm:$0xff]  ;;  %v55_v48 = vld [vmem:[%s3944_s0 + $0xa8] sm:$0xff]  ;;  %v2873_v42 = vld [vmem:[%s3943_s1 + $0x670] ss:$8 sps:$4 sm:$0xff]  }
  0x8d   :  { %2033 = vmatprep.subr.bf16.mxu1 %v2800_v49  ;;  %2006 = vmatprep.mubr.bf16.mxu0 %v2298_v50  ;;  %v63_v49 = vld [vmem:[%s3944_s0 + $0xe8] sm:$0xff]  ;;  %v2876_v43 = vld [vmem:[%s3943_s1 + $0x770] ss:$8 sps:$4 sm:$0xff]   ;;  %v2314_v50 = vcombine.high %v54_v40, %v62_v45 }
  0x8e   :  { %2059 = vmatprep.mubr.bf16.mxu1 %v2300_v51  ;;  %v2884_v47 = vld [vmem:[%s3943_s1 + $0x764] ss:$8 sps:$4 sm:$0xff]   ;;  %v2316_v51 = vcombine.high %v55_v48, %v63_v49 }
  0x8f   :  { %1981 = vmatpush1.bf16.msra.mxu0 %v2795_v52  ;;  %v2879_v52 = vld [vmem:[%s3943_s1 + $0x660] ss:$8 sps:$4 sm:$0xff]  }
  0x90   :  { %2034 = vmatpush1.bf16.msra.mxu1 %v2798_v53  ;;  %1982 = vmatprep.subr.bf16.mxu0 %v2803_v54  ;;  %v2882_v53 = vld [vmem:[%s3943_s1 + $0x760] ss:$8 sps:$4 sm:$0xff]   ;;  %v2887_v54 = vld [vmem:[%s3943_s1 + $0x654] ss:$8 sps:$4 sm:$0xff]  }
  0x91   :  { %2035 = vmatprep.subr.bf16.mxu1 %v2806_v55  ;;  %v2890_v55 = vld [vmem:[%s3943_s1 + $0x754] ss:$8 sps:$4 sm:$0xff]  }
  0x93   :  { %1983 = vmatpush1.bf16.msra.mxu0 %v2801_v56  ;;  %v3702_v56 = vld [vmem:[%s3944_s0 + $0x30] sm:$0xff] }
  0x94   :  { %2036 = vmatpush1.bf16.msra.mxu1 %v2804_v57  ;;  %1984 = vmatprep.subr.bf16.mxu0 %v2809_v58  ;;  %v2313_v57 = vcombine.low %v54_v40, %v62_v45  ;;  %v2315_v58 = vcombine.low %v55_v48, %v63_v49  ;;  %v2945_v40 = vld [vmem:[%s3943_s1 + $0x6b0] ss:$8 sps:$4 sm:$0xff]   ;;  %v2956_v45 = vld [vmem:[%s3943_s1 + $0x7a4] ss:$8 sps:$4 sm:$0xff]   ;;  %v2951_v48 = vld [vmem:[%s3943_s1 + $0x6a0] ss:$8 sps:$4 sm:$0xff]  }
  0x95   :  { %2037 = vmatprep.subr.bf16.mxu1 %v2812_v59  ;;  %v3707_v59 = vld [vmem:[%s3944_s0 + $0x70] sm:$0xff]  ;;  %v2954_v49 = vld [vmem:[%s3943_s1 + $0x7a0] ss:$8 sps:$4 sm:$0xff]  }
  0x97   :  { %1985 = vmatpush1.bf16.msra.mxu0 %v2807_v60  ;;  %v3712_v60 = vld [vmem:[%s3944_s0 + $0x38] sm:$0xff] }
  0x98   :  { %2038 = vmatpush1.bf16.msra.mxu1 %v2810_v61  ;;  %1986 = vmatprep.subr.bf16.mxu0 %v2815_v62  ;;  %v3717_v61 = vld [vmem:[%s3944_s0 + $0x78] sm:$0xff] }
  0x99   :  { %2039 = vmatprep.subr.bf16.mxu1 %v2818_v63  ;;  %v2885_v62 = vld [vmem:[%s3943_s1 + $0x650] ss:$8 sps:$4 sm:$0xff]  }
  0x9a   :  { %v2888_v63 = vld [vmem:[%s3943_s1 + $0x750] ss:$8 sps:$4 sm:$0xff]  }
  0x9b   :  { %1987 = vmatpush1.bf16.msra.mxu0 %v2813_v0  ;;  %v2893_v0 = vld [vmem:[%s3943_s1 + $0x644] ss:$8 sps:$4 sm:$0xff]  }
  0x9c   :  { %2040 = vmatpush1.bf16.msra.mxu1 %v2816_v1  ;;  %1988 = vmatprep.subr.bf16.mxu0 %v2821_v2  ;;  %v2896_v1 = vld [vmem:[%s3943_s1 + $0x744] ss:$8 sps:$4 sm:$0xff]   ;;  %v2302_v2 = vcombine.high %v3702_v56, %v3707_v59 }
  0x9d   :  { %2041 = vmatprep.subr.bf16.mxu1 %v2824_v3  ;;  %v2304_v3 = vcombine.high %v3712_v60, %v3717_v61 }
  0x9f   :  { %1989 = vmatpush1.bf16.msra.mxu0 %v2819_v4  ;;  %v2891_v4 = vld [vmem:[%s3943_s1 + $0x640] ss:$8 sps:$4 sm:$0xff]  }
  0xa0   :  { %2042 = vmatpush1.bf16.msra.mxu1 %v2822_v5  ;;  %1990 = vmatprep.subr.bf16.mxu0 %v2827_v6  ;;  %v2894_v5 = vld [vmem:[%s3943_s1 + $0x740] ss:$8 sps:$4 sm:$0xff]   ;;  %v2899_v6 = vld [vmem:[%s3943_s1 + $0x634] ss:$8 sps:$4 sm:$0xff]  }
  0xa1   :  { %2043 = vmatprep.subr.bf16.mxu1 %v2830_v7  ;;  %v2902_v7 = vld [vmem:[%s3943_s1 + $0x734] ss:$8 sps:$4 sm:$0xff]  }
  0xa3   :  { %1991 = vmatpush2.bf16.msra.mxu0 %v2825_v8  ;;  %v2897_v8 = vld [vmem:[%s3943_s1 + $0x630] ss:$8 sps:$4 sm:$0xff]  }
  0xa4   :  { %2044 = vmatpush2.bf16.msra.mxu1 %v2828_v9  ;;  %1992 = vmatprep.subr.bf16.mxu0 %v2833_v10  ;;  %v2900_v9 = vld [vmem:[%s3943_s1 + $0x730] ss:$8 sps:$4 sm:$0xff]   ;;  %v2905_v10 = vld [vmem:[%s3943_s1 + $0x624] ss:$8 sps:$4 sm:$0xff]  }
  0xa5   :  { %2045 = vmatprep.subr.bf16.mxu1 %v2836_v11  ;;  %v2908_v11 = vld [vmem:[%s3943_s1 + $0x724] ss:$8 sps:$4 sm:$0xff]  }
  0xa7   :  { %1993 = vmatpush2.bf16.msra.mxu0 %v2831_v12  ;;  %v2903_v12 = vld [vmem:[%s3943_s1 + $0x620] ss:$8 sps:$4 sm:$0xff]  }
  0xa8   :  { %2046 = vmatpush2.bf16.msra.mxu1 %v2834_v13  ;;  %1994 = vmatprep.subr.bf16.mxu0 %v2839_v14  ;;  %v2906_v13 = vld [vmem:[%s3943_s1 + $0x720] ss:$8 sps:$4 sm:$0xff]   ;;  %v2911_v14 = vld [vmem:[%s3943_s1 + $0x614] ss:$8 sps:$4 sm:$0xff]  }
  0xa9   :  { %2047 = vmatprep.subr.bf16.mxu1 %v2842_v15  ;;  %v2914_v15 = vld [vmem:[%s3943_s1 + $0x714] ss:$8 sps:$4 sm:$0xff]  }
  0xab   :  { %1995 = vmatpush2.bf16.msra.mxu0 %v2837_v16  ;;  %v2909_v16 = vld [vmem:[%s3943_s1 + $0x610] ss:$8 sps:$4 sm:$0xff]  }
  0xac   :  { %2048 = vmatpush2.bf16.msra.mxu1 %v2840_v17  ;;  %1996 = vmatprep.subr.bf16.mxu0 %v2845_v18  ;;  %v2912_v17 = vld [vmem:[%s3943_s1 + $0x710] ss:$8 sps:$4 sm:$0xff]   ;;  %v2917_v18 = vld [vmem:[%s3943_s1 + $0x604] ss:$8 sps:$4 sm:$0xff]  }
  0xad   :  { %2049 = vmatprep.subr.bf16.mxu1 %v2848_v19  ;;  %v2920_v19 = vld [vmem:[%s3943_s1 + $0x704] ss:$8 sps:$4 sm:$0xff]  }
  0xaf   :  { %1997 = vmatpush2.bf16.msra.mxu0 %v2843_v20  ;;  %v2915_v20 = vld [vmem:[%s3943_s1 + $0x600] ss:$8 sps:$4 sm:$0xff]  }
  0xb0   :  { %2050 = vmatpush2.bf16.msra.mxu1 %v2846_v21  ;;  %1998 = vmatprep.subr.bf16.mxu0 %v2851_v22  ;;  %v2918_v21 = vld [vmem:[%s3943_s1 + $0x700] ss:$8 sps:$4 sm:$0xff]   ;;  %v2923_v22 = vld [vmem:[%s3943_s1 + $0x6f4] ss:$8 sps:$4 sm:$0xff]  }
  0xb1   :  { %2051 = vmatprep.subr.bf16.mxu1 %v2854_v23  ;;  %v2926_v23 = vld [vmem:[%s3943_s1 + $0x7f4] ss:$8 sps:$4 sm:$0xff]  }
  0xb3   :  { %1999 = vmatpush2.bf16.msra.mxu0 %v2849_v24  ;;  %v2921_v24 = vld [vmem:[%s3943_s1 + $0x6f0] ss:$8 sps:$4 sm:$0xff]  }
  0xb4   :  { %2052 = vmatpush2.bf16.msra.mxu1 %v2852_v25  ;;  %2000 = vmatprep.subr.bf16.mxu0 %v2857_v26  ;;  %v2924_v25 = vld [vmem:[%s3943_s1 + $0x7f0] ss:$8 sps:$4 sm:$0xff]   ;;  %v2929_v26 = vld [vmem:[%s3943_s1 + $0x6e4] ss:$8 sps:$4 sm:$0xff]  }
  0xb5   :  { %2053 = vmatprep.subr.bf16.mxu1 %v2860_v27  ;;  %v2932_v27 = vld [vmem:[%s3943_s1 + $0x7e4] ss:$8 sps:$4 sm:$0xff]  }
  0xb7   :  { %2001 = vmatpush2.bf16.msra.mxu0 %v2855_v28  ;;  %v2927_v28 = vld [vmem:[%s3943_s1 + $0x6e0] ss:$8 sps:$4 sm:$0xff]  }
  0xb8   :  { %2054 = vmatpush2.bf16.msra.mxu1 %v2858_v29  ;;  %2002 = vmatprep.subr.bf16.mxu0 %v2863_v30  ;;  %v2930_v29 = vld [vmem:[%s3943_s1 + $0x7e0] ss:$8 sps:$4 sm:$0xff]   ;;  %v2935_v30 = vld [vmem:[%s3943_s1 + $0x6d4] ss:$8 sps:$4 sm:$0xff]  }
  0xb9   :  { %2055 = vmatprep.subr.bf16.mxu1 %v2866_v31  ;;  %v2938_v31 = vld [vmem:[%s3943_s1 + $0x7d4] ss:$8 sps:$4 sm:$0xff]  }
  0xbb   :  { %2003 = vmatpush2.bf16.msra.mxu0 %v2861_v32  ;;  %v2933_v32 = vld [vmem:[%s3943_s1 + $0x6d0] ss:$8 sps:$4 sm:$0xff]  }
  0xbc   :  { %2056 = vmatpush2.bf16.msra.mxu1 %v2864_v33  ;;  %2004 = vmatprep.subr.bf16.mxu0 %v2869_v34  ;;  %v2936_v33 = vld [vmem:[%s3943_s1 + $0x7d0] ss:$8 sps:$4 sm:$0xff]   ;;  %v2941_v34 = vld [vmem:[%s3943_s1 + $0x6c4] ss:$8 sps:$4 sm:$0xff]  }
  0xbd   :  { %2057 = vmatprep.subr.bf16.mxu1 %v2872_v35  ;;  %v2944_v35 = vld [vmem:[%s3943_s1 + $0x7c4] ss:$8 sps:$4 sm:$0xff]  }
  0xbf   :  { %2005 = vmatpush2.bf16.msra.mxu0 %v2867_v36  ;;  %v2939_v36 = vld [vmem:[%s3943_s1 + $0x6c0] ss:$8 sps:$4 sm:$0xff]  }
  0xc0   :  { %2058 = vmatpush2.bf16.msra.mxu1 %v2870_v37  ;;  %2080 = vmatprep.subr.bf16.mxu0 %v2875_v38  ;;  %v2942_v37 = vld [vmem:[%s3943_s1 + $0x7c0] ss:$8 sps:$4 sm:$0xff]   ;;  %v2947_v38 = vld [vmem:[%s3943_s1 + $0x6b4] ss:$8 sps:$4 sm:$0xff]  }
  0xc1   :  { %2133 = vmatprep.subr.bf16.mxu1 %v2878_v39  ;;  %v2950_v39 = vld [vmem:[%s3943_s1 + $0x7b4] ss:$8 sps:$4 sm:$0xff]  }
  0xc2   :  { %2007 = vmatmul.mubr.bf16.vlgmr.msra.gmra.mxu0 %v2297_v41  ;;  %v2948_v41 = vld [vmem:[%s3943_s1 + $0x7b0] ss:$8 sps:$4 sm:$0xff]  }
  0xc3   :  { %2060 = vmatmul.mubr.bf16.vlgmr.msra.gmra.mxu1 %v2299_v44  ;;  %2081 = vmatpush1.bf16.msra.mxu0 %v2873_v42  ;;  %v2953_v44 = vld [vmem:[%s3943_s1 + $0x6a4] ss:$8 sps:$4 sm:$0xff]   ;;  %v2959_v42 = vld [vmem:[%s3943_s1 + $0x694] ss:$8 sps:$4 sm:$0xff]  }
  0xc4   :  { %2134 = vmatpush1.bf16.msra.mxu1 %v2876_v43  ;;  %2082 = vmatprep.subr.bf16.mxu0 %v2881_v46  ;;  %v2962_v43 = vld [vmem:[%s3943_s1 + $0x794] ss:$8 sps:$4 sm:$0xff]   ;;  %v2957_v46 = vld [vmem:[%s3943_s1 + $0x690] ss:$8 sps:$4 sm:$0xff]  }
  0xc5   :  { %2135 = vmatprep.subr.bf16.mxu1 %v2884_v47  ;;  %2016 = vmatprep.mubr.bf16.mxu0 %v2314_v50  ;;  %v2960_v47 = vld [vmem:[%s3943_s1 + $0x790] ss:$8 sps:$4 sm:$0xff]   ;;  %v2965_v50 = vld [vmem:[%s3943_s1 + $0x684] ss:$8 sps:$4 sm:$0xff]  }
  0xc6   :  { %2069 = vmatprep.mubr.bf16.mxu1 %v2316_v51  ;;  %v2968_v51 = vld [vmem:[%s3943_s1 + $0x784] ss:$8 sps:$4 sm:$0xff]  }
  0xc7   :  { %2083 = vmatpush1.bf16.msra.mxu0 %v2879_v52  ;;  %v2963_v52 = vld [vmem:[%s3943_s1 + $0x680] ss:$8 sps:$4 sm:$0xff]  }
  0xc8   :  { %2136 = vmatpush1.bf16.msra.mxu1 %v2882_v53  ;;  %2084 = vmatprep.subr.bf16.mxu0 %v2887_v54  ;;  %v2966_v53 = vld [vmem:[%s3943_s1 + $0x780] ss:$8 sps:$4 sm:$0xff]   ;;  %v56_v54 = vld [vmem:[%s3944_s0 + $0xb0] sm:$0xff] }
  0xc9   :  { %2137 = vmatprep.subr.bf16.mxu1 %v2890_v55  ;;  %v64_v55 = vld [vmem:[%s3944_s0 + $0xf0] sm:$0xff] }
  0xca   :  { %2017 = vmatmul.mubr.bf16.gmra.mxu0 %v2313_v57  ;;  %v57_v57 = vld [vmem:[%s3944_s0 + $0xb8] sm:$0xff] }
  0xcb   :  { %2070 = vmatmul.mubr.bf16.gmra.mxu1 %v2315_v58  ;;  %2085 = vmatpush1.bf16.msra.mxu0 %v2885_v62  ;;  %v65_v58 = vld [vmem:[%s3944_s0 + $0xf8] sm:$0xff]  ;;  %v2301_v62 = vcombine.low %v3702_v56, %v3707_v59 }
  0xcc   :  { %2138 = vmatpush1.bf16.msra.mxu1 %v2888_v63  ;;  %2086 = vmatprep.subr.bf16.mxu0 %v2893_v0  ;;  %v2303_v63 = vcombine.low %v3712_v60, %v3717_v61  ;;  %v2318_v0 = vcombine.high %v56_v54, %v64_v55 }
  0xcd   :  { %2139 = vmatprep.subr.bf16.mxu1 %v2896_v1  ;;  %2112 = vmatprep.mubr.bf16.mxu0 %v2302_v2  ;;  %v2320_v1 = vcombine.high %v57_v57, %v65_v58  ;;  %v2317_v2 = vcombine.low %v56_v54, %v64_v55 }
  0xce   :  { %2165 = vmatprep.mubr.bf16.mxu1 %v2304_v3  ;;  %v2319_v3 = vcombine.low %v57_v57, %v65_v58 }
  0xcf   :  { %2087 = vmatpush1.bf16.msra.mxu0 %v2891_v4 }
  0xd0   :  { %2140 = vmatpush1.bf16.msra.mxu1 %v2894_v5  ;;  %2088 = vmatprep.subr.bf16.mxu0 %v2899_v6 }
  0xd1   :  { %2141 = vmatprep.subr.bf16.mxu1 %v2902_v7 }
  0xd3   :  { %2089 = vmatpush1.bf16.msra.mxu0 %v2897_v8 }
  0xd4   :  { %2142 = vmatpush1.bf16.msra.mxu1 %v2900_v9  ;;  %2090 = vmatprep.subr.bf16.mxu0 %v2905_v10 }
  0xd5   :  { %2143 = vmatprep.subr.bf16.mxu1 %v2908_v11 }
  0xd7   :  { %2091 = vmatpush1.bf16.msra.mxu0 %v2903_v12 }
  0xd8   :  { %2144 = vmatpush1.bf16.msra.mxu1 %v2906_v13  ;;  %2092 = vmatprep.subr.bf16.mxu0 %v2911_v14 }
  0xd9   :  { %2145 = vmatprep.subr.bf16.mxu1 %v2914_v15 }
  0xdb   :  { %2093 = vmatpush1.bf16.msra.mxu0 %v2909_v16 }
  0xdc   :  { %2146 = vmatpush1.bf16.msra.mxu1 %v2912_v17  ;;  %2094 = vmatprep.subr.bf16.mxu0 %v2917_v18 }
  0xdd   :  { %2147 = vmatprep.subr.bf16.mxu1 %v2920_v19 }
  0xdf   :  { %2095 = vmatpush1.bf16.msra.mxu0 %v2915_v20 }
  0xe0   :  { %2148 = vmatpush1.bf16.msra.mxu1 %v2918_v21  ;;  %2096 = vmatprep.subr.bf16.mxu0 %v2923_v22 }
  0xe1   :  { %2149 = vmatprep.subr.bf16.mxu1 %v2926_v23 }
  0xe3   :  { %2097 = vmatpush2.bf16.msra.mxu0 %v2921_v24 }
  0xe4   :  { %2150 = vmatpush2.bf16.msra.mxu1 %v2924_v25  ;;  %2098 = vmatprep.subr.bf16.mxu0 %v2929_v26 }
  0xe5   :  { %2151 = vmatprep.subr.bf16.mxu1 %v2932_v27 }
  0xe7   :  { %2099 = vmatpush2.bf16.msra.mxu0 %v2927_v28 }
  0xe8   :  { %2152 = vmatpush2.bf16.msra.mxu1 %v2930_v29  ;;  %2100 = vmatprep.subr.bf16.mxu0 %v2935_v30 }
  0xe9   :  { %2153 = vmatprep.subr.bf16.mxu1 %v2938_v31 }
  0xeb   :  { %2101 = vmatpush2.bf16.msra.mxu0 %v2933_v32 }
  0xec   :  { %2154 = vmatpush2.bf16.msra.mxu1 %v2936_v33  ;;  %2102 = vmatprep.subr.bf16.mxu0 %v2941_v34 }
  0xed   :  { %2155 = vmatprep.subr.bf16.mxu1 %v2944_v35 }
  0xef   :  { %2103 = vmatpush2.bf16.msra.mxu0 %v2939_v36 }
  0xf0   :  { %2156 = vmatpush2.bf16.msra.mxu1 %v2942_v37  ;;  %2104 = vmatprep.subr.bf16.mxu0 %v2947_v38 }
  0xf1   :  { %2157 = vmatprep.subr.bf16.mxu1 %v2950_v39 }
  0xf3   :  { %2105 = vmatpush2.bf16.msra.mxu0 %v2945_v40 }
  0xf4   :  { %2158 = vmatpush2.bf16.msra.mxu1 %v2948_v41  ;;  %2106 = vmatprep.subr.bf16.mxu0 %v2953_v44 }
  0xf5   :  { %2159 = vmatprep.subr.bf16.mxu1 %v2956_v45 }
  0xf7   :  { %2107 = vmatpush2.bf16.msra.mxu0 %v2951_v48 }
  0xf8   :  { %2160 = vmatpush2.bf16.msra.mxu1 %v2954_v49  ;;  %2108 = vmatprep.subr.bf16.mxu0 %v2959_v42  ;;  %v2215_v49 = vlaneseq }
  0xf9   :  { %2161 = vmatprep.subr.bf16.mxu1 %v2962_v43 }
  0xfb   :  { %2109 = vmatpush2.bf16.msra.mxu0 %v2957_v46 }
  0xfc   :  { %2162 = vmatpush2.bf16.msra.mxu1 %v2960_v47  ;;  %2110 = vmatprep.subr.bf16.mxu0 %v2965_v50 }
  0xfd   :  { %2163 = vmatprep.subr.bf16.mxu1 %v2968_v51 }
  0xff   :  { %2111 = vmatpush2.bf16.msra.mxu0 %v2963_v52  ;;  %v2216_v52 = vshrl.u32 %v2215_v49, 7 }
 0x100   :  { %2164 = vmatpush2.bf16.msra.mxu1 %v2966_v53 }
 0x102   :  { %2113 = vmatmul.mubr.bf16.vlgmr.msra.gmra.mxu0 %v2301_v62  ;;  %v1796_v4 = vpop.f32.mrf.mxu0 }
 0x103   :  { %2166 = vmatmul.mubr.bf16.vlgmr.msra.gmra.mxu1 %v2303_v63  ;;  %2122 = vmatprep.mubr.bf16.mxu0 %v2318_v0  ;;  %v1849_v5 = vpop.f32.mrf.mxu1 }
 0x104   :  { %2175 = vmatprep.mubr.bf16.mxu1 %v2320_v1  ;;  %v1798_v6 = vpop.f32.mrf.mxu0  ;;  %v1850_v44 = vadd.f32 %v1849_v5, %v1796_v4 }
 0x105   :  { %v1851_v7 = vpop.f32.mrf.mxu1 }
 0x106   :  { %v1800_v56 = vpop.f32.mrf.mxu0  ;;  %v1852_v45 = vadd.f32 %v1851_v7, %v1798_v6 }
 0x107   :  { %v1853_v59 = vpop.f32.mrf.mxu1 }
 0x108   :  { %v1802_v8 = vpop.f32.mrf.mxu0  ;;  %v1854_v46 = vadd.f32 %v1853_v59, %v1800_v56  ;;  %v2213_v56 = vld [vmem:[%s3945_s2] sm:$0x3] }
 0x109   :  { %v1855_v61 = vpop.f32.mrf.mxu1 }
 0x10a   :  { %2123 = vmatmul.mubr.bf16.gmra.mxu0 %v2317_v2  ;;  %v1806_v60 = vpop.f32.mrf.mxu0  ;;  %v1856_v53 = vadd.f32 %v1855_v61, %v1802_v8 }
 0x10b   :  { %2176 = vmatmul.mubr.bf16.gmra.mxu1 %v2319_v3  ;;  %v1859_v9 = vpop.f32.mrf.mxu1  ;;  %v2217_v3 = vsub.s32 0, %v2216_v52 }
 0x10c   :  { %v1808_v10 = vpop.f32.mrf.mxu0  ;;  %v1860_v62 = vadd.f32 %v1859_v9, %v1806_v60 }
 0x10d   :  { %v1861_v11 = vpop.f32.mrf.mxu1 }
 0x10e   :  { %v1810_v12 = vpop.f32.mrf.mxu0  ;;  %v1862_v63 = vadd.f32 %v1861_v11, %v1808_v10 }
 0x10f   :  { %v1863_v13 = vpop.f32.mrf.mxu1 }
 0x110   :  { %v1812_v14 = vpop.f32.mrf.mxu0  ;;  %v1864_v59 = vadd.f32 %v1863_v13, %v1810_v12 }
 0x111   :  { %v1865_v16 = vpop.f32.mrf.mxu1 }
 0x142   :  { %v1902_v15 = vpop.f32.mrf.mxu0 }
 0x143   :  { %v1955_v17 = vpop.f32.mrf.mxu1  ;;  %v1903_v48 = vadd.f32 %v1902_v15, %v1850_v44  ;;  %v2221_v15 = vsub.s32 1, %v2216_v52 }
 0x144   :  { %v1904_v18 = vpop.f32.mrf.mxu0 }
 0x145   :  { %v1957_v19 = vpop.f32.mrf.mxu1  ;;  %v1905_v47 = vadd.f32 %v1904_v18, %v1852_v45  ;;  %v1956_v50 = vadd.f32 %v1955_v17, %v1903_v48  ;;  %v1866_v17 = vadd.f32 %v1865_v16, %v1812_v14 }
 0x146   :  { %v1906_v20 = vpop.f32.mrf.mxu0 }
 0x147   :  { %v1959_v21 = vpop.f32.mrf.mxu1  ;;  %v1907_v51 = vadd.f32 %v1906_v20, %v1854_v46  ;;  %v1958_v57 = vadd.f32 %v1957_v19, %v1905_v47  ;;  %v3914_v20 = vrot.slane %v2213_v56, %v2217_v3 }
 0x148   :  { %v1908_v22 = vpop.f32.mrf.mxu0 }
 0x149   :  { %v1961_v23 = vpop.f32.mrf.mxu1  ;;  %v1909_v0 = vadd.f32 %v1908_v22, %v1856_v53  ;;  %v1960_v1 = vadd.f32 %v1959_v21, %v1907_v51 }
 0x14a   :  { %v1912_v24 = vpop.f32.mrf.mxu0 }
 0x14b   :  { %v1965_v25 = vpop.f32.mrf.mxu1  ;;  %v1913_v4 = vadd.f32 %v1912_v24, %v1860_v62  ;;  %v1962_v60 = vadd.f32 %v1961_v23, %v1909_v0 }
 0x14c   :  { %v1914_v26 = vpop.f32.mrf.mxu0 }
 0x14d   :  { %v1967_v27 = vpop.f32.mrf.mxu1  ;;  %v1915_v5 = vadd.f32 %v1914_v26, %v1862_v63  ;;  %v1966_v21 = vadd.f32 %v1965_v25, %v1913_v4 }
 0x14e   :  { %v1916_v28 = vpop.f32.mrf.mxu0 }
 0x14f   :  { %v3901_v29 = vpop.f32.mrf.mxu1  ;;  %v1917_v11 = vadd.f32 %v1916_v28, %v1864_v59  ;;  %v1968_v22 = vadd.f32 %v1967_v27, %v1915_v5 }
 0x150   :  { %v1918_v30 = vpop.f32.mrf.mxu0 }
 0x151   :  { %v3903_v31 = vpop.f32.mrf.mxu1  ;;  %v1919_v24 = vadd.f32 %v1918_v30, %v1866_v17  ;;  %v1970_v28 = vadd.f32 %v3901_v29, %v1917_v11 }
 0x153   :  { %v1972_v27 = vadd.f32 %v3903_v31, %v1919_v24 }
 0x182   :  { %v2008_v32 = vpop.f32.mrf.mxu0 }
 0x183   :  { %v2061_v33 = vpop.f32.mrf.mxu1  ;;  %v2009_v58 = vadd.f32 %v2008_v32, %v1956_v50 }
 0x184   :  { %v2010_v34 = vpop.f32.mrf.mxu0 }
 0x185   :  { %v2063_v35 = vpop.f32.mrf.mxu1  ;;  %v2011_v2 = vadd.f32 %v2010_v34, %v1958_v57  ;;  %v2062_v8 = vadd.f32 %v2061_v33, %v2009_v58  ;;  %v3916_v33 = vrot.slane %v2213_v56, %v2221_v15 }
 0x186   :  { %v2012_v36 = vpop.f32.mrf.mxu0 }
 0x187   :  { %v2065_v37 = vpop.f32.mrf.mxu1  ;;  %v2013_v61 = vadd.f32 %v2012_v36, %v1960_v1  ;;  %v2064_v18 = vadd.f32 %v2063_v35, %v2011_v2 }
 0x188   :  { %v2014_v38 = vpop.f32.mrf.mxu0 }
 0x189   :  { %v2067_v39 = vpop.f32.mrf.mxu1  ;;  %v2015_v26 = vadd.f32 %v2014_v38, %v1962_v60  ;;  %v2066_v44 = vadd.f32 %v2065_v37, %v2013_v61 }
 0x18a   :  { %v2018_v40 = vpop.f32.mrf.mxu0 }
 0x18b   :  { %v3905_v41 = vpop.f32.mrf.mxu1  ;;  %v2019_v14 = vadd.f32 %v2018_v40, %v1966_v21  ;;  %v2068_v30 = vadd.f32 %v2067_v39, %v2015_v26 }
 0x18c   :  { %v2020_v42 = vpop.f32.mrf.mxu0 }
 0x18d   :  { %v2073_v43 = vpop.f32.mrf.mxu1  ;;  %v2021_v16 = vadd.f32 %v2020_v42, %v1968_v22  ;;  %v2072_v40 = vadd.f32 %v3905_v41, %v2019_v14 }
 0x18e   :  { %v2022_v54 = vpop.f32.mrf.mxu0 }
 0x18f   :  { %v3907_v55 = vpop.f32.mrf.mxu1  ;;  %v2023_v37 = vadd.f32 %v2022_v54, %v1970_v28  ;;  %v2074_v42 = vadd.f32 %v2073_v43, %v2021_v16 }
 0x190   :  { %v2024_v6 = vpop.f32.mrf.mxu0 }
 0x191   :  { %v3909_v7 = vpop.f32.mrf.mxu1  ;;  %v2025_v52 = vadd.f32 %v2024_v6, %v1972_v27  ;;  %v2076_v62 = vadd.f32 %v3907_v55, %v2023_v37 }
 0x193   :  { %v2078_v5 = vadd.f32 %v3909_v7, %v2025_v52 }
 0x1c2   :  { %v2114_v9 = vpop.f32.mrf.mxu0 }
 0x1c3   :  { %v2167_v10 = vpop.f32.mrf.mxu1  ;;  %v2115_v19 = vadd.f32 %v2114_v9, %v2062_v8 }
 0x1c4   :  { %v2116_v32 = vpop.f32.mrf.mxu0 }
 0x1c5   :  { %v2169_v34 = vpop.f32.mrf.mxu1  ;;  %v2168_v12 = vadd.f32 %v2167_v10, %v2115_v19  ;;  %v2117_v13 = vadd.f32 %v2116_v32, %v2064_v18 }
 0x1c6   :  { %v2118_v23 = vpop.f32.mrf.mxu0 }
 0x1c7   :  { %v2171_v36 = vpop.f32.mrf.mxu1  ;;  %v2225_v35 = vadd.f32 %v3914_v20, %v2168_v12  ;;  %v2170_v45 = vadd.f32 %v2169_v34, %v2117_v13  ;;  %v2119_v25 = vadd.f32 %v2118_v23, %v2066_v44 }
 0x1c8   :  { %v2120_v38 = vpop.f32.mrf.mxu0 }
 0x1c9   :  { %v2173_v48 = vpop.f32.mrf.mxu1  ;;  %v2241_v49 = vmul.f32 0.2, %v2225_v35  ;;  %v2226_v46 = vadd.f32 %v3916_v33, %v2170_v45  ;;  %v2172_v47 = vadd.f32 %v2171_v36, %v2119_v25  ;;  %vm2233_vm0 = vcmp.ge.f32.partialorder %v2225_v35, 0.0 }
 0x1ca   :  { %v2121_v50 = vadd.f32 %v2120_v38, %v2068_v30  ;;  %v2124_v29 = vpop.f32.mrf.mxu0 }
 0x1cb   :  { %v2177_v51 = vpop.f32.mrf.mxu1  ;;  %vm2234_vm1 = vcmp.ge.f32.partialorder %v2226_v46, 0.0  ;;  %v2242_v53 = vmul.f32 0.2, %v2226_v46  ;;  %v2227_v31 = vadd.f32 %v3914_v20, %v2172_v47  ;;  %v2125_v57 = vadd.f32 %v2124_v29, %v2072_v40 }
 0x1cc   :  { %v2174_v39 = vadd.f32 %v2173_v48, %v2121_v50  ;;  %v2126_v58 = vpop.f32.mrf.mxu0  ;;  %v2249_v63 = vsel %vm2233_vm0, %v2225_v35, %v2241_v49 }
 0x1cd   :  { %v2179_v54 = vpop.f32.mrf.mxu1  ;;  %v2250_v0 = vsel %vm2234_vm1, %v2226_v46, %v2242_v53  ;;  %v2127_v1 = vadd.f32 %v2126_v58, %v2074_v42  ;;  %v2243_v43 = vmul.f32 0.2, %v2227_v31  ;;  %v2178_v3 = vadd.f32 %v2177_v51, %v2125_v57 }
 0x1ce   :  { %v2581_v41 = vpack.c.bf16 %v2250_v0, %v2249_v63  ;;  %v2228_v2 = vadd.f32 %v3916_v33, %v2174_v39  ;;  %v2128_v4 = vpop.f32.mrf.mxu0  ;;  %vm2235_vm2 = vcmp.ge.f32.partialorder %v2227_v31, 0.0 }
 0x1cf   :  { %v2180_v6 = vadd.f32 %v2179_v54, %v2127_v1  ;;  %v2129_v56 = vadd.f32 %v2128_v4, %v2076_v62  ;;  %v2181_v59 = vpop.f32.mrf.mxu1  ;;  %v2229_v8 = vadd.f32 %v3914_v20, %v2178_v3  ;;  %v2251_v9 = vsel %vm2235_vm2, %v2227_v31, %v2243_v43 }
 0x1d0   :  { %2281 = vst [vmem:[%s3946_s3] sm:$0xff] %v2581_v41  ;;  %vm2236_vm3 = vcmp.ge.f32.partialorder %v2228_v2, 0.0  ;;  %v2244_v55 = vmul.f32 0.2, %v2228_v2  ;;  %v2130_v61 = vpop.f32.mrf.mxu0 }
 0x1d1   :  { %v2230_v15 = vadd.f32 %v3916_v33, %v2180_v6  ;;  %v2182_v17 = vadd.f32 %v2181_v59, %v2129_v56  ;;  %v2131_v60 = vadd.f32 %v2130_v61, %v2078_v5  ;;  %vm2237_vm4 = vcmp.ge.f32.partialorder %v2229_v8, 0.0  ;;  %v2183_v21 = vpop.f32.mrf.mxu1 }
 0x1d2   :  { %v2252_v10 = vsel %vm2236_vm3, %v2228_v2, %v2244_v55  ;;  %v2245_v7 = vmul.f32 0.2, %v2229_v8 }
 0x1d3   :  { %v2582_v11 = vpack.c.bf16 %v2252_v10, %v2251_v9  ;;  %vm2238_vm5 = vcmp.ge.f32.partialorder %v2230_v15, 0.0  ;;  %v2246_v18 = vmul.f32 0.2, %v2230_v15  ;;  %v2231_v19 = vadd.f32 %v3914_v20, %v2182_v17 }
 0x1d4   :  { %v2184_v22 = vadd.f32 %v2183_v21, %v2131_v60  ;;  %v2253_v24 = vsel %vm2237_vm4, %v2229_v8, %v2245_v7 }
 0x1d5   :  { %2282 = vst [vmem:[%s3946_s3 + $0x8] sm:$0xff] %v2582_v11  ;;  %v2254_v26 = vsel %vm2238_vm5, %v2230_v15, %v2246_v18  ;;  %v2247_v34 = vmul.f32 0.2, %v2231_v19  ;;  %vm2239_vm6 = vcmp.ge.f32.partialorder %v2231_v19, 0.0 }
 0x1d6   :  { %v2583_v32 = vpack.c.bf16 %v2254_v26, %v2253_v24  ;;  %v2232_v44 = vadd.f32 %v3916_v33, %v2184_v22 }
 0x1d7   :  { %v2255_v20 = vsel %vm2239_vm6, %v2231_v19, %v2247_v34 }
 0x1d8   :  { %2283 = vst [vmem:[%s3946_s3 + $0x10] sm:$0xff] %v2583_v32  ;;  %vm2240_vm7 = vcmp.ge.f32.partialorder %v2232_v44, 0.0  ;;  %v2248_v12 = vmul.f32 0.2, %v2232_v44 }
 0x1da   :  { %v2256_v13 = vsel %vm2240_vm7, %v2232_v44, %v2248_v12 }
 0x1db   :  { %v2584_v14 = vpack.c.bf16 %v2256_v13, %v2255_v20 }
 0x1dd   :  { %2284 = vst [vmem:[%s3946_s3 + $0x18] sm:$0xff] %v2584_v14 }

// kernel: discriminator_forward.11
= control target key start
LH: loop header
LB: loop body
LE: loop exit
PB: predicated region body
PF: predicated region fallthrough
CT: control target
= control target key end

     0   :  { %s877_s0 = inlined_call_operand.vmem [shape: bf16[16,8192], index: 0, kind: input, shape index: {}]   ;;  %s878_s1 = inlined_call_operand.vmem [shape: f32[1,8192], index: 1, kind: input, shape index: {}]   ;;  %s879_s2 = inlined_call_operand.<no memory space> [shape: f32[1], index: 2, kind: input, shape index: {}]   ;;  %s880_s3 = inlined_call_operand.vmem [shape: f32[16,1], index: 3, kind: output, shape index: {}]  }
   0x1   :  { %8 = sst [smem:[#allocation3]] %s879_s2 }
   0x2   :  { %s708_s14 = smov 0   ;;  %s710_s15 = smov 0  }
   0x3   :  { %s712_s16 = smov 0   ;;  %s714_s17 = smov 0  }
   0x4   :  { %s716_s18 = smov 0  }
   0x5 LB: > { %s23_s2 = sadd.s32 1, %s678_s17  ;;  %p42_p1 = scmp.ne.s32.totalorder %s670_s15, %s666_s14  ;;  %s682_s18 = sphi %s716_s18, %s14_s18   ;;  %s678_s17 = sphi %s714_s17, %s884_s17   ;;  %s674_s16 = sphi %s712_s16, %s883_s16   ;;  %s670_s15 = sphi %s710_s15, %s882_s15   ;;  %s666_s14 = sphi %s708_s14, %s881_s14  }
   0x6   : > { %p24_p0 = scmp.ge.s32.totalorder %s23_s2, 4  ;;  %p43_p2 = scmp.eq.s32.totalorder %s682_s18, 0 }
   0x7   : > { %s35_s20 = sadd.s32 1, %s670_s15  ;;  %p579_p5 = scmp.ge.s32.totalorder %s682_s18, 4 }
   0x8   : > { %s886_s2 = smov (%p24_p0, %s23_s2), 0  ;;  %p44_p3 = por %p43_p2, %p42_p1 }
   0x9   : > { %s31_s19 = ssub.s32 %s678_s17, %s886_s2  ;;  %144 = sbr.rel (%p579_p5) target bundleno = 26 (0x1a), region = 20 }
   0xa   : > { %p33_p4 = scmp.eq.s32.totalorder %s31_s19, 0 }
   0xc   : > { %s743_s21 = scalar_select %p33_p4, %s670_s15, %s35_s20  }
   0xe   : > { %147 = sbr.rel (!%p44_p3) target bundleno = 26 (0x1a), region = 24  ;;  %s149_s22 = sand.u32 (%p44_p3), 1, %s670_s15  }
   0xf   : > { %s594_s23 = sshll.u32 (%p44_p3), %s678_s17, 6  ;;  %s580_s24 = sshll.u32 (%p44_p3), %s149_s22, 7 }
  0x10   : > { %s751_s27 = scalar_lea.vmem (%p44_p3), %s877_s0, %s594_s23  ;;  %s151_s28 = scalar_lea.vmem (%p44_p3), [#allocation4], %s580_s24 }
  0x11   : > { %v170_v0 = vld [vmem:[%s751_s27] sm:$0xff] (%p44_p3)  ;;  %v172_v1 = vld [vmem:[%s751_s27 + $0x8] sm:$0xff] (%p44_p3)  ;;  %v174_v2 = vld [vmem:[%s751_s27 + $0x10] sm:$0xff] (%p44_p3) }
  0x12   : > { %171 = vst [vmem:[%s151_s28] sm:$0xff] (%p44_p3), %v170_v0  ;;  %173 = vst [vmem:[%s151_s28 + $0x8] sm:$0xff] (%p44_p3), %v172_v1  ;;  %v176_v3 = vld [vmem:[%s751_s27 + $0x18] sm:$0xff] (%p44_p3)  ;;  %v178_v4 = vld [vmem:[%s751_s27 + $0x20] sm:$0xff] (%p44_p3) }
  0x13   : > { %175 = vst [vmem:[%s151_s28 + $0x10] sm:$0xff] %v174_v2  ;;  %v180_v5 = vld [vmem:[%s751_s27 + $0x28] sm:$0xff]  ;;  %177 = vst [vmem:[%s151_s28 + $0x18] sm:$0xff] %v176_v3  ;;  %v182_v6 = vld [vmem:[%s751_s27 + $0x30] sm:$0xff] }
  0x14   : > { %179 = vst [vmem:[%s151_s28 + $0x20] sm:$0xff] %v178_v4  ;;  %181 = vst [vmem:[%s151_s28 + $0x28] sm:$0xff] %v180_v5  ;;  %v184_v7 = vld [vmem:[%s751_s27 + $0x38] sm:$0xff]  ;;  %v186_v8 = vld [vmem:[%s751_s27 + $0x100] sm:$0xff] }
  0x15   : > { %183 = vst [vmem:[%s151_s28 + $0x30] sm:$0xff] %v182_v6  ;;  %185 = vst [vmem:[%s151_s28 + $0x38] sm:$0xff] %v184_v7  ;;  %v188_v9 = vld [vmem:[%s751_s27 + $0x108] sm:$0xff]  ;;  %v190_v10 = vld [vmem:[%s751_s27 + $0x110] sm:$0xff] }
  0x16   : > { %187 = vst [vmem:[%s151_s28 + $0x40] sm:$0xff] %v186_v8  ;;  %v192_v11 = vld [vmem:[%s751_s27 + $0x118] sm:$0xff]  ;;  %189 = vst [vmem:[%s151_s28 + $0x48] sm:$0xff] %v188_v9  ;;  %v194_v12 = vld [vmem:[%s751_s27 + $0x120] sm:$0xff] }
  0x17   : > { %191 = vst [vmem:[%s151_s28 + $0x50] sm:$0xff] %v190_v10  ;;  %193 = vst [vmem:[%s151_s28 + $0x58] sm:$0xff] %v192_v11  ;;  %v196_v13 = vld [vmem:[%s751_s27 + $0x128] sm:$0xff]  ;;  %v198_v14 = vld [vmem:[%s751_s27 + $0x130] sm:$0xff] }
  0x18   : > { %195 = vst [vmem:[%s151_s28 + $0x60] sm:$0xff] %v194_v12  ;;  %197 = vst [vmem:[%s151_s28 + $0x68] sm:$0xff] %v196_v13  ;;  %v200_v15 = vld [vmem:[%s751_s27 + $0x138] sm:$0xff] }
  0x19   : > { %199 = vst [vmem:[%s151_s28 + $0x70] sm:$0xff] %v198_v14  ;;  %201 = vst [vmem:[%s151_s28 + $0x78] sm:$0xff] %v200_v15 }
  0x1a PF: > { %p583_p6 = scmp.ge.s32.totalorder %s682_s18, 1  ;;  %p214_p7 = scmp.lt.s32.totalorder %s682_s18, 5 }
  0x1c   : > { %p215_p8 = pnand %p583_p6, %p214_p7 }
  0x1d   : > { %s221_s29 = sand.u32 (!%p215_p8), 1, %s666_s14   ;;  %s585_s30 = sshll.u32 (!%p215_p8), %s674_s16, 4 }
  0x1e   : > { %218 = sbr.rel (%p215_p8) target bundleno = 269 (0x10d), region = 51  ;;  %s584_s4 = sshll.u32 (!%p215_p8), %s221_s29, 7 }
  0x1f   : > { %p251_p9 = scmp.lt.s32.totalorder (!%p215_p8), %s585_s30, 63  ;;  %s778_s8 = scalar_lea.vmem (!%p215_p8), [#allocation4], %s584_s4 }
  0x20   : > { %p586_p10 = scmp.ne.s32.totalorder (!%p215_p8), %s674_s16, 0 }
  0x23   : > { %s888_s30 = smov (!%p251_p9, %s585_s30), 63  ;;  %264 = sbr.rel (%p586_p10) target bundleno = 42 (0x2a), region = 59 }
  0x24   : > { %s776_s7 = scalar_lea.vmem %s878_s1, %s888_s30 }
  0x28   : > { %vm265_vm0 = vcmask 7168   ;;  %v684_v16 = vmov 0.0  }
  0x29   : > { %266 = vst.msk [vmem:[#allocation2] sm:$0xff] %vm265_vm0, %v684_v16  ;;  %267 = vst.msk [vmem:[#allocation2 + $0x8] sm:$0xff] %vm265_vm0, %v684_v16 }
  0x2a PF: > { %v322_v17 = vlaneseq  ;;  %v270_v19 = vld [vmem:[%s778_s8] sm:$0xff]  ;;  %v318_v22 = vld [vmem:[%s776_s7] sm:$0xff]  ;;  %v271_v23 = vld [vmem:[%s778_s8 + $0x8] sm:$0xff]  ;;  %vm470_vm1 = vcmask 7168   ;;  %p587_p11 = scmp.ne.s32.totalorder %s674_s16, 3 }
  0x2b   : > { %v278_v25 = vld [vmem:[%s778_s8 + $0x40] sm:$0xff]  ;;  %v279_v26 = vld [vmem:[%s778_s8 + $0x48] sm:$0xff]  ;;  %v286_v27 = vunpack.c.l.bf16 %v270_v19  ;;  %v287_v28 = vunpack.c.h.bf16 %v270_v19  ;;  %v288_v32 = vunpack.c.l.bf16 %v271_v23  ;;  %v272_v34 = vld [vmem:[%s778_s8 + $0x10] sm:$0xff]  ;;  %v289_v40 = vunpack.c.h.bf16 %v271_v23  ;;  %s479_s9 = sld [smem:[#allocation3]] (!%p587_p11) }
  0x2c   : > { %v781_v18 = vshrl.u32 %v322_v17, 7  ;;  %v280_v35 = vld [vmem:[%s778_s8 + $0x50] sm:$0xff]  ;;  %v302_v36 = vunpack.c.l.bf16 %v278_v25  ;;  %v303_v37 = vunpack.c.h.bf16 %v278_v25  ;;  %v304_v38 = vunpack.c.l.bf16 %v279_v26  ;;  %v273_v50 = vld [vmem:[%s778_s8 + $0x18] sm:$0xff]  ;;  %v274_v3 = vld [vmem:[%s778_s8 + $0x20] sm:$0xff] }
  0x2d   : > { %v305_v42 = vunpack.c.h.bf16 %v279_v26  ;;  %v290_v46 = vunpack.c.l.bf16 %v272_v34  ;;  %v306_v47 = vunpack.c.l.bf16 %v280_v35  ;;  %v281_v51 = vld [vmem:[%s778_s8 + $0x58] sm:$0xff]  ;;  %v291_v56 = vunpack.c.h.bf16 %v272_v34  ;;  %v282_v4 = vld [vmem:[%s778_s8 + $0x60] sm:$0xff]  ;;  %v275_v25 = vld [vmem:[%s778_s8 + $0x28] sm:$0xff] }
  0x2e   : > { %v324_v20 = vsub.s32 0, %v781_v18  ;;  %v328_v21 = vsub.s32 1, %v781_v18  ;;  %v332_v24 = vsub.s32 2, %v781_v18  ;;  %v336_v31 = vsub.s32 3, %v781_v18  ;;  %v817_v5 = vld [vmem:[%s776_s7 + $0x8] sm:$0xff] }
  0x2f   : > { %v340_v33 = vsub.s32 4, %v781_v18  ;;  %v344_v41 = vsub.s32 5, %v781_v18  ;;  %v348_v49 = vsub.s32 6, %v781_v18  ;;  %v307_v57 = vunpack.c.h.bf16 %v280_v35 }
  0x30   : > { %v325_v29 = vrot.slane %v318_v22, %v324_v20  ;;  %v329_v30 = vrot.slane %v318_v22, %v328_v21  ;;  %v333_v39 = vrot.slane %v318_v22, %v332_v24  ;;  %v337_v43 = vrot.slane %v318_v22, %v336_v31 }
  0x31   : > { %v341_v48 = vrot.slane %v318_v22, %v340_v33  ;;  %v345_v58 = vrot.slane %v318_v22, %v344_v41  ;;  %v352_v59 = vsub.s32 7, %v781_v18  ;;  %v292_v0 = vunpack.c.l.bf16 %v273_v50 }
  0x32   : > { %v402_v44 = vmul.f32 %v325_v29, %v286_v27  ;;  %v403_v45 = vmul.f32 %v329_v30, %v287_v28  ;;  %v404_v52 = vmul.f32 %v333_v39, %v288_v32  ;;  %v418_v53 = vmul.f32 %v325_v29, %v302_v36 }
  0x33   : > { %v419_v54 = vmul.f32 %v329_v30, %v303_v37  ;;  %v420_v55 = vmul.f32 %v333_v39, %v304_v38  ;;  %v405_v60 = vmul.f32 %v337_v43, %v289_v40  ;;  %v421_v61 = vmul.f32 %v337_v43, %v305_v42  ;;  %v283_v30 = vld [vmem:[%s778_s8 + $0x68] sm:$0xff]  ;;  %v276_v42 = vld [vmem:[%s778_s8 + $0x30] sm:$0xff] }
  0x34   : > { %v434_v62 = vadd.f32 %v403_v45, %v402_v44  ;;  %v308_v1 = vunpack.c.l.bf16 %v281_v51  ;;  %v349_v2 = vrot.slane %v318_v22, %v348_v49  ;;  %v406_v6 = vmul.f32 %v341_v48, %v290_v46 }
  0x35   : > { %v451_v63 = vadd.f32 %v419_v54, %v418_v53  ;;  %v422_v7 = vmul.f32 %v341_v48, %v306_v47  ;;  %v293_v10 = vunpack.c.h.bf16 %v273_v50  ;;  %v309_v11 = vunpack.c.h.bf16 %v281_v51  ;;  %v284_v47 = vld [vmem:[%s778_s8 + $0x70] sm:$0xff] }
  0x36   : > { %v435_v8 = vadd.f32 %v434_v62, %v404_v52  ;;  %v353_v12 = vrot.slane %v318_v22, %v352_v59  ;;  %v407_v13 = vmul.f32 %v345_v58, %v291_v56  ;;  %v423_v14 = vmul.f32 %v345_v58, %v307_v57  ;;  %v277_v57 = vld [vmem:[%s778_s8 + $0x38] sm:$0xff] }
  0x37   : > { %v452_v9 = vadd.f32 %v451_v63, %v420_v55  ;;  %v294_v17 = vunpack.c.l.bf16 %v274_v3  ;;  %v310_v19 = vunpack.c.l.bf16 %v282_v4  ;;  %v357_v23 = vrot.slane %v817_v5, %v324_v20  ;;  %v285_v62 = vld [vmem:[%s778_s8 + $0x78] sm:$0xff] }
  0x38   : > { %v436_v15 = vadd.f32 %v435_v8, %v405_v60  ;;  %v408_v26 = vmul.f32 %v349_v2, %v292_v0  ;;  %v424_v27 = vmul.f32 %v349_v2, %v308_v1  ;;  %v295_v32 = vunpack.c.h.bf16 %v274_v3 }
  0x39   : > { %v453_v16 = vadd.f32 %v452_v9, %v421_v61  ;;  %v361_v22 = vrot.slane %v817_v5, %v328_v21  ;;  %v311_v34 = vunpack.c.h.bf16 %v282_v4  ;;  %v409_v35 = vmul.f32 %v353_v12, %v293_v10 }
  0x3a   : > { %v437_v28 = vadd.f32 %v436_v15, %v406_v6  ;;  %v425_v36 = vmul.f32 %v353_v12, %v309_v11  ;;  %v296_v39 = vunpack.c.l.bf16 %v275_v25  ;;  %v365_v20 = vrot.slane %v817_v5, %v332_v24 }
  0x3b   : > { %v454_v29 = vadd.f32 %v453_v16, %v422_v7  ;;  %v312_v40 = vunpack.c.l.bf16 %v283_v30  ;;  %v410_v43 = vmul.f32 %v357_v23, %v294_v17  ;;  %v426_v44 = vmul.f32 %v357_v23, %v310_v19 }
  0x3c   : > { %v438_v37 = vadd.f32 %v437_v28, %v407_v13  ;;  %v297_v21 = vunpack.c.h.bf16 %v275_v25  ;;  %v369_v48 = vrot.slane %v817_v5, %v336_v31  ;;  %v313_v50 = vunpack.c.h.bf16 %v283_v30 }
  0x3d   : > { %v455_v38 = vadd.f32 %v454_v29, %v423_v14  ;;  %v411_v51 = vmul.f32 %v361_v22, %v295_v32  ;;  %v427_v54 = vmul.f32 %v361_v22, %v311_v34  ;;  %v298_v24 = vunpack.c.l.bf16 %v276_v42 }
  0x3e   : > { %v439_v45 = vadd.f32 %v438_v37, %v408_v26  ;;  %v373_v55 = vrot.slane %v817_v5, %v340_v33  ;;  %v314_v56 = vunpack.c.l.bf16 %v284_v47  ;;  %v412_v58 = vmul.f32 %v365_v20, %v296_v39 }
  0x3f   : > { %v456_v46 = vadd.f32 %v455_v38, %v424_v27  ;;  %v428_v63 = vmul.f32 %v365_v20, %v312_v40  ;;  %v299_v0 = vunpack.c.h.bf16 %v276_v42  ;;  %v377_v31 = vrot.slane %v817_v5, %v344_v41 }
  0x40   : > { %v440_v52 = vadd.f32 %v439_v45, %v409_v35  ;;  %v315_v1 = vunpack.c.h.bf16 %v284_v47  ;;  %v413_v2 = vmul.f32 %v369_v48, %v297_v21  ;;  %v429_v4 = vmul.f32 %v369_v48, %v313_v50 }
  0x41   : > { %v457_v53 = vadd.f32 %v456_v46, %v425_v36  ;;  %v300_v7 = vunpack.c.l.bf16 %v277_v57  ;;  %v381_v33 = vrot.slane %v817_v5, %v348_v49  ;;  %v316_v8 = vunpack.c.l.bf16 %v285_v62  ;;  %v269_v36 = vld [vmem:[#allocation2 + $0x8] sm:$0xff] }
  0x42   : > { %v441_v60 = vadd.f32 %v440_v52, %v410_v43  ;;  %v414_v9 = vmul.f32 %v373_v55, %v298_v24  ;;  %v430_v11 = vmul.f32 %v373_v55, %v314_v56  ;;  %v301_v13 = vunpack.c.h.bf16 %v277_v57 }
  0x43   : > { %v458_v61 = vadd.f32 %v457_v53, %v426_v44  ;;  %v385_v41 = vrot.slane %v817_v5, %v352_v59  ;;  %v415_v14 = vmul.f32 %v377_v31, %v299_v0  ;;  %v431_v16 = vmul.f32 %v377_v31, %v315_v1  ;;  %v268_v59 = vld [vmem:[#allocation2] sm:$0xff] }
  0x44   : > { %v442_v3 = vadd.f32 %v441_v60, %v411_v51  ;;  %v416_v19 = vmul.f32 %v381_v33, %v300_v7  ;;  %v317_v25 = vunpack.c.h.bf16 %v285_v62  ;;  %v432_v26 = vmul.f32 %v381_v33, %v316_v8 }
  0x45   : > { %v459_v6 = vadd.f32 %v458_v61, %v427_v54  ;;  %v417_v49 = vmul.f32 %v385_v41, %v301_v13 }
  0x46   : > { %v443_v10 = vadd.f32 %v442_v3, %v412_v58  ;;  %v433_v32 = vmul.f32 %v385_v41, %v317_v25 }
  0x47   : > { %v460_v12 = vadd.f32 %v459_v6, %v428_v63 }
  0x48   : > { %v444_v15 = vadd.f32 %v443_v10, %v413_v2 }
  0x49   : > { %v461_v17 = vadd.f32 %v460_v12, %v429_v4 }
  0x4a   : > { %v445_v23 = vadd.f32 %v444_v15, %v414_v9 }
  0x4b   : > { %v462_v27 = vadd.f32 %v461_v17, %v430_v11 }
  0x4c   : > { %v446_v28 = vadd.f32 %v445_v23, %v415_v14 }
  0x4d   : > { %v463_v29 = vadd.f32 %v462_v27, %v431_v16 }
  0x4e   : > { %v447_v30 = vadd.f32 %v446_v28, %v416_v19 }
  0x4f   : > { %v464_v22 = vadd.f32 %v463_v29, %v432_v26 }
  0x50   : > { %v448_v34 = vadd.f32 %v447_v30, %v417_v49 }
  0x51   : > { %v465_v18 = vadd.f32 %v464_v22, %v433_v32 }
  0x52   : > { %449 = vadd.xlane.f32.xlu0 %v448_v34 }
  0x56   : > { %466 = vadd.xlane.f32.xlu0 %v465_v18 }
  0xdb   : > { %v450_v5 = vpop.xlane.xlu0 %449 }
  0xdc   : > { %v468_v35 = vadd.f32 %v450_v5, %v268_v59 }
  0xde   : > { %471 = vst.msk [vmem:[#allocation2] sm:$0xff] %vm470_vm1, %v468_v35  ;;  %476 = sbr.rel (%p587_p11) target bundleno = 269 (0x10d), region = 63 }
  0xdf   : > { %v467_v37 = vpop.xlane.xlu0 %466 }
  0xe0   : > { %v469_v38 = vadd.f32 %v467_v37, %v269_v36 }
  0xe2   : > { %472 = vst.msk [vmem:[#allocation2 + $0x8] sm:$0xff] %vm470_vm1, %v469_v38 }
  0xe3   : > { %v480_v40 = vstv %s479_s9 }
  0xe5   : > { %v477_v39 = vld [vmem:[#allocation2] sm:$0xff] }
  0xe6   : > { %v481_v42 = vadd.f32 %v480_v40, %v477_v39 }
  0xe8   : > { %v588_v44 = vmul.f32 -1.442695, %v481_v42 }
  0xe9   : > { %v478_v20 = vld [vmem:[#allocation2 + $0x8] sm:$0xff] }
  0xea   : > { %v482_v43 = vadd.f32 %v480_v40, %v478_v20  ;;  %636 = vpow2.f32 %v588_v44 }
  0xec   : > { %v589_v45 = vmul.f32 -1.442695, %v482_v43 }
  0xee   : > { %638 = vpow2.f32 %v589_v45 }
  0xf7   : > { %v637_v46 = vpop.eup %636 }
  0xf8   : > { %v489_v21 = vadd.f32 1.0, %v637_v46 }
  0xfa   : > { %640 = vrcp.f32 %v489_v21 }
  0xfb   : > { %v639_v47 = vpop.eup %638 }
  0xfc   : > { %v490_v48 = vadd.f32 1.0, %v639_v47 }
  0xfe   : > { %642 = vrcp.f32 %v490_v48 }
 0x107   : > { %v641_v50 = vpop.eup %640 }
 0x108   : > { %495 = vst.msk [vmem:[%s880_s3] sm:$0xff] %vm470_vm1, %v641_v50 }
 0x10b   : > { %v643_v51 = vpop.eup %642 }
 0x10c   : > { %496 = vst.msk [vmem:[%s880_s3 + $0x8] sm:$0xff] %vm470_vm1, %v643_v51 }
 0x10d PF: > { %s14_s18 = sadd.s32 1, %s682_s18   ;;  %s881_s14 = smov %s670_s15 }
 0x10e   : > { %p11_p12 = scmp.ge.s32.totalorder %s14_s18, 6   ;;  %s882_s15 = smov %s743_s21 }
 0x10f   : > { %s883_s16 = smov %s678_s17  ;;  %s884_s17 = smov %s886_s2 }
 0x110   :  { %13 = sbr.rel (!%p11_p12) target bundleno = 5 (0x5), region = 101 }

// kernel: discriminator_forward.10
= control target key start
LH: loop header
LB: loop body
LE: loop exit
PB: predicated region body
PF: predicated region fallthrough
CT: control target
= control target key end

     0   :  { %s5471_s0 = inlined_call_operand.vmem [shape: bf16[16,4096], index: 0, kind: input, shape index: {}]   ;;  %s5472_s1 = inlined_call_operand.vmem [shape: bf16[4096,512], index: 1, kind: input, shape index: {}]   ;;  %s5473_s2 = inlined_call_operand.vmem [shape: f32[1,512], index: 2, kind: input, shape index: {}]   ;;  %s5474_s3 = inlined_call_operand.vmem [shape: bf16[16,512], index: 3, kind: output, shape index: {}]  }
   0x1   :  { %5476 = sst [smem:[#allocation7_spill]] %s5471_s0 }
   0x2   :  { %5477 = sst [smem:[#allocation8_spill]] %s5472_s1 }
   0x3   :  { %s4435_s12 = smov 0   ;;  %s4437_s13 = smov 0  }
   0x4   :  { %s4439_s14 = smov 0   ;;  %s4441_s15 = smov 0  }
   0x5   :  { %s4443_s16 = smov 0   ;;  %s4445_s17 = smov 0  }
   0x6   :  { %s4447_s18 = smov 0   ;;  %s4449_s19 = smov 0  }
   0x7   :  { %s4451_s20 = smov 0   ;;  %s4453_s21 = smov 0  }
   0x8   :  { %s4455_s22 = smov 0  }
   0x9 LB: > { %s3550_s23 = sadd.s32 4294967295, %s4412_s22   ;;  %s25_s24 = sadd.s32 1, %s4404_s20  ;;  %s4412_s22 = sphi %s4455_s22, %s13_s22   ;;  %s4408_s21 = sphi %s4453_s21, %s5494_s21   ;;  %s4404_s20 = sphi %s4451_s20, %s5493_s20   ;;  %s4400_s19 = sphi %s4449_s19, %s5492_s19   ;;  %s4396_s18 = sphi %s4447_s18, %s5491_s18   ;;  %s4392_s17 = sphi %s4445_s17, %s5490_s17   ;;  %s4388_s16 = sphi %s4443_s16, %s5489_s16   ;;  %s4384_s15 = sphi %s4441_s15, %s5488_s15   ;;  %s4380_s14 = sphi %s4439_s14, %s5487_s14   ;;  %s4376_s13 = sphi %s4437_s13, %s5486_s13   ;;  %s4372_s12 = sphi %s4435_s12, %s5485_s12  }
   0xa   : > { %p26_p0 = scmp.ge.s32.totalorder %s25_s24, 2  ;;  %s28_s25 = sadd.s32 1, %s4408_s21 }
   0xb   : > { %s41_s26 = sadd.s32 1, %s4392_s17  ;;  %p48_p1 = scmp.ne.s32.totalorder %s4392_s17, %s4388_s16 }
   0xc   : > { %s5496_s24 = smov (%p26_p0, %s25_s24), 0  ;;  %s5498_s25 = smov (!%p26_p0, %s28_s25), %s4408_s21 }
   0xd   : > { %s37_s27 = ssub.s32 %s4404_s20, %s5496_s24  ;;  %p49_p2 = scmp.eq.s32.totalorder %s4412_s22, 0 }
   0xe   : > { %p30_p3 = scmp.ge.s32.totalorder %s5498_s25, 2  ;;  %p39_p4 = scmp.eq.s32.totalorder %s37_s27, 0 }
   0xf   : > { %p4502_p5 = por %p49_p2, %p48_p1  ;;  %s69_s29 = sadd.s32 1, %s4384_s15 }
  0x10   : > { %s5500_s25 = smov (%p30_p3, %s5498_s25), 0  ;;  %p76_p6 = scmp.ne.s32.totalorder %s4384_s15, %s4380_s14 }
  0x11   : > { %5479 = sst [smem:[#allocation6_spill]] %s5500_s25  ;;  %s65_s4 = ssub.s32 %s4408_s21, %s5500_s25 }
  0x12   : > { %s4510_s30 = scalar_select %p39_p4, %s4392_s17, %s41_s26  }
  0x13   : > { %s66_s5 = sor.u32 %s65_s4, %s37_s27  ;;  %p121_p7 = scmp.eq.s32.totalorder %s65_s4, 0 }
  0x14   : > { %p67_p8 = scmp.eq.s32.totalorder %s66_s5, 0  ;;  %p4516_p9 = por %p76_p6, %p49_p2 }
  0x15   : > { %s123_s7 = sadd.s32 1, %s4376_s13  ;;  %p133_p10 = scmp.ne.s32.totalorder %s4376_s13, %s4372_s12 }
  0x16   : > { %s4524_s8 = scalar_select %p67_p8, %s4384_s15, %s69_s29  }
  0x17   : > { %s4527_s9 = scalar_select %p121_p7, %s4376_s13, %s123_s7  }
  0x18   : > { %p134_p11 = scmp.eq.s32.totalorder %s3550_s23, 3  ;;  %p3553_p13 = scmp.ge.s32.totalorder %s4412_s22, 4 }
  0x1a   : > { %p4529_p12 = por %p134_p11, %p133_p10  ;;  %156 = sbr.rel (%p3553_p13) target bundleno = 187 (0xbb), region = 16 }
  0x1f   : > { %159 = sbr.rel (!%p4502_p5) target bundleno = 49 (0x31), region = 20  ;;  %s161_s11 = sand.u32 (%p4502_p5), 1, %s4392_s17  }
  0x20   : > { %s3848_s26 = sshll.u32 (%p4502_p5), %s4404_s20, 6  ;;  %s3554_s27 = sshll.u32 (%p4502_p5), %s161_s11, 7 }
  0x21   : > { %s5482_s0 = sld [smem:[#allocation7_spill]] (%p4502_p5)  ;;  %s163_s23 = scalar_lea.vmem (%p4502_p5), [#allocation3], %s3554_s27 }
  0x27   : > { %s4541_s5 = scalar_lea.vmem %s5482_s0, %s3848_s26 }
  0x28   : > { %v182_v0 = vld [vmem:[%s4541_s5] sm:$0xff]  ;;  %v184_v1 = vld [vmem:[%s4541_s5 + $0x8] sm:$0xff]  ;;  %v186_v2 = vld [vmem:[%s4541_s5 + $0x10] sm:$0xff] }
  0x29   : > { %183 = vst [vmem:[%s163_s23] sm:$0xff] %v182_v0  ;;  %185 = vst [vmem:[%s163_s23 + $0x8] sm:$0xff] %v184_v1  ;;  %v188_v3 = vld [vmem:[%s4541_s5 + $0x18] sm:$0xff]  ;;  %v190_v4 = vld [vmem:[%s4541_s5 + $0x20] sm:$0xff] }
  0x2a   : > { %187 = vst [vmem:[%s163_s23 + $0x10] sm:$0xff] %v186_v2  ;;  %v192_v5 = vld [vmem:[%s4541_s5 + $0x28] sm:$0xff]  ;;  %189 = vst [vmem:[%s163_s23 + $0x18] sm:$0xff] %v188_v3  ;;  %v194_v6 = vld [vmem:[%s4541_s5 + $0x30] sm:$0xff] }
  0x2b   : > { %191 = vst [vmem:[%s163_s23 + $0x20] sm:$0xff] %v190_v4  ;;  %193 = vst [vmem:[%s163_s23 + $0x28] sm:$0xff] %v192_v5  ;;  %v196_v7 = vld [vmem:[%s4541_s5 + $0x38] sm:$0xff]  ;;  %v198_v8 = vld [vmem:[%s4541_s5 + $0x80] sm:$0xff] }
  0x2c   : > { %195 = vst [vmem:[%s163_s23 + $0x30] sm:$0xff] %v194_v6  ;;  %197 = vst [vmem:[%s163_s23 + $0x38] sm:$0xff] %v196_v7  ;;  %v200_v9 = vld [vmem:[%s4541_s5 + $0x88] sm:$0xff]  ;;  %v202_v10 = vld [vmem:[%s4541_s5 + $0x90] sm:$0xff] }
  0x2d   : > { %199 = vst [vmem:[%s163_s23 + $0x40] sm:$0xff] %v198_v8  ;;  %v204_v11 = vld [vmem:[%s4541_s5 + $0x98] sm:$0xff]  ;;  %201 = vst [vmem:[%s163_s23 + $0x48] sm:$0xff] %v200_v9  ;;  %v206_v12 = vld [vmem:[%s4541_s5 + $0xa0] sm:$0xff] }
  0x2e   : > { %203 = vst [vmem:[%s163_s23 + $0x50] sm:$0xff] %v202_v10  ;;  %205 = vst [vmem:[%s163_s23 + $0x58] sm:$0xff] %v204_v11  ;;  %v208_v13 = vld [vmem:[%s4541_s5 + $0xa8] sm:$0xff]  ;;  %v210_v14 = vld [vmem:[%s4541_s5 + $0xb0] sm:$0xff] }
  0x2f   : > { %207 = vst [vmem:[%s163_s23 + $0x60] sm:$0xff] %v206_v12  ;;  %209 = vst [vmem:[%s163_s23 + $0x68] sm:$0xff] %v208_v13  ;;  %v212_v15 = vld [vmem:[%s4541_s5 + $0xb8] sm:$0xff] }
  0x30   : > { %211 = vst [vmem:[%s163_s23 + $0x70] sm:$0xff] %v210_v14  ;;  %213 = vst [vmem:[%s163_s23 + $0x78] sm:$0xff] %v212_v15 }
  0x31 PF: > { %219 = sbr.rel (!%p4516_p9) target bundleno = 187 (0xbb), region = 43  ;;  %s221_s28 = sand.u32 (%p4516_p9), 1, %s4384_s15  }
  0x32   : > { %s3559_s7 = sshll.u32 (%p4516_p9), %s4408_s21, 1  ;;  %s3557_s11 = sshll.u32 (%p4516_p9), %s221_s28, 11 }
  0x33   : > { %s3849_s26 = sshll.u32 (%p4516_p9), %s4404_s20, 10  ;;  %s5483_s1 = sld [smem:[#allocation8_spill]] (%p4516_p9) }
  0x34   : > { %s227_s27 = sadd.s32 (%p4516_p9), %s3849_s26, %s3559_s7  ;;  %s4572_s6 = scalar_lea.vmem (%p4516_p9), [#allocation4], %s3557_s11 }
  0x35   : > { %s3561_s29 = sshll.u32 (%p4516_p9), %s227_s27, 2 }
  0x39   : > { %s4567_s25 = scalar_lea.vmem %s5483_s1, %s3561_s29 }
  0x3a   : > { %v768_v16 = vld [vmem:[%s4567_s25] sm:$0xff]  ;;  %v770_v17 = vld [vmem:[%s4567_s25 + $0x10] sm:$0xff] }
  0x3b   : > { %v772_v18 = vld [vmem:[%s4567_s25 + $0x20] sm:$0xff]  ;;  %769 = vst [vmem:[%s4572_s6] sm:$0xff] %v768_v16  ;;  %771 = vst [vmem:[%s4572_s6 + $0x8] sm:$0xff] %v770_v17  ;;  %v774_v19 = vld [vmem:[%s4567_s25 + $0x30] sm:$0xff] }
  0x3c   : > { %773 = vst [vmem:[%s4572_s6 + $0x10] sm:$0xff] %v772_v18  ;;  %v776_v20 = vld [vmem:[%s4567_s25 + $0x40] sm:$0xff]  ;;  %v778_v21 = vld [vmem:[%s4567_s25 + $0x50] sm:$0xff]  ;;  %775 = vst [vmem:[%s4572_s6 + $0x18] sm:$0xff] %v774_v19 }
  0x3d   : > { %777 = vst [vmem:[%s4572_s6 + $0x20] sm:$0xff] %v776_v20  ;;  %779 = vst [vmem:[%s4572_s6 + $0x28] sm:$0xff] %v778_v21  ;;  %v780_v22 = vld [vmem:[%s4567_s25 + $0x60] sm:$0xff]  ;;  %v782_v23 = vld [vmem:[%s4567_s25 + $0x70] sm:$0xff] }
  0x3e   : > { %v784_v24 = vld [vmem:[%s4567_s25 + $0x80] sm:$0xff]  ;;  %781 = vst [vmem:[%s4572_s6 + $0x30] sm:$0xff] %v780_v22  ;;  %783 = vst [vmem:[%s4572_s6 + $0x38] sm:$0xff] %v782_v23  ;;  %v786_v25 = vld [vmem:[%s4567_s25 + $0x90] sm:$0xff] }
  0x3f   : > { %785 = vst [vmem:[%s4572_s6 + $0x40] sm:$0xff] %v784_v24  ;;  %v788_v26 = vld [vmem:[%s4567_s25 + $0xa0] sm:$0xff]  ;;  %v790_v27 = vld [vmem:[%s4567_s25 + $0xb0] sm:$0xff]  ;;  %787 = vst [vmem:[%s4572_s6 + $0x48] sm:$0xff] %v786_v25 }
  0x40   : > { %789 = vst [vmem:[%s4572_s6 + $0x50] sm:$0xff] %v788_v26  ;;  %791 = vst [vmem:[%s4572_s6 + $0x58] sm:$0xff] %v790_v27  ;;  %v792_v28 = vld [vmem:[%s4567_s25 + $0xc0] sm:$0xff]  ;;  %v794_v29 = vld [vmem:[%s4567_s25 + $0xd0] sm:$0xff] }
  0x41   : > { %v796_v30 = vld [vmem:[%s4567_s25 + $0xe0] sm:$0xff]  ;;  %793 = vst [vmem:[%s4572_s6 + $0x60] sm:$0xff] %v792_v28  ;;  %795 = vst [vmem:[%s4572_s6 + $0x68] sm:$0xff] %v794_v29  ;;  %v798_v31 = vld [vmem:[%s4567_s25 + $0xf0] sm:$0xff] }
  0x42   : > { %797 = vst [vmem:[%s4572_s6 + $0x70] sm:$0xff] %v796_v30  ;;  %v800_v32 = vld [vmem:[%s4567_s25 + $0x100] sm:$0xff]  ;;  %v802_v33 = vld [vmem:[%s4567_s25 + $0x110] sm:$0xff]  ;;  %799 = vst [vmem:[%s4572_s6 + $0x78] sm:$0xff] %v798_v31 }
  0x43   : > { %801 = vst [vmem:[%s4572_s6 + $0x80] sm:$0xff] %v800_v32  ;;  %803 = vst [vmem:[%s4572_s6 + $0x88] sm:$0xff] %v802_v33  ;;  %v804_v34 = vld [vmem:[%s4567_s25 + $0x120] sm:$0xff]  ;;  %v806_v35 = vld [vmem:[%s4567_s25 + $0x130] sm:$0xff] }
  0x44   : > { %v808_v36 = vld [vmem:[%s4567_s25 + $0x140] sm:$0xff]  ;;  %805 = vst [vmem:[%s4572_s6 + $0x90] sm:$0xff] %v804_v34  ;;  %807 = vst [vmem:[%s4572_s6 + $0x98] sm:$0xff] %v806_v35  ;;  %v810_v37 = vld [vmem:[%s4567_s25 + $0x150] sm:$0xff] }
  0x45   : > { %809 = vst [vmem:[%s4572_s6 + $0xa0] sm:$0xff] %v808_v36  ;;  %v812_v38 = vld [vmem:[%s4567_s25 + $0x160] sm:$0xff]  ;;  %v814_v39 = vld [vmem:[%s4567_s25 + $0x170] sm:$0xff]  ;;  %811 = vst [vmem:[%s4572_s6 + $0xa8] sm:$0xff] %v810_v37 }
  0x46   : > { %813 = vst [vmem:[%s4572_s6 + $0xb0] sm:$0xff] %v812_v38  ;;  %815 = vst [vmem:[%s4572_s6 + $0xb8] sm:$0xff] %v814_v39  ;;  %v816_v40 = vld [vmem:[%s4567_s25 + $0x180] sm:$0xff]  ;;  %v818_v41 = vld [vmem:[%s4567_s25 + $0x190] sm:$0xff] }
  0x47   : > { %v820_v42 = vld [vmem:[%s4567_s25 + $0x1a0] sm:$0xff]  ;;  %817 = vst [vmem:[%s4572_s6 + $0xc0] sm:$0xff] %v816_v40  ;;  %819 = vst [vmem:[%s4572_s6 + $0xc8] sm:$0xff] %v818_v41  ;;  %v822_v43 = vld [vmem:[%s4567_s25 + $0x1b0] sm:$0xff] }
  0x48   : > { %821 = vst [vmem:[%s4572_s6 + $0xd0] sm:$0xff] %v820_v42  ;;  %v824_v44 = vld [vmem:[%s4567_s25 + $0x1c0] sm:$0xff]  ;;  %v826_v45 = vld [vmem:[%s4567_s25 + $0x1d0] sm:$0xff]  ;;  %823 = vst [vmem:[%s4572_s6 + $0xd8] sm:$0xff] %v822_v43 }
  0x49   : > { %825 = vst [vmem:[%s4572_s6 + $0xe0] sm:$0xff] %v824_v44  ;;  %827 = vst [vmem:[%s4572_s6 + $0xe8] sm:$0xff] %v826_v45  ;;  %v828_v46 = vld [vmem:[%s4567_s25 + $0x1e0] sm:$0xff]  ;;  %v830_v47 = vld [vmem:[%s4567_s25 + $0x1f0] sm:$0xff] }
  0x4a   : > { %v832_v48 = vld [vmem:[%s4567_s25 + $0x200] sm:$0xff]  ;;  %829 = vst [vmem:[%s4572_s6 + $0xf0] sm:$0xff] %v828_v46  ;;  %831 = vst [vmem:[%s4572_s6 + $0xf8] sm:$0xff] %v830_v47  ;;  %v834_v49 = vld [vmem:[%s4567_s25 + $0x210] sm:$0xff] }
  0x4b   : > { %833 = vst [vmem:[%s4572_s6 + $0x100] sm:$0xff] %v832_v48  ;;  %v836_v50 = vld [vmem:[%s4567_s25 + $0x220] sm:$0xff]  ;;  %v838_v51 = vld [vmem:[%s4567_s25 + $0x230] sm:$0xff]  ;;  %835 = vst [vmem:[%s4572_s6 + $0x108] sm:$0xff] %v834_v49 }
  0x4c   : > { %837 = vst [vmem:[%s4572_s6 + $0x110] sm:$0xff] %v836_v50  ;;  %839 = vst [vmem:[%s4572_s6 + $0x118] sm:$0xff] %v838_v51  ;;  %v840_v52 = vld [vmem:[%s4567_s25 + $0x240] sm:$0xff]  ;;  %v842_v53 = vld [vmem:[%s4567_s25 + $0x250] sm:$0xff] }
  0x4d   : > { %v844_v54 = vld [vmem:[%s4567_s25 + $0x260] sm:$0xff]  ;;  %841 = vst [vmem:[%s4572_s6 + $0x120] sm:$0xff] %v840_v52  ;;  %843 = vst [vmem:[%s4572_s6 + $0x128] sm:$0xff] %v842_v53  ;;  %v846_v55 = vld [vmem:[%s4567_s25 + $0x270] sm:$0xff] }
  0x4e   : > { %845 = vst [vmem:[%s4572_s6 + $0x130] sm:$0xff] %v844_v54  ;;  %v848_v56 = vld [vmem:[%s4567_s25 + $0x280] sm:$0xff]  ;;  %v850_v57 = vld [vmem:[%s4567_s25 + $0x290] sm:$0xff]  ;;  %847 = vst [vmem:[%s4572_s6 + $0x138] sm:$0xff] %v846_v55 }
  0x4f   : > { %849 = vst [vmem:[%s4572_s6 + $0x140] sm:$0xff] %v848_v56  ;;  %851 = vst [vmem:[%s4572_s6 + $0x148] sm:$0xff] %v850_v57  ;;  %v852_v58 = vld [vmem:[%s4567_s25 + $0x2a0] sm:$0xff]  ;;  %v854_v59 = vld [vmem:[%s4567_s25 + $0x2b0] sm:$0xff] }
  0x50   : > { %v856_v60 = vld [vmem:[%s4567_s25 + $0x2c0] sm:$0xff]  ;;  %853 = vst [vmem:[%s4572_s6 + $0x150] sm:$0xff] %v852_v58  ;;  %855 = vst [vmem:[%s4572_s6 + $0x158] sm:$0xff] %v854_v59  ;;  %v858_v61 = vld [vmem:[%s4567_s25 + $0x2d0] sm:$0xff] }
  0x51   : > { %857 = vst [vmem:[%s4572_s6 + $0x160] sm:$0xff] %v856_v60  ;;  %v860_v62 = vld [vmem:[%s4567_s25 + $0x2e0] sm:$0xff]  ;;  %v862_v63 = vld [vmem:[%s4567_s25 + $0x2f0] sm:$0xff]  ;;  %859 = vst [vmem:[%s4572_s6 + $0x168] sm:$0xff] %v858_v61 }
  0x52   : > { %861 = vst [vmem:[%s4572_s6 + $0x170] sm:$0xff] %v860_v62  ;;  %863 = vst [vmem:[%s4572_s6 + $0x178] sm:$0xff] %v862_v63  ;;  %v864_v0 = vld [vmem:[%s4567_s25 + $0x300] sm:$0xff]  ;;  %v866_v1 = vld [vmem:[%s4567_s25 + $0x310] sm:$0xff] }
  0x53   : > { %v868_v2 = vld [vmem:[%s4567_s25 + $0x320] sm:$0xff]  ;;  %865 = vst [vmem:[%s4572_s6 + $0x180] sm:$0xff] %v864_v0  ;;  %867 = vst [vmem:[%s4572_s6 + $0x188] sm:$0xff] %v866_v1  ;;  %v870_v3 = vld [vmem:[%s4567_s25 + $0x330] sm:$0xff] }
  0x54   : > { %869 = vst [vmem:[%s4572_s6 + $0x190] sm:$0xff] %v868_v2  ;;  %v872_v4 = vld [vmem:[%s4567_s25 + $0x340] sm:$0xff]  ;;  %v874_v5 = vld [vmem:[%s4567_s25 + $0x350] sm:$0xff]  ;;  %871 = vst [vmem:[%s4572_s6 + $0x198] sm:$0xff] %v870_v3 }
  0x55   : > { %873 = vst [vmem:[%s4572_s6 + $0x1a0] sm:$0xff] %v872_v4  ;;  %875 = vst [vmem:[%s4572_s6 + $0x1a8] sm:$0xff] %v874_v5  ;;  %v876_v6 = vld [vmem:[%s4567_s25 + $0x360] sm:$0xff]  ;;  %v878_v7 = vld [vmem:[%s4567_s25 + $0x370] sm:$0xff] }
  0x56   : > { %v880_v8 = vld [vmem:[%s4567_s25 + $0x380] sm:$0xff]  ;;  %877 = vst [vmem:[%s4572_s6 + $0x1b0] sm:$0xff] %v876_v6  ;;  %879 = vst [vmem:[%s4572_s6 + $0x1b8] sm:$0xff] %v878_v7  ;;  %v882_v9 = vld [vmem:[%s4567_s25 + $0x390] sm:$0xff] }
  0x57   : > { %881 = vst [vmem:[%s4572_s6 + $0x1c0] sm:$0xff] %v880_v8  ;;  %v884_v10 = vld [vmem:[%s4567_s25 + $0x3a0] sm:$0xff]  ;;  %v886_v11 = vld [vmem:[%s4567_s25 + $0x3b0] sm:$0xff]  ;;  %883 = vst [vmem:[%s4572_s6 + $0x1c8] sm:$0xff] %v882_v9 }
  0x58   : > { %885 = vst [vmem:[%s4572_s6 + $0x1d0] sm:$0xff] %v884_v10  ;;  %887 = vst [vmem:[%s4572_s6 + $0x1d8] sm:$0xff] %v886_v11  ;;  %v888_v12 = vld [vmem:[%s4567_s25 + $0x3c0] sm:$0xff]  ;;  %v890_v13 = vld [vmem:[%s4567_s25 + $0x3d0] sm:$0xff] }
  0x59   : > { %v892_v14 = vld [vmem:[%s4567_s25 + $0x3e0] sm:$0xff]  ;;  %889 = vst [vmem:[%s4572_s6 + $0x1e0] sm:$0xff] %v888_v12  ;;  %891 = vst [vmem:[%s4572_s6 + $0x1e8] sm:$0xff] %v890_v13  ;;  %v894_v15 = vld [vmem:[%s4567_s25 + $0x3f0] sm:$0xff] }
  0x5a   : > { %893 = vst [vmem:[%s4572_s6 + $0x1f0] sm:$0xff] %v892_v14  ;;  %v896_v16 = vld [vmem:[%s4567_s25 + $0x400] sm:$0xff]  ;;  %v898_v17 = vld [vmem:[%s4567_s25 + $0x410] sm:$0xff]  ;;  %895 = vst [vmem:[%s4572_s6 + $0x1f8] sm:$0xff] %v894_v15 }
  0x5b   : > { %897 = vst [vmem:[%s4572_s6 + $0x200] sm:$0xff] %v896_v16  ;;  %899 = vst [vmem:[%s4572_s6 + $0x208] sm:$0xff] %v898_v17  ;;  %v900_v18 = vld [vmem:[%s4567_s25 + $0x420] sm:$0xff]  ;;  %v902_v19 = vld [vmem:[%s4567_s25 + $0x430] sm:$0xff] }
  0x5c   : > { %v904_v20 = vld [vmem:[%s4567_s25 + $0x440] sm:$0xff]  ;;  %901 = vst [vmem:[%s4572_s6 + $0x210] sm:$0xff] %v900_v18  ;;  %903 = vst [vmem:[%s4572_s6 + $0x218] sm:$0xff] %v902_v19  ;;  %v906_v21 = vld [vmem:[%s4567_s25 + $0x450] sm:$0xff] }
  0x5d   : > { %905 = vst [vmem:[%s4572_s6 + $0x220] sm:$0xff] %v904_v20  ;;  %v908_v22 = vld [vmem:[%s4567_s25 + $0x460] sm:$0xff]  ;;  %v910_v23 = vld [vmem:[%s4567_s25 + $0x470] sm:$0xff]  ;;  %907 = vst [vmem:[%s4572_s6 + $0x228] sm:$0xff] %v906_v21 }
  0x5e   : > { %909 = vst [vmem:[%s4572_s6 + $0x230] sm:$0xff] %v908_v22  ;;  %911 = vst [vmem:[%s4572_s6 + $0x238] sm:$0xff] %v910_v23  ;;  %v912_v24 = vld [vmem:[%s4567_s25 + $0x480] sm:$0xff]  ;;  %v914_v25 = vld [vmem:[%s4567_s25 + $0x490] sm:$0xff] }
  0x5f   : > { %v916_v26 = vld [vmem:[%s4567_s25 + $0x4a0] sm:$0xff]  ;;  %913 = vst [vmem:[%s4572_s6 + $0x240] sm:$0xff] %v912_v24  ;;  %915 = vst [vmem:[%s4572_s6 + $0x248] sm:$0xff] %v914_v25  ;;  %v918_v27 = vld [vmem:[%s4567_s25 + $0x4b0] sm:$0xff] }
  0x60   : > { %917 = vst [vmem:[%s4572_s6 + $0x250] sm:$0xff] %v916_v26  ;;  %v920_v28 = vld [vmem:[%s4567_s25 + $0x4c0] sm:$0xff]  ;;  %v922_v29 = vld [vmem:[%s4567_s25 + $0x4d0] sm:$0xff]  ;;  %919 = vst [vmem:[%s4572_s6 + $0x258] sm:$0xff] %v918_v27 }
  0x61   : > { %921 = vst [vmem:[%s4572_s6 + $0x260] sm:$0xff] %v920_v28  ;;  %923 = vst [vmem:[%s4572_s6 + $0x268] sm:$0xff] %v922_v29  ;;  %v924_v30 = vld [vmem:[%s4567_s25 + $0x4e0] sm:$0xff]  ;;  %v926_v31 = vld [vmem:[%s4567_s25 + $0x4f0] sm:$0xff] }
  0x62   : > { %v928_v32 = vld [vmem:[%s4567_s25 + $0x500] sm:$0xff]  ;;  %925 = vst [vmem:[%s4572_s6 + $0x270] sm:$0xff] %v924_v30  ;;  %927 = vst [vmem:[%s4572_s6 + $0x278] sm:$0xff] %v926_v31  ;;  %v930_v33 = vld [vmem:[%s4567_s25 + $0x510] sm:$0xff] }
  0x63   : > { %929 = vst [vmem:[%s4572_s6 + $0x280] sm:$0xff] %v928_v32  ;;  %v932_v34 = vld [vmem:[%s4567_s25 + $0x520] sm:$0xff]  ;;  %v934_v35 = vld [vmem:[%s4567_s25 + $0x530] sm:$0xff]  ;;  %931 = vst [vmem:[%s4572_s6 + $0x288] sm:$0xff] %v930_v33 }
  0x64   : > { %933 = vst [vmem:[%s4572_s6 + $0x290] sm:$0xff] %v932_v34  ;;  %935 = vst [vmem:[%s4572_s6 + $0x298] sm:$0xff] %v934_v35  ;;  %v936_v36 = vld [vmem:[%s4567_s25 + $0x540] sm:$0xff]  ;;  %v938_v37 = vld [vmem:[%s4567_s25 + $0x550] sm:$0xff] }
  0x65   : > { %v940_v38 = vld [vmem:[%s4567_s25 + $0x560] sm:$0xff]  ;;  %937 = vst [vmem:[%s4572_s6 + $0x2a0] sm:$0xff] %v936_v36  ;;  %939 = vst [vmem:[%s4572_s6 + $0x2a8] sm:$0xff] %v938_v37  ;;  %v942_v39 = vld [vmem:[%s4567_s25 + $0x570] sm:$0xff] }
  0x66   : > { %941 = vst [vmem:[%s4572_s6 + $0x2b0] sm:$0xff] %v940_v38  ;;  %v944_v40 = vld [vmem:[%s4567_s25 + $0x580] sm:$0xff]  ;;  %v946_v41 = vld [vmem:[%s4567_s25 + $0x590] sm:$0xff]  ;;  %943 = vst [vmem:[%s4572_s6 + $0x2b8] sm:$0xff] %v942_v39 }
  0x67   : > { %945 = vst [vmem:[%s4572_s6 + $0x2c0] sm:$0xff] %v944_v40  ;;  %947 = vst [vmem:[%s4572_s6 + $0x2c8] sm:$0xff] %v946_v41  ;;  %v948_v42 = vld [vmem:[%s4567_s25 + $0x5a0] sm:$0xff]  ;;  %v950_v43 = vld [vmem:[%s4567_s25 + $0x5b0] sm:$0xff] }
  0x68   : > { %v952_v44 = vld [vmem:[%s4567_s25 + $0x5c0] sm:$0xff]  ;;  %949 = vst [vmem:[%s4572_s6 + $0x2d0] sm:$0xff] %v948_v42  ;;  %951 = vst [vmem:[%s4572_s6 + $0x2d8] sm:$0xff] %v950_v43  ;;  %v954_v45 = vld [vmem:[%s4567_s25 + $0x5d0] sm:$0xff] }
  0x69   : > { %953 = vst [vmem:[%s4572_s6 + $0x2e0] sm:$0xff] %v952_v44  ;;  %v956_v46 = vld [vmem:[%s4567_s25 + $0x5e0] sm:$0xff]  ;;  %v958_v47 = vld [vmem:[%s4567_s25 + $0x5f0] sm:$0xff]  ;;  %955 = vst [vmem:[%s4572_s6 + $0x2e8] sm:$0xff] %v954_v45 }
  0x6a   : > { %957 = vst [vmem:[%s4572_s6 + $0x2f0] sm:$0xff] %v956_v46  ;;  %959 = vst [vmem:[%s4572_s6 + $0x2f8] sm:$0xff] %v958_v47  ;;  %v960_v48 = vld [vmem:[%s4567_s25 + $0x600] sm:$0xff]  ;;  %v962_v49 = vld [vmem:[%s4567_s25 + $0x610] sm:$0xff] }
  0x6b   : > { %v964_v50 = vld [vmem:[%s4567_s25 + $0x620] sm:$0xff]  ;;  %961 = vst [vmem:[%s4572_s6 + $0x300] sm:$0xff] %v960_v48  ;;  %963 = vst [vmem:[%s4572_s6 + $0x308] sm:$0xff] %v962_v49  ;;  %v966_v51 = vld [vmem:[%s4567_s25 + $0x630] sm:$0xff] }
  0x6c   : > { %965 = vst [vmem:[%s4572_s6 + $0x310] sm:$0xff] %v964_v50  ;;  %v968_v52 = vld [vmem:[%s4567_s25 + $0x640] sm:$0xff]  ;;  %v970_v53 = vld [vmem:[%s4567_s25 + $0x650] sm:$0xff]  ;;  %967 = vst [vmem:[%s4572_s6 + $0x318] sm:$0xff] %v966_v51 }
  0x6d   : > { %969 = vst [vmem:[%s4572_s6 + $0x320] sm:$0xff] %v968_v52  ;;  %971 = vst [vmem:[%s4572_s6 + $0x328] sm:$0xff] %v970_v53  ;;  %v972_v54 = vld [vmem:[%s4567_s25 + $0x660] sm:$0xff]  ;;  %v974_v55 = vld [vmem:[%s4567_s25 + $0x670] sm:$0xff] }
  0x6e   : > { %v976_v56 = vld [vmem:[%s4567_s25 + $0x680] sm:$0xff]  ;;  %973 = vst [vmem:[%s4572_s6 + $0x330] sm:$0xff] %v972_v54  ;;  %975 = vst [vmem:[%s4572_s6 + $0x338] sm:$0xff] %v974_v55  ;;  %v978_v57 = vld [vmem:[%s4567_s25 + $0x690] sm:$0xff] }
  0x6f   : > { %977 = vst [vmem:[%s4572_s6 + $0x340] sm:$0xff] %v976_v56  ;;  %v980_v58 = vld [vmem:[%s4567_s25 + $0x6a0] sm:$0xff]  ;;  %v982_v59 = vld [vmem:[%s4567_s25 + $0x6b0] sm:$0xff]  ;;  %979 = vst [vmem:[%s4572_s6 + $0x348] sm:$0xff] %v978_v57 }
  0x70   : > { %981 = vst [vmem:[%s4572_s6 + $0x350] sm:$0xff] %v980_v58  ;;  %983 = vst [vmem:[%s4572_s6 + $0x358] sm:$0xff] %v982_v59  ;;  %v984_v60 = vld [vmem:[%s4567_s25 + $0x6c0] sm:$0xff]  ;;  %v986_v61 = vld [vmem:[%s4567_s25 + $0x6d0] sm:$0xff] }
  0x71   : > { %v988_v62 = vld [vmem:[%s4567_s25 + $0x6e0] sm:$0xff]  ;;  %985 = vst [vmem:[%s4572_s6 + $0x360] sm:$0xff] %v984_v60  ;;  %987 = vst [vmem:[%s4572_s6 + $0x368] sm:$0xff] %v986_v61  ;;  %v990_v63 = vld [vmem:[%s4567_s25 + $0x6f0] sm:$0xff] }
  0x72   : > { %989 = vst [vmem:[%s4572_s6 + $0x370] sm:$0xff] %v988_v62  ;;  %v992_v0 = vld [vmem:[%s4567_s25 + $0x700] sm:$0xff]  ;;  %v994_v1 = vld [vmem:[%s4567_s25 + $0x710] sm:$0xff]  ;;  %991 = vst [vmem:[%s4572_s6 + $0x378] sm:$0xff] %v990_v63 }
  0x73   : > { %993 = vst [vmem:[%s4572_s6 + $0x380] sm:$0xff] %v992_v0  ;;  %995 = vst [vmem:[%s4572_s6 + $0x388] sm:$0xff] %v994_v1  ;;  %v996_v2 = vld [vmem:[%s4567_s25 + $0x720] sm:$0xff]  ;;  %v998_v3 = vld [vmem:[%s4567_s25 + $0x730] sm:$0xff] }
  0x74   : > { %v1000_v4 = vld [vmem:[%s4567_s25 + $0x740] sm:$0xff]  ;;  %997 = vst [vmem:[%s4572_s6 + $0x390] sm:$0xff] %v996_v2  ;;  %999 = vst [vmem:[%s4572_s6 + $0x398] sm:$0xff] %v998_v3  ;;  %v1002_v5 = vld [vmem:[%s4567_s25 + $0x750] sm:$0xff] }
  0x75   : > { %1001 = vst [vmem:[%s4572_s6 + $0x3a0] sm:$0xff] %v1000_v4  ;;  %v1004_v6 = vld [vmem:[%s4567_s25 + $0x760] sm:$0xff]  ;;  %v1006_v7 = vld [vmem:[%s4567_s25 + $0x770] sm:$0xff]  ;;  %1003 = vst [vmem:[%s4572_s6 + $0x3a8] sm:$0xff] %v1002_v5 }
  0x76   : > { %1005 = vst [vmem:[%s4572_s6 + $0x3b0] sm:$0xff] %v1004_v6  ;;  %1007 = vst [vmem:[%s4572_s6 + $0x3b8] sm:$0xff] %v1006_v7  ;;  %v1008_v8 = vld [vmem:[%s4567_s25 + $0x780] sm:$0xff]  ;;  %v1010_v9 = vld [vmem:[%s4567_s25 + $0x790] sm:$0xff] }
  0x77   : > { %v1012_v10 = vld [vmem:[%s4567_s25 + $0x7a0] sm:$0xff]  ;;  %1009 = vst [vmem:[%s4572_s6 + $0x3c0] sm:$0xff] %v1008_v8  ;;  %1011 = vst [vmem:[%s4572_s6 + $0x3c8] sm:$0xff] %v1010_v9  ;;  %v1014_v11 = vld [vmem:[%s4567_s25 + $0x7b0] sm:$0xff] }
  0x78   : > { %1013 = vst [vmem:[%s4572_s6 + $0x3d0] sm:$0xff] %v1012_v10  ;;  %v1016_v12 = vld [vmem:[%s4567_s25 + $0x7c0] sm:$0xff]  ;;  %v1018_v13 = vld [vmem:[%s4567_s25 + $0x7d0] sm:$0xff]  ;;  %1015 = vst [vmem:[%s4572_s6 + $0x3d8] sm:$0xff] %v1014_v11 }
  0x79   : > { %1017 = vst [vmem:[%s4572_s6 + $0x3e0] sm:$0xff] %v1016_v12  ;;  %1019 = vst [vmem:[%s4572_s6 + $0x3e8] sm:$0xff] %v1018_v13  ;;  %v1020_v14 = vld [vmem:[%s4567_s25 + $0x7e0] sm:$0xff]  ;;  %v1022_v15 = vld [vmem:[%s4567_s25 + $0x7f0] sm:$0xff] }
  0x7a   : > { %v1024_v16 = vld [vmem:[%s4567_s25 + $0x800] sm:$0xff]  ;;  %1021 = vst [vmem:[%s4572_s6 + $0x3f0] sm:$0xff] %v1020_v14  ;;  %1023 = vst [vmem:[%s4572_s6 + $0x3f8] sm:$0xff] %v1022_v15  ;;  %v1026_v17 = vld [vmem:[%s4567_s25 + $0x810] sm:$0xff] }
  0x7b   : > { %1025 = vst [vmem:[%s4572_s6 + $0x400] sm:$0xff] %v1024_v16  ;;  %v1028_v18 = vld [vmem:[%s4567_s25 + $0x820] sm:$0xff]  ;;  %v1030_v19 = vld [vmem:[%s4567_s25 + $0x830] sm:$0xff]  ;;  %1027 = vst [vmem:[%s4572_s6 + $0x408] sm:$0xff] %v1026_v17 }
  0x7c   : > { %1029 = vst [vmem:[%s4572_s6 + $0x410] sm:$0xff] %v1028_v18  ;;  %1031 = vst [vmem:[%s4572_s6 + $0x418] sm:$0xff] %v1030_v19  ;;  %v1032_v20 = vld [vmem:[%s4567_s25 + $0x840] sm:$0xff]  ;;  %v1034_v21 = vld [vmem:[%s4567_s25 + $0x850] sm:$0xff] }
  0x7d   : > { %v1036_v22 = vld [vmem:[%s4567_s25 + $0x860] sm:$0xff]  ;;  %1033 = vst [vmem:[%s4572_s6 + $0x420] sm:$0xff] %v1032_v20  ;;  %1035 = vst [vmem:[%s4572_s6 + $0x428] sm:$0xff] %v1034_v21  ;;  %v1038_v23 = vld [vmem:[%s4567_s25 + $0x870] sm:$0xff] }
  0x7e   : > { %1037 = vst [vmem:[%s4572_s6 + $0x430] sm:$0xff] %v1036_v22  ;;  %v1040_v24 = vld [vmem:[%s4567_s25 + $0x880] sm:$0xff]  ;;  %v1042_v25 = vld [vmem:[%s4567_s25 + $0x890] sm:$0xff]  ;;  %1039 = vst [vmem:[%s4572_s6 + $0x438] sm:$0xff] %v1038_v23 }
  0x7f   : > { %1041 = vst [vmem:[%s4572_s6 + $0x440] sm:$0xff] %v1040_v24  ;;  %1043 = vst [vmem:[%s4572_s6 + $0x448] sm:$0xff] %v1042_v25  ;;  %v1044_v26 = vld [vmem:[%s4567_s25 + $0x8a0] sm:$0xff]  ;;  %v1046_v27 = vld [vmem:[%s4567_s25 + $0x8b0] sm:$0xff] }
  0x80   : > { %v1048_v28 = vld [vmem:[%s4567_s25 + $0x8c0] sm:$0xff]  ;;  %1045 = vst [vmem:[%s4572_s6 + $0x450] sm:$0xff] %v1044_v26  ;;  %1047 = vst [vmem:[%s4572_s6 + $0x458] sm:$0xff] %v1046_v27  ;;  %v1050_v29 = vld [vmem:[%s4567_s25 + $0x8d0] sm:$0xff] }
  0x81   : > { %1049 = vst [vmem:[%s4572_s6 + $0x460] sm:$0xff] %v1048_v28  ;;  %v1052_v30 = vld [vmem:[%s4567_s25 + $0x8e0] sm:$0xff]  ;;  %v1054_v31 = vld [vmem:[%s4567_s25 + $0x8f0] sm:$0xff]  ;;  %1051 = vst [vmem:[%s4572_s6 + $0x468] sm:$0xff] %v1050_v29 }
  0x82   : > { %1053 = vst [vmem:[%s4572_s6 + $0x470] sm:$0xff] %v1052_v30  ;;  %1055 = vst [vmem:[%s4572_s6 + $0x478] sm:$0xff] %v1054_v31  ;;  %v1056_v32 = vld [vmem:[%s4567_s25 + $0x900] sm:$0xff]  ;;  %v1058_v33 = vld [vmem:[%s4567_s25 + $0x910] sm:$0xff] }
  0x83   : > { %v1060_v34 = vld [vmem:[%s4567_s25 + $0x920] sm:$0xff]  ;;  %1057 = vst [vmem:[%s4572_s6 + $0x480] sm:$0xff] %v1056_v32  ;;  %1059 = vst [vmem:[%s4572_s6 + $0x488] sm:$0xff] %v1058_v33  ;;  %v1062_v35 = vld [vmem:[%s4567_s25 + $0x930] sm:$0xff] }
  0x84   : > { %1061 = vst [vmem:[%s4572_s6 + $0x490] sm:$0xff] %v1060_v34  ;;  %v1064_v36 = vld [vmem:[%s4567_s25 + $0x940] sm:$0xff]  ;;  %v1066_v37 = vld [vmem:[%s4567_s25 + $0x950] sm:$0xff]  ;;  %1063 = vst [vmem:[%s4572_s6 + $0x498] sm:$0xff] %v1062_v35 }
  0x85   : > { %1065 = vst [vmem:[%s4572_s6 + $0x4a0] sm:$0xff] %v1064_v36  ;;  %1067 = vst [vmem:[%s4572_s6 + $0x4a8] sm:$0xff] %v1066_v37  ;;  %v1068_v38 = vld [vmem:[%s4567_s25 + $0x960] sm:$0xff]  ;;  %v1070_v39 = vld [vmem:[%s4567_s25 + $0x970] sm:$0xff] }
  0x86   : > { %v1072_v40 = vld [vmem:[%s4567_s25 + $0x980] sm:$0xff]  ;;  %1069 = vst [vmem:[%s4572_s6 + $0x4b0] sm:$0xff] %v1068_v38  ;;  %1071 = vst [vmem:[%s4572_s6 + $0x4b8] sm:$0xff] %v1070_v39  ;;  %v1074_v41 = vld [vmem:[%s4567_s25 + $0x990] sm:$0xff] }
  0x87   : > { %1073 = vst [vmem:[%s4572_s6 + $0x4c0] sm:$0xff] %v1072_v40  ;;  %v1076_v42 = vld [vmem:[%s4567_s25 + $0x9a0] sm:$0xff]  ;;  %v1078_v43 = vld [vmem:[%s4567_s25 + $0x9b0] sm:$0xff]  ;;  %1075 = vst [vmem:[%s4572_s6 + $0x4c8] sm:$0xff] %v1074_v41 }
  0x88   : > { %1077 = vst [vmem:[%s4572_s6 + $0x4d0] sm:$0xff] %v1076_v42  ;;  %1079 = vst [vmem:[%s4572_s6 + $0x4d8] sm:$0xff] %v1078_v43  ;;  %v1080_v44 = vld [vmem:[%s4567_s25 + $0x9c0] sm:$0xff]  ;;  %v1082_v45 = vld [vmem:[%s4567_s25 + $0x9d0] sm:$0xff] }
  0x89   : > { %v1084_v46 = vld [vmem:[%s4567_s25 + $0x9e0] sm:$0xff]  ;;  %1081 = vst [vmem:[%s4572_s6 + $0x4e0] sm:$0xff] %v1080_v44  ;;  %1083 = vst [vmem:[%s4572_s6 + $0x4e8] sm:$0xff] %v1082_v45  ;;  %v1086_v47 = vld [vmem:[%s4567_s25 + $0x9f0] sm:$0xff] }
  0x8a   : > { %1085 = vst [vmem:[%s4572_s6 + $0x4f0] sm:$0xff] %v1084_v46  ;;  %v1088_v48 = vld [vmem:[%s4567_s25 + $0xa00] sm:$0xff]  ;;  %v1090_v49 = vld [vmem:[%s4567_s25 + $0xa10] sm:$0xff]  ;;  %1087 = vst [vmem:[%s4572_s6 + $0x4f8] sm:$0xff] %v1086_v47 }
  0x8b   : > { %1089 = vst [vmem:[%s4572_s6 + $0x500] sm:$0xff] %v1088_v48  ;;  %1091 = vst [vmem:[%s4572_s6 + $0x508] sm:$0xff] %v1090_v49  ;;  %v1092_v50 = vld [vmem:[%s4567_s25 + $0xa20] sm:$0xff]  ;;  %v1094_v51 = vld [vmem:[%s4567_s25 + $0xa30] sm:$0xff] }
  0x8c   : > { %v1096_v52 = vld [vmem:[%s4567_s25 + $0xa40] sm:$0xff]  ;;  %1093 = vst [vmem:[%s4572_s6 + $0x510] sm:$0xff] %v1092_v50  ;;  %1095 = vst [vmem:[%s4572_s6 + $0x518] sm:$0xff] %v1094_v51  ;;  %v1098_v53 = vld [vmem:[%s4567_s25 + $0xa50] sm:$0xff] }
  0x8d   : > { %1097 = vst [vmem:[%s4572_s6 + $0x520] sm:$0xff] %v1096_v52  ;;  %v1100_v54 = vld [vmem:[%s4567_s25 + $0xa60] sm:$0xff]  ;;  %v1102_v55 = vld [vmem:[%s4567_s25 + $0xa70] sm:$0xff]  ;;  %1099 = vst [vmem:[%s4572_s6 + $0x528] sm:$0xff] %v1098_v53 }
  0x8e   : > { %1101 = vst [vmem:[%s4572_s6 + $0x530] sm:$0xff] %v1100_v54  ;;  %1103 = vst [vmem:[%s4572_s6 + $0x538] sm:$0xff] %v1102_v55  ;;  %v1104_v56 = vld [vmem:[%s4567_s25 + $0xa80] sm:$0xff]  ;;  %v1106_v57 = vld [vmem:[%s4567_s25 + $0xa90] sm:$0xff] }
  0x8f   : > { %v1108_v58 = vld [vmem:[%s4567_s25 + $0xaa0] sm:$0xff]  ;;  %1105 = vst [vmem:[%s4572_s6 + $0x540] sm:$0xff] %v1104_v56  ;;  %1107 = vst [vmem:[%s4572_s6 + $0x548] sm:$0xff] %v1106_v57  ;;  %v1110_v59 = vld [vmem:[%s4567_s25 + $0xab0] sm:$0xff] }
  0x90   : > { %1109 = vst [vmem:[%s4572_s6 + $0x550] sm:$0xff] %v1108_v58  ;;  %v1112_v60 = vld [vmem:[%s4567_s25 + $0xac0] sm:$0xff]  ;;  %v1114_v61 = vld [vmem:[%s4567_s25 + $0xad0] sm:$0xff]  ;;  %1111 = vst [vmem:[%s4572_s6 + $0x558] sm:$0xff] %v1110_v59 }
  0x91   : > { %1113 = vst [vmem:[%s4572_s6 + $0x560] sm:$0xff] %v1112_v60  ;;  %1115 = vst [vmem:[%s4572_s6 + $0x568] sm:$0xff] %v1114_v61  ;;  %v1116_v62 = vld [vmem:[%s4567_s25 + $0xae0] sm:$0xff]  ;;  %v1118_v63 = vld [vmem:[%s4567_s25 + $0xaf0] sm:$0xff] }
  0x92   : > { %v1120_v0 = vld [vmem:[%s4567_s25 + $0xb00] sm:$0xff]  ;;  %1117 = vst [vmem:[%s4572_s6 + $0x570] sm:$0xff] %v1116_v62  ;;  %1119 = vst [vmem:[%s4572_s6 + $0x578] sm:$0xff] %v1118_v63  ;;  %v1122_v1 = vld [vmem:[%s4567_s25 + $0xb10] sm:$0xff] }
  0x93   : > { %1121 = vst [vmem:[%s4572_s6 + $0x580] sm:$0xff] %v1120_v0  ;;  %v1124_v2 = vld [vmem:[%s4567_s25 + $0xb20] sm:$0xff]  ;;  %v1126_v3 = vld [vmem:[%s4567_s25 + $0xb30] sm:$0xff]  ;;  %1123 = vst [vmem:[%s4572_s6 + $0x588] sm:$0xff] %v1122_v1 }
  0x94   : > { %1125 = vst [vmem:[%s4572_s6 + $0x590] sm:$0xff] %v1124_v2  ;;  %1127 = vst [vmem:[%s4572_s6 + $0x598] sm:$0xff] %v1126_v3  ;;  %v1128_v4 = vld [vmem:[%s4567_s25 + $0xb40] sm:$0xff]  ;;  %v1130_v5 = vld [vmem:[%s4567_s25 + $0xb50] sm:$0xff] }
  0x95   : > { %v1132_v6 = vld [vmem:[%s4567_s25 + $0xb60] sm:$0xff]  ;;  %1129 = vst [vmem:[%s4572_s6 + $0x5a0] sm:$0xff] %v1128_v4  ;;  %1131 = vst [vmem:[%s4572_s6 + $0x5a8] sm:$0xff] %v1130_v5  ;;  %v1134_v7 = vld [vmem:[%s4567_s25 + $0xb70] sm:$0xff] }
  0x96   : > { %1133 = vst [vmem:[%s4572_s6 + $0x5b0] sm:$0xff] %v1132_v6  ;;  %v1136_v8 = vld [vmem:[%s4567_s25 + $0xb80] sm:$0xff]  ;;  %v1138_v9 = vld [vmem:[%s4567_s25 + $0xb90] sm:$0xff]  ;;  %1135 = vst [vmem:[%s4572_s6 + $0x5b8] sm:$0xff] %v1134_v7 }
  0x97   : > { %1137 = vst [vmem:[%s4572_s6 + $0x5c0] sm:$0xff] %v1136_v8  ;;  %1139 = vst [vmem:[%s4572_s6 + $0x5c8] sm:$0xff] %v1138_v9  ;;  %v1140_v10 = vld [vmem:[%s4567_s25 + $0xba0] sm:$0xff]  ;;  %v1142_v11 = vld [vmem:[%s4567_s25 + $0xbb0] sm:$0xff] }
  0x98   : > { %v1144_v12 = vld [vmem:[%s4567_s25 + $0xbc0] sm:$0xff]  ;;  %1141 = vst [vmem:[%s4572_s6 + $0x5d0] sm:$0xff] %v1140_v10  ;;  %1143 = vst [vmem:[%s4572_s6 + $0x5d8] sm:$0xff] %v1142_v11  ;;  %v1146_v13 = vld [vmem:[%s4567_s25 + $0xbd0] sm:$0xff] }
  0x99   : > { %1145 = vst [vmem:[%s4572_s6 + $0x5e0] sm:$0xff] %v1144_v12  ;;  %v1148_v14 = vld [vmem:[%s4567_s25 + $0xbe0] sm:$0xff]  ;;  %v1150_v15 = vld [vmem:[%s4567_s25 + $0xbf0] sm:$0xff]  ;;  %1147 = vst [vmem:[%s4572_s6 + $0x5e8] sm:$0xff] %v1146_v13 }
  0x9a   : > { %1149 = vst [vmem:[%s4572_s6 + $0x5f0] sm:$0xff] %v1148_v14  ;;  %1151 = vst [vmem:[%s4572_s6 + $0x5f8] sm:$0xff] %v1150_v15  ;;  %v1152_v16 = vld [vmem:[%s4567_s25 + $0xc00] sm:$0xff]  ;;  %v1154_v17 = vld [vmem:[%s4567_s25 + $0xc10] sm:$0xff] }
  0x9b   : > { %v1156_v18 = vld [vmem:[%s4567_s25 + $0xc20] sm:$0xff]  ;;  %1153 = vst [vmem:[%s4572_s6 + $0x600] sm:$0xff] %v1152_v16  ;;  %1155 = vst [vmem:[%s4572_s6 + $0x608] sm:$0xff] %v1154_v17  ;;  %v1158_v19 = vld [vmem:[%s4567_s25 + $0xc30] sm:$0xff] }
  0x9c   : > { %1157 = vst [vmem:[%s4572_s6 + $0x610] sm:$0xff] %v1156_v18  ;;  %v1160_v20 = vld [vmem:[%s4567_s25 + $0xc40] sm:$0xff]  ;;  %v1162_v21 = vld [vmem:[%s4567_s25 + $0xc50] sm:$0xff]  ;;  %1159 = vst [vmem:[%s4572_s6 + $0x618] sm:$0xff] %v1158_v19 }
  0x9d   : > { %1161 = vst [vmem:[%s4572_s6 + $0x620] sm:$0xff] %v1160_v20  ;;  %1163 = vst [vmem:[%s4572_s6 + $0x628] sm:$0xff] %v1162_v21  ;;  %v1164_v22 = vld [vmem:[%s4567_s25 + $0xc60] sm:$0xff]  ;;  %v1166_v23 = vld [vmem:[%s4567_s25 + $0xc70] sm:$0xff] }
  0x9e   : > { %v1168_v24 = vld [vmem:[%s4567_s25 + $0xc80] sm:$0xff]  ;;  %1165 = vst [vmem:[%s4572_s6 + $0x630] sm:$0xff] %v1164_v22  ;;  %1167 = vst [vmem:[%s4572_s6 + $0x638] sm:$0xff] %v1166_v23  ;;  %v1170_v25 = vld [vmem:[%s4567_s25 + $0xc90] sm:$0xff] }
  0x9f   : > { %1169 = vst [vmem:[%s4572_s6 + $0x640] sm:$0xff] %v1168_v24  ;;  %v1172_v26 = vld [vmem:[%s4567_s25 + $0xca0] sm:$0xff]  ;;  %v1174_v27 = vld [vmem:[%s4567_s25 + $0xcb0] sm:$0xff]  ;;  %1171 = vst [vmem:[%s4572_s6 + $0x648] sm:$0xff] %v1170_v25 }
  0xa0   : > { %1173 = vst [vmem:[%s4572_s6 + $0x650] sm:$0xff] %v1172_v26  ;;  %1175 = vst [vmem:[%s4572_s6 + $0x658] sm:$0xff] %v1174_v27  ;;  %v1176_v28 = vld [vmem:[%s4567_s25 + $0xcc0] sm:$0xff]  ;;  %v1178_v29 = vld [vmem:[%s4567_s25 + $0xcd0] sm:$0xff] }
  0xa1   : > { %v1180_v30 = vld [vmem:[%s4567_s25 + $0xce0] sm:$0xff]  ;;  %1177 = vst [vmem:[%s4572_s6 + $0x660] sm:$0xff] %v1176_v28  ;;  %1179 = vst [vmem:[%s4572_s6 + $0x668] sm:$0xff] %v1178_v29  ;;  %v1182_v31 = vld [vmem:[%s4567_s25 + $0xcf0] sm:$0xff] }
  0xa2   : > { %1181 = vst [vmem:[%s4572_s6 + $0x670] sm:$0xff] %v1180_v30  ;;  %v1184_v32 = vld [vmem:[%s4567_s25 + $0xd00] sm:$0xff]  ;;  %v1186_v33 = vld [vmem:[%s4567_s25 + $0xd10] sm:$0xff]  ;;  %1183 = vst [vmem:[%s4572_s6 + $0x678] sm:$0xff] %v1182_v31 }
  0xa3   : > { %1185 = vst [vmem:[%s4572_s6 + $0x680] sm:$0xff] %v1184_v32  ;;  %1187 = vst [vmem:[%s4572_s6 + $0x688] sm:$0xff] %v1186_v33  ;;  %v1188_v34 = vld [vmem:[%s4567_s25 + $0xd20] sm:$0xff]  ;;  %v1190_v35 = vld [vmem:[%s4567_s25 + $0xd30] sm:$0xff] }
  0xa4   : > { %v1192_v36 = vld [vmem:[%s4567_s25 + $0xd40] sm:$0xff]  ;;  %1189 = vst [vmem:[%s4572_s6 + $0x690] sm:$0xff] %v1188_v34  ;;  %1191 = vst [vmem:[%s4572_s6 + $0x698] sm:$0xff] %v1190_v35  ;;  %v1194_v37 = vld [vmem:[%s4567_s25 + $0xd50] sm:$0xff] }
  0xa5   : > { %1193 = vst [vmem:[%s4572_s6 + $0x6a0] sm:$0xff] %v1192_v36  ;;  %v1196_v38 = vld [vmem:[%s4567_s25 + $0xd60] sm:$0xff]  ;;  %v1198_v39 = vld [vmem:[%s4567_s25 + $0xd70] sm:$0xff]  ;;  %1195 = vst [vmem:[%s4572_s6 + $0x6a8] sm:$0xff] %v1194_v37 }
  0xa6   : > { %1197 = vst [vmem:[%s4572_s6 + $0x6b0] sm:$0xff] %v1196_v38  ;;  %1199 = vst [vmem:[%s4572_s6 + $0x6b8] sm:$0xff] %v1198_v39  ;;  %v1200_v40 = vld [vmem:[%s4567_s25 + $0xd80] sm:$0xff]  ;;  %v1202_v41 = vld [vmem:[%s4567_s25 + $0xd90] sm:$0xff] }
  0xa7   : > { %v1204_v42 = vld [vmem:[%s4567_s25 + $0xda0] sm:$0xff]  ;;  %1201 = vst [vmem:[%s4572_s6 + $0x6c0] sm:$0xff] %v1200_v40  ;;  %1203 = vst [vmem:[%s4572_s6 + $0x6c8] sm:$0xff] %v1202_v41  ;;  %v1206_v43 = vld [vmem:[%s4567_s25 + $0xdb0] sm:$0xff] }
  0xa8   : > { %1205 = vst [vmem:[%s4572_s6 + $0x6d0] sm:$0xff] %v1204_v42  ;;  %v1208_v44 = vld [vmem:[%s4567_s25 + $0xdc0] sm:$0xff]  ;;  %v1210_v45 = vld [vmem:[%s4567_s25 + $0xdd0] sm:$0xff]  ;;  %1207 = vst [vmem:[%s4572_s6 + $0x6d8] sm:$0xff] %v1206_v43 }
  0xa9   : > { %1209 = vst [vmem:[%s4572_s6 + $0x6e0] sm:$0xff] %v1208_v44  ;;  %1211 = vst [vmem:[%s4572_s6 + $0x6e8] sm:$0xff] %v1210_v45  ;;  %v1212_v46 = vld [vmem:[%s4567_s25 + $0xde0] sm:$0xff]  ;;  %v1214_v47 = vld [vmem:[%s4567_s25 + $0xdf0] sm:$0xff] }
  0xaa   : > { %v1216_v48 = vld [vmem:[%s4567_s25 + $0xe00] sm:$0xff]  ;;  %1213 = vst [vmem:[%s4572_s6 + $0x6f0] sm:$0xff] %v1212_v46  ;;  %1215 = vst [vmem:[%s4572_s6 + $0x6f8] sm:$0xff] %v1214_v47  ;;  %v1218_v49 = vld [vmem:[%s4567_s25 + $0xe10] sm:$0xff] }
  0xab   : > { %1217 = vst [vmem:[%s4572_s6 + $0x700] sm:$0xff] %v1216_v48  ;;  %v1220_v50 = vld [vmem:[%s4567_s25 + $0xe20] sm:$0xff]  ;;  %v1222_v51 = vld [vmem:[%s4567_s25 + $0xe30] sm:$0xff]  ;;  %1219 = vst [vmem:[%s4572_s6 + $0x708] sm:$0xff] %v1218_v49 }
  0xac   : > { %1221 = vst [vmem:[%s4572_s6 + $0x710] sm:$0xff] %v1220_v50  ;;  %1223 = vst [vmem:[%s4572_s6 + $0x718] sm:$0xff] %v1222_v51  ;;  %v1224_v52 = vld [vmem:[%s4567_s25 + $0xe40] sm:$0xff]  ;;  %v1226_v53 = vld [vmem:[%s4567_s25 + $0xe50] sm:$0xff] }
  0xad   : > { %v1228_v54 = vld [vmem:[%s4567_s25 + $0xe60] sm:$0xff]  ;;  %1225 = vst [vmem:[%s4572_s6 + $0x720] sm:$0xff] %v1224_v52  ;;  %1227 = vst [vmem:[%s4572_s6 + $0x728] sm:$0xff] %v1226_v53  ;;  %v1230_v55 = vld [vmem:[%s4567_s25 + $0xe70] sm:$0xff] }
  0xae   : > { %1229 = vst [vmem:[%s4572_s6 + $0x730] sm:$0xff] %v1228_v54  ;;  %v1232_v56 = vld [vmem:[%s4567_s25 + $0xe80] sm:$0xff]  ;;  %v1234_v57 = vld [vmem:[%s4567_s25 + $0xe90] sm:$0xff]  ;;  %1231 = vst [vmem:[%s4572_s6 + $0x738] sm:$0xff] %v1230_v55 }
  0xaf   : > { %1233 = vst [vmem:[%s4572_s6 + $0x740] sm:$0xff] %v1232_v56  ;;  %1235 = vst [vmem:[%s4572_s6 + $0x748] sm:$0xff] %v1234_v57  ;;  %v1236_v58 = vld [vmem:[%s4567_s25 + $0xea0] sm:$0xff]  ;;  %v1238_v59 = vld [vmem:[%s4567_s25 + $0xeb0] sm:$0xff] }
  0xb0   : > { %v1240_v60 = vld [vmem:[%s4567_s25 + $0xec0] sm:$0xff]  ;;  %1237 = vst [vmem:[%s4572_s6 + $0x750] sm:$0xff] %v1236_v58  ;;  %1239 = vst [vmem:[%s4572_s6 + $0x758] sm:$0xff] %v1238_v59  ;;  %v1242_v61 = vld [vmem:[%s4567_s25 + $0xed0] sm:$0xff] }
  0xb1   : > { %1241 = vst [vmem:[%s4572_s6 + $0x760] sm:$0xff] %v1240_v60  ;;  %v1244_v62 = vld [vmem:[%s4567_s25 + $0xee0] sm:$0xff]  ;;  %v1246_v63 = vld [vmem:[%s4567_s25 + $0xef0] sm:$0xff]  ;;  %1243 = vst [vmem:[%s4572_s6 + $0x768] sm:$0xff] %v1242_v61 }
  0xb2   : > { %1245 = vst [vmem:[%s4572_s6 + $0x770] sm:$0xff] %v1244_v62  ;;  %1247 = vst [vmem:[%s4572_s6 + $0x778] sm:$0xff] %v1246_v63  ;;  %v1248_v0 = vld [vmem:[%s4567_s25 + $0xf00] sm:$0xff]  ;;  %v1250_v1 = vld [vmem:[%s4567_s25 + $0xf10] sm:$0xff] }
  0xb3   : > { %v1252_v2 = vld [vmem:[%s4567_s25 + $0xf20] sm:$0xff]  ;;  %1249 = vst [vmem:[%s4572_s6 + $0x780] sm:$0xff] %v1248_v0  ;;  %1251 = vst [vmem:[%s4572_s6 + $0x788] sm:$0xff] %v1250_v1  ;;  %v1254_v3 = vld [vmem:[%s4567_s25 + $0xf30] sm:$0xff] }
  0xb4   : > { %1253 = vst [vmem:[%s4572_s6 + $0x790] sm:$0xff] %v1252_v2  ;;  %v1256_v4 = vld [vmem:[%s4567_s25 + $0xf40] sm:$0xff]  ;;  %v1258_v5 = vld [vmem:[%s4567_s25 + $0xf50] sm:$0xff]  ;;  %1255 = vst [vmem:[%s4572_s6 + $0x798] sm:$0xff] %v1254_v3 }
  0xb5   : > { %1257 = vst [vmem:[%s4572_s6 + $0x7a0] sm:$0xff] %v1256_v4  ;;  %1259 = vst [vmem:[%s4572_s6 + $0x7a8] sm:$0xff] %v1258_v5  ;;  %v1260_v6 = vld [vmem:[%s4567_s25 + $0xf60] sm:$0xff]  ;;  %v1262_v7 = vld [vmem:[%s4567_s25 + $0xf70] sm:$0xff] }
  0xb6   : > { %v1264_v8 = vld [vmem:[%s4567_s25 + $0xf80] sm:$0xff]  ;;  %1261 = vst [vmem:[%s4572_s6 + $0x7b0] sm:$0xff] %v1260_v6  ;;  %1263 = vst [vmem:[%s4572_s6 + $0x7b8] sm:$0xff] %v1262_v7  ;;  %v1266_v9 = vld [vmem:[%s4567_s25 + $0xf90] sm:$0xff] }
  0xb7   : > { %1265 = vst [vmem:[%s4572_s6 + $0x7c0] sm:$0xff] %v1264_v8  ;;  %v1268_v10 = vld [vmem:[%s4567_s25 + $0xfa0] sm:$0xff]  ;;  %v1270_v11 = vld [vmem:[%s4567_s25 + $0xfb0] sm:$0xff]  ;;  %1267 = vst [vmem:[%s4572_s6 + $0x7c8] sm:$0xff] %v1266_v9 }
  0xb8   : > { %1269 = vst [vmem:[%s4572_s6 + $0x7d0] sm:$0xff] %v1268_v10  ;;  %1271 = vst [vmem:[%s4572_s6 + $0x7d8] sm:$0xff] %v1270_v11  ;;  %v1272_v12 = vld [vmem:[%s4567_s25 + $0xfc0] sm:$0xff]  ;;  %v1274_v13 = vld [vmem:[%s4567_s25 + $0xfd0] sm:$0xff] }
  0xb9   : > { %v1276_v14 = vld [vmem:[%s4567_s25 + $0xfe0] sm:$0xff]  ;;  %1273 = vst [vmem:[%s4572_s6 + $0x7e0] sm:$0xff] %v1272_v12  ;;  %1275 = vst [vmem:[%s4572_s6 + $0x7e8] sm:$0xff] %v1274_v13  ;;  %v1278_v15 = vld [vmem:[%s4567_s25 + $0xff0] sm:$0xff] }
  0xba   : > { %1277 = vst [vmem:[%s4572_s6 + $0x7f0] sm:$0xff] %v1276_v14  ;;  %1279 = vst [vmem:[%s4572_s6 + $0x7f8] sm:$0xff] %v1278_v15 }
  0xbb PF: > { %p3562_p0 = scmp.ge.s32.totalorder %s4412_s22, 1  ;;  %p1292_p1 = scmp.lt.s32.totalorder %s4412_s22, 5 }
  0xbd   : > { %p1293_p2 = pnand %p3562_p0, %p1292_p1 }
  0xbe   : > { %s1299_s0 = sand.u32 (!%p1293_p2), 1, %s4388_s16   ;;  %s1306_s5 = sand.u32 (!%p1293_p2), 1, %s4380_s14  }
  0xbf   : > { %1296 = sbr.rel (%p1293_p2) target bundleno = 694 (0x2b6), region = 85  ;;  %s3563_s23 = sshll.u32 (!%p1293_p2), %s1299_s0, 7 }
  0xc0   : > { %s3564_s28 = sshll.u32 (!%p1293_p2), %s1306_s5, 11  ;;  %s1333_s7 = sand.u32 (!%p1293_p2), 1, %s4372_s12  }
  0xc1   : > { %s3566_s11 = sshll.u32 (!%p1293_p2), %s4400_s19, 1  ;;  %s3565_s25 = sshll.u32 (!%p1293_p2), %s1333_s7, 4 }
  0xc2   : > { %p1341_p3 = scmp.lt.s32.totalorder (!%p1293_p2), %s3566_s11, 3  ;;  %s5095_s4 = scalar_lea.vmem (!%p1293_p2), [#allocation3], %s3563_s23 }
  0xc3   : > { %s5097_s6 = scalar_lea.vmem (!%p1293_p2), [#allocation4], %s3564_s28  ;;  %s5099_s1 = scalar_lea.vmem (!%p1293_p2), [#allocation5], %s3565_s25 }
  0xc4   : > { %s5502_s11 = smov (!%p1341_p3, %s3566_s11), 3  ;;  %p3567_p4 = scmp.ne.s32.totalorder %s4396_s18, 0 }
  0xc5   : > { %s1343_s29 = scalar_lea.vmem %s5473_s2, %s5502_s11 }
  0xc6   : > { %1350 = sbr.rel (%p3567_p4) target bundleno = 206 (0xce), region = 97 }
  0xcb   : > { %v4414_v16 = vmov 0.0  }
  0xcc   : > { %1351 = vst [vmem:[#allocation2 + $0x10] sm:$0xff] %v4414_v16  ;;  %1352 = vst [vmem:[#allocation2] sm:$0xff] %v4414_v16 }
  0xcd   : > { %1353 = vst [vmem:[#allocation2 + $0x18] sm:$0xff] %v4414_v16  ;;  %1354 = vst [vmem:[#allocation2 + $0x8] sm:$0xff] %v4414_v16 }
  0xce PF: > { %v3942_v17 = vld [vmem:[%s5097_s6 + $0x74] ss:$8 sps:$4 sm:$0xff]   ;;  %v3946_v19 = vld [vmem:[%s5097_s6 + $0x70] ss:$8 sps:$4 sm:$0xff]   ;;  %v3948_v21 = vld [vmem:[%s5097_s6 + $0x64] ss:$8 sps:$4 sm:$0xff]  }
  0xcf   : > { %v3944_v18 = vld [vmem:[%s5097_s6 + $0x174] ss:$8 sps:$4 sm:$0xff]   ;;  %2991 = vmatprep.subr.bf16.mxu0 %v3942_v17  ;;  %v3947_v20 = vld [vmem:[%s5097_s6 + $0x170] ss:$8 sps:$4 sm:$0xff]   ;;  %v3950_v22 = vld [vmem:[%s5097_s6 + $0x164] ss:$8 sps:$4 sm:$0xff]  }
  0xd0   : > { %3034 = vmatprep.subr.bf16.mxu1 %v3944_v18  ;;  %2992 = vmatpush1.bf16.msra.mxu0 %v3946_v19  ;;  %v3952_v23 = vld [vmem:[%s5097_s6 + $0x60] ss:$8 sps:$4 sm:$0xff]   ;;  %v3954_v25 = vld [vmem:[%s5097_s6 + $0x54] ss:$8 sps:$4 sm:$0xff]   ;;  %v3958_v27 = vld [vmem:[%s5097_s6 + $0x50] ss:$8 sps:$4 sm:$0xff]  }
  0xd1   : > { %3035 = vmatpush1.bf16.msra.mxu1 %v3947_v20  ;;  %2993 = vmatprep.subr.bf16.mxu0 %v3948_v21  ;;  %v3953_v24 = vld [vmem:[%s5097_s6 + $0x160] ss:$8 sps:$4 sm:$0xff]   ;;  %v3956_v26 = vld [vmem:[%s5097_s6 + $0x154] ss:$8 sps:$4 sm:$0xff]   ;;  %v3959_v28 = vld [vmem:[%s5097_s6 + $0x150] ss:$8 sps:$4 sm:$0xff]  }
  0xd2   : > { %3036 = vmatprep.subr.bf16.mxu1 %v3950_v22  ;;  %v3960_v29 = vld [vmem:[%s5097_s6 + $0x44] ss:$8 sps:$4 sm:$0xff]   ;;  %v3964_v31 = vld [vmem:[%s5097_s6 + $0x40] ss:$8 sps:$4 sm:$0xff]   ;;  %v3966_v33 = vld [vmem:[%s5097_s6 + $0x34] ss:$8 sps:$4 sm:$0xff]  }
  0xd3   : > { %v3962_v30 = vld [vmem:[%s5097_s6 + $0x144] ss:$8 sps:$4 sm:$0xff]   ;;  %v3965_v32 = vld [vmem:[%s5097_s6 + $0x140] ss:$8 sps:$4 sm:$0xff]   ;;  %v3968_v34 = vld [vmem:[%s5097_s6 + $0x134] ss:$8 sps:$4 sm:$0xff]  }
  0xd4   : > { %2994 = vmatpush1.bf16.msra.mxu0 %v3952_v23  ;;  %v3970_v35 = vld [vmem:[%s5097_s6 + $0x30] ss:$8 sps:$4 sm:$0xff]   ;;  %v3972_v37 = vld [vmem:[%s5097_s6 + $0x24] ss:$8 sps:$4 sm:$0xff]   ;;  %v3976_v39 = vld [vmem:[%s5097_s6 + $0x20] ss:$8 sps:$4 sm:$0xff]  }
  0xd5   : > { %3037 = vmatpush1.bf16.msra.mxu1 %v3953_v24  ;;  %2995 = vmatprep.subr.bf16.mxu0 %v3954_v25  ;;  %v3971_v36 = vld [vmem:[%s5097_s6 + $0x130] ss:$8 sps:$4 sm:$0xff]   ;;  %v3974_v38 = vld [vmem:[%s5097_s6 + $0x124] ss:$8 sps:$4 sm:$0xff]   ;;  %v3977_v40 = vld [vmem:[%s5097_s6 + $0x120] ss:$8 sps:$4 sm:$0xff]  }
  0xd6   : > { %3038 = vmatprep.subr.bf16.mxu1 %v3956_v26  ;;  %v3978_v41 = vld [vmem:[%s5097_s6 + $0x14] ss:$8 sps:$4 sm:$0xff]   ;;  %v3982_v43 = vld [vmem:[%s5097_s6 + $0x10] ss:$8 sps:$4 sm:$0xff]   ;;  %v3984_v45 = vld [vmem:[%s5097_s6 + $0x4] ss:$8 sps:$4 sm:$0xff]  }
  0xd7   : > { %v3980_v42 = vld [vmem:[%s5097_s6 + $0x114] ss:$8 sps:$4 sm:$0xff]   ;;  %v3983_v44 = vld [vmem:[%s5097_s6 + $0x110] ss:$8 sps:$4 sm:$0xff]   ;;  %v3986_v46 = vld [vmem:[%s5097_s6 + $0x104] ss:$8 sps:$4 sm:$0xff]  }
  0xd8   : > { %2996 = vmatpush1.bf16.msra.mxu0 %v3958_v27  ;;  %v3988_v47 = vld [vmem:[%s5097_s6] ss:$8 sps:$4 sm:$0xff]   ;;  %v3990_v49 = vld [vmem:[%s5097_s6 + $0xf4] ss:$8 sps:$4 sm:$0xff]   ;;  %v3994_v51 = vld [vmem:[%s5097_s6 + $0xf0] ss:$8 sps:$4 sm:$0xff]  }
  0xd9   : > { %3039 = vmatpush1.bf16.msra.mxu1 %v3959_v28  ;;  %2997 = vmatprep.subr.bf16.mxu0 %v3960_v29  ;;  %v3989_v48 = vld [vmem:[%s5097_s6 + $0x100] ss:$8 sps:$4 sm:$0xff]   ;;  %v3992_v50 = vld [vmem:[%s5097_s6 + $0x1f4] ss:$8 sps:$4 sm:$0xff]   ;;  %v3995_v52 = vld [vmem:[%s5097_s6 + $0x1f0] ss:$8 sps:$4 sm:$0xff]  }
  0xda   : > { %3040 = vmatprep.subr.bf16.mxu1 %v3962_v30  ;;  %v3996_v53 = vld [vmem:[%s5097_s6 + $0xe4] ss:$8 sps:$4 sm:$0xff]   ;;  %v4000_v55 = vld [vmem:[%s5097_s6 + $0xe0] ss:$8 sps:$4 sm:$0xff]   ;;  %v4002_v57 = vld [vmem:[%s5097_s6 + $0xd4] ss:$8 sps:$4 sm:$0xff]  }
  0xdb   : > { %v3998_v54 = vld [vmem:[%s5097_s6 + $0x1e4] ss:$8 sps:$4 sm:$0xff]   ;;  %v4001_v56 = vld [vmem:[%s5097_s6 + $0x1e0] ss:$8 sps:$4 sm:$0xff]   ;;  %v4004_v58 = vld [vmem:[%s5097_s6 + $0x1d4] ss:$8 sps:$4 sm:$0xff]  }
  0xdc   : > { %2998 = vmatpush1.bf16.msra.mxu0 %v3964_v31  ;;  %v4006_v59 = vld [vmem:[%s5097_s6 + $0xd0] ss:$8 sps:$4 sm:$0xff]   ;;  %v4008_v61 = vld [vmem:[%s5097_s6 + $0xc4] ss:$8 sps:$4 sm:$0xff]   ;;  %v4012_v63 = vld [vmem:[%s5097_s6 + $0xc0] ss:$8 sps:$4 sm:$0xff]  }
  0xdd   : > { %3041 = vmatpush1.bf16.msra.mxu1 %v3965_v32  ;;  %2999 = vmatprep.subr.bf16.mxu0 %v3966_v33  ;;  %v4007_v60 = vld [vmem:[%s5097_s6 + $0x1d0] ss:$8 sps:$4 sm:$0xff]   ;;  %v4010_v62 = vld [vmem:[%s5097_s6 + $0x1c4] ss:$8 sps:$4 sm:$0xff]   ;;  %v4013_v0 = vld [vmem:[%s5097_s6 + $0x1c0] ss:$8 sps:$4 sm:$0xff]  }
  0xde   : > { %3042 = vmatprep.subr.bf16.mxu1 %v3968_v34  ;;  %v1359_v1 = vld [vmem:[%s5095_s4] sm:$0xff]  ;;  %v1360_v3 = vld [vmem:[%s5095_s4 + $0x8] sm:$0xff]  ;;  %v4014_v5 = vld [vmem:[%s5097_s6 + $0xb4] ss:$8 sps:$4 sm:$0xff]   ;;  %p3840_p5 = scmp.ne.s32.totalorder %s4396_s18, 1 }
  0xdf   : > { %v1367_v2 = vld [vmem:[%s5095_s4 + $0x40] sm:$0xff]  ;;  %v1368_v4 = vld [vmem:[%s5095_s4 + $0x48] sm:$0xff]  ;;  %v4016_v7 = vld [vmem:[%s5097_s6 + $0x1b4] ss:$8 sps:$4 sm:$0xff]  }
  0xe0   : > { %3000 = vmatpush1.bf16.msra.mxu0 %v3970_v35  ;;  %v3569_v6 = vcombine.high %v1359_v1, %v1367_v2  ;;  %v3571_v8 = vcombine.high %v1360_v3, %v1368_v4  ;;  %v4018_v9 = vld [vmem:[%s5097_s6 + $0xb0] ss:$8 sps:$4 sm:$0xff]   ;;  %v4020_v11 = vld [vmem:[%s5097_s6 + $0xa4] ss:$8 sps:$4 sm:$0xff]   ;;  %v4024_v13 = vld [vmem:[%s5097_s6 + $0xa0] ss:$8 sps:$4 sm:$0xff]   ;;  %v3568_v25 = vcombine.low %v1359_v1, %v1367_v2  ;;  %v3570_v26 = vcombine.low %v1360_v3, %v1368_v4 }
  0xe1   : > { %3043 = vmatpush1.bf16.msra.mxu1 %v3971_v36  ;;  %3001 = vmatprep.subr.bf16.mxu0 %v3972_v37  ;;  %v4019_v10 = vld [vmem:[%s5097_s6 + $0x1b0] ss:$8 sps:$4 sm:$0xff]   ;;  %v4022_v12 = vld [vmem:[%s5097_s6 + $0x1a4] ss:$8 sps:$4 sm:$0xff]   ;;  %v4025_v14 = vld [vmem:[%s5097_s6 + $0x1a0] ss:$8 sps:$4 sm:$0xff]  }
  0xe2   : > { %3044 = vmatprep.subr.bf16.mxu1 %v3974_v38  ;;  %3023 = vmatprep.mubr.bf16.mxu0 %v3569_v6  ;;  %v4026_v15 = vld [vmem:[%s5097_s6 + $0x94] ss:$8 sps:$4 sm:$0xff]   ;;  %v4030_v17 = vld [vmem:[%s5097_s6 + $0x90] ss:$8 sps:$4 sm:$0xff]   ;;  %v4032_v19 = vld [vmem:[%s5097_s6 + $0x84] ss:$8 sps:$4 sm:$0xff]  }
  0xe3   : > { %3066 = vmatprep.mubr.bf16.mxu1 %v3571_v8  ;;  %v4028_v16 = vld [vmem:[%s5097_s6 + $0x194] ss:$8 sps:$4 sm:$0xff]   ;;  %v4031_v18 = vld [vmem:[%s5097_s6 + $0x190] ss:$8 sps:$4 sm:$0xff]   ;;  %v4034_v20 = vld [vmem:[%s5097_s6 + $0x184] ss:$8 sps:$4 sm:$0xff]  }
  0xe4   : > { %3002 = vmatpush1.bf16.msra.mxu0 %v3976_v39  ;;  %v4036_v21 = vld [vmem:[%s5097_s6 + $0x80] ss:$8 sps:$4 sm:$0xff]   ;;  %v4040_v23 = vld [vmem:[%s5097_s6 + $0x274] ss:$8 sps:$4 sm:$0xff]   ;;  %v4038_v27 = vld [vmem:[%s5097_s6 + $0x270] ss:$8 sps:$4 sm:$0xff]  }
  0xe5   : > { %3045 = vmatpush1.bf16.msra.mxu1 %v3977_v40  ;;  %3003 = vmatprep.subr.bf16.mxu0 %v3978_v41  ;;  %v4037_v22 = vld [vmem:[%s5097_s6 + $0x180] ss:$8 sps:$4 sm:$0xff]   ;;  %v4043_v24 = vld [vmem:[%s5097_s6 + $0x374] ss:$8 sps:$4 sm:$0xff]   ;;  %v4041_v28 = vld [vmem:[%s5097_s6 + $0x370] ss:$8 sps:$4 sm:$0xff]  }
  0xe6   : > { %3046 = vmatprep.subr.bf16.mxu1 %v3980_v42  ;;  %v4046_v29 = vld [vmem:[%s5097_s6 + $0x264] ss:$8 sps:$4 sm:$0xff]   ;;  %v4044_v31 = vld [vmem:[%s5097_s6 + $0x260] ss:$8 sps:$4 sm:$0xff]   ;;  %v4052_v33 = vld [vmem:[%s5097_s6 + $0x254] ss:$8 sps:$4 sm:$0xff]  }
  0xe7   : > { %v4049_v30 = vld [vmem:[%s5097_s6 + $0x364] ss:$8 sps:$4 sm:$0xff]   ;;  %v4047_v32 = vld [vmem:[%s5097_s6 + $0x360] ss:$8 sps:$4 sm:$0xff]   ;;  %v4055_v34 = vld [vmem:[%s5097_s6 + $0x354] ss:$8 sps:$4 sm:$0xff]  }
  0xe8   : > { %3004 = vmatpush1.bf16.msra.mxu0 %v3982_v43  ;;  %v4050_v35 = vld [vmem:[%s5097_s6 + $0x250] ss:$8 sps:$4 sm:$0xff]   ;;  %v4058_v37 = vld [vmem:[%s5097_s6 + $0x244] ss:$8 sps:$4 sm:$0xff]   ;;  %v4056_v39 = vld [vmem:[%s5097_s6 + $0x240] ss:$8 sps:$4 sm:$0xff]  }
  0xe9   : > { %3047 = vmatpush1.bf16.msra.mxu1 %v3983_v44  ;;  %3005 = vmatprep.subr.bf16.mxu0 %v3984_v45  ;;  %v4053_v36 = vld [vmem:[%s5097_s6 + $0x350] ss:$8 sps:$4 sm:$0xff]   ;;  %v4061_v38 = vld [vmem:[%s5097_s6 + $0x344] ss:$8 sps:$4 sm:$0xff]   ;;  %v4059_v40 = vld [vmem:[%s5097_s6 + $0x340] ss:$8 sps:$4 sm:$0xff]  }
  0xea   : > { %3048 = vmatprep.subr.bf16.mxu1 %v3986_v46  ;;  %v4064_v41 = vld [vmem:[%s5097_s6 + $0x234] ss:$8 sps:$4 sm:$0xff]   ;;  %v4062_v43 = vld [vmem:[%s5097_s6 + $0x230] ss:$8 sps:$4 sm:$0xff]   ;;  %v4070_v45 = vld [vmem:[%s5097_s6 + $0x224] ss:$8 sps:$4 sm:$0xff]  }
  0xeb   : > { %v4067_v42 = vld [vmem:[%s5097_s6 + $0x334] ss:$8 sps:$4 sm:$0xff]   ;;  %v4065_v44 = vld [vmem:[%s5097_s6 + $0x330] ss:$8 sps:$4 sm:$0xff]   ;;  %v4073_v46 = vld [vmem:[%s5097_s6 + $0x324] ss:$8 sps:$4 sm:$0xff]  }
  0xec   : > { %3006 = vmatpush1.bf16.msra.mxu0 %v3988_v47  ;;  %v4068_v47 = vld [vmem:[%s5097_s6 + $0x220] ss:$8 sps:$4 sm:$0xff]   ;;  %v4086_v1 = vld [vmem:[%s5097_s6 + $0x2f0] ss:$8 sps:$4 sm:$0xff]   ;;  %v4094_v3 = vld [vmem:[%s5097_s6 + $0x2e4] ss:$8 sps:$4 sm:$0xff]  }
  0xed   : > { %3049 = vmatpush1.bf16.msra.mxu1 %v3989_v48  ;;  %3007 = vmatprep.subr.bf16.mxu0 %v3990_v49  ;;  %v4071_v48 = vld [vmem:[%s5097_s6 + $0x320] ss:$8 sps:$4 sm:$0xff]   ;;  %v4076_v49 = vld [vmem:[%s5097_s6 + $0x214] ss:$8 sps:$4 sm:$0xff]   ;;  %v4089_v2 = vld [vmem:[%s5097_s6 + $0x3f0] ss:$8 sps:$4 sm:$0xff]  }
  0xee   : > { %3050 = vmatprep.subr.bf16.mxu1 %v3992_v50  ;;  %v4079_v50 = vld [vmem:[%s5097_s6 + $0x314] ss:$8 sps:$4 sm:$0xff]   ;;  %v4097_v4 = vld [vmem:[%s5097_s6 + $0x3e4] ss:$8 sps:$4 sm:$0xff]   ;;  %v4095_v6 = vld [vmem:[%s5097_s6 + $0x3e0] ss:$8 sps:$4 sm:$0xff]  }
  0xef   : > { %v4103_v8 = vld [vmem:[%s5097_s6 + $0x3d4] ss:$8 sps:$4 sm:$0xff]  }
  0xf0   : > { %3008 = vmatpush2.bf16.msra.mxu0 %v3994_v51  ;;  %v4074_v51 = vld [vmem:[%s5097_s6 + $0x210] ss:$8 sps:$4 sm:$0xff]  }
  0xf1   : > { %3051 = vmatpush2.bf16.msra.mxu1 %v3995_v52  ;;  %3009 = vmatprep.subr.bf16.mxu0 %v3996_v53  ;;  %v4077_v52 = vld [vmem:[%s5097_s6 + $0x310] ss:$8 sps:$4 sm:$0xff]  }
  0xf2   : > { %3052 = vmatprep.subr.bf16.mxu1 %v3998_v54  ;;  %v5199_v53 = vld [vmem:[%s5095_s4 + $0x10] sm:$0xff] }
  0xf3   : > { %v5202_v54 = vld [vmem:[%s5095_s4 + $0x50] sm:$0xff] }
  0xf4   : > { %3010 = vmatpush2.bf16.msra.mxu0 %v4000_v55  ;;  %v5205_v55 = vld [vmem:[%s5095_s4 + $0x18] sm:$0xff] }
  0xf5   : > { %3053 = vmatpush2.bf16.msra.mxu1 %v4001_v56  ;;  %3011 = vmatprep.subr.bf16.mxu0 %v4002_v57  ;;  %v5208_v56 = vld [vmem:[%s5095_s4 + $0x58] sm:$0xff]  ;;  %v4082_v57 = vld [vmem:[%s5097_s6 + $0x204] ss:$8 sps:$4 sm:$0xff]  }
  0xf6   : > { %3054 = vmatprep.subr.bf16.mxu1 %v4004_v58  ;;  %v3573_v58 = vcombine.high %v5199_v53, %v5202_v54 }
  0xf8   : > { %3012 = vmatpush2.bf16.msra.mxu0 %v4006_v59  ;;  %v4085_v59 = vld [vmem:[%s5097_s6 + $0x304] ss:$8 sps:$4 sm:$0xff]  }
  0xf9   : > { %3055 = vmatpush2.bf16.msra.mxu1 %v4007_v60  ;;  %3013 = vmatprep.subr.bf16.mxu0 %v4008_v61  ;;  %v3575_v60 = vcombine.high %v5205_v55, %v5208_v56  ;;  %v4080_v61 = vld [vmem:[%s5097_s6 + $0x200] ss:$8 sps:$4 sm:$0xff]  }
  0xfa   : > { %3056 = vmatprep.subr.bf16.mxu1 %v4010_v62  ;;  %v4083_v62 = vld [vmem:[%s5097_s6 + $0x300] ss:$8 sps:$4 sm:$0xff]  }
  0xfc   : > { %3014 = vmatpush2.bf16.msra.mxu0 %v4012_v63  ;;  %v4088_v63 = vld [vmem:[%s5097_s6 + $0x2f4] ss:$8 sps:$4 sm:$0xff]  }
  0xfd   : > { %3057 = vmatpush2.bf16.msra.mxu1 %v4013_v0  ;;  %3015 = vmatprep.subr.bf16.mxu0 %v4014_v5  ;;  %v4091_v0 = vld [vmem:[%s5097_s6 + $0x3f4] ss:$8 sps:$4 sm:$0xff]   ;;  %v4092_v5 = vld [vmem:[%s5097_s6 + $0x2e0] ss:$8 sps:$4 sm:$0xff]  }
  0xfe   : > { %3058 = vmatprep.subr.bf16.mxu1 %v4016_v7  ;;  %v4100_v7 = vld [vmem:[%s5097_s6 + $0x2d4] ss:$8 sps:$4 sm:$0xff]  }
 0x100   : > { %3016 = vmatpush2.bf16.msra.mxu0 %v4018_v9  ;;  %v4098_v9 = vld [vmem:[%s5097_s6 + $0x2d0] ss:$8 sps:$4 sm:$0xff]  }
 0x101   : > { %3059 = vmatpush2.bf16.msra.mxu1 %v4019_v10  ;;  %3017 = vmatprep.subr.bf16.mxu0 %v4020_v11  ;;  %v4101_v10 = vld [vmem:[%s5097_s6 + $0x3d0] ss:$8 sps:$4 sm:$0xff]   ;;  %v4106_v11 = vld [vmem:[%s5097_s6 + $0x2c4] ss:$8 sps:$4 sm:$0xff]  }
 0x102   : > { %3060 = vmatprep.subr.bf16.mxu1 %v4022_v12  ;;  %v4109_v12 = vld [vmem:[%s5097_s6 + $0x3c4] ss:$8 sps:$4 sm:$0xff]  }
 0x104   : > { %3018 = vmatpush2.bf16.msra.mxu0 %v4024_v13  ;;  %v4104_v13 = vld [vmem:[%s5097_s6 + $0x2c0] ss:$8 sps:$4 sm:$0xff]  }
 0x105   : > { %3061 = vmatpush2.bf16.msra.mxu1 %v4025_v14  ;;  %3019 = vmatprep.subr.bf16.mxu0 %v4026_v15  ;;  %v4107_v14 = vld [vmem:[%s5097_s6 + $0x3c0] ss:$8 sps:$4 sm:$0xff]   ;;  %v4112_v15 = vld [vmem:[%s5097_s6 + $0x2b4] ss:$8 sps:$4 sm:$0xff]  }
 0x106   : > { %3062 = vmatprep.subr.bf16.mxu1 %v4028_v16  ;;  %v4115_v16 = vld [vmem:[%s5097_s6 + $0x3b4] ss:$8 sps:$4 sm:$0xff]  }
 0x108   : > { %3020 = vmatpush2.bf16.msra.mxu0 %v4030_v17  ;;  %v4110_v17 = vld [vmem:[%s5097_s6 + $0x2b0] ss:$8 sps:$4 sm:$0xff]  }
 0x109   : > { %3063 = vmatpush2.bf16.msra.mxu1 %v4031_v18  ;;  %3021 = vmatprep.subr.bf16.mxu0 %v4032_v19  ;;  %v4113_v18 = vld [vmem:[%s5097_s6 + $0x3b0] ss:$8 sps:$4 sm:$0xff]   ;;  %v4118_v19 = vld [vmem:[%s5097_s6 + $0x2a4] ss:$8 sps:$4 sm:$0xff]  }
 0x10a   : > { %3064 = vmatprep.subr.bf16.mxu1 %v4034_v20  ;;  %v4121_v20 = vld [vmem:[%s5097_s6 + $0x3a4] ss:$8 sps:$4 sm:$0xff]  }
 0x10c   : > { %3022 = vmatpush2.bf16.msra.mxu0 %v4036_v21  ;;  %v4116_v21 = vld [vmem:[%s5097_s6 + $0x2a0] ss:$8 sps:$4 sm:$0xff]  }
 0x10d   : > { %3065 = vmatpush2.bf16.msra.mxu1 %v4037_v22  ;;  %3077 = vmatprep.subr.bf16.mxu0 %v4040_v23  ;;  %v4119_v22 = vld [vmem:[%s5097_s6 + $0x3a0] ss:$8 sps:$4 sm:$0xff]   ;;  %v4124_v23 = vld [vmem:[%s5097_s6 + $0x294] ss:$8 sps:$4 sm:$0xff]  }
 0x10e   : > { %3120 = vmatprep.subr.bf16.mxu1 %v4043_v24  ;;  %v4127_v24 = vld [vmem:[%s5097_s6 + $0x394] ss:$8 sps:$4 sm:$0xff]  }
 0x10f   : > { %3024 = vmatmul.mubr.bf16.vlgmr.msra.gmra.mxu0 %v3568_v25  ;;  %v4122_v25 = vld [vmem:[%s5097_s6 + $0x290] ss:$8 sps:$4 sm:$0xff]  }
 0x110   : > { %3067 = vmatmul.mubr.bf16.vlgmr.msra.gmra.mxu1 %v3570_v26  ;;  %3078 = vmatpush1.bf16.msra.mxu0 %v4038_v27  ;;  %v4125_v26 = vld [vmem:[%s5097_s6 + $0x390] ss:$8 sps:$4 sm:$0xff]   ;;  %v4130_v27 = vld [vmem:[%s5097_s6 + $0x284] ss:$8 sps:$4 sm:$0xff]  }
 0x111   : > { %3121 = vmatpush1.bf16.msra.mxu1 %v4041_v28  ;;  %3079 = vmatprep.subr.bf16.mxu0 %v4046_v29  ;;  %v4133_v28 = vld [vmem:[%s5097_s6 + $0x384] ss:$8 sps:$4 sm:$0xff]   ;;  %v4128_v29 = vld [vmem:[%s5097_s6 + $0x280] ss:$8 sps:$4 sm:$0xff]  }
 0x112   : > { %3122 = vmatprep.subr.bf16.mxu1 %v4049_v30  ;;  %3109 = vmatprep.mubr.bf16.mxu0 %v3573_v58  ;;  %v4131_v30 = vld [vmem:[%s5097_s6 + $0x380] ss:$8 sps:$4 sm:$0xff]   ;;  %v4161_v58 = vld [vmem:[%s5097_s6 + $0x530] ss:$8 sps:$4 sm:$0xff]  }
 0x113   : > { %3152 = vmatprep.mubr.bf16.mxu1 %v3575_v60  ;;  %v4169_v60 = vld [vmem:[%s5097_s6 + $0x524] ss:$8 sps:$4 sm:$0xff]  }
 0x114   : > { %3080 = vmatpush1.bf16.msra.mxu0 %v4044_v31  ;;  %v4136_v31 = vld [vmem:[%s5097_s6 + $0x474] ss:$8 sps:$4 sm:$0xff]  }
 0x115   : > { %3123 = vmatpush1.bf16.msra.mxu1 %v4047_v32  ;;  %3081 = vmatprep.subr.bf16.mxu0 %v4052_v33  ;;  %v4139_v32 = vld [vmem:[%s5097_s6 + $0x574] ss:$8 sps:$4 sm:$0xff]   ;;  %v3572_v33 = vcombine.low %v5199_v53, %v5202_v54  ;;  %v4152_v53 = vld [vmem:[%s5097_s6 + $0x440] ss:$8 sps:$4 sm:$0xff]  }
 0x116   : > { %3124 = vmatprep.subr.bf16.mxu1 %v4055_v34  ;;  %v3574_v34 = vcombine.low %v5205_v55, %v5208_v56  ;;  %v4155_v54 = vld [vmem:[%s5097_s6 + $0x540] ss:$8 sps:$4 sm:$0xff]   ;;  %v4160_v55 = vld [vmem:[%s5097_s6 + $0x434] ss:$8 sps:$4 sm:$0xff]  }
 0x117   : > { %v4163_v56 = vld [vmem:[%s5097_s6 + $0x534] ss:$8 sps:$4 sm:$0xff]  }
 0x118   : > { %3082 = vmatpush1.bf16.msra.mxu0 %v4050_v35  ;;  %v4134_v35 = vld [vmem:[%s5097_s6 + $0x470] ss:$8 sps:$4 sm:$0xff]  }
 0x119   : > { %3125 = vmatpush1.bf16.msra.mxu1 %v4053_v36  ;;  %3083 = vmatprep.subr.bf16.mxu0 %v4058_v37  ;;  %v4137_v36 = vld [vmem:[%s5097_s6 + $0x570] ss:$8 sps:$4 sm:$0xff]   ;;  %v4142_v37 = vld [vmem:[%s5097_s6 + $0x464] ss:$8 sps:$4 sm:$0xff]  }
 0x11a   : > { %3126 = vmatprep.subr.bf16.mxu1 %v4061_v38  ;;  %v4145_v38 = vld [vmem:[%s5097_s6 + $0x564] ss:$8 sps:$4 sm:$0xff]  }
 0x11c   : > { %3084 = vmatpush1.bf16.msra.mxu0 %v4056_v39  ;;  %v4140_v39 = vld [vmem:[%s5097_s6 + $0x460] ss:$8 sps:$4 sm:$0xff]  }
 0x11d   : > { %3127 = vmatpush1.bf16.msra.mxu1 %v4059_v40  ;;  %3085 = vmatprep.subr.bf16.mxu0 %v4064_v41  ;;  %v4143_v40 = vld [vmem:[%s5097_s6 + $0x560] ss:$8 sps:$4 sm:$0xff]  }
 0x11e   : > { %3128 = vmatprep.subr.bf16.mxu1 %v4067_v42  ;;  %v5263_v41 = vld [vmem:[%s5095_s4 + $0x20] sm:$0xff] }
 0x11f   : > { %v5266_v42 = vld [vmem:[%s5095_s4 + $0x60] sm:$0xff] }
 0x120   : > { %3086 = vmatpush1.bf16.msra.mxu0 %v4062_v43  ;;  %v5269_v43 = vld [vmem:[%s5095_s4 + $0x28] sm:$0xff] }
 0x121   : > { %3129 = vmatpush1.bf16.msra.mxu1 %v4065_v44  ;;  %3087 = vmatprep.subr.bf16.mxu0 %v4070_v45  ;;  %v5272_v44 = vld [vmem:[%s5095_s4 + $0x68] sm:$0xff]  ;;  %v4148_v45 = vld [vmem:[%s5097_s6 + $0x454] ss:$8 sps:$4 sm:$0xff]  }
 0x122   : > { %3130 = vmatprep.subr.bf16.mxu1 %v4073_v46  ;;  %v3577_v46 = vcombine.high %v5263_v41, %v5266_v42 }
 0x124   : > { %3088 = vmatpush1.bf16.msra.mxu0 %v4068_v47  ;;  %v4151_v47 = vld [vmem:[%s5097_s6 + $0x554] ss:$8 sps:$4 sm:$0xff]  }
 0x125   : > { %3131 = vmatpush1.bf16.msra.mxu1 %v4071_v48  ;;  %3089 = vmatprep.subr.bf16.mxu0 %v4076_v49  ;;  %v3579_v48 = vcombine.high %v5269_v43, %v5272_v44  ;;  %v4146_v49 = vld [vmem:[%s5097_s6 + $0x450] ss:$8 sps:$4 sm:$0xff]  }
 0x126   : > { %3132 = vmatprep.subr.bf16.mxu1 %v4079_v50  ;;  %v4149_v50 = vld [vmem:[%s5097_s6 + $0x550] ss:$8 sps:$4 sm:$0xff]  }
 0x128   : > { %3090 = vmatpush1.bf16.msra.mxu0 %v4074_v51  ;;  %v4154_v51 = vld [vmem:[%s5097_s6 + $0x444] ss:$8 sps:$4 sm:$0xff]  }
 0x129   : > { %3133 = vmatpush1.bf16.msra.mxu1 %v4077_v52  ;;  %3091 = vmatprep.subr.bf16.mxu0 %v4082_v57  ;;  %v4157_v52 = vld [vmem:[%s5097_s6 + $0x544] ss:$8 sps:$4 sm:$0xff]   ;;  %v4158_v57 = vld [vmem:[%s5097_s6 + $0x430] ss:$8 sps:$4 sm:$0xff]  }
 0x12a   : > { %3134 = vmatprep.subr.bf16.mxu1 %v4085_v59  ;;  %v4166_v59 = vld [vmem:[%s5097_s6 + $0x424] ss:$8 sps:$4 sm:$0xff]  }
 0x12c   : > { %3092 = vmatpush1.bf16.msra.mxu0 %v4080_v61  ;;  %v4164_v61 = vld [vmem:[%s5097_s6 + $0x420] ss:$8 sps:$4 sm:$0xff]  }
 0x12d   : > { %3135 = vmatpush1.bf16.msra.mxu1 %v4083_v62  ;;  %3093 = vmatprep.subr.bf16.mxu0 %v4088_v63  ;;  %v4167_v62 = vld [vmem:[%s5097_s6 + $0x520] ss:$8 sps:$4 sm:$0xff]   ;;  %v4172_v63 = vld [vmem:[%s5097_s6 + $0x414] ss:$8 sps:$4 sm:$0xff]  }
 0x12e   : > { %3136 = vmatprep.subr.bf16.mxu1 %v4091_v0  ;;  %v4175_v0 = vld [vmem:[%s5097_s6 + $0x514] ss:$8 sps:$4 sm:$0xff]  }
 0x130   : > { %3094 = vmatpush2.bf16.msra.mxu0 %v4086_v1  ;;  %v4170_v1 = vld [vmem:[%s5097_s6 + $0x410] ss:$8 sps:$4 sm:$0xff]  }
 0x131   : > { %3137 = vmatpush2.bf16.msra.mxu1 %v4089_v2  ;;  %3095 = vmatprep.subr.bf16.mxu0 %v4094_v3  ;;  %v4173_v2 = vld [vmem:[%s5097_s6 + $0x510] ss:$8 sps:$4 sm:$0xff]   ;;  %v4178_v3 = vld [vmem:[%s5097_s6 + $0x404] ss:$8 sps:$4 sm:$0xff]  }
 0x132   : > { %3138 = vmatprep.subr.bf16.mxu1 %v4097_v4  ;;  %v4181_v4 = vld [vmem:[%s5097_s6 + $0x504] ss:$8 sps:$4 sm:$0xff]  }
 0x134   : > { %3096 = vmatpush2.bf16.msra.mxu0 %v4092_v5  ;;  %v4176_v5 = vld [vmem:[%s5097_s6 + $0x400] ss:$8 sps:$4 sm:$0xff]  }
 0x135   : > { %3139 = vmatpush2.bf16.msra.mxu1 %v4095_v6  ;;  %3097 = vmatprep.subr.bf16.mxu0 %v4100_v7  ;;  %v4179_v6 = vld [vmem:[%s5097_s6 + $0x500] ss:$8 sps:$4 sm:$0xff]   ;;  %v4184_v7 = vld [vmem:[%s5097_s6 + $0x4f4] ss:$8 sps:$4 sm:$0xff]  }
 0x136   : > { %3140 = vmatprep.subr.bf16.mxu1 %v4103_v8  ;;  %v4187_v8 = vld [vmem:[%s5097_s6 + $0x5f4] ss:$8 sps:$4 sm:$0xff]  }
 0x138   : > { %3098 = vmatpush2.bf16.msra.mxu0 %v4098_v9  ;;  %v4182_v9 = vld [vmem:[%s5097_s6 + $0x4f0] ss:$8 sps:$4 sm:$0xff]  }
 0x139   : > { %3141 = vmatpush2.bf16.msra.mxu1 %v4101_v10  ;;  %3099 = vmatprep.subr.bf16.mxu0 %v4106_v11  ;;  %v4185_v10 = vld [vmem:[%s5097_s6 + $0x5f0] ss:$8 sps:$4 sm:$0xff]   ;;  %v4190_v11 = vld [vmem:[%s5097_s6 + $0x4e4] ss:$8 sps:$4 sm:$0xff]  }
 0x13a   : > { %3142 = vmatprep.subr.bf16.mxu1 %v4109_v12  ;;  %v4193_v12 = vld [vmem:[%s5097_s6 + $0x5e4] ss:$8 sps:$4 sm:$0xff]  }
 0x13c   : > { %3100 = vmatpush2.bf16.msra.mxu0 %v4104_v13  ;;  %v4188_v13 = vld [vmem:[%s5097_s6 + $0x4e0] ss:$8 sps:$4 sm:$0xff]  }
 0x13d   : > { %3143 = vmatpush2.bf16.msra.mxu1 %v4107_v14  ;;  %3101 = vmatprep.subr.bf16.mxu0 %v4112_v15  ;;  %v4191_v14 = vld [vmem:[%s5097_s6 + $0x5e0] ss:$8 sps:$4 sm:$0xff]   ;;  %v4196_v15 = vld [vmem:[%s5097_s6 + $0x4d4] ss:$8 sps:$4 sm:$0xff]  }
 0x13e   : > { %3144 = vmatprep.subr.bf16.mxu1 %v4115_v16  ;;  %v4199_v16 = vld [vmem:[%s5097_s6 + $0x5d4] ss:$8 sps:$4 sm:$0xff]  }
 0x140   : > { %3102 = vmatpush2.bf16.msra.mxu0 %v4110_v17  ;;  %v4194_v17 = vld [vmem:[%s5097_s6 + $0x4d0] ss:$8 sps:$4 sm:$0xff]  }
 0x141   : > { %3145 = vmatpush2.bf16.msra.mxu1 %v4113_v18  ;;  %3103 = vmatprep.subr.bf16.mxu0 %v4118_v19  ;;  %v4197_v18 = vld [vmem:[%s5097_s6 + $0x5d0] ss:$8 sps:$4 sm:$0xff]   ;;  %v4202_v19 = vld [vmem:[%s5097_s6 + $0x4c4] ss:$8 sps:$4 sm:$0xff]  }
 0x142   : > { %3146 = vmatprep.subr.bf16.mxu1 %v4121_v20  ;;  %v4205_v20 = vld [vmem:[%s5097_s6 + $0x5c4] ss:$8 sps:$4 sm:$0xff]  }
 0x144   : > { %3104 = vmatpush2.bf16.msra.mxu0 %v4116_v21  ;;  %v4200_v21 = vld [vmem:[%s5097_s6 + $0x4c0] ss:$8 sps:$4 sm:$0xff]  }
 0x145   : > { %3147 = vmatpush2.bf16.msra.mxu1 %v4119_v22  ;;  %3105 = vmatprep.subr.bf16.mxu0 %v4124_v23  ;;  %v4203_v22 = vld [vmem:[%s5097_s6 + $0x5c0] ss:$8 sps:$4 sm:$0xff]   ;;  %v4208_v23 = vld [vmem:[%s5097_s6 + $0x4b4] ss:$8 sps:$4 sm:$0xff]  }
 0x146   : > { %3148 = vmatprep.subr.bf16.mxu1 %v4127_v24  ;;  %v4211_v24 = vld [vmem:[%s5097_s6 + $0x5b4] ss:$8 sps:$4 sm:$0xff]  }
 0x148   : > { %3106 = vmatpush2.bf16.msra.mxu0 %v4122_v25  ;;  %v4206_v25 = vld [vmem:[%s5097_s6 + $0x4b0] ss:$8 sps:$4 sm:$0xff]  }
 0x149   : > { %3149 = vmatpush2.bf16.msra.mxu1 %v4125_v26  ;;  %3107 = vmatprep.subr.bf16.mxu0 %v4130_v27  ;;  %v4209_v26 = vld [vmem:[%s5097_s6 + $0x5b0] ss:$8 sps:$4 sm:$0xff]   ;;  %v4214_v27 = vld [vmem:[%s5097_s6 + $0x4a4] ss:$8 sps:$4 sm:$0xff]  }
 0x14a   : > { %3150 = vmatprep.subr.bf16.mxu1 %v4133_v28  ;;  %v4217_v28 = vld [vmem:[%s5097_s6 + $0x5a4] ss:$8 sps:$4 sm:$0xff]  }
 0x14c   : > { %3108 = vmatpush2.bf16.msra.mxu0 %v4128_v29  ;;  %v4212_v29 = vld [vmem:[%s5097_s6 + $0x4a0] ss:$8 sps:$4 sm:$0xff]  }
 0x14d   : > { %3151 = vmatpush2.bf16.msra.mxu1 %v4131_v30  ;;  %3163 = vmatprep.subr.bf16.mxu0 %v4136_v31  ;;  %v4215_v30 = vld [vmem:[%s5097_s6 + $0x5a0] ss:$8 sps:$4 sm:$0xff]   ;;  %v4220_v31 = vld [vmem:[%s5097_s6 + $0x494] ss:$8 sps:$4 sm:$0xff]  }
 0x14e   : > { %3206 = vmatprep.subr.bf16.mxu1 %v4139_v32  ;;  %v4223_v32 = vld [vmem:[%s5097_s6 + $0x594] ss:$8 sps:$4 sm:$0xff]  }
 0x14f   : > { %3110 = vmatmul.mubr.bf16.vlgmr.msra.gmra.mxu0 %v3572_v33  ;;  %v4218_v33 = vld [vmem:[%s5097_s6 + $0x490] ss:$8 sps:$4 sm:$0xff]  }
 0x150   : > { %3153 = vmatmul.mubr.bf16.vlgmr.msra.gmra.mxu1 %v3574_v34  ;;  %3164 = vmatpush1.bf16.msra.mxu0 %v4134_v35  ;;  %v4221_v34 = vld [vmem:[%s5097_s6 + $0x590] ss:$8 sps:$4 sm:$0xff]   ;;  %v4226_v35 = vld [vmem:[%s5097_s6 + $0x484] ss:$8 sps:$4 sm:$0xff]  }
 0x151   : > { %3207 = vmatpush1.bf16.msra.mxu1 %v4137_v36  ;;  %3165 = vmatprep.subr.bf16.mxu0 %v4142_v37  ;;  %v4229_v36 = vld [vmem:[%s5097_s6 + $0x584] ss:$8 sps:$4 sm:$0xff]   ;;  %v4224_v37 = vld [vmem:[%s5097_s6 + $0x480] ss:$8 sps:$4 sm:$0xff]  }
 0x152   : > { %3208 = vmatprep.subr.bf16.mxu1 %v4145_v38  ;;  %3195 = vmatprep.mubr.bf16.mxu0 %v3577_v46  ;;  %v4227_v38 = vld [vmem:[%s5097_s6 + $0x580] ss:$8 sps:$4 sm:$0xff]   ;;  %v3576_v46 = vcombine.low %v5263_v41, %v5266_v42  ;;  %v4238_v41 = vld [vmem:[%s5097_s6 + $0x664] ss:$8 sps:$4 sm:$0xff]  }
 0x153   : > { %3238 = vmatprep.mubr.bf16.mxu1 %v3579_v48  ;;  %v5344_v48 = vld [vmem:[%s5095_s4 + $0x70] sm:$0xff]  ;;  %v4241_v42 = vld [vmem:[%s5097_s6 + $0x764] ss:$8 sps:$4 sm:$0xff]  }
 0x154   : > { %3166 = vmatpush1.bf16.msra.mxu0 %v4140_v39  ;;  %v4232_v39 = vld [vmem:[%s5097_s6 + $0x674] ss:$8 sps:$4 sm:$0xff]  }
 0x155   : > { %3209 = vmatpush1.bf16.msra.mxu1 %v4143_v40  ;;  %3167 = vmatprep.subr.bf16.mxu0 %v4148_v45  ;;  %v4235_v40 = vld [vmem:[%s5097_s6 + $0x774] ss:$8 sps:$4 sm:$0xff]  }
 0x156   : > { %3210 = vmatprep.subr.bf16.mxu1 %v4151_v47  ;;  %v5337_v45 = vld [vmem:[%s5095_s4 + $0x30] sm:$0xff]  ;;  %v3578_v47 = vcombine.low %v5269_v43, %v5272_v44 }
 0x157   : > { %v3581_v43 = vcombine.high %v5337_v45, %v5344_v48 }
 0x158   : > { %3168 = vmatpush1.bf16.msra.mxu0 %v4146_v49  ;;  %v5347_v49 = vld [vmem:[%s5095_s4 + $0x38] sm:$0xff] }
 0x159   : > { %3211 = vmatpush1.bf16.msra.mxu1 %v4149_v50  ;;  %3169 = vmatprep.subr.bf16.mxu0 %v4154_v51  ;;  %v5350_v50 = vld [vmem:[%s5095_s4 + $0x78] sm:$0xff] }
 0x15a   : > { %3212 = vmatprep.subr.bf16.mxu1 %v4157_v52  ;;  %v4230_v51 = vld [vmem:[%s5097_s6 + $0x670] ss:$8 sps:$4 sm:$0xff]   ;;  %v3583_v44 = vcombine.high %v5347_v49, %v5350_v50 }
 0x15b   : > { %v4233_v52 = vld [vmem:[%s5097_s6 + $0x770] ss:$8 sps:$4 sm:$0xff]  }
 0x15c   : > { %3170 = vmatpush1.bf16.msra.mxu0 %v4152_v53  ;;  %v4236_v53 = vld [vmem:[%s5097_s6 + $0x660] ss:$8 sps:$4 sm:$0xff]  }
 0x15d   : > { %3213 = vmatpush1.bf16.msra.mxu1 %v4155_v54  ;;  %3171 = vmatprep.subr.bf16.mxu0 %v4160_v55  ;;  %v4239_v54 = vld [vmem:[%s5097_s6 + $0x760] ss:$8 sps:$4 sm:$0xff]   ;;  %v4244_v55 = vld [vmem:[%s5097_s6 + $0x654] ss:$8 sps:$4 sm:$0xff]  }
 0x15e   : > { %3214 = vmatprep.subr.bf16.mxu1 %v4163_v56  ;;  %v4247_v56 = vld [vmem:[%s5097_s6 + $0x754] ss:$8 sps:$4 sm:$0xff]  }
 0x160   : > { %3172 = vmatpush1.bf16.msra.mxu0 %v4158_v57  ;;  %v4242_v57 = vld [vmem:[%s5097_s6 + $0x650] ss:$8 sps:$4 sm:$0xff]  }
 0x161   : > { %3215 = vmatpush1.bf16.msra.mxu1 %v4161_v58  ;;  %3173 = vmatprep.subr.bf16.mxu0 %v4166_v59  ;;  %v4245_v58 = vld [vmem:[%s5097_s6 + $0x750] ss:$8 sps:$4 sm:$0xff]   ;;  %v4250_v59 = vld [vmem:[%s5097_s6 + $0x644] ss:$8 sps:$4 sm:$0xff]  }
 0x162   : > { %3216 = vmatprep.subr.bf16.mxu1 %v4169_v60  ;;  %v4253_v60 = vld [vmem:[%s5097_s6 + $0x744] ss:$8 sps:$4 sm:$0xff]  }
 0x164   : > { %3174 = vmatpush1.bf16.msra.mxu0 %v4164_v61  ;;  %v4248_v61 = vld [vmem:[%s5097_s6 + $0x640] ss:$8 sps:$4 sm:$0xff]  }
 0x165   : > { %3217 = vmatpush1.bf16.msra.mxu1 %v4167_v62  ;;  %3175 = vmatprep.subr.bf16.mxu0 %v4172_v63  ;;  %v4251_v62 = vld [vmem:[%s5097_s6 + $0x740] ss:$8 sps:$4 sm:$0xff]   ;;  %v4256_v63 = vld [vmem:[%s5097_s6 + $0x634] ss:$8 sps:$4 sm:$0xff]  }
 0x166   : > { %3218 = vmatprep.subr.bf16.mxu1 %v4175_v0  ;;  %v4259_v0 = vld [vmem:[%s5097_s6 + $0x734] ss:$8 sps:$4 sm:$0xff]  }
 0x168   : > { %3176 = vmatpush1.bf16.msra.mxu0 %v4170_v1  ;;  %v4254_v1 = vld [vmem:[%s5097_s6 + $0x630] ss:$8 sps:$4 sm:$0xff]  }
 0x169   : > { %3219 = vmatpush1.bf16.msra.mxu1 %v4173_v2  ;;  %3177 = vmatprep.subr.bf16.mxu0 %v4178_v3  ;;  %v4257_v2 = vld [vmem:[%s5097_s6 + $0x730] ss:$8 sps:$4 sm:$0xff]   ;;  %v4262_v3 = vld [vmem:[%s5097_s6 + $0x624] ss:$8 sps:$4 sm:$0xff]  }
 0x16a   : > { %3220 = vmatprep.subr.bf16.mxu1 %v4181_v4  ;;  %v4265_v4 = vld [vmem:[%s5097_s6 + $0x724] ss:$8 sps:$4 sm:$0xff]  }
 0x16c   : > { %3178 = vmatpush1.bf16.msra.mxu0 %v4176_v5  ;;  %v4260_v5 = vld [vmem:[%s5097_s6 + $0x620] ss:$8 sps:$4 sm:$0xff]  }
 0x16d   : > { %3221 = vmatpush1.bf16.msra.mxu1 %v4179_v6  ;;  %3179 = vmatprep.subr.bf16.mxu0 %v4184_v7  ;;  %v4263_v6 = vld [vmem:[%s5097_s6 + $0x720] ss:$8 sps:$4 sm:$0xff]   ;;  %v4268_v7 = vld [vmem:[%s5097_s6 + $0x614] ss:$8 sps:$4 sm:$0xff]  }
 0x16e   : > { %3222 = vmatprep.subr.bf16.mxu1 %v4187_v8  ;;  %v4271_v8 = vld [vmem:[%s5097_s6 + $0x714] ss:$8 sps:$4 sm:$0xff]  }
 0x170   : > { %3180 = vmatpush2.bf16.msra.mxu0 %v4182_v9  ;;  %v4266_v9 = vld [vmem:[%s5097_s6 + $0x610] ss:$8 sps:$4 sm:$0xff]  }
 0x171   : > { %3223 = vmatpush2.bf16.msra.mxu1 %v4185_v10  ;;  %3181 = vmatprep.subr.bf16.mxu0 %v4190_v11  ;;  %v4269_v10 = vld [vmem:[%s5097_s6 + $0x710] ss:$8 sps:$4 sm:$0xff]   ;;  %v4274_v11 = vld [vmem:[%s5097_s6 + $0x604] ss:$8 sps:$4 sm:$0xff]  }
 0x172   : > { %3224 = vmatprep.subr.bf16.mxu1 %v4193_v12  ;;  %v4277_v12 = vld [vmem:[%s5097_s6 + $0x704] ss:$8 sps:$4 sm:$0xff]  }
 0x174   : > { %3182 = vmatpush2.bf16.msra.mxu0 %v4188_v13  ;;  %v4272_v13 = vld [vmem:[%s5097_s6 + $0x600] ss:$8 sps:$4 sm:$0xff]  }
 0x175   : > { %3225 = vmatpush2.bf16.msra.mxu1 %v4191_v14  ;;  %3183 = vmatprep.subr.bf16.mxu0 %v4196_v15  ;;  %v4275_v14 = vld [vmem:[%s5097_s6 + $0x700] ss:$8 sps:$4 sm:$0xff]   ;;  %v4280_v15 = vld [vmem:[%s5097_s6 + $0x6f4] ss:$8 sps:$4 sm:$0xff]  }
 0x176   : > { %3226 = vmatprep.subr.bf16.mxu1 %v4199_v16  ;;  %v4283_v16 = vld [vmem:[%s5097_s6 + $0x7f4] ss:$8 sps:$4 sm:$0xff]  }
 0x178   : > { %3184 = vmatpush2.bf16.msra.mxu0 %v4194_v17  ;;  %v4278_v17 = vld [vmem:[%s5097_s6 + $0x6f0] ss:$8 sps:$4 sm:$0xff]  }
 0x179   : > { %3227 = vmatpush2.bf16.msra.mxu1 %v4197_v18  ;;  %3185 = vmatprep.subr.bf16.mxu0 %v4202_v19  ;;  %v4281_v18 = vld [vmem:[%s5097_s6 + $0x7f0] ss:$8 sps:$4 sm:$0xff]   ;;  %v4286_v19 = vld [vmem:[%s5097_s6 + $0x6e4] ss:$8 sps:$4 sm:$0xff]  }
 0x17a   : > { %3228 = vmatprep.subr.bf16.mxu1 %v4205_v20  ;;  %v4289_v20 = vld [vmem:[%s5097_s6 + $0x7e4] ss:$8 sps:$4 sm:$0xff]  }
 0x17c   : > { %3186 = vmatpush2.bf16.msra.mxu0 %v4200_v21  ;;  %v4284_v21 = vld [vmem:[%s5097_s6 + $0x6e0] ss:$8 sps:$4 sm:$0xff]  }
 0x17d   : > { %3229 = vmatpush2.bf16.msra.mxu1 %v4203_v22  ;;  %3187 = vmatprep.subr.bf16.mxu0 %v4208_v23  ;;  %v4287_v22 = vld [vmem:[%s5097_s6 + $0x7e0] ss:$8 sps:$4 sm:$0xff]   ;;  %v4292_v23 = vld [vmem:[%s5097_s6 + $0x6d4] ss:$8 sps:$4 sm:$0xff]  }
 0x17e   : > { %3230 = vmatprep.subr.bf16.mxu1 %v4211_v24  ;;  %v4295_v24 = vld [vmem:[%s5097_s6 + $0x7d4] ss:$8 sps:$4 sm:$0xff]  }
 0x180   : > { %3188 = vmatpush2.bf16.msra.mxu0 %v4206_v25  ;;  %v4290_v25 = vld [vmem:[%s5097_s6 + $0x6d0] ss:$8 sps:$4 sm:$0xff]  }
 0x181   : > { %3231 = vmatpush2.bf16.msra.mxu1 %v4209_v26  ;;  %3189 = vmatprep.subr.bf16.mxu0 %v4214_v27  ;;  %v4293_v26 = vld [vmem:[%s5097_s6 + $0x7d0] ss:$8 sps:$4 sm:$0xff]   ;;  %v4298_v27 = vld [vmem:[%s5097_s6 + $0x6c4] ss:$8 sps:$4 sm:$0xff]  }
 0x182   : > { %3232 = vmatprep.subr.bf16.mxu1 %v4217_v28  ;;  %v4301_v28 = vld [vmem:[%s5097_s6 + $0x7c4] ss:$8 sps:$4 sm:$0xff]  }
 0x184   : > { %3190 = vmatpush2.bf16.msra.mxu0 %v4212_v29  ;;  %v4296_v29 = vld [vmem:[%s5097_s6 + $0x6c0] ss:$8 sps:$4 sm:$0xff]  }
 0x185   : > { %3233 = vmatpush2.bf16.msra.mxu1 %v4215_v30  ;;  %3191 = vmatprep.subr.bf16.mxu0 %v4220_v31  ;;  %v4299_v30 = vld [vmem:[%s5097_s6 + $0x7c0] ss:$8 sps:$4 sm:$0xff]   ;;  %v4304_v31 = vld [vmem:[%s5097_s6 + $0x6b4] ss:$8 sps:$4 sm:$0xff]  }
 0x186   : > { %3234 = vmatprep.subr.bf16.mxu1 %v4223_v32  ;;  %v4307_v32 = vld [vmem:[%s5097_s6 + $0x7b4] ss:$8 sps:$4 sm:$0xff]  }
 0x188   : > { %3192 = vmatpush2.bf16.msra.mxu0 %v4218_v33  ;;  %v4302_v33 = vld [vmem:[%s5097_s6 + $0x6b0] ss:$8 sps:$4 sm:$0xff]  }
 0x189   : > { %3235 = vmatpush2.bf16.msra.mxu1 %v4221_v34  ;;  %3193 = vmatprep.subr.bf16.mxu0 %v4226_v35  ;;  %v4305_v34 = vld [vmem:[%s5097_s6 + $0x7b0] ss:$8 sps:$4 sm:$0xff]   ;;  %v4310_v35 = vld [vmem:[%s5097_s6 + $0x6a4] ss:$8 sps:$4 sm:$0xff]  }
 0x18a   : > { %3236 = vmatprep.subr.bf16.mxu1 %v4229_v36  ;;  %v4313_v36 = vld [vmem:[%s5097_s6 + $0x7a4] ss:$8 sps:$4 sm:$0xff]  }
 0x18c   : > { %3194 = vmatpush2.bf16.msra.mxu0 %v4224_v37  ;;  %v4308_v37 = vld [vmem:[%s5097_s6 + $0x6a0] ss:$8 sps:$4 sm:$0xff]  }
 0x18d   : > { %3237 = vmatpush2.bf16.msra.mxu1 %v4227_v38  ;;  %3249 = vmatprep.subr.bf16.mxu0 %v4232_v39  ;;  %v4311_v38 = vld [vmem:[%s5097_s6 + $0x7a0] ss:$8 sps:$4 sm:$0xff]   ;;  %v4316_v39 = vld [vmem:[%s5097_s6 + $0x694] ss:$8 sps:$4 sm:$0xff]  }
 0x18e   : > { %3292 = vmatprep.subr.bf16.mxu1 %v4235_v40  ;;  %v4319_v40 = vld [vmem:[%s5097_s6 + $0x794] ss:$8 sps:$4 sm:$0xff]  }
 0x18f   : > { %3196 = vmatmul.mubr.bf16.vlgmr.msra.gmra.mxu0 %v3576_v46  ;;  %v4314_v46 = vld [vmem:[%s5097_s6 + $0x690] ss:$8 sps:$4 sm:$0xff]  }
 0x190   : > { %3239 = vmatmul.mubr.bf16.vlgmr.msra.gmra.mxu1 %v3578_v47  ;;  %3250 = vmatpush1.bf16.msra.mxu0 %v4230_v51  ;;  %v4317_v47 = vld [vmem:[%s5097_s6 + $0x790] ss:$8 sps:$4 sm:$0xff]   ;;  %v4322_v51 = vld [vmem:[%s5097_s6 + $0x684] ss:$8 sps:$4 sm:$0xff]  }
 0x191   : > { %3293 = vmatpush1.bf16.msra.mxu1 %v4233_v52  ;;  %3251 = vmatprep.subr.bf16.mxu0 %v4238_v41  ;;  %v4325_v52 = vld [vmem:[%s5097_s6 + $0x784] ss:$8 sps:$4 sm:$0xff]   ;;  %v4320_v41 = vld [vmem:[%s5097_s6 + $0x680] ss:$8 sps:$4 sm:$0xff]  }
 0x192   : > { %3294 = vmatprep.subr.bf16.mxu1 %v4241_v42  ;;  %3281 = vmatprep.mubr.bf16.mxu0 %v3581_v43  ;;  %v4323_v42 = vld [vmem:[%s5097_s6 + $0x780] ss:$8 sps:$4 sm:$0xff]   ;;  %v3580_v43 = vcombine.low %v5337_v45, %v5344_v48 }
 0x193   : > { %3324 = vmatprep.mubr.bf16.mxu1 %v3583_v44  ;;  %v3582_v44 = vcombine.low %v5347_v49, %v5350_v50 }
 0x194   : > { %3252 = vmatpush1.bf16.msra.mxu0 %v4236_v53 }
 0x195   : > { %3295 = vmatpush1.bf16.msra.mxu1 %v4239_v54  ;;  %3253 = vmatprep.subr.bf16.mxu0 %v4244_v55 }
 0x196   : > { %3296 = vmatprep.subr.bf16.mxu1 %v4247_v56 }
 0x198   : > { %3254 = vmatpush1.bf16.msra.mxu0 %v4242_v57 }
 0x199   : > { %3297 = vmatpush1.bf16.msra.mxu1 %v4245_v58  ;;  %3255 = vmatprep.subr.bf16.mxu0 %v4250_v59 }
 0x19a   : > { %3298 = vmatprep.subr.bf16.mxu1 %v4253_v60 }
 0x19c   : > { %3256 = vmatpush1.bf16.msra.mxu0 %v4248_v61 }
 0x19d   : > { %3299 = vmatpush1.bf16.msra.mxu1 %v4251_v62  ;;  %3257 = vmatprep.subr.bf16.mxu0 %v4256_v63 }
 0x19e   : > { %3300 = vmatprep.subr.bf16.mxu1 %v4259_v0 }
 0x1a0   : > { %3258 = vmatpush1.bf16.msra.mxu0 %v4254_v1 }
 0x1a1   : > { %3301 = vmatpush1.bf16.msra.mxu1 %v4257_v2  ;;  %3259 = vmatprep.subr.bf16.mxu0 %v4262_v3 }
 0x1a2   : > { %3302 = vmatprep.subr.bf16.mxu1 %v4265_v4 }
 0x1a4   : > { %3260 = vmatpush1.bf16.msra.mxu0 %v4260_v5 }
 0x1a5   : > { %3303 = vmatpush1.bf16.msra.mxu1 %v4263_v6  ;;  %3261 = vmatprep.subr.bf16.mxu0 %v4268_v7 }
 0x1a6   : > { %3304 = vmatprep.subr.bf16.mxu1 %v4271_v8 }
 0x1a8   : > { %3262 = vmatpush1.bf16.msra.mxu0 %v4266_v9 }
 0x1a9   : > { %3305 = vmatpush1.bf16.msra.mxu1 %v4269_v10  ;;  %3263 = vmatprep.subr.bf16.mxu0 %v4274_v11 }
 0x1aa   : > { %3306 = vmatprep.subr.bf16.mxu1 %v4277_v12 }
 0x1ac   : > { %3264 = vmatpush1.bf16.msra.mxu0 %v4272_v13 }
 0x1ad   : > { %3307 = vmatpush1.bf16.msra.mxu1 %v4275_v14  ;;  %3265 = vmatprep.subr.bf16.mxu0 %v4280_v15 }
 0x1ae   : > { %3308 = vmatprep.subr.bf16.mxu1 %v4283_v16 }
 0x1b0   : > { %3266 = vmatpush2.bf16.msra.mxu0 %v4278_v17 }
 0x1b1   : > { %3309 = vmatpush2.bf16.msra.mxu1 %v4281_v18  ;;  %3267 = vmatprep.subr.bf16.mxu0 %v4286_v19 }
 0x1b2   : > { %3310 = vmatprep.subr.bf16.mxu1 %v4289_v20 }
 0x1b4   : > { %3268 = vmatpush2.bf16.msra.mxu0 %v4284_v21 }
 0x1b5   : > { %3311 = vmatpush2.bf16.msra.mxu1 %v4287_v22  ;;  %3269 = vmatprep.subr.bf16.mxu0 %v4292_v23 }
 0x1b6   : > { %3312 = vmatprep.subr.bf16.mxu1 %v4295_v24 }
 0x1b8   : > { %3270 = vmatpush2.bf16.msra.mxu0 %v4290_v25 }
 0x1b9   : > { %3313 = vmatpush2.bf16.msra.mxu1 %v4293_v26  ;;  %3271 = vmatprep.subr.bf16.mxu0 %v4298_v27 }
 0x1ba   : > { %3314 = vmatprep.subr.bf16.mxu1 %v4301_v28 }
 0x1bc   : > { %3272 = vmatpush2.bf16.msra.mxu0 %v4296_v29 }
 0x1bd   : > { %3315 = vmatpush2.bf16.msra.mxu1 %v4299_v30  ;;  %3273 = vmatprep.subr.bf16.mxu0 %v4304_v31  ;;  %v1355_v30 = vld [vmem:[#allocation2 + $0x10] sm:$0xff] }
 0x1be   : > { %3316 = vmatprep.subr.bf16.mxu1 %v4307_v32 }
 0x1c0   : > { %3274 = vmatpush2.bf16.msra.mxu0 %v4302_v33 }
 0x1c1   : > { %3317 = vmatpush2.bf16.msra.mxu1 %v4305_v34  ;;  %3275 = vmatprep.subr.bf16.mxu0 %v4310_v35 }
 0x1c2   : > { %3318 = vmatprep.subr.bf16.mxu1 %v4313_v36  ;;  %v1356_v36 = vld [vmem:[#allocation2] sm:$0xff] }
 0x1c4   : > { %3276 = vmatpush2.bf16.msra.mxu0 %v4308_v37 }
 0x1c5   : > { %3319 = vmatpush2.bf16.msra.mxu1 %v4311_v38  ;;  %3277 = vmatprep.subr.bf16.mxu0 %v4316_v39 }
 0x1c6   : > { %3320 = vmatprep.subr.bf16.mxu1 %v4319_v40 }
 0x1c8   : > { %3278 = vmatpush2.bf16.msra.mxu0 %v4314_v46 }
 0x1c9   : > { %3321 = vmatpush2.bf16.msra.mxu1 %v4317_v47  ;;  %3279 = vmatprep.subr.bf16.mxu0 %v4322_v51  ;;  %v1357_v51 = vld [vmem:[#allocation2 + $0x18] sm:$0xff] }
 0x1ca   : > { %3322 = vmatprep.subr.bf16.mxu1 %v4325_v52 }
 0x1cc   : > { %3280 = vmatpush2.bf16.msra.mxu0 %v4320_v41 }
 0x1cd   : > { %3323 = vmatpush2.bf16.msra.mxu1 %v4323_v42 }
 0x1cf   : > { %3282 = vmatmul.mubr.bf16.vlgmr.msra.gmra.mxu0 %v3580_v43  ;;  %v3025_v53 = vpop.f32.mrf.mxu0 }
 0x1d0   : > { %3325 = vmatmul.mubr.bf16.vlgmr.msra.gmra.mxu1 %v3582_v44  ;;  %v3068_v54 = vpop.f32.mrf.mxu1  ;;  %v1358_v44 = vld [vmem:[#allocation2 + $0x8] sm:$0xff] }
 0x1d1   : > { %v3027_v55 = vpop.f32.mrf.mxu0  ;;  %v3069_v3 = vadd.f32 %v3068_v54, %v3025_v53 }
 0x1d2   : > { %v3070_v56 = vpop.f32.mrf.mxu1 }
 0x1d3   : > { %v3029_v57 = vpop.f32.mrf.mxu0  ;;  %v3071_v4 = vadd.f32 %v3070_v56, %v3027_v55 }
 0x1d4   : > { %v3072_v58 = vpop.f32.mrf.mxu1 }
 0x1d5   : > { %v3031_v59 = vpop.f32.mrf.mxu0  ;;  %v3073_v8 = vadd.f32 %v3072_v58, %v3029_v57 }
 0x1d6   : > { %v3074_v60 = vpop.f32.mrf.mxu1 }
 0x1d7   : > { %v3075_v10 = vadd.f32 %v3074_v60, %v3031_v59 }
 0x20f   : > { %v3111_v61 = vpop.f32.mrf.mxu0 }
 0x210   : > { %v3154_v62 = vpop.f32.mrf.mxu1  ;;  %v3112_v5 = vadd.f32 %v3111_v61, %v3069_v3 }
 0x211   : > { %v3113_v63 = vpop.f32.mrf.mxu0 }
 0x212   : > { %v3156_v0 = vpop.f32.mrf.mxu1  ;;  %v3114_v9 = vadd.f32 %v3113_v63, %v3071_v4  ;;  %v3155_v11 = vadd.f32 %v3154_v62, %v3112_v5 }
 0x213   : > { %v3115_v45 = vpop.f32.mrf.mxu0 }
 0x214   : > { %v3158_v48 = vpop.f32.mrf.mxu1  ;;  %v3116_v12 = vadd.f32 %v3115_v45, %v3073_v8  ;;  %v3157_v15 = vadd.f32 %v3156_v0, %v3114_v9 }
 0x215   : > { %v3117_v1 = vpop.f32.mrf.mxu0 }
 0x216   : > { %v3160_v49 = vpop.f32.mrf.mxu1  ;;  %v3118_v16 = vadd.f32 %v3117_v1, %v3075_v10  ;;  %v3159_v18 = vadd.f32 %v3158_v48, %v3116_v12 }
 0x218   : > { %v3161_v22 = vadd.f32 %v3160_v49, %v3118_v16 }
 0x24f   : > { %v3197_v50 = vpop.f32.mrf.mxu0 }
 0x250   : > { %v3240_v2 = vpop.f32.mrf.mxu1  ;;  %v3198_v17 = vadd.f32 %v3197_v50, %v3155_v11 }
 0x251   : > { %v3199_v6 = vpop.f32.mrf.mxu0 }
 0x252   : > { %v3242_v7 = vpop.f32.mrf.mxu1  ;;  %v3200_v19 = vadd.f32 %v3199_v6, %v3157_v15  ;;  %v3241_v23 = vadd.f32 %v3240_v2, %v3198_v17 }
 0x253   : > { %v3201_v13 = vpop.f32.mrf.mxu0 }
 0x254   : > { %v3244_v14 = vpop.f32.mrf.mxu1  ;;  %v3202_v24 = vadd.f32 %v3201_v13, %v3159_v18  ;;  %v3243_v27 = vadd.f32 %v3242_v7, %v3200_v19 }
 0x255   : > { %v3203_v20 = vpop.f32.mrf.mxu0 }
 0x256   : > { %v3246_v21 = vpop.f32.mrf.mxu1  ;;  %v3204_v28 = vadd.f32 %v3203_v20, %v3161_v22  ;;  %v3245_v33 = vadd.f32 %v3244_v14, %v3202_v24 }
 0x258   : > { %v3247_v39 = vadd.f32 %v3246_v21, %v3204_v28 }
 0x28f   : > { %v3283_v25 = vpop.f32.mrf.mxu0 }
 0x290   : > { %v3326_v26 = vpop.f32.mrf.mxu1  ;;  %v3284_v29 = vadd.f32 %v3283_v25, %v3241_v23 }
 0x291   : > { %v3285_v31 = vpop.f32.mrf.mxu0 }
 0x292   : > { %v3328_v32 = vpop.f32.mrf.mxu1  ;;  %v3327_v34 = vadd.f32 %v3326_v26, %v3284_v29  ;;  %v3286_v35 = vadd.f32 %v3285_v31, %v3243_v27 }
 0x293   : > { %v3287_v37 = vpop.f32.mrf.mxu0 }
 0x294   : > { %v3330_v38 = vpop.f32.mrf.mxu1  ;;  %v3335_v40 = vadd.f32 %v3327_v34, %v1355_v30  ;;  %v3329_v46 = vadd.f32 %v3328_v32, %v3286_v35  ;;  %v3288_v47 = vadd.f32 %v3287_v37, %v3245_v33 }
 0x295   : > { %v3289_v52 = vpop.f32.mrf.mxu0 }
 0x296   : > { %3339 = vst [vmem:[#allocation2 + $0x10] sm:$0xff] %v3335_v40  ;;  %v3336_v41 = vadd.f32 %v3329_v46, %v1356_v36  ;;  %v3331_v42 = vadd.f32 %v3330_v38, %v3288_v47  ;;  %v3290_v43 = vadd.f32 %v3289_v52, %v3247_v39  ;;  %v3332_v53 = vpop.f32.mrf.mxu1 }
 0x298   : > { %3340 = vst [vmem:[#allocation2] sm:$0xff] %v3336_v41  ;;  %v3337_v54 = vadd.f32 %v3331_v42, %v1357_v51  ;;  %v3333_v55 = vadd.f32 %v3332_v53, %v3290_v43  ;;  %3346 = sbr.rel (%p3840_p5) target bundleno = 686 (0x2ae), region = 101 }
 0x29a   : > { %3341 = vst [vmem:[#allocation2 + $0x18] sm:$0xff] %v3337_v54  ;;  %v3338_v56 = vadd.f32 %v3333_v55, %v1358_v44 }
 0x29c   : > { %3342 = vst [vmem:[#allocation2 + $0x8] sm:$0xff] %v3338_v56 }
 0x29d   : > { %v3353_v57 = vlaneseq  ;;  %v3351_v59 = vld [vmem:[%s1343_s29] sm:$0x3]  ;;  %v3347_v60 = vld [vmem:[#allocation2 + $0x10] sm:$0xff] }
 0x29f   : > { %v3354_v58 = vshrl.u32 %v3353_v57, 7  ;;  %v3348_v63 = vld [vmem:[#allocation2] sm:$0xff] }
 0x2a1   : > { %v3355_v61 = vsub.s32 0, %v3354_v58  ;;  %v3359_v62 = vsub.s32 1, %v3354_v58  ;;  %v3349_v0 = vld [vmem:[#allocation2 + $0x18] sm:$0xff] }
 0x2a3   : > { %v3350_v45 = vld [vmem:[#allocation2 + $0x8] sm:$0xff]  ;;  %v3356_v48 = vrot.slane %v3351_v59, %v3355_v61  ;;  %v3360_v1 = vrot.slane %v3351_v59, %v3359_v62 }
 0x2a5   : > { %v3363_v49 = vadd.f32 %v3356_v48, %v3347_v60  ;;  %v3364_v50 = vadd.f32 %v3360_v1, %v3348_v63  ;;  %v3365_v2 = vadd.f32 %v3356_v48, %v3349_v0  ;;  %v3366_v3 = vadd.f32 %v3360_v1, %v3350_v45 }
 0x2a7   : > { %vm3367_vm0 = vcmp.ge.f32.partialorder %v3363_v49, 0.0  ;;  %vm3368_vm1 = vcmp.ge.f32.partialorder %v3364_v50, 0.0  ;;  %v3371_v4 = vmul.f32 0.2, %v3363_v49  ;;  %v3372_v5 = vmul.f32 0.2, %v3364_v50 }
 0x2a8   : > { %vm3369_vm2 = vcmp.ge.f32.partialorder %v3365_v2, 0.0  ;;  %vm3370_vm3 = vcmp.ge.f32.partialorder %v3366_v3, 0.0  ;;  %v3373_v6 = vmul.f32 0.2, %v3365_v2  ;;  %v3374_v7 = vmul.f32 0.2, %v3366_v3 }
 0x2a9   : > { %v3375_v8 = vsel %vm3367_vm0, %v3363_v49, %v3371_v4  ;;  %v3376_v9 = vsel %vm3368_vm1, %v3364_v50, %v3372_v5 }
 0x2aa   : > { %v3850_v10 = vpack.c.bf16 %v3376_v9, %v3375_v8  ;;  %v3377_v11 = vsel %vm3369_vm2, %v3365_v2, %v3373_v6  ;;  %v3378_v12 = vsel %vm3370_vm3, %v3366_v3, %v3374_v7 }
 0x2ab   : > { %v3851_v13 = vpack.c.bf16 %v3378_v12, %v3377_v11 }
 0x2ac   : > { %3391 = vst [vmem:[%s5099_s1] sm:$0xff] %v3850_v10 }
 0x2ad   : > { %3392 = vst [vmem:[%s5099_s1 + $0x8] sm:$0xff] %v3851_v13 }
 0x2ae PF: > { %3399 = sbr.rel (!%p4529_p12) target bundleno = 694 (0x2b6), region = 105  ;;  %s3852_s16 = sshll.u32 (%p4529_p12), %s4400_s19, 3 }
 0x2af   : > { %s3405_s5 = scalar_lea.vmem (%p4529_p12), %s5474_s3, %s3852_s16 }
 0x2b3   : > { %v3436_v14 = vld [vmem:[%s5099_s1] sm:$0xff] }
 0x2b4   : > { %v3438_v15 = vld [vmem:[%s5099_s1 + $0x8] sm:$0xff]  ;;  %3437 = vst [vmem:[%s3405_s5] sm:$0xff] %v3436_v14 }
 0x2b5   : > { %3439 = vst [vmem:[%s3405_s5 + $0x10] sm:$0xff] %v3438_v15 }
 0x2b6 PF: > { %s13_s22 = sadd.s32 1, %s4412_s22   ;;  %s5484_s1 = sld [smem:[#allocation6_spill]] }
 0x2b7   : > { %p10_p6 = scmp.ge.s32.totalorder %s13_s22, 6   ;;  %s5485_s12 = smov %s4376_s13 }
 0x2b8   : > { %s5486_s13 = smov %s4527_s9  ;;  %s5487_s14 = smov %s4384_s15 }
 0x2b9   : > { %s5488_s15 = smov %s4524_s8  ;;  %s5489_s16 = smov %s4392_s17 }
 0x2ba   : > { %s5490_s17 = smov %s4510_s30  ;;  %s5491_s18 = smov %s4404_s20 }
 0x2bb   : > { %s5492_s19 = smov %s4408_s21  ;;  %s5493_s20 = smov %s5496_s24 }
 0x2bc   : > { %s5494_s21 = smov %s5484_s1  ;;  %12 = sbr.rel (!%p10_p6) target bundleno = 9 (0x9), region = 185 }

</bundles_post_ra>
